<compile_context>
chip_gen: v7x
topology: tpu7x:2x2x1
jax: 0.10.0
libtpu: 0.0.40
codegen_flags: <defaults>
</compile_context>

<pallas_src>
import math
import functools

import jax
import jax.numpy as jnp
from jax.experimental import pallas as pl
from jax.experimental.pallas import tpu as pltpu


# ----------------------------------------------------------------------------
# Fused Pallas kernel: Btile batch elements per grid step, everything in VMEM
# ----------------------------------------------------------------------------
def _forecast_kernel(x2_ref, d_ref, cond_ref, adj_ref,
                     win_ref, bin_ref,
                     wts_ref, wtn_ref, bt_ref,
                     wfs_ref, wfn_ref, bf_ref,
                     wm_ref, bm_ref, wout_ref, bout_ref,
                     wo1_ref, bo1_ref, wo2_ref, bo2_ref,
                     out_ref, *, n_layers, cl, compute_dtype):
    f32 = jnp.float32
    cdt = compute_dtype
    adj = adj_ref[...]                                  # (R, R) block-diag kron(I_Btile, adj)

    # input_projection (1x1 conv) + ReLU; activation slab is [R = Btile*J, C*L]
    x = jnp.dot(x2_ref[...].astype(cdt), win_ref[...],
                preferred_element_type=f32) + bin_ref[...]
    x = jnp.maximum(x, 0.0)

    skip_acc = jnp.zeros_like(x)
    inv_sqrt2 = 1.0 / math.sqrt(2.0)

    for layer in range(n_layers):                       # static unroll (n_layers=2)
        # diffusion_projection add (per batch element, broadcast over J/L in wrapper)
        y = x + d_ref[layer]

        # ---- time GCN: y @ kron(I_C, Ws) + (A y) @ kron(I_C, Wn); stays in vregs
        yb = y.astype(cdt)
        ay = jnp.dot(adj, yb, preferred_element_type=f32).astype(cdt)
        y = (jnp.dot(yb, wts_ref[layer], preferred_element_type=f32)
             + jnp.dot(ay, wtn_ref[layer], preferred_element_type=f32)
             + bt_ref[layer])
        y = jnp.maximum(y, 0.0)

        # ---- feature GCN: y @ kron(Ws, I_L) + (A y) @ kron(Wn, I_L)
        yb = y.astype(cdt)
        ay = jnp.dot(adj, yb, preferred_element_type=f32).astype(cdt)
        y = (jnp.dot(yb, wfs_ref[layer], preferred_element_type=f32)
             + jnp.dot(ay, wfn_ref[layer], preferred_element_type=f32)
             + bf_ref[layer])
        y = jnp.maximum(y, 0.0)

        # ---- mid_projection; cond_projection precomputed in wrapper, added here
        h = (jnp.dot(y.astype(cdt), wm_ref[layer], preferred_element_type=f32)
             + bm_ref[layer] + cond_ref[layer])
        z = jax.nn.sigmoid(h[:, :cl]) * jnp.tanh(h[:, cl:])     # gate * filter (EUP)

        # ---- output_projection; residual / skip split
        o = (jnp.dot(z.astype(cdt), wout_ref[layer], preferred_element_type=f32)
             + bout_ref[layer])
        x = (x + o[:, :cl]) * inv_sqrt2
        skip_acc = skip_acc + o[:, cl:]

    # skip sum -> output_projection1 + relu -> output_projection2 (lane-padded to 128)
    s = skip_acc * (1.0 / math.sqrt(n_layers))
    s = jnp.maximum(jnp.dot(s.astype(cdt), wo1_ref[...], preferred_element_type=f32)
                    + bo1_ref[...], 0.0)
    out = jnp.dot(s.astype(cdt), wo2_ref[...], preferred_element_type=f32) + bo2_ref[...]
    out_ref[...] = out.astype(out_ref.dtype)


def _choose_batch_tile(B, J, max_rows=256):
    """Largest divisor t of B with t*J rows fitting the MXU and, if possible,
    B//t >= 2 grid steps (keeps both v7x TensorCores busy)."""
    cands = [t for t in range(1, B + 1)
             if B % t == 0 and t * J <= max_rows and (t * J) % 8 == 0]
    if not cands:
        return B
    multi = [t for t in cands if B // t >= 2]
    return max(multi) if multi else max(cands)


def forecast_ct_gcn_forward(packed, x, cond_info, diffusion_step):
    B, n_inputs, K, L = x.shape
    J = packed["adj"].shape[0]
    CL = packed["wo1"].shape[0]                     # channels * L
    NL = packed["wts"].shape[0]                     # number of residual layers
    CIN = packed["win"].shape[0] // L               # n_inputs * input_channels
    IC = packed["wcond"].shape[1] // L              # input_channels
    OUT_PAD = packed["wo2"].shape[1]                # lane-padded output width (>=128)
    N = J * L
    wdtype = packed["wts"].dtype                    # compute dtype (bf16 in production)

    Btile = _choose_batch_tile(B, J)
    NB = B // Btile
    R = Btile * J                                   # rows per grid step

    # --- input / conditioning rearrangement (tiny; mirrors the PyTorch reshapes) ---
    x1 = x.reshape(B, CIN, N)                                             # torch: x.reshape(B, n_in*ic, -1)
    x2 = x1.reshape(B, CIN, J, L).transpose(0, 2, 1, 3).reshape(B * J, CIN * L)
    cm = cond_info[:, -1, :, :].reshape(B, IC, N)                         # torch: cond_mask.reshape(B, -1, J*L)
    cond2 = cm.reshape(B, IC, J, L).transpose(0, 2, 1, 3).reshape(B * J, IC * L)

    # --- diffusion embedding (table gather + two tiny Linears; left to XLA) ---
    de = packed["diff_emb"]
    emb = de["table"][diffusion_step]
    emb = jax.nn.silu(emb @ de["w1"].T + de["b1"])
    emb = jax.nn.silu(emb @ de["w2"].T + de["b2"])                        # (B, D)
    d_all = jnp.einsum("bd,ncd->bnc", emb, packed["diff_w"]) + packed["diff_b"][None]
    d_cl = jnp.repeat(d_all, L, axis=-1)                                  # (B, NL, C*L)
    d_big = (jnp.broadcast_to(d_cl[:, None], (B, J, NL, CL))
             .transpose(2, 0, 1, 3).reshape(NL, B * J, CL))               # per-row add, f32

    # --- cond_projection precomputed per layer (activation-independent, f32) ---
    cond_add = jnp.einsum("rk,nko->nro", cond2, packed["wcond"]) + packed["bcond"]   # (NL, B*J, 2CL)

    # --- block-diagonal adjacency for the batched tile ---
    adj_big = jnp.kron(jnp.eye(Btile, dtype=jnp.float32), packed["adj"]).astype(wdtype)

    kernel = functools.partial(_forecast_kernel, n_layers=NL, cl=CL, compute_dtype=wdtype)

    out_flat = pl.pallas_call(
        kernel,
        out_shape=jax.ShapeDtypeStruct((B * J, OUT_PAD), jnp.float32),
        grid=(NB,),
        in_specs=[
            pl.BlockSpec((R, CIN * L), lambda b: (b, 0)),                 # x2
            pl.BlockSpec((NL, R, CL), lambda b: (0, b, 0)),               # diffusion add, per layer
            pl.BlockSpec((NL, R, 2 * CL), lambda b: (0, b, 0)),           # cond add, per layer
            pl.BlockSpec((R, R), lambda b: (0, 0)),                       # block-diag adjacency
            pl.BlockSpec((CIN * L, CL), lambda b: (0, 0)),                # input projection
            pl.BlockSpec((1, CL), lambda b: (0, 0)),
            pl.BlockSpec((NL, CL, CL), lambda b: (0, 0, 0)),              # time GCN self
            pl.BlockSpec((NL, CL, CL), lambda b: (0, 0, 0)),              # time GCN neighbor
            pl.BlockSpec((NL, 1, CL), lambda b: (0, 0, 0)),
            pl.BlockSpec((NL, CL, CL), lambda b: (0, 0, 0)),              # feature GCN self
            pl.BlockSpec((NL, CL, CL), lambda b: (0, 0, 0)),              # feature GCN neighbor
            pl.BlockSpec((NL, 1, CL), lambda b: (0, 0, 0)),
            pl.BlockSpec((NL, CL, 2 * CL), lambda b: (0, 0, 0)),          # mid projection
            pl.BlockSpec((NL, 1, 2 * CL), lambda b: (0, 0, 0)),
            pl.BlockSpec((NL, CL, 2 * CL), lambda b: (0, 0, 0)),          # output projection
            pl.BlockSpec((NL, 1, 2 * CL), lambda b: (0, 0, 0)),
            pl.BlockSpec((CL, CL), lambda b: (0, 0)),                     # output_projection1
            pl.BlockSpec((1, CL), lambda b: (0, 0)),
            pl.BlockSpec((CL, OUT_PAD), lambda b: (0, 0)),                # output_projection2 (lane-padded)
            pl.BlockSpec((1, OUT_PAD), lambda b: (0, 0)),
        ],
        out_specs=pl.BlockSpec((R, OUT_PAD), lambda b: (b, 0)),           # lane-dense (128-wide) writeback
        compiler_params=pltpu.CompilerParams(
            dimension_semantics=("parallel",),          # >=2 parallel steps feeds both v7x TCs
        ),
    )(x2, d_big, cond_add, adj_big,
      packed["win"], packed["bin"],
      packed["wts"], packed["wtn"], packed["bt"],
      packed["wfs"], packed["wfn"], packed["bf"],
      packed["wm"], packed["bm"], packed["wout"], packed["bout"],
      packed["wo1"], packed["bo1"], packed["wo2"], packed["bo2"])

    # kernel output [B*J, OUT_PAD] (lane index = coord*L + l) -> torch order [B, K, L]
    out = out_flat[:, :IC * L].reshape(B, J, IC, L).transpose(0, 2, 1, 3).reshape(B, IC * J, L)
    return out


# ----------------------------------------------------------------------------
# Parameter init (deterministic, synthetic — mirrors the shapes of __init__)
# ----------------------------------------------------------------------------
def kaiming_conv1d(key, cout, cin):
    return math.sqrt(2.0 / cin) * jax.random.normal(key, (cout, cin), jnp.float32)


def conv1d_bias(key, cout, cin):
    bound = 1.0 / math.sqrt(cin)
    return jax.random.uniform(key, (cout,), jnp.float32, -bound, bound)


def linear_params(key, fin, fout):
    k1, k2 = jax.random.split(key)
    bound = 1.0 / math.sqrt(fin)
    w = jax.random.uniform(k1, (fout, fin), jnp.float32, -bound, bound)
    b = jax.random.uniform(k2, (fout,), jnp.float32, -bound, bound)
    return w, b


def xavier(key, fin, fout):
    bound = math.sqrt(6.0 / (fin + fout))
    return jax.random.uniform(key, (fin, fout), jnp.float32, -bound, bound)


def build_diffusion_table(num_steps, dim):
    half = dim // 2
    steps = jnp.arange(num_steps, dtype=jnp.float32)[:, None]
    freqs = (10.0 ** (jnp.arange(half, dtype=jnp.float32) / (half - 1) * 4.0))[None, :]
    table = steps * freqs
    return jnp.concatenate([jnp.sin(table), jnp.cos(table)], axis=1)


def build_chain_adjacency(n_joints):
    # TODO(synk): h36m_skeleton / adj_mx_from_skeleton are not available in-script;
    # synthetic chain skeleton with symmetric normalization as a stand-in.
    A = jnp.eye(n_joints, dtype=jnp.float32)
    idx = jnp.arange(n_joints - 1)
    A = A.at[idx, idx + 1].set(1.0).at[idx + 1, idx].set(1.0)
    d_inv_sqrt = 1.0 / jnp.sqrt(jnp.sum(A, axis=1))
    return A * d_inv_sqrt[:, None] * d_inv_sqrt[None, :]


def init_params(key, *, channels, seq_len, n_joints, n_inputs, input_channels,
                diffusion_embedding_dim, num_steps, n_layers):
    kit = iter(jax.random.split(key, 16 + 16 * n_layers))
    nxt = lambda: next(kit)
    C = channels
    D = diffusion_embedding_dim

    p = {"channels": C, "input_channels": input_channels}

    w1, b1 = linear_params(nxt(), D, D)
    w2, b2 = linear_params(nxt(), D, D)
    p["diff_emb"] = {"table": build_diffusion_table(num_steps, D),
                     "w1": w1, "b1": b1, "w2": w2, "b2": b2}

    p["w_in"] = kaiming_conv1d(nxt(), C, n_inputs * input_channels)
    p["b_in"] = conv1d_bias(nxt(), C, n_inputs * input_channels)
    p["w_o1"] = kaiming_conv1d(nxt(), C, C)
    p["b_o1"] = conv1d_bias(nxt(), C, C)
    p["w_o2"] = jnp.zeros((input_channels, C), jnp.float32)   # nn.init.zeros_
    p["b_o2"] = conv1d_bias(nxt(), input_channels, C)

    adj = build_chain_adjacency(n_joints)

    layers = []
    for _ in range(n_layers):
        dw, db = linear_params(nxt(), D, C)
        layers.append({
            "adj": adj,
            "diff_w": dw, "diff_b": db,
            "w_cond": kaiming_conv1d(nxt(), 2 * C, input_channels),
            "b_cond": conv1d_bias(nxt(), 2 * C, input_channels),
            "w_mid": kaiming_conv1d(nxt(), 2 * C, C),
            "b_mid": conv1d_bias(nxt(), 2 * C, C),
            "w_out": kaiming_conv1d(nxt(), 2 * C, C),
            "b_out": conv1d_bias(nxt(), 2 * C, C),
            # TODO(synk): _GraphConv('dc_preagg') internals unavailable; modeled as a
            # vanilla 2-weight GCN (self + neighbor); eval-mode BatchNorm/Dropout = identity.
            "t_ws": xavier(nxt(), seq_len, seq_len),
            "t_wn": xavier(nxt(), seq_len, seq_len),
            "t_b": jnp.zeros((seq_len,), jnp.float32),
            "f_ws": xavier(nxt(), C, C),
            "f_wn": xavier(nxt(), C, C),
            "f_b": jnp.zeros((C,), jnp.float32),
        })
    p["layers"] = layers
    return p


# ----------------------------------------------------------------------------
# Pack PyTorch-shaped params into Kronecker-expanded, kernel-ready form.
# Weights (MXU inputs) are stored in `weight_dtype` (bf16 by default); biases
# and additive terms stay f32.
# ----------------------------------------------------------------------------
def pack_params(p, *, seq_len, weight_dtype=jnp.bfloat16):
    C = p["channels"]
    IC = p["input_channels"]
    L = seq_len
    wd = weight_dtype
    I_L = jnp.eye(L, dtype=jnp.float32)
    I_C = jnp.eye(C, dtype=jnp.float32)
    kron_T = lambda w: jnp.kron(w.T, I_L)           # conv weight [out,in] -> [in*L, out*L]
    rep = lambda b: jnp.repeat(b, L)[None, :]       # per-channel bias -> [1, out*L]
    out_pad = max(128, ((IC * L + 127) // 128) * 128)

    packed = {
        "adj": p["layers"][0]["adj"],
        "diff_emb": p["diff_emb"],
        "diff_w": jnp.stack([lp["diff_w"] for lp in p["layers"]]),
        "diff_b": jnp.stack([lp["diff_b"] for lp in p["layers"]]),
        "win": kron_T(p["w_in"]).astype(wd), "bin": rep(p["b_in"]),
        "wo1": kron_T(p["w_o1"]).astype(wd), "bo1": rep(p["b_o1"]),
        # lane-pad output_projection2 to a full 128-lane block (unmasked stores)
        "wo2": jnp.pad(kron_T(p["w_o2"]), ((0, 0), (0, out_pad - IC * L))).astype(wd),
        "bo2": jnp.pad(rep(p["b_o2"]), ((0, 0), (0, out_pad - IC * L))),
    }

    wts, wtn, bt, wfs, wfn, bf_, wm, bm, wout, bout, wcond, bcond = ([] for _ in range(12))
    for lp in p["layers"]:
        # time GCN: contracts L (kron(I_C, W))
        wts.append(jnp.kron(I_C, lp["t_ws"]))
        wtn.append(jnp.kron(I_C, lp["t_wn"]))
        bt.append(jnp.tile(lp["t_b"], C)[None, :])
        # feature GCN: contracts C (kron(W, I_L))
        wfs.append(jnp.kron(lp["f_ws"], I_L))
        wfn.append(jnp.kron(lp["f_wn"], I_L))
        bf_.append(jnp.repeat(lp["f_b"], L)[None, :])
        # mid projection
        wm.append(kron_T(lp["w_mid"]))
        bm.append(rep(lp["b_mid"]))
        # cond projection (kept f32 — applied in the XLA-side wrapper precompute)
        wcond.append(kron_T(lp["w_cond"]))
        bcond.append(rep(lp["b_cond"]))
        # output projection
        wout.append(kron_T(lp["w_out"]))
        bout.append(rep(lp["b_out"]))

    packed["wts"] = jnp.stack(wts).astype(wd); packed["wtn"] = jnp.stack(wtn).astype(wd)
    packed["bt"] = jnp.stack(bt)
    packed["wfs"] = jnp.stack(wfs).astype(wd); packed["wfn"] = jnp.stack(wfn).astype(wd)
    packed["bf"] = jnp.stack(bf_)
    packed["wm"] = jnp.stack(wm).astype(wd); packed["bm"] = jnp.stack(bm)
    packed["wout"] = jnp.stack(wout).astype(wd); packed["bout"] = jnp.stack(bout)
    packed["wcond"] = jnp.stack(wcond); packed["bcond"] = jnp.stack(bcond)
    return packed


# ----------------------------------------------------------------------------
# Pure-JAX reference (literal translation of the PyTorch forward) for validation
# ----------------------------------------------------------------------------
def reference_forward(params, x, cond_info, diffusion_step):
    B, n_inputs, K, L = x.shape
    C = params["channels"]
    IC = params["input_channels"]
    J = K // IC
    N = J * L

    x1 = x.reshape(B, n_inputs * IC, N)
    u = jnp.einsum("cp,bpm->bcm", params["w_in"], x1) + params["b_in"][None, :, None]
    xk = jax.nn.relu(u)                                               # [B, C, N]

    de = params["diff_emb"]
    emb = de["table"][diffusion_step]
    emb = jax.nn.silu(emb @ de["w1"].T + de["b1"])
    emb = jax.nn.silu(emb @ de["w2"].T + de["b2"])

    skip_sum = jnp.zeros_like(xk)
    for lp in params["layers"]:
        d = emb @ lp["diff_w"].T + lp["diff_b"]
        y = xk + d[:, :, None]
        # time GCN on [B*C] graphs of (J, L)
        y4 = y.reshape(B, C, J, L)
        ay = jnp.einsum("jk,bckl->bcjl", lp["adj"], y4)
        yt = (jnp.einsum("bcjl,lm->bcjm", y4, lp["t_ws"])
              + jnp.einsum("bcjl,lm->bcjm", ay, lp["t_wn"]) + lp["t_b"])
        y = jax.nn.relu(yt).reshape(B, C, N)
        # feature GCN on [B*L] graphs of (J, C)
        y4 = y.reshape(B, C, J, L)
        ay = jnp.einsum("jk,bckl->bcjl", lp["adj"], y4)
        yf = (jnp.einsum("bcjl,cd->bdjl", y4, lp["f_ws"])
              + jnp.einsum("bcjl,cd->bdjl", ay, lp["f_wn"])
              + lp["f_b"][None, :, None, None])
        y = jax.nn.relu(yf).reshape(B, C, N)
        # mid + cond projections
        h = jnp.einsum("oc,bcm->bom", lp["w_mid"], y) + lp["b_mid"][None, :, None]
        cm = cond_info[:, -1].reshape(B, IC, N)
        h = h + jnp.einsum("oc,bcm->bom", lp["w_cond"], cm) + lp["b_cond"][None, :, None]
        z = jax.nn.sigmoid(h[:, :C]) * jnp.tanh(h[:, C:])
        o = jnp.einsum("oc,bcm->bom", lp["w_out"], z) + lp["b_out"][None, :, None]
        xk = (xk + o[:, :C]) / math.sqrt(2.0)
        skip_sum = skip_sum + o[:, C:]

    s = skip_sum / math.sqrt(len(params["layers"]))
    v = jax.nn.relu(jnp.einsum("oc,bcm->bom", params["w_o1"], s) + params["b_o1"][None, :, None])
    w = jnp.einsum("oc,bcm->bom", params["w_o2"], v) + params["b_o2"][None, :, None]
    return w.reshape(B, K, L)


# ----------------------------------------------------------------------------
if __name__ == "__main__":
    # B=16 so the batch tile fills a 128-row MXU slab (Btile=8, grid=(2,)).
    B, n_inputs, input_channels = 16, 2, 3
    J, L = 16, 8
    K = J * input_channels          # 48
    channels = 32
    diffusion_embedding_dim = 32
    num_steps = 50
    n_layers = 2

    key = jax.random.PRNGKey(0)
    k_params, k_x, k_c, k_s, k_w2 = jax.random.split(key, 5)

    params = init_params(
        k_params, channels=channels, seq_len=L, n_joints=J,
        n_inputs=n_inputs, input_channels=input_channels,
        diffusion_embedding_dim=diffusion_embedding_dim,
        num_steps=num_steps, n_layers=n_layers)

    x = jax.random.normal(k_x, (B, n_inputs, K, L), jnp.float32)
    cond_info = jax.random.normal(k_c, (B, 2, K, L), jnp.float32)
    diffusion_step = jax.random.randint(k_s, (B,), 0, num_steps)

    fwd = jax.jit(forecast_ct_gcn_forward)

    # Non-zero output_projection2 so the whole fused network is exercised end-to-end.
    params_val = dict(params)
    params_val["w_o2"] = 0.1 * jax.random.normal(k_w2, (input_channels, channels), jnp.float32)
    ref_val = reference_forward(params_val, x, cond_info, diffusion_step)
    ref_max = float(jnp.max(jnp.abs(ref_val)))

    # (a) f32 weights: tight check — catches any layout / Kronecker-packing bug.
    out_f32 = jax.block_until_ready(
        fwd(pack_params(params_val, seq_len=L, weight_dtype=jnp.float32),
            x, cond_info, diffusion_step))
    assert out_f32.shape == (B, K, L), out_f32.shape
    err_f32 = float(jnp.max(jnp.abs(out_f32 - ref_val)))
    assert err_f32 < 2e-3 * (1.0 + ref_max), f"f32 mismatch vs reference: {err_f32}"

    # (b) bf16 weights (production path): looser tolerance for bf16 MXU inputs.
    out_bf16 = jax.block_until_ready(
        fwd(pack_params(params_val, seq_len=L, weight_dtype=jnp.bfloat16),
            x, cond_info, diffusion_step))
    err_bf16 = float(jnp.max(jnp.abs(out_bf16 - ref_val)))
    assert err_bf16 < 5e-2 * (1.0 + ref_max), f"bf16 mismatch vs reference: {err_bf16}"

    # (c) faithful module init: output_projection2 is zero-initialized, so the output
    #     must equal the broadcast bias exactly (precision-independent structural check).
    out = jax.block_until_ready(
        fwd(pack_params(params, seq_len=L), x, cond_info, diffusion_step))
    assert out.shape == (B, K, L), out.shape
    assert out.dtype == jnp.float32
    expected_bias = jnp.repeat(params["b_o2"], J)[None, :, None]   # row k = c*J + j -> b_o2[c]
    bias_err = float(jnp.max(jnp.abs(out - expected_bias)))
    assert bias_err < 1e-6, f"zero-init output != bias broadcast: {bias_err}"

    print("KERNEL_OK")
</pallas_src>

<mosaic_0001>
module attributes {stable_mosaic.version = 11 : i64} {
  func.func @_forecast_kernel(%arg0: i32, %arg1: memref<128x48xf32, #tpu.memory_space<vmem>>, %arg2: memref<2x128x256xf32, #tpu.memory_space<vmem>>, %arg3: memref<2x128x512xf32, #tpu.memory_space<vmem>>, %arg4: memref<128x128xf32, #tpu.memory_space<vmem>>, %arg5: memref<48x256xf32, #tpu.memory_space<vmem>>, %arg6: memref<1x256xf32, #tpu.memory_space<vmem>>, %arg7: memref<2x256x256xf32, #tpu.memory_space<vmem>>, %arg8: memref<2x256x256xf32, #tpu.memory_space<vmem>>, %arg9: memref<2x1x256xf32, #tpu.memory_space<vmem>>, %arg10: memref<2x256x256xf32, #tpu.memory_space<vmem>>, %arg11: memref<2x256x256xf32, #tpu.memory_space<vmem>>, %arg12: memref<2x1x256xf32, #tpu.memory_space<vmem>>, %arg13: memref<2x256x512xf32, #tpu.memory_space<vmem>>, %arg14: memref<2x1x512xf32, #tpu.memory_space<vmem>>, %arg15: memref<2x256x512xf32, #tpu.memory_space<vmem>>, %arg16: memref<2x1x512xf32, #tpu.memory_space<vmem>>, %arg17: memref<256x256xf32, #tpu.memory_space<vmem>>, %arg18: memref<1x256xf32, #tpu.memory_space<vmem>>, %arg19: memref<256x128xf32, #tpu.memory_space<vmem>>, %arg20: memref<1x128xf32, #tpu.memory_space<vmem>>, %arg21: memref<128x128xf32, #tpu.memory_space<vmem>>) attributes {dimension_semantics = [#tpu.dimension_semantics<parallel>], iteration_bounds = array<i64: 2>, scalar_prefetch = 0 : i64, scratch_operands = 0 : i64, tpu.core_type = #tpu.core_type<tc>, window_params = [{transform_indices = @transform_0, window_bounds = array<i64: 128, 48>}, {transform_indices = @transform_1, window_bounds = array<i64: 2, 128, 256>}, {transform_indices = @transform_2, window_bounds = array<i64: 2, 128, 512>}, {pipeline_mode = #tpu.pipeline_mode<synchronous>, transform_indices = @transform_3, window_bounds = array<i64: 128, 128>}, {pipeline_mode = #tpu.pipeline_mode<synchronous>, transform_indices = @transform_4, window_bounds = array<i64: 48, 256>}, {pipeline_mode = #tpu.pipeline_mode<synchronous>, transform_indices = @transform_5, window_bounds = array<i64: 1, 256>}, {pipeline_mode = #tpu.pipeline_mode<synchronous>, transform_indices = @transform_6, window_bounds = array<i64: 2, 256, 256>}, {pipeline_mode = #tpu.pipeline_mode<synchronous>, transform_indices = @transform_7, window_bounds = array<i64: 2, 256, 256>}, {pipeline_mode = #tpu.pipeline_mode<synchronous>, transform_indices = @transform_8, window_bounds = array<i64: 2, 1, 256>}, {pipeline_mode = #tpu.pipeline_mode<synchronous>, transform_indices = @transform_9, window_bounds = array<i64: 2, 256, 256>}, {pipeline_mode = #tpu.pipeline_mode<synchronous>, transform_indices = @transform_10, window_bounds = array<i64: 2, 256, 256>}, {pipeline_mode = #tpu.pipeline_mode<synchronous>, transform_indices = @transform_11, window_bounds = array<i64: 2, 1, 256>}, {pipeline_mode = #tpu.pipeline_mode<synchronous>, transform_indices = @transform_12, window_bounds = array<i64: 2, 256, 512>}, {pipeline_mode = #tpu.pipeline_mode<synchronous>, transform_indices = @transform_13, window_bounds = array<i64: 2, 1, 512>}, {pipeline_mode = #tpu.pipeline_mode<synchronous>, transform_indices = @transform_14, window_bounds = array<i64: 2, 256, 512>}, {pipeline_mode = #tpu.pipeline_mode<synchronous>, transform_indices = @transform_15, window_bounds = array<i64: 2, 1, 512>}, {pipeline_mode = #tpu.pipeline_mode<synchronous>, transform_indices = @transform_16, window_bounds = array<i64: 256, 256>}, {pipeline_mode = #tpu.pipeline_mode<synchronous>, transform_indices = @transform_17, window_bounds = array<i64: 1, 256>}, {pipeline_mode = #tpu.pipeline_mode<synchronous>, transform_indices = @transform_18, window_bounds = array<i64: 256, 128>}, {pipeline_mode = #tpu.pipeline_mode<synchronous>, transform_indices = @transform_19, window_bounds = array<i64: 1, 128>}, {transform_indices = @transform_20, window_bounds = array<i64: 128, 128>}]} {
    %c0 = arith.constant 0 : index
    %c0_0 = arith.constant 0 : index
    %0 = vector.load %arg4[%c0, %c0_0] : memref<128x128xf32, #tpu.memory_space<vmem>>, vector<128x128xf32>
    %c0_1 = arith.constant 0 : index
    %c0_2 = arith.constant 0 : index
    %1 = vector.load %arg1[%c0_1, %c0_2] : memref<128x48xf32, #tpu.memory_space<vmem>>, vector<128x48xf32>
    %c0_3 = arith.constant 0 : index
    %c0_4 = arith.constant 0 : index
    %2 = vector.load %arg5[%c0_3, %c0_4] : memref<48x256xf32, #tpu.memory_space<vmem>>, vector<48x256xf32>
    %cst = arith.constant dense<0.000000e+00> : vector<128x256xf32>
    %3 = tpu.matmul %1, %2, %cst {dimension_numbers = #tpu.dot_dimension_numbers<[1], [0], [0], [1], [0, 0, 1, 1], [], []>} : vector<128x48xf32>, vector<48x256xf32>, vector<128x256xf32> -> vector<128x256xf32>
    %c0_5 = arith.constant 0 : index
    %c0_6 = arith.constant 0 : index
    %4 = vector.load %arg6[%c0_5, %c0_6] : memref<1x256xf32, #tpu.memory_space<vmem>>, vector<1x256xf32>
    %5 = vector.broadcast %4 : vector<1x256xf32> to vector<128x256xf32>
    %6 = arith.addf %3, %5 : vector<128x256xf32>
    %cst_7 = arith.constant 0.000000e+00 : f32
    %7 = vector.broadcast %cst_7 : f32 to vector<128x256xf32>
    %8 = arith.maximumf %6, %7 : vector<128x256xf32>
    %cst_8 = arith.constant 0.000000e+00 : f32
    %9 = vector.broadcast %cst_8 : f32 to vector<128x256xf32>
    %c0_9 = arith.constant 0 : index
    %c0_10 = arith.constant 0 : index
    %c0_11 = arith.constant 0 : index
    %10 = vector.load %arg2[%c0_9, %c0_10, %c0_11] : memref<2x128x256xf32, #tpu.memory_space<vmem>>, vector<1x128x256xf32>
    %11 = vector.shape_cast %10 : vector<1x128x256xf32> to vector<128x256xf32>
    %12 = arith.addf %8, %11 : vector<128x256xf32>
    %cst_12 = arith.constant dense<0.000000e+00> : vector<128x256xf32>
    %13 = tpu.matmul %0, %12, %cst_12 {dimension_numbers = #tpu.dot_dimension_numbers<[1], [0], [0], [1], [0, 0, 1, 1], [], []>} : vector<128x128xf32>, vector<128x256xf32>, vector<128x256xf32> -> vector<128x256xf32>
    %c0_13 = arith.constant 0 : index
    %c0_14 = arith.constant 0 : index
    %c0_15 = arith.constant 0 : index
    %14 = vector.load %arg7[%c0_13, %c0_14, %c0_15] : memref<2x256x256xf32, #tpu.memory_space<vmem>>, vector<1x256x256xf32>
    %15 = vector.shape_cast %14 : vector<1x256x256xf32> to vector<256x256xf32>
    %cst_16 = arith.constant dense<0.000000e+00> : vector<128x256xf32>
    %16 = tpu.matmul %12, %15, %cst_16 {dimension_numbers = #tpu.dot_dimension_numbers<[1], [0], [0], [1], [0, 0, 1, 1], [], []>} : vector<128x256xf32>, vector<256x256xf32>, vector<128x256xf32> -> vector<128x256xf32>
    %c0_17 = arith.constant 0 : index
    %c0_18 = arith.constant 0 : index
    %c0_19 = arith.constant 0 : index
    %17 = vector.load %arg8[%c0_17, %c0_18, %c0_19] : memref<2x256x256xf32, #tpu.memory_space<vmem>>, vector<1x256x256xf32>
    %18 = vector.shape_cast %17 : vector<1x256x256xf32> to vector<256x256xf32>
    %cst_20 = arith.constant dense<0.000000e+00> : vector<128x256xf32>
    %19 = tpu.matmul %13, %18, %cst_20 {dimension_numbers = #tpu.dot_dimension_numbers<[1], [0], [0], [1], [0, 0, 1, 1], [], []>} : vector<128x256xf32>, vector<256x256xf32>, vector<128x256xf32> -> vector<128x256xf32>
    %20 = arith.addf %16, %19 : vector<128x256xf32>
    %c0_21 = arith.constant 0 : index
    %c0_22 = arith.constant 0 : index
    %c0_23 = arith.constant 0 : index
    %21 = vector.load %arg9[%c0_21, %c0_22, %c0_23] : memref<2x1x256xf32, #tpu.memory_space<vmem>>, vector<1x1x256xf32>
    %22 = vector.shape_cast %21 : vector<1x1x256xf32> to vector<1x256xf32>
    %23 = vector.broadcast %22 : vector<1x256xf32> to vector<128x256xf32>
    %24 = arith.addf %20, %23 : vector<128x256xf32>
    %cst_24 = arith.constant 0.000000e+00 : f32
    %25 = vector.broadcast %cst_24 : f32 to vector<128x256xf32>
    %26 = arith.maximumf %24, %25 : vector<128x256xf32>
    %cst_25 = arith.constant dense<0.000000e+00> : vector<128x256xf32>
    %27 = tpu.matmul %0, %26, %cst_25 {dimension_numbers = #tpu.dot_dimension_numbers<[1], [0], [0], [1], [0, 0, 1, 1], [], []>} : vector<128x128xf32>, vector<128x256xf32>, vector<128x256xf32> -> vector<128x256xf32>
    %c0_26 = arith.constant 0 : index
    %c0_27 = arith.constant 0 : index
    %c0_28 = arith.constant 0 : index
    %28 = vector.load %arg10[%c0_26, %c0_27, %c0_28] : memref<2x256x256xf32, #tpu.memory_space<vmem>>, vector<1x256x256xf32>
    %29 = vector.shape_cast %28 : vector<1x256x256xf32> to vector<256x256xf32>
    %cst_29 = arith.constant dense<0.000000e+00> : vector<128x256xf32>
    %30 = tpu.matmul %26, %29, %cst_29 {dimension_numbers = #tpu.dot_dimension_numbers<[1], [0], [0], [1], [0, 0, 1, 1], [], []>} : vector<128x256xf32>, vector<256x256xf32>, vector<128x256xf32> -> vector<128x256xf32>
    %c0_30 = arith.constant 0 : index
    %c0_31 = arith.constant 0 : index
    %c0_32 = arith.constant 0 : index
    %31 = vector.load %arg11[%c0_30, %c0_31, %c0_32] : memref<2x256x256xf32, #tpu.memory_space<vmem>>, vector<1x256x256xf32>
    %32 = vector.shape_cast %31 : vector<1x256x256xf32> to vector<256x256xf32>
    %cst_33 = arith.constant dense<0.000000e+00> : vector<128x256xf32>
    %33 = tpu.matmul %27, %32, %cst_33 {dimension_numbers = #tpu.dot_dimension_numbers<[1], [0], [0], [1], [0, 0, 1, 1], [], []>} : vector<128x256xf32>, vector<256x256xf32>, vector<128x256xf32> -> vector<128x256xf32>
    %34 = arith.addf %30, %33 : vector<128x256xf32>
    %c0_34 = arith.constant 0 : index
    %c0_35 = arith.constant 0 : index
    %c0_36 = arith.constant 0 : index
    %35 = vector.load %arg12[%c0_34, %c0_35, %c0_36] : memref<2x1x256xf32, #tpu.memory_space<vmem>>, vector<1x1x256xf32>
    %36 = vector.shape_cast %35 : vector<1x1x256xf32> to vector<1x256xf32>
    %37 = vector.broadcast %36 : vector<1x256xf32> to vector<128x256xf32>
    %38 = arith.addf %34, %37 : vector<128x256xf32>
    %cst_37 = arith.constant 0.000000e+00 : f32
    %39 = vector.broadcast %cst_37 : f32 to vector<128x256xf32>
    %40 = arith.maximumf %38, %39 : vector<128x256xf32>
    %c0_38 = arith.constant 0 : index
    %c0_39 = arith.constant 0 : index
    %c0_40 = arith.constant 0 : index
    %41 = vector.load %arg13[%c0_38, %c0_39, %c0_40] : memref<2x256x512xf32, #tpu.memory_space<vmem>>, vector<1x256x512xf32>
    %42 = vector.shape_cast %41 : vector<1x256x512xf32> to vector<256x512xf32>
    %cst_41 = arith.constant dense<0.000000e+00> : vector<128x512xf32>
    %43 = tpu.matmul %40, %42, %cst_41 {dimension_numbers = #tpu.dot_dimension_numbers<[1], [0], [0], [1], [0, 0, 1, 1], [], []>} : vector<128x256xf32>, vector<256x512xf32>, vector<128x512xf32> -> vector<128x512xf32>
    %c0_42 = arith.constant 0 : index
    %c0_43 = arith.constant 0 : index
    %c0_44 = arith.constant 0 : index
    %44 = vector.load %arg14[%c0_42, %c0_43, %c0_44] : memref<2x1x512xf32, #tpu.memory_space<vmem>>, vector<1x1x512xf32>
    %45 = vector.shape_cast %44 : vector<1x1x512xf32> to vector<1x512xf32>
    %46 = vector.broadcast %45 : vector<1x512xf32> to vector<128x512xf32>
    %47 = arith.addf %43, %46 : vector<128x512xf32>
    %c0_45 = arith.constant 0 : index
    %c0_46 = arith.constant 0 : index
    %c0_47 = arith.constant 0 : index
    %48 = vector.load %arg3[%c0_45, %c0_46, %c0_47] : memref<2x128x512xf32, #tpu.memory_space<vmem>>, vector<1x128x512xf32>
    %49 = vector.shape_cast %48 : vector<1x128x512xf32> to vector<128x512xf32>
    %50 = arith.addf %47, %49 : vector<128x512xf32>
    %51 = vector.extract_strided_slice %50 {offsets = [0, 0], sizes = [128, 256], strides = [1, 1]} : vector<128x512xf32> to vector<128x256xf32>
    %52 = arith.negf %51 : vector<128x256xf32>
    %53 = math.exp %52 : vector<128x256xf32>
    %cst_48 = arith.constant 1.000000e+00 : f32
    %54 = vector.broadcast %cst_48 : f32 to vector<128x256xf32>
    %55 = arith.addf %54, %53 : vector<128x256xf32>
    %56 = arith.divf %54, %55 : vector<128x256xf32>
    %57 = vector.extract_strided_slice %50 {offsets = [0, 256], sizes = [128, 256], strides = [1, 1]} : vector<128x512xf32> to vector<128x256xf32>
    %58 = math.tanh %57 : vector<128x256xf32>
    %59 = arith.mulf %56, %58 : vector<128x256xf32>
    %c0_49 = arith.constant 0 : index
    %c0_50 = arith.constant 0 : index
    %c0_51 = arith.constant 0 : index
    %60 = vector.load %arg15[%c0_49, %c0_50, %c0_51] : memref<2x256x512xf32, #tpu.memory_space<vmem>>, vector<1x256x512xf32>
    %61 = vector.shape_cast %60 : vector<1x256x512xf32> to vector<256x512xf32>
    %cst_52 = arith.constant dense<0.000000e+00> : vector<128x512xf32>
    %62 = tpu.matmul %59, %61, %cst_52 {dimension_numbers = #tpu.dot_dimension_numbers<[1], [0], [0], [1], [0, 0, 1, 1], [], []>} : vector<128x256xf32>, vector<256x512xf32>, vector<128x512xf32> -> vector<128x512xf32>
    %c0_53 = arith.constant 0 : index
    %c0_54 = arith.constant 0 : index
    %c0_55 = arith.constant 0 : index
    %63 = vector.load %arg16[%c0_53, %c0_54, %c0_55] : memref<2x1x512xf32, #tpu.memory_space<vmem>>, vector<1x1x512xf32>
    %64 = vector.shape_cast %63 : vector<1x1x512xf32> to vector<1x512xf32>
    %65 = vector.broadcast %64 : vector<1x512xf32> to vector<128x512xf32>
    %66 = arith.addf %62, %65 : vector<128x512xf32>
    %67 = vector.extract_strided_slice %66 {offsets = [0, 0], sizes = [128, 256], strides = [1, 1]} : vector<128x512xf32> to vector<128x256xf32>
    %68 = arith.addf %8, %67 : vector<128x256xf32>
    %cst_56 = arith.constant 0.707106769 : f32
    %69 = vector.broadcast %cst_56 : f32 to vector<128x256xf32>
    %70 = arith.mulf %68, %69 : vector<128x256xf32>
    %71 = vector.extract_strided_slice %66 {offsets = [0, 256], sizes = [128, 256], strides = [1, 1]} : vector<128x512xf32> to vector<128x256xf32>
    %72 = arith.addf %9, %71 : vector<128x256xf32>
    %c1 = arith.constant 1 : index
    %c0_57 = arith.constant 0 : index
    %c0_58 = arith.constant 0 : index
    %73 = vector.load %arg2[%c1, %c0_57, %c0_58] : memref<2x128x256xf32, #tpu.memory_space<vmem>>, vector<1x128x256xf32>
    %74 = vector.shape_cast %73 : vector<1x128x256xf32> to vector<128x256xf32>
    %75 = arith.addf %70, %74 : vector<128x256xf32>
    %cst_59 = arith.constant dense<0.000000e+00> : vector<128x256xf32>
    %76 = tpu.matmul %0, %75, %cst_59 {dimension_numbers = #tpu.dot_dimension_numbers<[1], [0], [0], [1], [0, 0, 1, 1], [], []>} : vector<128x128xf32>, vector<128x256xf32>, vector<128x256xf32> -> vector<128x256xf32>
    %c1_60 = arith.constant 1 : index
    %c0_61 = arith.constant 0 : index
    %c0_62 = arith.constant 0 : index
    %77 = vector.load %arg7[%c1_60, %c0_61, %c0_62] : memref<2x256x256xf32, #tpu.memory_space<vmem>>, vector<1x256x256xf32>
    %78 = vector.shape_cast %77 : vector<1x256x256xf32> to vector<256x256xf32>
    %cst_63 = arith.constant dense<0.000000e+00> : vector<128x256xf32>
    %79 = tpu.matmul %75, %78, %cst_63 {dimension_numbers = #tpu.dot_dimension_numbers<[1], [0], [0], [1], [0, 0, 1, 1], [], []>} : vector<128x256xf32>, vector<256x256xf32>, vector<128x256xf32> -> vector<128x256xf32>
    %c1_64 = arith.constant 1 : index
    %c0_65 = arith.constant 0 : index
    %c0_66 = arith.constant 0 : index
    %80 = vector.load %arg8[%c1_64, %c0_65, %c0_66] : memref<2x256x256xf32, #tpu.memory_space<vmem>>, vector<1x256x256xf32>
    %81 = vector.shape_cast %80 : vector<1x256x256xf32> to vector<256x256xf32>
    %cst_67 = arith.constant dense<0.000000e+00> : vector<128x256xf32>
    %82 = tpu.matmul %76, %81, %cst_67 {dimension_numbers = #tpu.dot_dimension_numbers<[1], [0], [0], [1], [0, 0, 1, 1], [], []>} : vector<128x256xf32>, vector<256x256xf32>, vector<128x256xf32> -> vector<128x256xf32>
    %83 = arith.addf %79, %82 : vector<128x256xf32>
    %c1_68 = arith.constant 1 : index
    %c0_69 = arith.constant 0 : index
    %c0_70 = arith.constant 0 : index
    %84 = vector.load %arg9[%c1_68, %c0_69, %c0_70] : memref<2x1x256xf32, #tpu.memory_space<vmem>>, vector<1x1x256xf32>
    %85 = vector.shape_cast %84 : vector<1x1x256xf32> to vector<1x256xf32>
    %86 = vector.broadcast %85 : vector<1x256xf32> to vector<128x256xf32>
    %87 = arith.addf %83, %86 : vector<128x256xf32>
    %cst_71 = arith.constant 0.000000e+00 : f32
    %88 = vector.broadcast %cst_71 : f32 to vector<128x256xf32>
    %89 = arith.maximumf %87, %88 : vector<128x256xf32>
    %cst_72 = arith.constant dense<0.000000e+00> : vector<128x256xf32>
    %90 = tpu.matmul %0, %89, %cst_72 {dimension_numbers = #tpu.dot_dimension_numbers<[1], [0], [0], [1], [0, 0, 1, 1], [], []>} : vector<128x128xf32>, vector<128x256xf32>, vector<128x256xf32> -> vector<128x256xf32>
    %c1_73 = arith.constant 1 : index
    %c0_74 = arith.constant 0 : index
    %c0_75 = arith.constant 0 : index
    %91 = vector.load %arg10[%c1_73, %c0_74, %c0_75] : memref<2x256x256xf32, #tpu.memory_space<vmem>>, vector<1x256x256xf32>
    %92 = vector.shape_cast %91 : vector<1x256x256xf32> to vector<256x256xf32>
    %cst_76 = arith.constant dense<0.000000e+00> : vector<128x256xf32>
    %93 = tpu.matmul %89, %92, %cst_76 {dimension_numbers = #tpu.dot_dimension_numbers<[1], [0], [0], [1], [0, 0, 1, 1], [], []>} : vector<128x256xf32>, vector<256x256xf32>, vector<128x256xf32> -> vector<128x256xf32>
    %c1_77 = arith.constant 1 : index
    %c0_78 = arith.constant 0 : index
    %c0_79 = arith.constant 0 : index
    %94 = vector.load %arg11[%c1_77, %c0_78, %c0_79] : memref<2x256x256xf32, #tpu.memory_space<vmem>>, vector<1x256x256xf32>
    %95 = vector.shape_cast %94 : vector<1x256x256xf32> to vector<256x256xf32>
    %cst_80 = arith.constant dense<0.000000e+00> : vector<128x256xf32>
    %96 = tpu.matmul %90, %95, %cst_80 {dimension_numbers = #tpu.dot_dimension_numbers<[1], [0], [0], [1], [0, 0, 1, 1], [], []>} : vector<128x256xf32>, vector<256x256xf32>, vector<128x256xf32> -> vector<128x256xf32>
    %97 = arith.addf %93, %96 : vector<128x256xf32>
    %c1_81 = arith.constant 1 : index
    %c0_82 = arith.constant 0 : index
    %c0_83 = arith.constant 0 : index
    %98 = vector.load %arg12[%c1_81, %c0_82, %c0_83] : memref<2x1x256xf32, #tpu.memory_space<vmem>>, vector<1x1x256xf32>
    %99 = vector.shape_cast %98 : vector<1x1x256xf32> to vector<1x256xf32>
    %100 = vector.broadcast %99 : vector<1x256xf32> to vector<128x256xf32>
    %101 = arith.addf %97, %100 : vector<128x256xf32>
    %cst_84 = arith.constant 0.000000e+00 : f32
    %102 = vector.broadcast %cst_84 : f32 to vector<128x256xf32>
    %103 = arith.maximumf %101, %102 : vector<128x256xf32>
    %c1_85 = arith.constant 1 : index
    %c0_86 = arith.constant 0 : index
    %c0_87 = arith.constant 0 : index
    %104 = vector.load %arg13[%c1_85, %c0_86, %c0_87] : memref<2x256x512xf32, #tpu.memory_space<vmem>>, vector<1x256x512xf32>
    %105 = vector.shape_cast %104 : vector<1x256x512xf32> to vector<256x512xf32>
    %cst_88 = arith.constant dense<0.000000e+00> : vector<128x512xf32>
    %106 = tpu.matmul %103, %105, %cst_88 {dimension_numbers = #tpu.dot_dimension_numbers<[1], [0], [0], [1], [0, 0, 1, 1], [], []>} : vector<128x256xf32>, vector<256x512xf32>, vector<128x512xf32> -> vector<128x512xf32>
    %c1_89 = arith.constant 1 : index
    %c0_90 = arith.constant 0 : index
    %c0_91 = arith.constant 0 : index
    %107 = vector.load %arg14[%c1_89, %c0_90, %c0_91] : memref<2x1x512xf32, #tpu.memory_space<vmem>>, vector<1x1x512xf32>
    %108 = vector.shape_cast %107 : vector<1x1x512xf32> to vector<1x512xf32>
    %109 = vector.broadcast %108 : vector<1x512xf32> to vector<128x512xf32>
    %110 = arith.addf %106, %109 : vector<128x512xf32>
    %c1_92 = arith.constant 1 : index
    %c0_93 = arith.constant 0 : index
    %c0_94 = arith.constant 0 : index
    %111 = vector.load %arg3[%c1_92, %c0_93, %c0_94] : memref<2x128x512xf32, #tpu.memory_space<vmem>>, vector<1x128x512xf32>
    %112 = vector.shape_cast %111 : vector<1x128x512xf32> to vector<128x512xf32>
    %113 = arith.addf %110, %112 : vector<128x512xf32>
    %114 = vector.extract_strided_slice %113 {offsets = [0, 0], sizes = [128, 256], strides = [1, 1]} : vector<128x512xf32> to vector<128x256xf32>
    %115 = arith.negf %114 : vector<128x256xf32>
    %116 = math.exp %115 : vector<128x256xf32>
    %cst_95 = arith.constant 1.000000e+00 : f32
    %117 = vector.broadcast %cst_95 : f32 to vector<128x256xf32>
    %118 = arith.addf %117, %116 : vector<128x256xf32>
    %119 = arith.divf %117, %118 : vector<128x256xf32>
    %120 = vector.extract_strided_slice %113 {offsets = [0, 256], sizes = [128, 256], strides = [1, 1]} : vector<128x512xf32> to vector<128x256xf32>
    %121 = math.tanh %120 : vector<128x256xf32>
    %122 = arith.mulf %119, %121 : vector<128x256xf32>
    %c1_96 = arith.constant 1 : index
    %c0_97 = arith.constant 0 : index
    %c0_98 = arith.constant 0 : index
    %123 = vector.load %arg15[%c1_96, %c0_97, %c0_98] : memref<2x256x512xf32, #tpu.memory_space<vmem>>, vector<1x256x512xf32>
    %124 = vector.shape_cast %123 : vector<1x256x512xf32> to vector<256x512xf32>
    %cst_99 = arith.constant dense<0.000000e+00> : vector<128x512xf32>
    %125 = tpu.matmul %122, %124, %cst_99 {dimension_numbers = #tpu.dot_dimension_numbers<[1], [0], [0], [1], [0, 0, 1, 1], [], []>} : vector<128x256xf32>, vector<256x512xf32>, vector<128x512xf32> -> vector<128x512xf32>
    %c1_100 = arith.constant 1 : index
    %c0_101 = arith.constant 0 : index
    %c0_102 = arith.constant 0 : index
    %126 = vector.load %arg16[%c1_100, %c0_101, %c0_102] : memref<2x1x512xf32, #tpu.memory_space<vmem>>, vector<1x1x512xf32>
    %127 = vector.shape_cast %126 : vector<1x1x512xf32> to vector<1x512xf32>
    %128 = vector.broadcast %127 : vector<1x512xf32> to vector<128x512xf32>
    %129 = arith.addf %125, %128 : vector<128x512xf32>
    %130 = vector.extract_strided_slice %129 {offsets = [0, 256], sizes = [128, 256], strides = [1, 1]} : vector<128x512xf32> to vector<128x256xf32>
    %131 = arith.addf %72, %130 : vector<128x256xf32>
    %cst_103 = arith.constant 0.707106769 : f32
    %132 = vector.broadcast %cst_103 : f32 to vector<128x256xf32>
    %133 = arith.mulf %131, %132 : vector<128x256xf32>
    %c0_104 = arith.constant 0 : index
    %c0_105 = arith.constant 0 : index
    %134 = vector.load %arg17[%c0_104, %c0_105] : memref<256x256xf32, #tpu.memory_space<vmem>>, vector<256x256xf32>
    %cst_106 = arith.constant dense<0.000000e+00> : vector<128x256xf32>
    %135 = tpu.matmul %133, %134, %cst_106 {dimension_numbers = #tpu.dot_dimension_numbers<[1], [0], [0], [1], [0, 0, 1, 1], [], []>} : vector<128x256xf32>, vector<256x256xf32>, vector<128x256xf32> -> vector<128x256xf32>
    %c0_107 = arith.constant 0 : index
    %c0_108 = arith.constant 0 : index
    %136 = vector.load %arg18[%c0_107, %c0_108] : memref<1x256xf32, #tpu.memory_space<vmem>>, vector<1x256xf32>
    %137 = vector.broadcast %136 : vector<1x256xf32> to vector<128x256xf32>
    %138 = arith.addf %135, %137 : vector<128x256xf32>
    %cst_109 = arith.constant 0.000000e+00 : f32
    %139 = vector.broadcast %cst_109 : f32 to vector<128x256xf32>
    %140 = arith.maximumf %138, %139 : vector<128x256xf32>
    %c0_110 = arith.constant 0 : index
    %c0_111 = arith.constant 0 : index
    %141 = vector.load %arg19[%c0_110, %c0_111] : memref<256x128xf32, #tpu.memory_space<vmem>>, vector<256x128xf32>
    %cst_112 = arith.constant dense<0.000000e+00> : vector<128x128xf32>
    %142 = tpu.matmul %140, %141, %cst_112 {dimension_numbers = #tpu.dot_dimension_numbers<[1], [0], [0], [1], [0, 0, 1, 1], [], []>} : vector<128x256xf32>, vector<256x128xf32>, vector<128x128xf32> -> vector<128x128xf32>
    %c0_113 = arith.constant 0 : index
    %c0_114 = arith.constant 0 : index
    %143 = vector.load %arg20[%c0_113, %c0_114] : memref<1x128xf32, #tpu.memory_space<vmem>>, vector<1x128xf32>
    %144 = vector.broadcast %143 : vector<1x128xf32> to vector<128x128xf32>
    %145 = arith.addf %142, %144 : vector<128x128xf32>
    %c0_115 = arith.constant 0 : index
    %c0_116 = arith.constant 0 : index
    %146 = vector.load %arg21[%c0_115, %c0_116] : memref<128x128xf32, #tpu.memory_space<vmem>>, vector<128x128xf32>
    tpu.vector_store %arg21[%c0_115, %c0_116], %145 {strides = array<i32>} : memref<128x128xf32, #tpu.memory_space<vmem>>, vector<128x128xf32>,
    return
  }
  func.func @transform_0(%arg0: i32) -> (i32, i32) {
    %c0_i32 = arith.constant 0 : i32
    %c0_i32_0 = arith.constant 0 : i32
    return %arg0, %c0_i32 : i32, i32
  }
  func.func @transform_1(%arg0: i32) -> (i32, i32, i32) {
    %c0_i32 = arith.constant 0 : i32
    %c0_i32_0 = arith.constant 0 : i32
    %c0_i32_1 = arith.constant 0 : i32
    return %c0_i32, %arg0, %c0_i32_0 : i32, i32, i32
  }
  func.func @transform_2(%arg0: i32) -> (i32, i32, i32) {
    %c0_i32 = arith.constant 0 : i32
    %c0_i32_0 = arith.constant 0 : i32
    %c0_i32_1 = arith.constant 0 : i32
    return %c0_i32, %arg0, %c0_i32_0 : i32, i32, i32
  }
  func.func @transform_3(%arg0: i32) -> (i32, i32) {
    %c0_i32 = arith.constant 0 : i32
    %c0_i32_0 = arith.constant 0 : i32
    %c0_i32_1 = arith.constant 0 : i32
    return %c0_i32, %c0_i32_0 : i32, i32
  }
  func.func @transform_4(%arg0: i32) -> (i32, i32) {
    %c0_i32 = arith.constant 0 : i32
    %c0_i32_0 = arith.constant 0 : i32
    %c0_i32_1 = arith.constant 0 : i32
    return %c0_i32, %c0_i32_0 : i32, i32
  }
  func.func @transform_5(%arg0: i32) -> (i32, i32) {
    %c0_i32 = arith.constant 0 : i32
    %c0_i32_0 = arith.constant 0 : i32
    %c0_i32_1 = arith.constant 0 : i32
    return %c0_i32, %c0_i32_0 : i32, i32
  }
  func.func @transform_6(%arg0: i32) -> (i32, i32, i32) {
    %c0_i32 = arith.constant 0 : i32
    %c0_i32_0 = arith.constant 0 : i32
    %c0_i32_1 = arith.constant 0 : i32
    %c0_i32_2 = arith.constant 0 : i32
    return %c0_i32, %c0_i32_0, %c0_i32_1 : i32, i32, i32
  }
  func.func @transform_7(%arg0: i32) -> (i32, i32, i32) {
    %c0_i32 = arith.constant 0 : i32
    %c0_i32_0 = arith.constant 0 : i32
    %c0_i32_1 = arith.constant 0 : i32
    %c0_i32_2 = arith.constant 0 : i32
    return %c0_i32, %c0_i32_0, %c0_i32_1 : i32, i32, i32
  }
  func.func @transform_8(%arg0: i32) -> (i32, i32, i32) {
    %c0_i32 = arith.constant 0 : i32
    %c0_i32_0 = arith.constant 0 : i32
    %c0_i32_1 = arith.constant 0 : i32
    %c0_i32_2 = arith.constant 0 : i32
    return %c0_i32, %c0_i32_0, %c0_i32_1 : i32, i32, i32
  }
  func.func @transform_9(%arg0: i32) -> (i32, i32, i32) {
    %c0_i32 = arith.constant 0 : i32
    %c0_i32_0 = arith.constant 0 : i32
    %c0_i32_1 = arith.constant 0 : i32
    %c0_i32_2 = arith.constant 0 : i32
    return %c0_i32, %c0_i32_0, %c0_i32_1 : i32, i32, i32
  }
  func.func @transform_10(%arg0: i32) -> (i32, i32, i32) {
    %c0_i32 = arith.constant 0 : i32
    %c0_i32_0 = arith.constant 0 : i32
    %c0_i32_1 = arith.constant 0 : i32
    %c0_i32_2 = arith.constant 0 : i32
    return %c0_i32, %c0_i32_0, %c0_i32_1 : i32, i32, i32
  }
  func.func @transform_11(%arg0: i32) -> (i32, i32, i32) {
    %c0_i32 = arith.constant 0 : i32
    %c0_i32_0 = arith.constant 0 : i32
    %c0_i32_1 = arith.constant 0 : i32
    %c0_i32_2 = arith.constant 0 : i32
    return %c0_i32, %c0_i32_0, %c0_i32_1 : i32, i32, i32
  }
  func.func @transform_12(%arg0: i32) -> (i32, i32, i32) {
    %c0_i32 = arith.constant 0 : i32
    %c0_i32_0 = arith.constant 0 : i32
    %c0_i32_1 = arith.constant 0 : i32
    %c0_i32_2 = arith.constant 0 : i32
    return %c0_i32, %c0_i32_0, %c0_i32_1 : i32, i32, i32
  }
  func.func @transform_13(%arg0: i32) -> (i32, i32, i32) {
    %c0_i32 = arith.constant 0 : i32
    %c0_i32_0 = arith.constant 0 : i32
    %c0_i32_1 = arith.constant 0 : i32
    %c0_i32_2 = arith.constant 0 : i32
    return %c0_i32, %c0_i32_0, %c0_i32_1 : i32, i32, i32
  }
  func.func @transform_14(%arg0: i32) -> (i32, i32, i32) {
    %c0_i32 = arith.constant 0 : i32
    %c0_i32_0 = arith.constant 0 : i32
    %c0_i32_1 = arith.constant 0 : i32
    %c0_i32_2 = arith.constant 0 : i32
    return %c0_i32, %c0_i32_0, %c0_i32_1 : i32, i32, i32
  }
  func.func @transform_15(%arg0: i32) -> (i32, i32, i32) {
    %c0_i32 = arith.constant 0 : i32
    %c0_i32_0 = arith.constant 0 : i32
    %c0_i32_1 = arith.constant 0 : i32
    %c0_i32_2 = arith.constant 0 : i32
    return %c0_i32, %c0_i32_0, %c0_i32_1 : i32, i32, i32
  }
  func.func @transform_16(%arg0: i32) -> (i32, i32) {
    %c0_i32 = arith.constant 0 : i32
    %c0_i32_0 = arith.constant 0 : i32
    %c0_i32_1 = arith.constant 0 : i32
    return %c0_i32, %c0_i32_0 : i32, i32
  }
  func.func @transform_17(%arg0: i32) -> (i32, i32) {
    %c0_i32 = arith.constant 0 : i32
    %c0_i32_0 = arith.constant 0 : i32
    %c0_i32_1 = arith.constant 0 : i32
    return %c0_i32, %c0_i32_0 : i32, i32
  }
  func.func @transform_18(%arg0: i32) -> (i32, i32) {
    %c0_i32 = arith.constant 0 : i32
    %c0_i32_0 = arith.constant 0 : i32
    %c0_i32_1 = arith.constant 0 : i32
    return %c0_i32, %c0_i32_0 : i32, i32
  }
  func.func @transform_19(%arg0: i32) -> (i32, i32) {
    %c0_i32 = arith.constant 0 : i32
    %c0_i32_0 = arith.constant 0 : i32
    %c0_i32_1 = arith.constant 0 : i32
    return %c0_i32, %c0_i32_0 : i32, i32
  }
  func.func @transform_20(%arg0: i32) -> (i32, i32) {
    %c0_i32 = arith.constant 0 : i32
    %c0_i32_0 = arith.constant 0 : i32
    return %arg0, %c0_i32 : i32, i32
  }
}

</mosaic_0001>

<bundles_post_ra>
// kernel: squeeze.1
= control target key start
LH: loop header
LB: loop body
LE: loop exit
PB: predicated region body
PF: predicated region fallthrough
CT: control target
= control target key end

     0   :  { %vm258_vm0 = vcmask 130048   ;;  %s1953_s22 = smov 96   ;;  %s2609_s0 = inlined_call_operand.vmem [shape: bf16[16,1,48,8], index: 0, kind: input, shape index: {}]   ;;  %s2610_s1 = inlined_call_operand.vmem [shape: bf16[16,3,16,8], index: 1, kind: output, shape index: {}]  }
   0x1   :  { %v1859_v0 = vld [vmem:[%s2609_s0] sm:$0xff]   ;;  %v1867_v1 = vld [vmem:[%s2609_s0 + $0x10] sm:$0xff]   ;;  %v1868_v2 = vld [vmem:[%s2609_s0 + $0x8] sm:$0xff]  }
   0x2   :  { %v1860_v3 = vunpack.c.l.bf16 %v1859_v0  ;;  %v1861_v4 = vunpack.c.h.bf16 %v1859_v0  ;;  %v1852_v5 = vunpack.c.l.bf16 %v1867_v1  ;;  %v1853_v6 = vunpack.c.h.bf16 %v1867_v1  ;;  %v1866_v7 = vld [vmem:[%s2609_s0 + $0x18] sm:$0xff]   ;;  %v1865_v8 = vld [vmem:[%s2609_s0 + $0x20] sm:$0xff]   ;;  %v1864_v9 = vld [vmem:[%s2609_s0 + $0x28] sm:$0xff]  }
   0x3   :  { %v1856_v10 = vunpack.c.l.bf16 %v1868_v2  ;;  %v1857_v11 = vunpack.c.h.bf16 %v1868_v2  ;;  %v1848_v12 = vunpack.c.l.bf16 %v1866_v7  ;;  %v1849_v13 = vunpack.c.h.bf16 %v1866_v7  ;;  %v1863_v14 = vld [vmem:[%s2609_s0 + $0x30] sm:$0xff]   ;;  %v1862_v15 = vld [vmem:[%s2609_s0 + $0x38] sm:$0xff]   ;;  %s1952_s0 = smov 112  }
   0x4   :  { %265 = vst.msk [vmem:[#allocation0 + $0x40] ss:$8 sm:$0xf] %vm258_vm0, %v1861_v4   ;;  %267 = vst.msk [vmem:[#allocation0 + $0x40] ss:$8 sm:$0xf0] %vm258_vm0, %v1861_v4   ;;  %v1872_v16 = vpack.i.bf16 %v1861_v4, %v1860_v3  ;;  %v1882_v17 = vpack.i.bf16 %v1853_v6, %v1852_v5  ;;  %v1844_v18 = vunpack.c.l.bf16 %v1865_v8  ;;  %v1845_v19 = vunpack.c.h.bf16 %v1865_v8 }
   0x5   :  { %259 = vst.msk [vmem:[#allocation0] ss:$8 sm:$0xf] %vm258_vm0, %v1860_v3   ;;  %260 = vst.msk [vmem:[#allocation0] ss:$8 sm:$0xf0] %vm258_vm0, %v1860_v3   ;;  %v1877_v20 = vpack.i.bf16 %v1857_v11, %v1856_v10  ;;  %v1840_v21 = vunpack.c.l.bf16 %v1864_v9  ;;  %v1841_v22 = vunpack.c.h.bf16 %v1864_v9  ;;  %v1887_v23 = vpack.i.bf16 %v1849_v13, %v1848_v12 }
   0x6   :  { %293 = vst.msk [vmem:[#allocation0 + $0x140] ss:$8 sm:$0xf] %vm258_vm0, %v1853_v6   ;;  %295 = vst.msk [vmem:[#allocation0 + $0x140] ss:$8 sm:$0xf0] %vm258_vm0, %v1853_v6   ;;  %1873 = vrot.lane.b32.xlu0 %v1872_v16, %s1952_s0  ;;  %1883 = vrot.lane.b32.xlu1 %v1882_v17, %s1952_s0  ;;  %v1836_v24 = vunpack.c.l.bf16 %v1863_v14  ;;  %v1837_v25 = vunpack.c.h.bf16 %v1863_v14  ;;  %v1832_v26 = vunpack.c.l.bf16 %v1862_v15  ;;  %v1833_v27 = vunpack.c.h.bf16 %v1862_v15 }
   0x7   :  { %286 = vst.msk [vmem:[#allocation0 + $0x100] ss:$8 sm:$0xf] %vm258_vm0, %v1852_v5   ;;  %288 = vst.msk [vmem:[#allocation0 + $0x100] ss:$8 sm:$0xf0] %vm258_vm0, %v1852_v5   ;;  %v1892_v28 = vpack.i.bf16 %v1845_v19, %v1844_v18  ;;  %v1897_v29 = vpack.i.bf16 %v1841_v22, %v1840_v21 }
   0x8   :  { %272 = vst.msk [vmem:[#allocation0 + $0x80] ss:$8 sm:$0xf] %vm258_vm0, %v1856_v10   ;;  %274 = vst.msk [vmem:[#allocation0 + $0x80] ss:$8 sm:$0xf0] %vm258_vm0, %v1856_v10   ;;  %v1902_v30 = vpack.i.bf16 %v1837_v25, %v1836_v24  ;;  %v1907_v31 = vpack.i.bf16 %v1833_v27, %v1832_v26 }
   0x9   :  { %279 = vst.msk [vmem:[#allocation0 + $0xc0] ss:$8 sm:$0xf] %vm258_vm0, %v1857_v11   ;;  %281 = vst.msk [vmem:[#allocation0 + $0xc0] ss:$8 sm:$0xf0] %vm258_vm0, %v1857_v11  }
   0xa   :  { %307 = vst.msk [vmem:[#allocation0 + $0x1c0] ss:$8 sm:$0xf] %vm258_vm0, %v1849_v13   ;;  %309 = vst.msk [vmem:[#allocation0 + $0x1c0] ss:$8 sm:$0xf0] %vm258_vm0, %v1849_v13   ;;  %1878 = vrot.lane.b32.xlu0 %v1877_v20, %s1952_s0  ;;  %1888 = vrot.lane.b32.xlu1 %v1887_v23, %s1952_s0 }
   0xb   :  { %300 = vst.msk [vmem:[#allocation0 + $0x180] ss:$8 sm:$0xf] %vm258_vm0, %v1848_v12   ;;  %302 = vst.msk [vmem:[#allocation0 + $0x180] ss:$8 sm:$0xf0] %vm258_vm0, %v1848_v12  }
   0xc   :  { %314 = vst.msk [vmem:[#allocation0 + $0x200] ss:$8 sm:$0xf] %vm258_vm0, %v1844_v18   ;;  %316 = vst.msk [vmem:[#allocation0 + $0x200] ss:$8 sm:$0xf0] %vm258_vm0, %v1844_v18  }
   0xd   :  { %321 = vst.msk [vmem:[#allocation0 + $0x240] ss:$8 sm:$0xf] %vm258_vm0, %v1845_v19   ;;  %323 = vst.msk [vmem:[#allocation0 + $0x240] ss:$8 sm:$0xf0] %vm258_vm0, %v1845_v19  }
   0xe   :  { %335 = vst.msk [vmem:[#allocation0 + $0x2c0] ss:$8 sm:$0xf] %vm258_vm0, %v1841_v22   ;;  %337 = vst.msk [vmem:[#allocation0 + $0x2c0] ss:$8 sm:$0xf0] %vm258_vm0, %v1841_v22   ;;  %1893 = vrot.lane.b32.xlu0 %v1892_v28, %s1952_s0  ;;  %1898 = vrot.lane.b32.xlu1 %v1897_v29, %s1952_s0 }
   0xf   :  { %328 = vst.msk [vmem:[#allocation0 + $0x280] ss:$8 sm:$0xf] %vm258_vm0, %v1840_v21   ;;  %330 = vst.msk [vmem:[#allocation0 + $0x280] ss:$8 sm:$0xf0] %vm258_vm0, %v1840_v21  }
  0x10   :  { %349 = vst.msk [vmem:[#allocation0 + $0x340] ss:$8 sm:$0xf] %vm258_vm0, %v1837_v25   ;;  %351 = vst.msk [vmem:[#allocation0 + $0x340] ss:$8 sm:$0xf0] %vm258_vm0, %v1837_v25  }
  0x11   :  { %342 = vst.msk [vmem:[#allocation0 + $0x300] ss:$8 sm:$0xf] %vm258_vm0, %v1836_v24   ;;  %344 = vst.msk [vmem:[#allocation0 + $0x300] ss:$8 sm:$0xf0] %vm258_vm0, %v1836_v24  }
  0x12   :  { %356 = vst.msk [vmem:[#allocation0 + $0x380] ss:$8 sm:$0xf] %vm258_vm0, %v1832_v26   ;;  %358 = vst.msk [vmem:[#allocation0 + $0x380] ss:$8 sm:$0xf0] %vm258_vm0, %v1832_v26   ;;  %1903 = vrot.lane.b32.xlu0 %v1902_v30, %s1952_s0  ;;  %1908 = vrot.lane.b32.xlu1 %v1907_v31, %s1952_s0 }
  0x13   :  { %363 = vst.msk [vmem:[#allocation0 + $0x3c0] ss:$8 sm:$0xf] %vm258_vm0, %v1833_v27   ;;  %365 = vst.msk [vmem:[#allocation0 + $0x3c0] ss:$8 sm:$0xf0] %vm258_vm0, %v1833_v27  }
  0x14   :  { %v1954_v13 = vmov 0.0  }
  0x16   :  { %1913 = vrot.lane.b32.xlu0 %v1872_v16, %s1953_s22  ;;  %1918 = vrot.lane.b32.xlu1 %v1877_v20, %s1953_s22 }
  0x1a   :  { %1923 = vrot.lane.b32.xlu0 %v1882_v17, %s1953_s22  ;;  %1928 = vrot.lane.b32.xlu1 %v1887_v23, %s1953_s22 }
  0x1e   :  { %1933 = vrot.lane.b32.xlu0 %v1892_v28, %s1953_s22  ;;  %1938 = vrot.lane.b32.xlu1 %v1897_v29, %s1953_s22 }
  0x22   :  { %1943 = vrot.lane.b32.xlu0 %v1902_v30, %s1953_s22  ;;  %1948 = vrot.lane.b32.xlu1 %v1907_v31, %s1953_s22 }
  0x78   :  { %v1874_v32 = vpop.permute.xlu0 %1873  ;;  %v1884_v33 = vpop.permute.xlu1 %1883 }
  0x79   :  { %v1876_v34 = vunpack.i.h.bf16 %v1874_v32  ;;  %v1875_v35 = vunpack.i.l.bf16 %v1874_v32  ;;  %v1886_v36 = vunpack.i.h.bf16 %v1884_v33  ;;  %v1885_v37 = vunpack.i.l.bf16 %v1884_v33 }
  0x7b   :  { %380 = vst.msk [vmem:[#allocation0 + $0x41] ss:$8 sm:$0xf] %vm258_vm0, %v1876_v34   ;;  %382 = vst.msk [vmem:[#allocation0 + $0x41] ss:$8 sm:$0xf0] %vm258_vm0, %v1876_v34  }
  0x7c   :  { %371 = vst.msk [vmem:[#allocation0 + $0x1] ss:$8 sm:$0xf] %vm258_vm0, %v1875_v35   ;;  %373 = vst.msk [vmem:[#allocation0 + $0x1] ss:$8 sm:$0xf0] %vm258_vm0, %v1875_v35   ;;  %v1879_v38 = vpop.permute.xlu0 %1878  ;;  %v1889_v39 = vpop.permute.xlu1 %1888 }
  0x7d   :  { %416 = vst.msk [vmem:[#allocation0 + $0x141] ss:$8 sm:$0xf] %vm258_vm0, %v1886_v36   ;;  %418 = vst.msk [vmem:[#allocation0 + $0x141] ss:$8 sm:$0xf0] %vm258_vm0, %v1886_v36   ;;  %v1881_v40 = vunpack.i.h.bf16 %v1879_v38  ;;  %v1880_v41 = vunpack.i.l.bf16 %v1879_v38  ;;  %v1891_v42 = vunpack.i.h.bf16 %v1889_v39  ;;  %v1890_v43 = vunpack.i.l.bf16 %v1889_v39 }
  0x7e   :  { %407 = vst.msk [vmem:[#allocation0 + $0x101] ss:$8 sm:$0xf] %vm258_vm0, %v1885_v37   ;;  %409 = vst.msk [vmem:[#allocation0 + $0x101] ss:$8 sm:$0xf0] %vm258_vm0, %v1885_v37  }
  0x7f   :  { %398 = vst.msk [vmem:[#allocation0 + $0xc1] ss:$8 sm:$0xf] %vm258_vm0, %v1881_v40   ;;  %400 = vst.msk [vmem:[#allocation0 + $0xc1] ss:$8 sm:$0xf0] %vm258_vm0, %v1881_v40  }
  0x80   :  { %389 = vst.msk [vmem:[#allocation0 + $0x81] ss:$8 sm:$0xf] %vm258_vm0, %v1880_v41   ;;  %391 = vst.msk [vmem:[#allocation0 + $0x81] ss:$8 sm:$0xf0] %vm258_vm0, %v1880_v41   ;;  %v1894_v44 = vpop.permute.xlu0 %1893  ;;  %v1899_v45 = vpop.permute.xlu1 %1898 }
  0x81   :  { %434 = vst.msk [vmem:[#allocation0 + $0x1c1] ss:$8 sm:$0xf] %vm258_vm0, %v1891_v42   ;;  %436 = vst.msk [vmem:[#allocation0 + $0x1c1] ss:$8 sm:$0xf0] %vm258_vm0, %v1891_v42   ;;  %v1896_v46 = vunpack.i.h.bf16 %v1894_v44  ;;  %v1895_v47 = vunpack.i.l.bf16 %v1894_v44  ;;  %v1901_v48 = vunpack.i.h.bf16 %v1899_v45  ;;  %v1900_v49 = vunpack.i.l.bf16 %v1899_v45 }
  0x82   :  { %425 = vst.msk [vmem:[#allocation0 + $0x181] ss:$8 sm:$0xf] %vm258_vm0, %v1890_v43   ;;  %427 = vst.msk [vmem:[#allocation0 + $0x181] ss:$8 sm:$0xf0] %vm258_vm0, %v1890_v43  }
  0x83   :  { %452 = vst.msk [vmem:[#allocation0 + $0x241] ss:$8 sm:$0xf] %vm258_vm0, %v1896_v46   ;;  %454 = vst.msk [vmem:[#allocation0 + $0x241] ss:$8 sm:$0xf0] %vm258_vm0, %v1896_v46  }
  0x84   :  { %443 = vst.msk [vmem:[#allocation0 + $0x201] ss:$8 sm:$0xf] %vm258_vm0, %v1895_v47   ;;  %445 = vst.msk [vmem:[#allocation0 + $0x201] ss:$8 sm:$0xf0] %vm258_vm0, %v1895_v47   ;;  %v1904_v50 = vpop.permute.xlu0 %1903  ;;  %v1909_v51 = vpop.permute.xlu1 %1908 }
  0x85   :  { %470 = vst.msk [vmem:[#allocation0 + $0x2c1] ss:$8 sm:$0xf] %vm258_vm0, %v1901_v48   ;;  %472 = vst.msk [vmem:[#allocation0 + $0x2c1] ss:$8 sm:$0xf0] %vm258_vm0, %v1901_v48   ;;  %v1906_v52 = vunpack.i.h.bf16 %v1904_v50  ;;  %v1905_v53 = vunpack.i.l.bf16 %v1904_v50  ;;  %v1911_v54 = vunpack.i.h.bf16 %v1909_v51  ;;  %v1910_v55 = vunpack.i.l.bf16 %v1909_v51 }
  0x86   :  { %461 = vst.msk [vmem:[#allocation0 + $0x281] ss:$8 sm:$0xf] %vm258_vm0, %v1900_v49   ;;  %463 = vst.msk [vmem:[#allocation0 + $0x281] ss:$8 sm:$0xf0] %vm258_vm0, %v1900_v49  }
  0x87   :  { %488 = vst.msk [vmem:[#allocation0 + $0x341] ss:$8 sm:$0xf] %vm258_vm0, %v1906_v52   ;;  %490 = vst.msk [vmem:[#allocation0 + $0x341] ss:$8 sm:$0xf0] %vm258_vm0, %v1906_v52  }
  0x88   :  { %479 = vst.msk [vmem:[#allocation0 + $0x301] ss:$8 sm:$0xf] %vm258_vm0, %v1905_v53   ;;  %481 = vst.msk [vmem:[#allocation0 + $0x301] ss:$8 sm:$0xf0] %vm258_vm0, %v1905_v53   ;;  %v1914_v56 = vpop.permute.xlu0 %1913  ;;  %v1919_v57 = vpop.permute.xlu1 %1918 }
  0x89   :  { %506 = vst.msk [vmem:[#allocation0 + $0x3c1] ss:$8 sm:$0xf] %vm258_vm0, %v1911_v54   ;;  %508 = vst.msk [vmem:[#allocation0 + $0x3c1] ss:$8 sm:$0xf0] %vm258_vm0, %v1911_v54   ;;  %v1916_v58 = vunpack.i.h.bf16 %v1914_v56  ;;  %v1915_v59 = vunpack.i.l.bf16 %v1914_v56  ;;  %v1921_v60 = vunpack.i.h.bf16 %v1919_v57  ;;  %v1920_v61 = vunpack.i.l.bf16 %v1919_v57 }
  0x8a   :  { %497 = vst.msk [vmem:[#allocation0 + $0x381] ss:$8 sm:$0xf] %vm258_vm0, %v1910_v55   ;;  %499 = vst.msk [vmem:[#allocation0 + $0x381] ss:$8 sm:$0xf0] %vm258_vm0, %v1910_v55  }
  0x8b   :  { %523 = vst.msk [vmem:[#allocation0 + $0x42] ss:$8 sm:$0xf] %vm258_vm0, %v1916_v58   ;;  %525 = vst.msk [vmem:[#allocation0 + $0x42] ss:$8 sm:$0xf0] %vm258_vm0, %v1916_v58  }
  0x8c   :  { %514 = vst.msk [vmem:[#allocation0 + $0x2] ss:$8 sm:$0xf] %vm258_vm0, %v1915_v59   ;;  %516 = vst.msk [vmem:[#allocation0 + $0x2] ss:$8 sm:$0xf0] %vm258_vm0, %v1915_v59   ;;  %v1924_v62 = vpop.permute.xlu0 %1923  ;;  %v1929_v63 = vpop.permute.xlu1 %1928 }
  0x8d   :  { %541 = vst.msk [vmem:[#allocation0 + $0xc2] ss:$8 sm:$0xf] %vm258_vm0, %v1921_v60   ;;  %543 = vst.msk [vmem:[#allocation0 + $0xc2] ss:$8 sm:$0xf0] %vm258_vm0, %v1921_v60   ;;  %v1926_v0 = vunpack.i.h.bf16 %v1924_v62  ;;  %v1925_v1 = vunpack.i.l.bf16 %v1924_v62  ;;  %v1931_v2 = vunpack.i.h.bf16 %v1929_v63  ;;  %v1930_v3 = vunpack.i.l.bf16 %v1929_v63 }
  0x8e   :  { %532 = vst.msk [vmem:[#allocation0 + $0x82] ss:$8 sm:$0xf] %vm258_vm0, %v1920_v61   ;;  %534 = vst.msk [vmem:[#allocation0 + $0x82] ss:$8 sm:$0xf0] %vm258_vm0, %v1920_v61  }
  0x8f   :  { %559 = vst.msk [vmem:[#allocation0 + $0x142] ss:$8 sm:$0xf] %vm258_vm0, %v1926_v0   ;;  %561 = vst.msk [vmem:[#allocation0 + $0x142] ss:$8 sm:$0xf0] %vm258_vm0, %v1926_v0  }
  0x90   :  { %550 = vst.msk [vmem:[#allocation0 + $0x102] ss:$8 sm:$0xf] %vm258_vm0, %v1925_v1   ;;  %552 = vst.msk [vmem:[#allocation0 + $0x102] ss:$8 sm:$0xf0] %vm258_vm0, %v1925_v1   ;;  %v1934_v4 = vpop.permute.xlu0 %1933  ;;  %v1939_v5 = vpop.permute.xlu1 %1938 }
  0x91   :  { %577 = vst.msk [vmem:[#allocation0 + $0x1c2] ss:$8 sm:$0xf] %vm258_vm0, %v1931_v2   ;;  %579 = vst.msk [vmem:[#allocation0 + $0x1c2] ss:$8 sm:$0xf0] %vm258_vm0, %v1931_v2   ;;  %v1936_v6 = vunpack.i.h.bf16 %v1934_v4  ;;  %v1935_v7 = vunpack.i.l.bf16 %v1934_v4  ;;  %v1941_v8 = vunpack.i.h.bf16 %v1939_v5  ;;  %v1940_v9 = vunpack.i.l.bf16 %v1939_v5 }
  0x92   :  { %568 = vst.msk [vmem:[#allocation0 + $0x182] ss:$8 sm:$0xf] %vm258_vm0, %v1930_v3   ;;  %570 = vst.msk [vmem:[#allocation0 + $0x182] ss:$8 sm:$0xf0] %vm258_vm0, %v1930_v3  }
  0x93   :  { %v709_v10 = vld [vmem:[#allocation0 + $0x40] sm:$0xf]  ;;  %v716_v11 = vld [vmem:[#allocation0 + $0x48] sm:$0xf]  ;;  %v723_v12 = vld [vmem:[#allocation0 + $0x50] sm:$0xf] }
  0x94   :  { %v710_v14 = vpack.c.bf16 %v1954_v13, %v709_v10  ;;  %v717_v15 = vpack.c.bf16 %v1954_v13, %v716_v11  ;;  %v724_v16 = vpack.c.bf16 %v1954_v13, %v723_v12  ;;  %v730_v17 = vld [vmem:[#allocation0 + $0x58] sm:$0xf]  ;;  %v656_v18 = vld [vmem:[#allocation0] sm:$0xf]  ;;  %v661_v19 = vld [vmem:[#allocation0 + $0x8] sm:$0xf]  ;;  %v1944_v26 = vpop.permute.xlu0 %1943  ;;  %v2091_v27 = vpop.permute.xlu1 %1948 }
  0x95   :  { %595 = vst.msk [vmem:[#allocation0 + $0x242] ss:$8 sm:$0xf] %vm258_vm0, %v1936_v6   ;;  %597 = vst.msk [vmem:[#allocation0 + $0x242] ss:$8 sm:$0xf0] %vm258_vm0, %v1936_v6   ;;  %v731_v20 = vpack.c.bf16 %v1954_v13, %v730_v17  ;;  %v657_v21 = vpack.c.bf16 %v1954_v13, %v656_v18  ;;  %v662_v22 = vpack.c.bf16 %v1954_v13, %v661_v19  ;;  %v1946_v34 = vunpack.i.h.bf16 %v1944_v26 }
  0x96   :  { %586 = vst.msk [vmem:[#allocation0 + $0x202] ss:$8 sm:$0xf] %vm258_vm0, %v1935_v7   ;;  %588 = vst.msk [vmem:[#allocation0 + $0x202] ss:$8 sm:$0xf0] %vm258_vm0, %v1935_v7   ;;  %v1945_v41 = vunpack.i.l.bf16 %v1944_v26  ;;  %v1951_v48 = vunpack.i.h.bf16 %v2091_v27  ;;  %v1950_v55 = vunpack.i.l.bf16 %v2091_v27 }
  0x97   :  { %613 = vst.msk [vmem:[#allocation0 + $0x2c2] ss:$8 sm:$0xf] %vm258_vm0, %v1941_v8   ;;  %615 = vst.msk [vmem:[#allocation0 + $0x2c2] ss:$8 sm:$0xf0] %vm258_vm0, %v1941_v8  }
  0x98   :  { %604 = vst.msk [vmem:[#allocation0 + $0x282] ss:$8 sm:$0xf] %vm258_vm0, %v1940_v9   ;;  %606 = vst.msk [vmem:[#allocation0 + $0x282] ss:$8 sm:$0xf0] %vm258_vm0, %v1940_v9  }
  0x99   :  { %v667_v23 = vld [vmem:[#allocation0 + $0x10] sm:$0xf]  ;;  %v674_v24 = vld [vmem:[#allocation0 + $0x18] sm:$0xf]  ;;  %v681_v25 = vld [vmem:[#allocation0 + $0x20] sm:$0xf] }
  0x9a   :  { %1710 = vst [vmem:[%s2610_s1 + $0x10] sm:$0x3] %v710_v14  ;;  %1711 = vst [vmem:[%s2610_s1 + $0x12] sm:$0x3] %v717_v15  ;;  %v668_v28 = vpack.c.bf16 %v1954_v13, %v667_v23  ;;  %v675_v29 = vpack.c.bf16 %v1954_v13, %v674_v24  ;;  %v682_v30 = vpack.c.bf16 %v1954_v13, %v681_v25  ;;  %v688_v31 = vld [vmem:[#allocation0 + $0x28] sm:$0xf] }
  0x9b   :  { %1712 = vst [vmem:[%s2610_s1 + $0x14] sm:$0x3] %v724_v16  ;;  %v695_v32 = vld [vmem:[#allocation0 + $0x30] sm:$0xf]  ;;  %v702_v33 = vld [vmem:[#allocation0 + $0x38] sm:$0xf]  ;;  %v689_v35 = vpack.c.bf16 %v1954_v13, %v688_v31 }
  0x9c   :  { %1713 = vst [vmem:[%s2610_s1 + $0x16] sm:$0x3] %v731_v20  ;;  %659 = vst [vmem:[%s2610_s1] sm:$0x3] %v657_v21  ;;  %v696_v36 = vpack.c.bf16 %v1954_v13, %v695_v32  ;;  %v703_v37 = vpack.c.bf16 %v1954_v13, %v702_v33  ;;  %v737_v38 = vld [vmem:[#allocation0 + $0x60] sm:$0xf] }
  0x9d   :  { %1703 = vst [vmem:[%s2610_s1 + $0x2] sm:$0x3] %v662_v22  ;;  %v744_v39 = vld [vmem:[#allocation0 + $0x68] sm:$0xf]  ;;  %v751_v40 = vld [vmem:[#allocation0 + $0x70] sm:$0xf]  ;;  %v738_v45 = vpack.c.bf16 %v1954_v13, %v737_v38 }
  0x9e   :  { %1704 = vst [vmem:[%s2610_s1 + $0x4] sm:$0x3] %v668_v28  ;;  %1705 = vst [vmem:[%s2610_s1 + $0x6] sm:$0x3] %v675_v29  ;;  %v758_v42 = vld [vmem:[#allocation0 + $0x78] sm:$0xf]  ;;  %v745_v46 = vpack.c.bf16 %v1954_v13, %v744_v39  ;;  %v752_v47 = vpack.c.bf16 %v1954_v13, %v751_v40 }
  0x9f   :  { %1706 = vst [vmem:[%s2610_s1 + $0x8] sm:$0x3] %v682_v30  ;;  %v821_v43 = vld [vmem:[#allocation0 + $0xc0] sm:$0xf]  ;;  %v828_v44 = vld [vmem:[#allocation0 + $0xc8] sm:$0xf]  ;;  %v759_v54 = vpack.c.bf16 %v1954_v13, %v758_v42 }
  0xa0   :  { %631 = vst.msk [vmem:[#allocation0 + $0x342] ss:$8 sm:$0xf] %vm258_vm0, %v1946_v34   ;;  %633 = vst.msk [vmem:[#allocation0 + $0x342] ss:$8 sm:$0xf0] %vm258_vm0, %v1946_v34   ;;  %v822_v49 = vpack.c.bf16 %v1954_v13, %v821_v43  ;;  %v829_v50 = vpack.c.bf16 %v1954_v13, %v828_v44 }
  0xa1   :  { %1707 = vst [vmem:[%s2610_s1 + $0xa] sm:$0x3] %v689_v35  ;;  %1708 = vst [vmem:[%s2610_s1 + $0xc] sm:$0x3] %v696_v36  ;;  %v835_v51 = vld [vmem:[#allocation0 + $0xd0] sm:$0xf] }
  0xa2   :  { %1709 = vst [vmem:[%s2610_s1 + $0xe] sm:$0x3] %v703_v37  ;;  %v842_v52 = vld [vmem:[#allocation0 + $0xd8] sm:$0xf]  ;;  %v849_v53 = vld [vmem:[#allocation0 + $0xe0] sm:$0xf]  ;;  %v836_v56 = vpack.c.bf16 %v1954_v13, %v835_v51 }
  0xa3   :  { %622 = vst.msk [vmem:[#allocation0 + $0x302] ss:$8 sm:$0xf] %vm258_vm0, %v1945_v41   ;;  %624 = vst.msk [vmem:[#allocation0 + $0x302] ss:$8 sm:$0xf0] %vm258_vm0, %v1945_v41   ;;  %v843_v57 = vpack.c.bf16 %v1954_v13, %v842_v52  ;;  %v850_v58 = vpack.c.bf16 %v1954_v13, %v849_v53 }
  0xa4   :  { %v856_v59 = vld [vmem:[#allocation0 + $0xe8] sm:$0xf]  ;;  %v863_v60 = vld [vmem:[#allocation0 + $0xf0] sm:$0xf]  ;;  %v870_v61 = vld [vmem:[#allocation0 + $0xf8] sm:$0xf] }
  0xa5   :  { %1714 = vst [vmem:[%s2610_s1 + $0x18] sm:$0x3] %v738_v45  ;;  %1715 = vst [vmem:[%s2610_s1 + $0x1a] sm:$0x3] %v745_v46  ;;  %v857_v62 = vpack.c.bf16 %v1954_v13, %v856_v59  ;;  %v864_v63 = vpack.c.bf16 %v1954_v13, %v863_v60  ;;  %v871_v0 = vpack.c.bf16 %v1954_v13, %v870_v61  ;;  %v765_v1 = vld [vmem:[#allocation0 + $0x80] sm:$0xf] }
  0xa6   :  { %1716 = vst [vmem:[%s2610_s1 + $0x1c] sm:$0x3] %v752_v47  ;;  %649 = vst.msk [vmem:[#allocation0 + $0x3c2] ss:$8 sm:$0xf] %vm258_vm0, %v1951_v48   ;;  %v766_v4 = vpack.c.bf16 %v1954_v13, %v765_v1 }
  0xa7   :  { %651 = vst.msk [vmem:[#allocation0 + $0x3c2] ss:$8 sm:$0xf0] %vm258_vm0, %v1951_v48   ;;  %1726 = vst [vmem:[%s2610_s1 + $0x30] sm:$0x3] %v822_v49 }
  0xa8   :  { %1727 = vst [vmem:[%s2610_s1 + $0x32] sm:$0x3] %v829_v50  ;;  %v772_v2 = vld [vmem:[#allocation0 + $0x88] sm:$0xf]  ;;  %v779_v3 = vld [vmem:[#allocation0 + $0x90] sm:$0xf] }
  0xa9   :  { %1717 = vst [vmem:[%s2610_s1 + $0x1e] sm:$0x3] %v759_v54  ;;  %640 = vst.msk [vmem:[#allocation0 + $0x382] ss:$8 sm:$0xf] %vm258_vm0, %v1950_v55   ;;  %v773_v5 = vpack.c.bf16 %v1954_v13, %v772_v2  ;;  %v780_v6 = vpack.c.bf16 %v1954_v13, %v779_v3 }
  0xaa   :  { %642 = vst.msk [vmem:[#allocation0 + $0x382] ss:$8 sm:$0xf0] %vm258_vm0, %v1950_v55   ;;  %1728 = vst [vmem:[%s2610_s1 + $0x34] sm:$0x3] %v836_v56 }
  0xab   :  { %1729 = vst [vmem:[%s2610_s1 + $0x36] sm:$0x3] %v843_v57  ;;  %1730 = vst [vmem:[%s2610_s1 + $0x38] sm:$0x3] %v850_v58  ;;  %v786_v7 = vld [vmem:[#allocation0 + $0x98] sm:$0xf] }
  0xac   :  { %v793_v8 = vld [vmem:[#allocation0 + $0xa0] sm:$0xf]  ;;  %v800_v9 = vld [vmem:[#allocation0 + $0xa8] sm:$0xf]  ;;  %1731 = vst [vmem:[%s2610_s1 + $0x3a] sm:$0x3] %v857_v62  ;;  %v787_v10 = vpack.c.bf16 %v1954_v13, %v786_v7 }
  0xad   :  { %1732 = vst [vmem:[%s2610_s1 + $0x3c] sm:$0x3] %v864_v63  ;;  %1733 = vst [vmem:[%s2610_s1 + $0x3e] sm:$0x3] %v871_v0  ;;  %v807_v11 = vld [vmem:[#allocation0 + $0xb0] sm:$0xf]  ;;  %v794_v15 = vpack.c.bf16 %v1954_v13, %v793_v8  ;;  %v801_v16 = vpack.c.bf16 %v1954_v13, %v800_v9 }
  0xae   :  { %v814_v12 = vld [vmem:[#allocation0 + $0xb8] sm:$0xf]  ;;  %v961_v14 = vld [vmem:[#allocation0 + $0x160] sm:$0xf]  ;;  %1718 = vst [vmem:[%s2610_s1 + $0x20] sm:$0x3] %v766_v4  ;;  %v808_v21 = vpack.c.bf16 %v1954_v13, %v807_v11 }
  0xaf   :  { %1719 = vst [vmem:[%s2610_s1 + $0x22] sm:$0x3] %v773_v5  ;;  %1720 = vst [vmem:[%s2610_s1 + $0x24] sm:$0x3] %v780_v6  ;;  %v962_v17 = vpack.c.bf16 %v1954_v13, %v961_v14  ;;  %v968_v18 = vld [vmem:[#allocation0 + $0x168] sm:$0xf]  ;;  %v815_v22 = vpack.c.bf16 %v1954_v13, %v814_v12 }
  0xb0   :  { %v975_v19 = vld [vmem:[#allocation0 + $0x170] sm:$0xf]  ;;  %v982_v20 = vld [vmem:[#allocation0 + $0x178] sm:$0xf]  ;;  %1721 = vst [vmem:[%s2610_s1 + $0x26] sm:$0x3] %v787_v10  ;;  %v969_v23 = vpack.c.bf16 %v1954_v13, %v968_v18 }
  0xb1   :  { %v976_v24 = vpack.c.bf16 %v1954_v13, %v975_v19  ;;  %v983_v25 = vpack.c.bf16 %v1954_v13, %v982_v20  ;;  %v877_v26 = vld [vmem:[#allocation0 + $0x100] sm:$0xf]  ;;  %v884_v27 = vld [vmem:[#allocation0 + $0x108] sm:$0xf]  ;;  %v891_v28 = vld [vmem:[#allocation0 + $0x110] sm:$0xf] }
  0xb2   :  { %1722 = vst [vmem:[%s2610_s1 + $0x28] sm:$0x3] %v794_v15  ;;  %1723 = vst [vmem:[%s2610_s1 + $0x2a] sm:$0x3] %v801_v16  ;;  %v878_v29 = vpack.c.bf16 %v1954_v13, %v877_v26  ;;  %v885_v30 = vpack.c.bf16 %v1954_v13, %v884_v27  ;;  %v892_v31 = vpack.c.bf16 %v1954_v13, %v891_v28  ;;  %v898_v32 = vld [vmem:[#allocation0 + $0x118] sm:$0xf] }
  0xb3   :  { %1746 = vst [vmem:[%s2610_s1 + $0x58] sm:$0x3] %v962_v17  ;;  %v905_v33 = vld [vmem:[#allocation0 + $0x120] sm:$0xf]  ;;  %v912_v34 = vld [vmem:[#allocation0 + $0x128] sm:$0xf]  ;;  %v899_v35 = vpack.c.bf16 %v1954_v13, %v898_v32 }
  0xb4   :  { %1724 = vst [vmem:[%s2610_s1 + $0x2c] sm:$0x3] %v808_v21  ;;  %1725 = vst [vmem:[%s2610_s1 + $0x2e] sm:$0x3] %v815_v22  ;;  %v906_v36 = vpack.c.bf16 %v1954_v13, %v905_v33  ;;  %v913_v37 = vpack.c.bf16 %v1954_v13, %v912_v34  ;;  %v919_v38 = vld [vmem:[#allocation0 + $0x130] sm:$0xf] }
  0xb5   :  { %1747 = vst [vmem:[%s2610_s1 + $0x5a] sm:$0x3] %v969_v23  ;;  %1748 = vst [vmem:[%s2610_s1 + $0x5c] sm:$0x3] %v976_v24  ;;  %v926_v39 = vld [vmem:[#allocation0 + $0x138] sm:$0xf]  ;;  %v920_v41 = vpack.c.bf16 %v1954_v13, %v919_v38 }
  0xb6   :  { %1749 = vst [vmem:[%s2610_s1 + $0x5e] sm:$0x3] %v983_v25  ;;  %v933_v40 = vld [vmem:[#allocation0 + $0x140] sm:$0xf]  ;;  %1734 = vst [vmem:[%s2610_s1 + $0x40] sm:$0x3] %v878_v29  ;;  %v927_v42 = vpack.c.bf16 %v1954_v13, %v926_v39 }
  0xb7   :  { %1735 = vst [vmem:[%s2610_s1 + $0x42] sm:$0x3] %v885_v30  ;;  %1736 = vst [vmem:[%s2610_s1 + $0x44] sm:$0x3] %v892_v31  ;;  %v940_v43 = vld [vmem:[#allocation0 + $0x148] sm:$0xf]  ;;  %v934_v46 = vpack.c.bf16 %v1954_v13, %v933_v40 }
  0xb8   :  { %v947_v44 = vld [vmem:[#allocation0 + $0x150] sm:$0xf]  ;;  %v954_v45 = vld [vmem:[#allocation0 + $0x158] sm:$0xf]  ;;  %1737 = vst [vmem:[%s2610_s1 + $0x46] sm:$0x3] %v899_v35  ;;  %v941_v50 = vpack.c.bf16 %v1954_v13, %v940_v43 }
  0xb9   :  { %1738 = vst [vmem:[%s2610_s1 + $0x48] sm:$0x3] %v906_v36  ;;  %1739 = vst [vmem:[%s2610_s1 + $0x4a] sm:$0x3] %v913_v37  ;;  %v989_v47 = vld [vmem:[#allocation0 + $0x180] sm:$0xf]  ;;  %v948_v51 = vpack.c.bf16 %v1954_v13, %v947_v44  ;;  %v955_v52 = vpack.c.bf16 %v1954_v13, %v954_v45 }
  0xba   :  { %v996_v48 = vld [vmem:[#allocation0 + $0x188] sm:$0xf]  ;;  %v1003_v49 = vld [vmem:[#allocation0 + $0x190] sm:$0xf]  ;;  %1740 = vst [vmem:[%s2610_s1 + $0x4c] sm:$0x3] %v920_v41  ;;  %v990_v53 = vpack.c.bf16 %v1954_v13, %v989_v47 }
  0xbb   :  { %1741 = vst [vmem:[%s2610_s1 + $0x4e] sm:$0x3] %v927_v42  ;;  %v997_v54 = vpack.c.bf16 %v1954_v13, %v996_v48  ;;  %v1004_v55 = vpack.c.bf16 %v1954_v13, %v1003_v49  ;;  %v1010_v56 = vld [vmem:[#allocation0 + $0x198] sm:$0xf]  ;;  %v1017_v57 = vld [vmem:[#allocation0 + $0x1a0] sm:$0xf] }
  0xbc   :  { %v1024_v58 = vld [vmem:[#allocation0 + $0x1a8] sm:$0xf]  ;;  %1742 = vst [vmem:[%s2610_s1 + $0x50] sm:$0x3] %v934_v46  ;;  %v1011_v59 = vpack.c.bf16 %v1954_v13, %v1010_v56  ;;  %v1031_v60 = vld [vmem:[#allocation0 + $0x1b0] sm:$0xf]  ;;  %v1018_v63 = vpack.c.bf16 %v1954_v13, %v1017_v57 }
  0xbd   :  { %v1038_v61 = vld [vmem:[#allocation0 + $0x1b8] sm:$0xf]  ;;  %v1045_v62 = vld [vmem:[#allocation0 + $0x1c0] sm:$0xf]  ;;  %1743 = vst [vmem:[%s2610_s1 + $0x52] sm:$0x3] %v941_v50  ;;  %v1025_v0 = vpack.c.bf16 %v1954_v13, %v1024_v58  ;;  %v1032_v4 = vpack.c.bf16 %v1954_v13, %v1031_v60 }
  0xbe   :  { %1744 = vst [vmem:[%s2610_s1 + $0x54] sm:$0x3] %v948_v51  ;;  %1745 = vst [vmem:[%s2610_s1 + $0x56] sm:$0x3] %v955_v52  ;;  %v1052_v1 = vld [vmem:[#allocation0 + $0x1c8] sm:$0xf]  ;;  %v1039_v5 = vpack.c.bf16 %v1954_v13, %v1038_v61  ;;  %v1046_v6 = vpack.c.bf16 %v1954_v13, %v1045_v62 }
  0xbf   :  { %1750 = vst [vmem:[%s2610_s1 + $0x60] sm:$0x3] %v990_v53  ;;  %1751 = vst [vmem:[%s2610_s1 + $0x62] sm:$0x3] %v997_v54  ;;  %v1059_v2 = vld [vmem:[#allocation0 + $0x1d0] sm:$0xf]  ;;  %v1053_v10 = vpack.c.bf16 %v1954_v13, %v1052_v1 }
  0xc0   :  { %1752 = vst [vmem:[%s2610_s1 + $0x64] sm:$0x3] %v1004_v55  ;;  %v1066_v3 = vld [vmem:[#allocation0 + $0x1d8] sm:$0xf]  ;;  %1753 = vst [vmem:[%s2610_s1 + $0x66] sm:$0x3] %v1011_v59  ;;  %v1060_v11 = vpack.c.bf16 %v1954_v13, %v1059_v2 }
  0xc1   :  { %v1073_v7 = vld [vmem:[#allocation0 + $0x1e0] sm:$0xf]  ;;  %v1080_v8 = vld [vmem:[#allocation0 + $0x1e8] sm:$0xf]  ;;  %v1087_v9 = vld [vmem:[#allocation0 + $0x1f0] sm:$0xf]  ;;  %v1067_v12 = vpack.c.bf16 %v1954_v13, %v1066_v3 }
  0xc2   :  { %1754 = vst [vmem:[%s2610_s1 + $0x68] sm:$0x3] %v1018_v63  ;;  %1755 = vst [vmem:[%s2610_s1 + $0x6a] sm:$0x3] %v1025_v0  ;;  %v1094_v14 = vld [vmem:[#allocation0 + $0x1f8] sm:$0xf]  ;;  %v1074_v17 = vpack.c.bf16 %v1954_v13, %v1073_v7  ;;  %v1081_v18 = vpack.c.bf16 %v1954_v13, %v1080_v8  ;;  %v1088_v19 = vpack.c.bf16 %v1954_v13, %v1087_v9 }
  0xc3   :  { %v1101_v15 = vld [vmem:[#allocation0 + $0x200] sm:$0xf]  ;;  %v1108_v16 = vld [vmem:[#allocation0 + $0x208] sm:$0xf]  ;;  %1756 = vst [vmem:[%s2610_s1 + $0x6c] sm:$0x3] %v1032_v4  ;;  %v1095_v24 = vpack.c.bf16 %v1954_v13, %v1094_v14 }
  0xc4   :  { %1757 = vst [vmem:[%s2610_s1 + $0x6e] sm:$0x3] %v1039_v5  ;;  %1758 = vst [vmem:[%s2610_s1 + $0x70] sm:$0x3] %v1046_v6  ;;  %v1102_v20 = vpack.c.bf16 %v1954_v13, %v1101_v15  ;;  %v1109_v21 = vpack.c.bf16 %v1954_v13, %v1108_v16  ;;  %v1115_v22 = vld [vmem:[#allocation0 + $0x210] sm:$0xf] }
  0xc5   :  { %v1122_v23 = vld [vmem:[#allocation0 + $0x218] sm:$0xf]  ;;  %v1129_v25 = vld [vmem:[#allocation0 + $0x220] sm:$0xf]  ;;  %1759 = vst [vmem:[%s2610_s1 + $0x72] sm:$0x3] %v1053_v10  ;;  %v1116_v26 = vpack.c.bf16 %v1954_v13, %v1115_v22 }
  0xc6   :  { %1760 = vst [vmem:[%s2610_s1 + $0x74] sm:$0x3] %v1060_v11  ;;  %1761 = vst [vmem:[%s2610_s1 + $0x76] sm:$0x3] %v1067_v12  ;;  %v1123_v27 = vpack.c.bf16 %v1954_v13, %v1122_v23  ;;  %v1136_v28 = vld [vmem:[#allocation0 + $0x228] sm:$0xf]  ;;  %v1130_v31 = vpack.c.bf16 %v1954_v13, %v1129_v25 }
  0xc7   :  { %v1143_v29 = vld [vmem:[#allocation0 + $0x230] sm:$0xf]  ;;  %v1150_v30 = vld [vmem:[#allocation0 + $0x238] sm:$0xf]  ;;  %1762 = vst [vmem:[%s2610_s1 + $0x78] sm:$0x3] %v1074_v17  ;;  %v1137_v35 = vpack.c.bf16 %v1954_v13, %v1136_v28 }
  0xc8   :  { %1763 = vst [vmem:[%s2610_s1 + $0x7a] sm:$0x3] %v1081_v18  ;;  %1764 = vst [vmem:[%s2610_s1 + $0x7c] sm:$0x3] %v1088_v19  ;;  %v1157_v32 = vld [vmem:[#allocation0 + $0x240] sm:$0xf]  ;;  %v1144_v36 = vpack.c.bf16 %v1954_v13, %v1143_v29  ;;  %v1151_v37 = vpack.c.bf16 %v1954_v13, %v1150_v30 }
  0xc9   :  { %1766 = vst [vmem:[%s2610_s1 + $0x80] sm:$0x3] %v1102_v20  ;;  %1767 = vst [vmem:[%s2610_s1 + $0x82] sm:$0x3] %v1109_v21  ;;  %v1164_v33 = vld [vmem:[#allocation0 + $0x248] sm:$0xf]  ;;  %v1158_v41 = vpack.c.bf16 %v1954_v13, %v1157_v32 }
  0xca   :  { %v1171_v34 = vld [vmem:[#allocation0 + $0x250] sm:$0xf]  ;;  %1765 = vst [vmem:[%s2610_s1 + $0x7e] sm:$0x3] %v1095_v24  ;;  %1768 = vst [vmem:[%s2610_s1 + $0x84] sm:$0x3] %v1116_v26  ;;  %v1165_v42 = vpack.c.bf16 %v1954_v13, %v1164_v33 }
  0xcb   :  { %1769 = vst [vmem:[%s2610_s1 + $0x86] sm:$0x3] %v1123_v27  ;;  %v1178_v38 = vld [vmem:[#allocation0 + $0x258] sm:$0xf]  ;;  %v1185_v39 = vld [vmem:[#allocation0 + $0x260] sm:$0xf]  ;;  %v1172_v43 = vpack.c.bf16 %v1954_v13, %v1171_v34 }
  0xcc   :  { %v1192_v40 = vld [vmem:[#allocation0 + $0x268] sm:$0xf]  ;;  %1770 = vst [vmem:[%s2610_s1 + $0x88] sm:$0x3] %v1130_v31  ;;  %v1199_v44 = vld [vmem:[#allocation0 + $0x270] sm:$0xf]  ;;  %v1179_v47 = vpack.c.bf16 %v1954_v13, %v1178_v38  ;;  %v1186_v48 = vpack.c.bf16 %v1954_v13, %v1185_v39 }
  0xcd   :  { %v1206_v45 = vld [vmem:[#allocation0 + $0x278] sm:$0xf]  ;;  %v1269_v46 = vld [vmem:[#allocation0 + $0x2c0] sm:$0xf]  ;;  %v1193_v49 = vpack.c.bf16 %v1954_v13, %v1192_v40  ;;  %1771 = vst [vmem:[%s2610_s1 + $0x8a] sm:$0x3] %v1137_v35  ;;  %v1200_v54 = vpack.c.bf16 %v1954_v13, %v1199_v44 }
  0xce   :  { %1772 = vst [vmem:[%s2610_s1 + $0x8c] sm:$0x3] %v1144_v36  ;;  %1773 = vst [vmem:[%s2610_s1 + $0x8e] sm:$0x3] %v1151_v37  ;;  %v1270_v50 = vpack.c.bf16 %v1954_v13, %v1269_v46  ;;  %v1276_v51 = vld [vmem:[#allocation0 + $0x2c8] sm:$0xf]  ;;  %v1207_v55 = vpack.c.bf16 %v1954_v13, %v1206_v45 }
  0xcf   :  { %v1283_v52 = vld [vmem:[#allocation0 + $0x2d0] sm:$0xf]  ;;  %v1290_v53 = vld [vmem:[#allocation0 + $0x2d8] sm:$0xf]  ;;  %1774 = vst [vmem:[%s2610_s1 + $0x90] sm:$0x3] %v1158_v41  ;;  %v1277_v56 = vpack.c.bf16 %v1954_v13, %v1276_v51 }
  0xd0   :  { %1775 = vst [vmem:[%s2610_s1 + $0x92] sm:$0x3] %v1165_v42  ;;  %1776 = vst [vmem:[%s2610_s1 + $0x94] sm:$0x3] %v1172_v43  ;;  %v1284_v57 = vpack.c.bf16 %v1954_v13, %v1283_v52  ;;  %v1291_v58 = vpack.c.bf16 %v1954_v13, %v1290_v53  ;;  %v1297_v59 = vld [vmem:[#allocation0 + $0x2e0] sm:$0xf] }
  0xd1   :  { %v1304_v60 = vld [vmem:[#allocation0 + $0x2e8] sm:$0xf]  ;;  %v1311_v61 = vld [vmem:[#allocation0 + $0x2f0] sm:$0xf]  ;;  %1777 = vst [vmem:[%s2610_s1 + $0x96] sm:$0x3] %v1179_v47  ;;  %v1298_v62 = vpack.c.bf16 %v1954_v13, %v1297_v59 }
  0xd2   :  { %1778 = vst [vmem:[%s2610_s1 + $0x98] sm:$0x3] %v1186_v48  ;;  %1779 = vst [vmem:[%s2610_s1 + $0x9a] sm:$0x3] %v1193_v49  ;;  %v1305_v63 = vpack.c.bf16 %v1954_v13, %v1304_v60  ;;  %v1312_v0 = vpack.c.bf16 %v1954_v13, %v1311_v61  ;;  %v1318_v1 = vld [vmem:[#allocation0 + $0x2f8] sm:$0xf] }
  0xd3   :  { %1790 = vst [vmem:[%s2610_s1 + $0xb0] sm:$0x3] %v1270_v50  ;;  %v1213_v2 = vld [vmem:[#allocation0 + $0x280] sm:$0xf]  ;;  %v1220_v3 = vld [vmem:[#allocation0 + $0x288] sm:$0xf]  ;;  %v1319_v4 = vpack.c.bf16 %v1954_v13, %v1318_v1 }
  0xd4   :  { %1780 = vst [vmem:[%s2610_s1 + $0x9c] sm:$0x3] %v1200_v54  ;;  %1781 = vst [vmem:[%s2610_s1 + $0x9e] sm:$0x3] %v1207_v55  ;;  %v1227_v5 = vld [vmem:[#allocation0 + $0x290] sm:$0xf]  ;;  %v1214_v8 = vpack.c.bf16 %v1954_v13, %v1213_v2  ;;  %v1221_v9 = vpack.c.bf16 %v1954_v13, %v1220_v3 }
  0xd5   :  { %1791 = vst [vmem:[%s2610_s1 + $0xb2] sm:$0x3] %v1277_v56  ;;  %1792 = vst [vmem:[%s2610_s1 + $0xb4] sm:$0x3] %v1284_v57  ;;  %v1234_v6 = vld [vmem:[#allocation0 + $0x298] sm:$0xf]  ;;  %v1228_v14 = vpack.c.bf16 %v1954_v13, %v1227_v5 }
  0xd6   :  { %1793 = vst [vmem:[%s2610_s1 + $0xb6] sm:$0x3] %v1291_v58  ;;  %v1241_v7 = vld [vmem:[#allocation0 + $0x2a0] sm:$0xf]  ;;  %1794 = vst [vmem:[%s2610_s1 + $0xb8] sm:$0x3] %v1298_v62  ;;  %v1235_v15 = vpack.c.bf16 %v1954_v13, %v1234_v6 }
  0xd7   :  { %1795 = vst [vmem:[%s2610_s1 + $0xba] sm:$0x3] %v1305_v63  ;;  %1796 = vst [vmem:[%s2610_s1 + $0xbc] sm:$0x3] %v1312_v0  ;;  %v1248_v10 = vld [vmem:[#allocation0 + $0x2a8] sm:$0xf]  ;;  %v1242_v16 = vpack.c.bf16 %v1954_v13, %v1241_v7 }
  0xd8   :  { %v1255_v11 = vld [vmem:[#allocation0 + $0x2b0] sm:$0xf]  ;;  %v1262_v12 = vld [vmem:[#allocation0 + $0x2b8] sm:$0xf]  ;;  %1797 = vst [vmem:[%s2610_s1 + $0xbe] sm:$0x3] %v1319_v4  ;;  %v1249_v20 = vpack.c.bf16 %v1954_v13, %v1248_v10 }
  0xd9   :  { %v1325_v17 = vld [vmem:[#allocation0 + $0x300] sm:$0xf]  ;;  %v1332_v18 = vld [vmem:[#allocation0 + $0x308] sm:$0xf]  ;;  %v1339_v19 = vld [vmem:[#allocation0 + $0x310] sm:$0xf]  ;;  %v1256_v21 = vpack.c.bf16 %v1954_v13, %v1255_v11  ;;  %v1263_v22 = vpack.c.bf16 %v1954_v13, %v1262_v12 }
  0xda   :  { %1782 = vst [vmem:[%s2610_s1 + $0xa0] sm:$0x3] %v1214_v8  ;;  %1783 = vst [vmem:[%s2610_s1 + $0xa2] sm:$0x3] %v1221_v9  ;;  %v1326_v23 = vpack.c.bf16 %v1954_v13, %v1325_v17  ;;  %v1333_v24 = vpack.c.bf16 %v1954_v13, %v1332_v18  ;;  %v1340_v25 = vpack.c.bf16 %v1954_v13, %v1339_v19  ;;  %v1346_v26 = vld [vmem:[#allocation0 + $0x318] sm:$0xf] }
  0xdb   :  { %v1353_v27 = vld [vmem:[#allocation0 + $0x320] sm:$0xf]  ;;  %v1360_v28 = vld [vmem:[#allocation0 + $0x328] sm:$0xf]  ;;  %1784 = vst [vmem:[%s2610_s1 + $0xa4] sm:$0x3] %v1228_v14  ;;  %v1347_v29 = vpack.c.bf16 %v1954_v13, %v1346_v26 }
  0xdc   :  { %1785 = vst [vmem:[%s2610_s1 + $0xa6] sm:$0x3] %v1235_v15  ;;  %1786 = vst [vmem:[%s2610_s1 + $0xa8] sm:$0x3] %v1242_v16  ;;  %v1354_v30 = vpack.c.bf16 %v1954_v13, %v1353_v27  ;;  %v1361_v31 = vpack.c.bf16 %v1954_v13, %v1360_v28  ;;  %v1367_v32 = vld [vmem:[#allocation0 + $0x330] sm:$0xf] }
  0xdd   :  { %v1374_v33 = vld [vmem:[#allocation0 + $0x338] sm:$0xf]  ;;  %v1381_v34 = vld [vmem:[#allocation0 + $0x340] sm:$0xf]  ;;  %1787 = vst [vmem:[%s2610_s1 + $0xaa] sm:$0x3] %v1249_v20  ;;  %v1368_v35 = vpack.c.bf16 %v1954_v13, %v1367_v32 }
  0xde   :  { %1788 = vst [vmem:[%s2610_s1 + $0xac] sm:$0x3] %v1256_v21  ;;  %1789 = vst [vmem:[%s2610_s1 + $0xae] sm:$0x3] %v1263_v22  ;;  %v1375_v36 = vpack.c.bf16 %v1954_v13, %v1374_v33  ;;  %v1382_v37 = vpack.c.bf16 %v1954_v13, %v1381_v34  ;;  %v1388_v38 = vld [vmem:[#allocation0 + $0x348] sm:$0xf] }
  0xdf   :  { %1798 = vst [vmem:[%s2610_s1 + $0xc0] sm:$0x3] %v1326_v23  ;;  %1799 = vst [vmem:[%s2610_s1 + $0xc2] sm:$0x3] %v1333_v24  ;;  %v1395_v39 = vld [vmem:[#allocation0 + $0x350] sm:$0xf]  ;;  %v1389_v41 = vpack.c.bf16 %v1954_v13, %v1388_v38 }
  0xe0   :  { %1800 = vst [vmem:[%s2610_s1 + $0xc4] sm:$0x3] %v1340_v25  ;;  %v1402_v40 = vld [vmem:[#allocation0 + $0x358] sm:$0xf]  ;;  %1801 = vst [vmem:[%s2610_s1 + $0xc6] sm:$0x3] %v1347_v29  ;;  %v1396_v42 = vpack.c.bf16 %v1954_v13, %v1395_v39 }
  0xe1   :  { %1802 = vst [vmem:[%s2610_s1 + $0xc8] sm:$0x3] %v1354_v30  ;;  %1803 = vst [vmem:[%s2610_s1 + $0xca] sm:$0x3] %v1361_v31  ;;  %v1403_v43 = vpack.c.bf16 %v1954_v13, %v1402_v40  ;;  %v1409_v44 = vld [vmem:[#allocation0 + $0x360] sm:$0xf] }
  0xe2   :  { %v1416_v45 = vld [vmem:[#allocation0 + $0x368] sm:$0xf]  ;;  %v1423_v46 = vld [vmem:[#allocation0 + $0x370] sm:$0xf]  ;;  %1804 = vst [vmem:[%s2610_s1 + $0xcc] sm:$0x3] %v1368_v35  ;;  %v1410_v47 = vpack.c.bf16 %v1954_v13, %v1409_v44 }
  0xe3   :  { %1805 = vst [vmem:[%s2610_s1 + $0xce] sm:$0x3] %v1375_v36  ;;  %1806 = vst [vmem:[%s2610_s1 + $0xd0] sm:$0x3] %v1382_v37  ;;  %v1417_v48 = vpack.c.bf16 %v1954_v13, %v1416_v45  ;;  %v1424_v49 = vpack.c.bf16 %v1954_v13, %v1423_v46  ;;  %v1430_v50 = vld [vmem:[#allocation0 + $0x378] sm:$0xf] }
  0xe4   :  { %v1437_v51 = vld [vmem:[#allocation0 + $0x380] sm:$0xf]  ;;  %v1444_v52 = vld [vmem:[#allocation0 + $0x388] sm:$0xf]  ;;  %1807 = vst [vmem:[%s2610_s1 + $0xd2] sm:$0x3] %v1389_v41  ;;  %v1431_v53 = vpack.c.bf16 %v1954_v13, %v1430_v50 }
  0xe5   :  { %1808 = vst [vmem:[%s2610_s1 + $0xd4] sm:$0x3] %v1396_v42  ;;  %1809 = vst [vmem:[%s2610_s1 + $0xd6] sm:$0x3] %v1403_v43  ;;  %v1438_v54 = vpack.c.bf16 %v1954_v13, %v1437_v51  ;;  %v1445_v55 = vpack.c.bf16 %v1954_v13, %v1444_v52  ;;  %v1451_v56 = vld [vmem:[#allocation0 + $0x390] sm:$0xf] }
  0xe6   :  { %v1458_v57 = vld [vmem:[#allocation0 + $0x398] sm:$0xf]  ;;  %v1465_v58 = vld [vmem:[#allocation0 + $0x3a0] sm:$0xf]  ;;  %1810 = vst [vmem:[%s2610_s1 + $0xd8] sm:$0x3] %v1410_v47  ;;  %v1452_v59 = vpack.c.bf16 %v1954_v13, %v1451_v56 }
  0xe7   :  { %1811 = vst [vmem:[%s2610_s1 + $0xda] sm:$0x3] %v1417_v48  ;;  %1812 = vst [vmem:[%s2610_s1 + $0xdc] sm:$0x3] %v1424_v49  ;;  %v1459_v60 = vpack.c.bf16 %v1954_v13, %v1458_v57  ;;  %v1466_v61 = vpack.c.bf16 %v1954_v13, %v1465_v58  ;;  %v1472_v62 = vld [vmem:[#allocation0 + $0x3a8] sm:$0xf] }
  0xe8   :  { %v1479_v63 = vld [vmem:[#allocation0 + $0x3b0] sm:$0xf]  ;;  %v1486_v0 = vld [vmem:[#allocation0 + $0x3b8] sm:$0xf]  ;;  %1813 = vst [vmem:[%s2610_s1 + $0xde] sm:$0x3] %v1431_v53  ;;  %v1473_v1 = vpack.c.bf16 %v1954_v13, %v1472_v62 }
  0xe9   :  { %1814 = vst [vmem:[%s2610_s1 + $0xe0] sm:$0x3] %v1438_v54  ;;  %1815 = vst [vmem:[%s2610_s1 + $0xe2] sm:$0x3] %v1445_v55  ;;  %v1480_v2 = vpack.c.bf16 %v1954_v13, %v1479_v63  ;;  %v1487_v3 = vpack.c.bf16 %v1954_v13, %v1486_v0  ;;  %v1493_v4 = vld [vmem:[#allocation0 + $0x3c0] sm:$0xf] }
  0xea   :  { %v1500_v5 = vld [vmem:[#allocation0 + $0x3c8] sm:$0xf]  ;;  %v1507_v6 = vld [vmem:[#allocation0 + $0x3d0] sm:$0xf]  ;;  %1816 = vst [vmem:[%s2610_s1 + $0xe4] sm:$0x3] %v1452_v59  ;;  %v1494_v7 = vpack.c.bf16 %v1954_v13, %v1493_v4 }
  0xeb   :  { %1817 = vst [vmem:[%s2610_s1 + $0xe6] sm:$0x3] %v1459_v60  ;;  %1818 = vst [vmem:[%s2610_s1 + $0xe8] sm:$0x3] %v1466_v61  ;;  %v1501_v8 = vpack.c.bf16 %v1954_v13, %v1500_v5  ;;  %v1508_v9 = vpack.c.bf16 %v1954_v13, %v1507_v6  ;;  %v1514_v10 = vld [vmem:[#allocation0 + $0x3d8] sm:$0xf] }
  0xec   :  { %v1521_v11 = vld [vmem:[#allocation0 + $0x3e0] sm:$0xf]  ;;  %v1528_v12 = vld [vmem:[#allocation0 + $0x3e8] sm:$0xf]  ;;  %1819 = vst [vmem:[%s2610_s1 + $0xea] sm:$0x3] %v1473_v1  ;;  %v1515_v14 = vpack.c.bf16 %v1954_v13, %v1514_v10 }
  0xed   :  { %1820 = vst [vmem:[%s2610_s1 + $0xec] sm:$0x3] %v1480_v2  ;;  %1821 = vst [vmem:[%s2610_s1 + $0xee] sm:$0x3] %v1487_v3  ;;  %v1522_v15 = vpack.c.bf16 %v1954_v13, %v1521_v11  ;;  %v1529_v16 = vpack.c.bf16 %v1954_v13, %v1528_v12  ;;  %v1535_v17 = vld [vmem:[#allocation0 + $0x3f0] sm:$0xf] }
  0xee   :  { %v1542_v18 = vld [vmem:[#allocation0 + $0x3f8] sm:$0xf]  ;;  %1822 = vst [vmem:[%s2610_s1 + $0xf0] sm:$0x3] %v1494_v7  ;;  %1823 = vst [vmem:[%s2610_s1 + $0xf2] sm:$0x3] %v1501_v8  ;;  %v1536_v19 = vpack.c.bf16 %v1954_v13, %v1535_v17 }
  0xef   :  { %1824 = vst [vmem:[%s2610_s1 + $0xf4] sm:$0x3] %v1508_v9  ;;  %v1543_v13 = vpack.c.bf16 %v1954_v13, %v1542_v18  ;;  %1825 = vst [vmem:[%s2610_s1 + $0xf6] sm:$0x3] %v1515_v14 }
  0xf0   :  { %1826 = vst [vmem:[%s2610_s1 + $0xf8] sm:$0x3] %v1522_v15  ;;  %1827 = vst [vmem:[%s2610_s1 + $0xfa] sm:$0x3] %v1529_v16 }
  0xf1   :  { %1828 = vst [vmem:[%s2610_s1 + $0xfc] sm:$0x3] %v1536_v19  ;;  %1829 = vst [vmem:[%s2610_s1 + $0xfe] sm:$0x3] %v1543_v13 }

// kernel: forecast_ct_gcn_forward.1
= control target key start
LH: loop header
LB: loop body
LE: loop exit
PB: predicated region body
PF: predicated region fallthrough
CT: control target
= control target key end

     0   :  { %s16717_s0 = inlined_call_operand.vmem [shape: f32[256,48], index: 0, kind: input, shape index: {}]   ;;  %s16718_s1 = inlined_call_operand.vmem [shape: f32[2,256,256], index: 1, kind: input, shape index: {}]   ;;  %s16719_s2 = inlined_call_operand.vmem [shape: f32[2,256,512], index: 2, kind: input, shape index: {}]   ;;  %s16720_s3 = inlined_call_operand.vmem [shape: f32[128,128], index: 3, kind: input, shape index: {}]   ;;  %s16721_s4 = inlined_call_operand.vmem [shape: f32[48,256], index: 4, kind: input, shape index: {}]   ;;  %s16722_s5 = inlined_call_operand.vmem [shape: f32[1,256], index: 5, kind: input, shape index: {}]   ;;  %s16723_s6 = inlined_call_operand.vmem [shape: f32[2,256,256], index: 6, kind: input, shape index: {}]   ;;  %s16724_s7 = inlined_call_operand.vmem [shape: f32[2,256,256], index: 7, kind: input, shape index: {}]   ;;  %s16725_s8 = inlined_call_operand.vmem [shape: f32[2,1,256], index: 8, kind: input, shape index: {}]   ;;  %s16726_s9 = inlined_call_operand.vmem [shape: f32[2,256,256], index: 9, kind: input, shape index: {}]   ;;  %s16727_s10 = inlined_call_operand.vmem [shape: f32[2,256,256], index: 10, kind: input, shape index: {}]   ;;  %s16728_s11 = inlined_call_operand.vmem [shape: f32[2,1,256], index: 11, kind: input, shape index: {}]   ;;  %s16729_s12 = inlined_call_operand.vmem [shape: f32[2,256,512], index: 12, kind: input, shape index: {}]   ;;  %s16730_s13 = inlined_call_operand.vmem [shape: f32[2,1,512], index: 13, kind: input, shape index: {}]   ;;  %s16731_s14 = inlined_call_operand.vmem [shape: f32[2,256,512], index: 14, kind: input, shape index: {}]   ;;  %s16732_s15 = inlined_call_operand.vmem [shape: f32[2,1,512], index: 15, kind: input, shape index: {}]   ;;  %s16733_s16 = inlined_call_operand.vmem [shape: f32[256,256], index: 16, kind: input, shape index: {}]   ;;  %s16734_s17 = inlined_call_operand.vmem [shape: f32[1,256], index: 17, kind: input, shape index: {}]   ;;  %s16735_s18 = inlined_call_operand.vmem [shape: f32[256,128], index: 18, kind: input, shape index: {}]   ;;  %s16736_s19 = inlined_call_operand.vmem [shape: f32[1,128], index: 19, kind: input, shape index: {}]   ;;  %s16737_s20 = inlined_call_operand.vmem [shape: f32[256,128], index: 20, kind: output, shape index: {}]  }
   0x1   :  { %16918 = sst [smem:[#allocation43_spill]] %s16717_s0 }
   0x2   :  { %16919 = sst [smem:[#allocation44_spill]] %s16718_s1 }
   0x3   :  { %16920 = sst [smem:[#allocation45_spill]] %s16719_s2 }
   0x4   :  { %16921 = sst [smem:[#allocation46_spill]] %s16720_s3 }
   0x5   :  { %16922 = sst [smem:[#allocation47_spill]] %s16721_s4 }
   0x6   :  { %16923 = sst [smem:[#allocation48_spill]] %s16722_s5 }
   0x7   :  { %s10172_s1 = smov 0   ;;  %s10174_s22 = smov 0  }
   0x8   :  { %s10176_s23 = smov 0  }
   0x9 LB: > { %16924 = sst [smem:[#allocation4_spill]] %s10060_s22  ;;  %s10189_s2 = sadd.s32 1, %s10064_s23   ;;  %s10064_s23 = sphi %s10176_s23, %s17171_s23   ;;  %s10060_s22 = sphi %s10174_s22, %s17173_s22   ;;  %s10056_s1 = sphi %s10172_s1, %s17172_s1  }
   0xa   : > { %16925 = sst [smem:[#allocation5_spill]] %s10189_s2  ;;  %s60_s25 = ssub.s32 %s10064_s23, %s10189_s2 }
   0xb   : > { %s63_s3 = sadd.s32 1, %s10060_s22  ;;  %p61_p0 = scmp.eq.s32.totalorder %s60_s25, 0 }
   0xc   : > { %p70_p1 = scmp.ne.s32.totalorder %s10060_s22, %s10056_s1  ;;  %p71_p2 = scmp.eq.s32.totalorder %s10064_s23, 0 }
   0xd   : > { %s10198_s26 = scalar_select %p61_p0, %s10060_s22, %s63_s3  }
   0xe   : > { %p10200_p3 = por %p71_p2, %p70_p1  ;;  %p7428_p4 = scmp.ge.s32.totalorder %s10064_s23, 2 }
   0xf   : > { %16926 = sst [smem:[#allocation6_spill]] %s10198_s26 }
  0x10   : > { %556 = sbr.rel (%p7428_p4) target bundleno = 139 (0x8b), region = 84 }
  0x17   : > { %568 = sbr.rel (!%p10200_p3) target bundleno = 65 (0x41), region = 92  ;;  %s570_s28 = sand.u32 (%p10200_p3), 1, %s10060_s22  }
  0x18   : > { %s8076_s4 = sshll.u32 (%p10200_p3), %s10064_s23, 8  ;;  %s7429_s29 = sshll.u32 (%p10200_p3), %s570_s28, 9 }
  0x19   : > { %s16928_s21 = sld [smem:[#allocation44_spill]] (%p10200_p3)  ;;  %s10217_s3 = scalar_lea.vmem (%p10200_p3), [#allocation2], %s7429_s29 }
  0x1f   : > { %s10212_s25 = scalar_lea.vmem %s16928_s21, %s8076_s4 }
  0x20   : > { %v589_v0 = vld [vmem:[%s10212_s25] sm:$0xff]  ;;  %v591_v1 = vld [vmem:[%s10212_s25 + $0x8] sm:$0xff]  ;;  %v593_v2 = vld [vmem:[%s10212_s25 + $0x10] sm:$0xff] }
  0x21   : > { %590 = vst [vmem:[%s10217_s3] sm:$0xff] %v589_v0  ;;  %592 = vst [vmem:[%s10217_s3 + $0x8] sm:$0xff] %v591_v1  ;;  %v595_v3 = vld [vmem:[%s10212_s25 + $0x18] sm:$0xff]  ;;  %v597_v4 = vld [vmem:[%s10212_s25 + $0x20] sm:$0xff] }
  0x22   : > { %594 = vst [vmem:[%s10217_s3 + $0x10] sm:$0xff] %v593_v2  ;;  %v599_v5 = vld [vmem:[%s10212_s25 + $0x28] sm:$0xff]  ;;  %596 = vst [vmem:[%s10217_s3 + $0x18] sm:$0xff] %v595_v3  ;;  %v601_v6 = vld [vmem:[%s10212_s25 + $0x30] sm:$0xff] }
  0x23   : > { %598 = vst [vmem:[%s10217_s3 + $0x20] sm:$0xff] %v597_v4  ;;  %600 = vst [vmem:[%s10217_s3 + $0x28] sm:$0xff] %v599_v5  ;;  %v603_v7 = vld [vmem:[%s10212_s25 + $0x38] sm:$0xff]  ;;  %v605_v8 = vld [vmem:[%s10212_s25 + $0x40] sm:$0xff] }
  0x24   : > { %602 = vst [vmem:[%s10217_s3 + $0x30] sm:$0xff] %v601_v6  ;;  %604 = vst [vmem:[%s10217_s3 + $0x38] sm:$0xff] %v603_v7  ;;  %v607_v9 = vld [vmem:[%s10212_s25 + $0x48] sm:$0xff]  ;;  %v609_v10 = vld [vmem:[%s10212_s25 + $0x50] sm:$0xff] }
  0x25   : > { %606 = vst [vmem:[%s10217_s3 + $0x40] sm:$0xff] %v605_v8  ;;  %v611_v11 = vld [vmem:[%s10212_s25 + $0x58] sm:$0xff]  ;;  %608 = vst [vmem:[%s10217_s3 + $0x48] sm:$0xff] %v607_v9  ;;  %v613_v12 = vld [vmem:[%s10212_s25 + $0x60] sm:$0xff] }
  0x26   : > { %610 = vst [vmem:[%s10217_s3 + $0x50] sm:$0xff] %v609_v10  ;;  %612 = vst [vmem:[%s10217_s3 + $0x58] sm:$0xff] %v611_v11  ;;  %v615_v13 = vld [vmem:[%s10212_s25 + $0x68] sm:$0xff]  ;;  %v617_v14 = vld [vmem:[%s10212_s25 + $0x70] sm:$0xff] }
  0x27   : > { %614 = vst [vmem:[%s10217_s3 + $0x60] sm:$0xff] %v613_v12  ;;  %616 = vst [vmem:[%s10217_s3 + $0x68] sm:$0xff] %v615_v13  ;;  %v619_v15 = vld [vmem:[%s10212_s25 + $0x78] sm:$0xff]  ;;  %v621_v16 = vld [vmem:[%s10212_s25 + $0x80] sm:$0xff] }
  0x28   : > { %618 = vst [vmem:[%s10217_s3 + $0x70] sm:$0xff] %v617_v14  ;;  %v623_v17 = vld [vmem:[%s10212_s25 + $0x88] sm:$0xff]  ;;  %620 = vst [vmem:[%s10217_s3 + $0x78] sm:$0xff] %v619_v15  ;;  %v625_v18 = vld [vmem:[%s10212_s25 + $0x90] sm:$0xff] }
  0x29   : > { %622 = vst [vmem:[%s10217_s3 + $0x80] sm:$0xff] %v621_v16  ;;  %624 = vst [vmem:[%s10217_s3 + $0x88] sm:$0xff] %v623_v17  ;;  %v627_v19 = vld [vmem:[%s10212_s25 + $0x98] sm:$0xff]  ;;  %v629_v20 = vld [vmem:[%s10212_s25 + $0xa0] sm:$0xff] }
  0x2a   : > { %626 = vst [vmem:[%s10217_s3 + $0x90] sm:$0xff] %v625_v18  ;;  %628 = vst [vmem:[%s10217_s3 + $0x98] sm:$0xff] %v627_v19  ;;  %v631_v21 = vld [vmem:[%s10212_s25 + $0xa8] sm:$0xff]  ;;  %v633_v22 = vld [vmem:[%s10212_s25 + $0xb0] sm:$0xff] }
  0x2b   : > { %630 = vst [vmem:[%s10217_s3 + $0xa0] sm:$0xff] %v629_v20  ;;  %v635_v23 = vld [vmem:[%s10212_s25 + $0xb8] sm:$0xff]  ;;  %632 = vst [vmem:[%s10217_s3 + $0xa8] sm:$0xff] %v631_v21  ;;  %v637_v24 = vld [vmem:[%s10212_s25 + $0xc0] sm:$0xff] }
  0x2c   : > { %634 = vst [vmem:[%s10217_s3 + $0xb0] sm:$0xff] %v633_v22  ;;  %636 = vst [vmem:[%s10217_s3 + $0xb8] sm:$0xff] %v635_v23  ;;  %v639_v25 = vld [vmem:[%s10212_s25 + $0xc8] sm:$0xff]  ;;  %v641_v26 = vld [vmem:[%s10212_s25 + $0xd0] sm:$0xff] }
  0x2d   : > { %638 = vst [vmem:[%s10217_s3 + $0xc0] sm:$0xff] %v637_v24  ;;  %640 = vst [vmem:[%s10217_s3 + $0xc8] sm:$0xff] %v639_v25  ;;  %v643_v27 = vld [vmem:[%s10212_s25 + $0xd8] sm:$0xff]  ;;  %v645_v28 = vld [vmem:[%s10212_s25 + $0xe0] sm:$0xff] }
  0x2e   : > { %642 = vst [vmem:[%s10217_s3 + $0xd0] sm:$0xff] %v641_v26  ;;  %v647_v29 = vld [vmem:[%s10212_s25 + $0xe8] sm:$0xff]  ;;  %644 = vst [vmem:[%s10217_s3 + $0xd8] sm:$0xff] %v643_v27  ;;  %v649_v30 = vld [vmem:[%s10212_s25 + $0xf0] sm:$0xff] }
  0x2f   : > { %646 = vst [vmem:[%s10217_s3 + $0xe0] sm:$0xff] %v645_v28  ;;  %648 = vst [vmem:[%s10217_s3 + $0xe8] sm:$0xff] %v647_v29  ;;  %v651_v31 = vld [vmem:[%s10212_s25 + $0xf8] sm:$0xff]  ;;  %v653_v32 = vld [vmem:[%s10212_s25 + $0x200] sm:$0xff] }
  0x30   : > { %650 = vst [vmem:[%s10217_s3 + $0xf0] sm:$0xff] %v649_v30  ;;  %652 = vst [vmem:[%s10217_s3 + $0xf8] sm:$0xff] %v651_v31  ;;  %v655_v33 = vld [vmem:[%s10212_s25 + $0x208] sm:$0xff]  ;;  %v657_v34 = vld [vmem:[%s10212_s25 + $0x210] sm:$0xff] }
  0x31   : > { %654 = vst [vmem:[%s10217_s3 + $0x100] sm:$0xff] %v653_v32  ;;  %v659_v35 = vld [vmem:[%s10212_s25 + $0x218] sm:$0xff]  ;;  %656 = vst [vmem:[%s10217_s3 + $0x108] sm:$0xff] %v655_v33  ;;  %v661_v36 = vld [vmem:[%s10212_s25 + $0x220] sm:$0xff] }
  0x32   : > { %658 = vst [vmem:[%s10217_s3 + $0x110] sm:$0xff] %v657_v34  ;;  %660 = vst [vmem:[%s10217_s3 + $0x118] sm:$0xff] %v659_v35  ;;  %v663_v37 = vld [vmem:[%s10212_s25 + $0x228] sm:$0xff]  ;;  %v665_v38 = vld [vmem:[%s10212_s25 + $0x230] sm:$0xff] }
  0x33   : > { %662 = vst [vmem:[%s10217_s3 + $0x120] sm:$0xff] %v661_v36  ;;  %664 = vst [vmem:[%s10217_s3 + $0x128] sm:$0xff] %v663_v37  ;;  %v667_v39 = vld [vmem:[%s10212_s25 + $0x238] sm:$0xff]  ;;  %v669_v40 = vld [vmem:[%s10212_s25 + $0x240] sm:$0xff] }
  0x34   : > { %666 = vst [vmem:[%s10217_s3 + $0x130] sm:$0xff] %v665_v38  ;;  %v671_v41 = vld [vmem:[%s10212_s25 + $0x248] sm:$0xff]  ;;  %668 = vst [vmem:[%s10217_s3 + $0x138] sm:$0xff] %v667_v39  ;;  %v673_v42 = vld [vmem:[%s10212_s25 + $0x250] sm:$0xff] }
  0x35   : > { %670 = vst [vmem:[%s10217_s3 + $0x140] sm:$0xff] %v669_v40  ;;  %672 = vst [vmem:[%s10217_s3 + $0x148] sm:$0xff] %v671_v41  ;;  %v675_v43 = vld [vmem:[%s10212_s25 + $0x258] sm:$0xff]  ;;  %v677_v44 = vld [vmem:[%s10212_s25 + $0x260] sm:$0xff] }
  0x36   : > { %674 = vst [vmem:[%s10217_s3 + $0x150] sm:$0xff] %v673_v42  ;;  %676 = vst [vmem:[%s10217_s3 + $0x158] sm:$0xff] %v675_v43  ;;  %v679_v45 = vld [vmem:[%s10212_s25 + $0x268] sm:$0xff]  ;;  %v681_v46 = vld [vmem:[%s10212_s25 + $0x270] sm:$0xff] }
  0x37   : > { %678 = vst [vmem:[%s10217_s3 + $0x160] sm:$0xff] %v677_v44  ;;  %v683_v47 = vld [vmem:[%s10212_s25 + $0x278] sm:$0xff]  ;;  %680 = vst [vmem:[%s10217_s3 + $0x168] sm:$0xff] %v679_v45  ;;  %v685_v48 = vld [vmem:[%s10212_s25 + $0x280] sm:$0xff] }
  0x38   : > { %682 = vst [vmem:[%s10217_s3 + $0x170] sm:$0xff] %v681_v46  ;;  %684 = vst [vmem:[%s10217_s3 + $0x178] sm:$0xff] %v683_v47  ;;  %v687_v49 = vld [vmem:[%s10212_s25 + $0x288] sm:$0xff]  ;;  %v689_v50 = vld [vmem:[%s10212_s25 + $0x290] sm:$0xff] }
  0x39   : > { %686 = vst [vmem:[%s10217_s3 + $0x180] sm:$0xff] %v685_v48  ;;  %688 = vst [vmem:[%s10217_s3 + $0x188] sm:$0xff] %v687_v49  ;;  %v691_v51 = vld [vmem:[%s10212_s25 + $0x298] sm:$0xff]  ;;  %v693_v52 = vld [vmem:[%s10212_s25 + $0x2a0] sm:$0xff] }
  0x3a   : > { %690 = vst [vmem:[%s10217_s3 + $0x190] sm:$0xff] %v689_v50  ;;  %v695_v53 = vld [vmem:[%s10212_s25 + $0x2a8] sm:$0xff]  ;;  %692 = vst [vmem:[%s10217_s3 + $0x198] sm:$0xff] %v691_v51  ;;  %v697_v54 = vld [vmem:[%s10212_s25 + $0x2b0] sm:$0xff] }
  0x3b   : > { %694 = vst [vmem:[%s10217_s3 + $0x1a0] sm:$0xff] %v693_v52  ;;  %696 = vst [vmem:[%s10217_s3 + $0x1a8] sm:$0xff] %v695_v53  ;;  %v699_v55 = vld [vmem:[%s10212_s25 + $0x2b8] sm:$0xff]  ;;  %v701_v56 = vld [vmem:[%s10212_s25 + $0x2c0] sm:$0xff] }
  0x3c   : > { %698 = vst [vmem:[%s10217_s3 + $0x1b0] sm:$0xff] %v697_v54  ;;  %700 = vst [vmem:[%s10217_s3 + $0x1b8] sm:$0xff] %v699_v55  ;;  %v703_v57 = vld [vmem:[%s10212_s25 + $0x2c8] sm:$0xff]  ;;  %v705_v58 = vld [vmem:[%s10212_s25 + $0x2d0] sm:$0xff] }
  0x3d   : > { %702 = vst [vmem:[%s10217_s3 + $0x1c0] sm:$0xff] %v701_v56  ;;  %v707_v59 = vld [vmem:[%s10212_s25 + $0x2d8] sm:$0xff]  ;;  %704 = vst [vmem:[%s10217_s3 + $0x1c8] sm:$0xff] %v703_v57  ;;  %v709_v60 = vld [vmem:[%s10212_s25 + $0x2e0] sm:$0xff] }
  0x3e   : > { %706 = vst [vmem:[%s10217_s3 + $0x1d0] sm:$0xff] %v705_v58  ;;  %708 = vst [vmem:[%s10217_s3 + $0x1d8] sm:$0xff] %v707_v59  ;;  %v711_v61 = vld [vmem:[%s10212_s25 + $0x2e8] sm:$0xff]  ;;  %v713_v62 = vld [vmem:[%s10212_s25 + $0x2f0] sm:$0xff] }
  0x3f   : > { %710 = vst [vmem:[%s10217_s3 + $0x1e0] sm:$0xff] %v709_v60  ;;  %712 = vst [vmem:[%s10217_s3 + $0x1e8] sm:$0xff] %v711_v61  ;;  %v715_v63 = vld [vmem:[%s10212_s25 + $0x2f8] sm:$0xff] }
  0x40   : > { %714 = vst [vmem:[%s10217_s3 + $0x1f0] sm:$0xff] %v713_v62  ;;  %716 = vst [vmem:[%s10217_s3 + $0x1f8] sm:$0xff] %v715_v63 }
  0x41 PF: > { %722 = sbr.rel (!%p10200_p3) target bundleno = 139 (0x8b), region = 115  ;;  %s724_s28 = sand.u32 (%p10200_p3), 1, %s10060_s22  }
  0x42   : > { %s8078_s4 = sshll.u32 (%p10200_p3), %s10064_s23, 9  ;;  %s7433_s29 = sshll.u32 (%p10200_p3), %s724_s28, 10 }
  0x43   : > { %s16929_s21 = sld [smem:[#allocation45_spill]] (%p10200_p3)  ;;  %s10356_s27 = scalar_lea.vmem (%p10200_p3), [#allocation3], %s7433_s29 }
  0x49   : > { %s10351_s24 = scalar_lea.vmem %s16929_s21, %s8078_s4 }
  0x4a   : > { %v743_v0 = vld [vmem:[%s10351_s24] sm:$0xff]  ;;  %v745_v1 = vld [vmem:[%s10351_s24 + $0x8] sm:$0xff]  ;;  %v747_v2 = vld [vmem:[%s10351_s24 + $0x10] sm:$0xff] }
  0x4b   : > { %744 = vst [vmem:[%s10356_s27] sm:$0xff] %v743_v0  ;;  %746 = vst [vmem:[%s10356_s27 + $0x8] sm:$0xff] %v745_v1  ;;  %v749_v3 = vld [vmem:[%s10351_s24 + $0x18] sm:$0xff]  ;;  %v751_v4 = vld [vmem:[%s10351_s24 + $0x20] sm:$0xff] }
  0x4c   : > { %748 = vst [vmem:[%s10356_s27 + $0x10] sm:$0xff] %v747_v2  ;;  %v753_v5 = vld [vmem:[%s10351_s24 + $0x28] sm:$0xff]  ;;  %750 = vst [vmem:[%s10356_s27 + $0x18] sm:$0xff] %v749_v3  ;;  %v755_v6 = vld [vmem:[%s10351_s24 + $0x30] sm:$0xff] }
  0x4d   : > { %752 = vst [vmem:[%s10356_s27 + $0x20] sm:$0xff] %v751_v4  ;;  %754 = vst [vmem:[%s10356_s27 + $0x28] sm:$0xff] %v753_v5  ;;  %v757_v7 = vld [vmem:[%s10351_s24 + $0x38] sm:$0xff]  ;;  %v759_v8 = vld [vmem:[%s10351_s24 + $0x40] sm:$0xff] }
  0x4e   : > { %756 = vst [vmem:[%s10356_s27 + $0x30] sm:$0xff] %v755_v6  ;;  %758 = vst [vmem:[%s10356_s27 + $0x38] sm:$0xff] %v757_v7  ;;  %v761_v9 = vld [vmem:[%s10351_s24 + $0x48] sm:$0xff]  ;;  %v763_v10 = vld [vmem:[%s10351_s24 + $0x50] sm:$0xff] }
  0x4f   : > { %760 = vst [vmem:[%s10356_s27 + $0x40] sm:$0xff] %v759_v8  ;;  %v765_v11 = vld [vmem:[%s10351_s24 + $0x58] sm:$0xff]  ;;  %762 = vst [vmem:[%s10356_s27 + $0x48] sm:$0xff] %v761_v9  ;;  %v767_v12 = vld [vmem:[%s10351_s24 + $0x60] sm:$0xff] }
  0x50   : > { %764 = vst [vmem:[%s10356_s27 + $0x50] sm:$0xff] %v763_v10  ;;  %766 = vst [vmem:[%s10356_s27 + $0x58] sm:$0xff] %v765_v11  ;;  %v769_v13 = vld [vmem:[%s10351_s24 + $0x68] sm:$0xff]  ;;  %v771_v14 = vld [vmem:[%s10351_s24 + $0x70] sm:$0xff] }
  0x51   : > { %768 = vst [vmem:[%s10356_s27 + $0x60] sm:$0xff] %v767_v12  ;;  %770 = vst [vmem:[%s10356_s27 + $0x68] sm:$0xff] %v769_v13  ;;  %v773_v15 = vld [vmem:[%s10351_s24 + $0x78] sm:$0xff]  ;;  %v775_v16 = vld [vmem:[%s10351_s24 + $0x80] sm:$0xff] }
  0x52   : > { %772 = vst [vmem:[%s10356_s27 + $0x70] sm:$0xff] %v771_v14  ;;  %v777_v17 = vld [vmem:[%s10351_s24 + $0x88] sm:$0xff]  ;;  %774 = vst [vmem:[%s10356_s27 + $0x78] sm:$0xff] %v773_v15  ;;  %v779_v18 = vld [vmem:[%s10351_s24 + $0x90] sm:$0xff] }
  0x53   : > { %776 = vst [vmem:[%s10356_s27 + $0x80] sm:$0xff] %v775_v16  ;;  %778 = vst [vmem:[%s10356_s27 + $0x88] sm:$0xff] %v777_v17  ;;  %v781_v19 = vld [vmem:[%s10351_s24 + $0x98] sm:$0xff]  ;;  %v783_v20 = vld [vmem:[%s10351_s24 + $0xa0] sm:$0xff] }
  0x54   : > { %780 = vst [vmem:[%s10356_s27 + $0x90] sm:$0xff] %v779_v18  ;;  %782 = vst [vmem:[%s10356_s27 + $0x98] sm:$0xff] %v781_v19  ;;  %v785_v21 = vld [vmem:[%s10351_s24 + $0xa8] sm:$0xff]  ;;  %v787_v22 = vld [vmem:[%s10351_s24 + $0xb0] sm:$0xff] }
  0x55   : > { %784 = vst [vmem:[%s10356_s27 + $0xa0] sm:$0xff] %v783_v20  ;;  %v789_v23 = vld [vmem:[%s10351_s24 + $0xb8] sm:$0xff]  ;;  %786 = vst [vmem:[%s10356_s27 + $0xa8] sm:$0xff] %v785_v21  ;;  %v791_v24 = vld [vmem:[%s10351_s24 + $0xc0] sm:$0xff] }
  0x56   : > { %788 = vst [vmem:[%s10356_s27 + $0xb0] sm:$0xff] %v787_v22  ;;  %790 = vst [vmem:[%s10356_s27 + $0xb8] sm:$0xff] %v789_v23  ;;  %v793_v25 = vld [vmem:[%s10351_s24 + $0xc8] sm:$0xff]  ;;  %v795_v26 = vld [vmem:[%s10351_s24 + $0xd0] sm:$0xff] }
  0x57   : > { %792 = vst [vmem:[%s10356_s27 + $0xc0] sm:$0xff] %v791_v24  ;;  %794 = vst [vmem:[%s10356_s27 + $0xc8] sm:$0xff] %v793_v25  ;;  %v797_v27 = vld [vmem:[%s10351_s24 + $0xd8] sm:$0xff]  ;;  %v799_v28 = vld [vmem:[%s10351_s24 + $0xe0] sm:$0xff] }
  0x58   : > { %796 = vst [vmem:[%s10356_s27 + $0xd0] sm:$0xff] %v795_v26  ;;  %v801_v29 = vld [vmem:[%s10351_s24 + $0xe8] sm:$0xff]  ;;  %798 = vst [vmem:[%s10356_s27 + $0xd8] sm:$0xff] %v797_v27  ;;  %v803_v30 = vld [vmem:[%s10351_s24 + $0xf0] sm:$0xff] }
  0x59   : > { %800 = vst [vmem:[%s10356_s27 + $0xe0] sm:$0xff] %v799_v28  ;;  %802 = vst [vmem:[%s10356_s27 + $0xe8] sm:$0xff] %v801_v29  ;;  %v805_v31 = vld [vmem:[%s10351_s24 + $0xf8] sm:$0xff]  ;;  %v807_v32 = vld [vmem:[%s10351_s24 + $0x100] sm:$0xff] }
  0x5a   : > { %804 = vst [vmem:[%s10356_s27 + $0xf0] sm:$0xff] %v803_v30  ;;  %806 = vst [vmem:[%s10356_s27 + $0xf8] sm:$0xff] %v805_v31  ;;  %v809_v33 = vld [vmem:[%s10351_s24 + $0x108] sm:$0xff]  ;;  %v811_v34 = vld [vmem:[%s10351_s24 + $0x110] sm:$0xff] }
  0x5b   : > { %808 = vst [vmem:[%s10356_s27 + $0x100] sm:$0xff] %v807_v32  ;;  %v813_v35 = vld [vmem:[%s10351_s24 + $0x118] sm:$0xff]  ;;  %810 = vst [vmem:[%s10356_s27 + $0x108] sm:$0xff] %v809_v33  ;;  %v815_v36 = vld [vmem:[%s10351_s24 + $0x120] sm:$0xff] }
  0x5c   : > { %812 = vst [vmem:[%s10356_s27 + $0x110] sm:$0xff] %v811_v34  ;;  %814 = vst [vmem:[%s10356_s27 + $0x118] sm:$0xff] %v813_v35  ;;  %v817_v37 = vld [vmem:[%s10351_s24 + $0x128] sm:$0xff]  ;;  %v819_v38 = vld [vmem:[%s10351_s24 + $0x130] sm:$0xff] }
  0x5d   : > { %816 = vst [vmem:[%s10356_s27 + $0x120] sm:$0xff] %v815_v36  ;;  %818 = vst [vmem:[%s10356_s27 + $0x128] sm:$0xff] %v817_v37  ;;  %v821_v39 = vld [vmem:[%s10351_s24 + $0x138] sm:$0xff]  ;;  %v823_v40 = vld [vmem:[%s10351_s24 + $0x140] sm:$0xff] }
  0x5e   : > { %820 = vst [vmem:[%s10356_s27 + $0x130] sm:$0xff] %v819_v38  ;;  %v825_v41 = vld [vmem:[%s10351_s24 + $0x148] sm:$0xff]  ;;  %822 = vst [vmem:[%s10356_s27 + $0x138] sm:$0xff] %v821_v39  ;;  %v827_v42 = vld [vmem:[%s10351_s24 + $0x150] sm:$0xff] }
  0x5f   : > { %824 = vst [vmem:[%s10356_s27 + $0x140] sm:$0xff] %v823_v40  ;;  %826 = vst [vmem:[%s10356_s27 + $0x148] sm:$0xff] %v825_v41  ;;  %v829_v43 = vld [vmem:[%s10351_s24 + $0x158] sm:$0xff]  ;;  %v831_v44 = vld [vmem:[%s10351_s24 + $0x160] sm:$0xff] }
  0x60   : > { %828 = vst [vmem:[%s10356_s27 + $0x150] sm:$0xff] %v827_v42  ;;  %830 = vst [vmem:[%s10356_s27 + $0x158] sm:$0xff] %v829_v43  ;;  %v833_v45 = vld [vmem:[%s10351_s24 + $0x168] sm:$0xff]  ;;  %v835_v46 = vld [vmem:[%s10351_s24 + $0x170] sm:$0xff] }
  0x61   : > { %832 = vst [vmem:[%s10356_s27 + $0x160] sm:$0xff] %v831_v44  ;;  %v837_v47 = vld [vmem:[%s10351_s24 + $0x178] sm:$0xff]  ;;  %834 = vst [vmem:[%s10356_s27 + $0x168] sm:$0xff] %v833_v45  ;;  %v839_v48 = vld [vmem:[%s10351_s24 + $0x180] sm:$0xff] }
  0x62   : > { %836 = vst [vmem:[%s10356_s27 + $0x170] sm:$0xff] %v835_v46  ;;  %838 = vst [vmem:[%s10356_s27 + $0x178] sm:$0xff] %v837_v47  ;;  %v841_v49 = vld [vmem:[%s10351_s24 + $0x188] sm:$0xff]  ;;  %v843_v50 = vld [vmem:[%s10351_s24 + $0x190] sm:$0xff] }
  0x63   : > { %840 = vst [vmem:[%s10356_s27 + $0x180] sm:$0xff] %v839_v48  ;;  %842 = vst [vmem:[%s10356_s27 + $0x188] sm:$0xff] %v841_v49  ;;  %v845_v51 = vld [vmem:[%s10351_s24 + $0x198] sm:$0xff]  ;;  %v847_v52 = vld [vmem:[%s10351_s24 + $0x1a0] sm:$0xff] }
  0x64   : > { %844 = vst [vmem:[%s10356_s27 + $0x190] sm:$0xff] %v843_v50  ;;  %v849_v53 = vld [vmem:[%s10351_s24 + $0x1a8] sm:$0xff]  ;;  %846 = vst [vmem:[%s10356_s27 + $0x198] sm:$0xff] %v845_v51  ;;  %v851_v54 = vld [vmem:[%s10351_s24 + $0x1b0] sm:$0xff] }
  0x65   : > { %848 = vst [vmem:[%s10356_s27 + $0x1a0] sm:$0xff] %v847_v52  ;;  %850 = vst [vmem:[%s10356_s27 + $0x1a8] sm:$0xff] %v849_v53  ;;  %v853_v55 = vld [vmem:[%s10351_s24 + $0x1b8] sm:$0xff]  ;;  %v855_v56 = vld [vmem:[%s10351_s24 + $0x1c0] sm:$0xff] }
  0x66   : > { %852 = vst [vmem:[%s10356_s27 + $0x1b0] sm:$0xff] %v851_v54  ;;  %854 = vst [vmem:[%s10356_s27 + $0x1b8] sm:$0xff] %v853_v55  ;;  %v857_v57 = vld [vmem:[%s10351_s24 + $0x1c8] sm:$0xff]  ;;  %v859_v58 = vld [vmem:[%s10351_s24 + $0x1d0] sm:$0xff] }
  0x67   : > { %856 = vst [vmem:[%s10356_s27 + $0x1c0] sm:$0xff] %v855_v56  ;;  %v861_v59 = vld [vmem:[%s10351_s24 + $0x1d8] sm:$0xff]  ;;  %858 = vst [vmem:[%s10356_s27 + $0x1c8] sm:$0xff] %v857_v57  ;;  %v863_v60 = vld [vmem:[%s10351_s24 + $0x1e0] sm:$0xff] }
  0x68   : > { %860 = vst [vmem:[%s10356_s27 + $0x1d0] sm:$0xff] %v859_v58  ;;  %862 = vst [vmem:[%s10356_s27 + $0x1d8] sm:$0xff] %v861_v59  ;;  %v865_v61 = vld [vmem:[%s10351_s24 + $0x1e8] sm:$0xff]  ;;  %v867_v62 = vld [vmem:[%s10351_s24 + $0x1f0] sm:$0xff] }
  0x69   : > { %864 = vst [vmem:[%s10356_s27 + $0x1e0] sm:$0xff] %v863_v60  ;;  %866 = vst [vmem:[%s10356_s27 + $0x1e8] sm:$0xff] %v865_v61  ;;  %v869_v63 = vld [vmem:[%s10351_s24 + $0x1f8] sm:$0xff]  ;;  %v871_v0 = vld [vmem:[%s10351_s24 + $0x400] sm:$0xff] }
  0x6a   : > { %868 = vst [vmem:[%s10356_s27 + $0x1f0] sm:$0xff] %v867_v62  ;;  %v873_v1 = vld [vmem:[%s10351_s24 + $0x408] sm:$0xff]  ;;  %870 = vst [vmem:[%s10356_s27 + $0x1f8] sm:$0xff] %v869_v63  ;;  %v875_v2 = vld [vmem:[%s10351_s24 + $0x410] sm:$0xff] }
  0x6b   : > { %872 = vst [vmem:[%s10356_s27 + $0x200] sm:$0xff] %v871_v0  ;;  %874 = vst [vmem:[%s10356_s27 + $0x208] sm:$0xff] %v873_v1  ;;  %v877_v3 = vld [vmem:[%s10351_s24 + $0x418] sm:$0xff]  ;;  %v879_v4 = vld [vmem:[%s10351_s24 + $0x420] sm:$0xff] }
  0x6c   : > { %876 = vst [vmem:[%s10356_s27 + $0x210] sm:$0xff] %v875_v2  ;;  %878 = vst [vmem:[%s10356_s27 + $0x218] sm:$0xff] %v877_v3  ;;  %v881_v5 = vld [vmem:[%s10351_s24 + $0x428] sm:$0xff]  ;;  %v883_v6 = vld [vmem:[%s10351_s24 + $0x430] sm:$0xff] }
  0x6d   : > { %880 = vst [vmem:[%s10356_s27 + $0x220] sm:$0xff] %v879_v4  ;;  %v885_v7 = vld [vmem:[%s10351_s24 + $0x438] sm:$0xff]  ;;  %882 = vst [vmem:[%s10356_s27 + $0x228] sm:$0xff] %v881_v5  ;;  %v887_v8 = vld [vmem:[%s10351_s24 + $0x440] sm:$0xff] }
  0x6e   : > { %884 = vst [vmem:[%s10356_s27 + $0x230] sm:$0xff] %v883_v6  ;;  %886 = vst [vmem:[%s10356_s27 + $0x238] sm:$0xff] %v885_v7  ;;  %v889_v9 = vld [vmem:[%s10351_s24 + $0x448] sm:$0xff]  ;;  %v891_v10 = vld [vmem:[%s10351_s24 + $0x450] sm:$0xff] }
  0x6f   : > { %888 = vst [vmem:[%s10356_s27 + $0x240] sm:$0xff] %v887_v8  ;;  %890 = vst [vmem:[%s10356_s27 + $0x248] sm:$0xff] %v889_v9  ;;  %v893_v11 = vld [vmem:[%s10351_s24 + $0x458] sm:$0xff]  ;;  %v895_v12 = vld [vmem:[%s10351_s24 + $0x460] sm:$0xff] }
  0x70   : > { %892 = vst [vmem:[%s10356_s27 + $0x250] sm:$0xff] %v891_v10  ;;  %v897_v13 = vld [vmem:[%s10351_s24 + $0x468] sm:$0xff]  ;;  %894 = vst [vmem:[%s10356_s27 + $0x258] sm:$0xff] %v893_v11  ;;  %v899_v14 = vld [vmem:[%s10351_s24 + $0x470] sm:$0xff] }
  0x71   : > { %896 = vst [vmem:[%s10356_s27 + $0x260] sm:$0xff] %v895_v12  ;;  %898 = vst [vmem:[%s10356_s27 + $0x268] sm:$0xff] %v897_v13  ;;  %v901_v15 = vld [vmem:[%s10351_s24 + $0x478] sm:$0xff]  ;;  %v903_v16 = vld [vmem:[%s10351_s24 + $0x480] sm:$0xff] }
  0x72   : > { %900 = vst [vmem:[%s10356_s27 + $0x270] sm:$0xff] %v899_v14  ;;  %902 = vst [vmem:[%s10356_s27 + $0x278] sm:$0xff] %v901_v15  ;;  %v905_v17 = vld [vmem:[%s10351_s24 + $0x488] sm:$0xff]  ;;  %v907_v18 = vld [vmem:[%s10351_s24 + $0x490] sm:$0xff] }
  0x73   : > { %904 = vst [vmem:[%s10356_s27 + $0x280] sm:$0xff] %v903_v16  ;;  %v909_v19 = vld [vmem:[%s10351_s24 + $0x498] sm:$0xff]  ;;  %906 = vst [vmem:[%s10356_s27 + $0x288] sm:$0xff] %v905_v17  ;;  %v911_v20 = vld [vmem:[%s10351_s24 + $0x4a0] sm:$0xff] }
  0x74   : > { %908 = vst [vmem:[%s10356_s27 + $0x290] sm:$0xff] %v907_v18  ;;  %910 = vst [vmem:[%s10356_s27 + $0x298] sm:$0xff] %v909_v19  ;;  %v913_v21 = vld [vmem:[%s10351_s24 + $0x4a8] sm:$0xff]  ;;  %v915_v22 = vld [vmem:[%s10351_s24 + $0x4b0] sm:$0xff] }
  0x75   : > { %912 = vst [vmem:[%s10356_s27 + $0x2a0] sm:$0xff] %v911_v20  ;;  %914 = vst [vmem:[%s10356_s27 + $0x2a8] sm:$0xff] %v913_v21  ;;  %v917_v23 = vld [vmem:[%s10351_s24 + $0x4b8] sm:$0xff]  ;;  %v919_v24 = vld [vmem:[%s10351_s24 + $0x4c0] sm:$0xff] }
  0x76   : > { %916 = vst [vmem:[%s10356_s27 + $0x2b0] sm:$0xff] %v915_v22  ;;  %v921_v25 = vld [vmem:[%s10351_s24 + $0x4c8] sm:$0xff]  ;;  %918 = vst [vmem:[%s10356_s27 + $0x2b8] sm:$0xff] %v917_v23  ;;  %v923_v26 = vld [vmem:[%s10351_s24 + $0x4d0] sm:$0xff] }
  0x77   : > { %920 = vst [vmem:[%s10356_s27 + $0x2c0] sm:$0xff] %v919_v24  ;;  %922 = vst [vmem:[%s10356_s27 + $0x2c8] sm:$0xff] %v921_v25  ;;  %v925_v27 = vld [vmem:[%s10351_s24 + $0x4d8] sm:$0xff]  ;;  %v927_v28 = vld [vmem:[%s10351_s24 + $0x4e0] sm:$0xff] }
  0x78   : > { %924 = vst [vmem:[%s10356_s27 + $0x2d0] sm:$0xff] %v923_v26  ;;  %926 = vst [vmem:[%s10356_s27 + $0x2d8] sm:$0xff] %v925_v27  ;;  %v929_v29 = vld [vmem:[%s10351_s24 + $0x4e8] sm:$0xff]  ;;  %v931_v30 = vld [vmem:[%s10351_s24 + $0x4f0] sm:$0xff] }
  0x79   : > { %928 = vst [vmem:[%s10356_s27 + $0x2e0] sm:$0xff] %v927_v28  ;;  %v933_v31 = vld [vmem:[%s10351_s24 + $0x4f8] sm:$0xff]  ;;  %930 = vst [vmem:[%s10356_s27 + $0x2e8] sm:$0xff] %v929_v29  ;;  %v935_v32 = vld [vmem:[%s10351_s24 + $0x500] sm:$0xff] }
  0x7a   : > { %932 = vst [vmem:[%s10356_s27 + $0x2f0] sm:$0xff] %v931_v30  ;;  %934 = vst [vmem:[%s10356_s27 + $0x2f8] sm:$0xff] %v933_v31  ;;  %v937_v33 = vld [vmem:[%s10351_s24 + $0x508] sm:$0xff]  ;;  %v939_v34 = vld [vmem:[%s10351_s24 + $0x510] sm:$0xff] }
  0x7b   : > { %936 = vst [vmem:[%s10356_s27 + $0x300] sm:$0xff] %v935_v32  ;;  %938 = vst [vmem:[%s10356_s27 + $0x308] sm:$0xff] %v937_v33  ;;  %v941_v35 = vld [vmem:[%s10351_s24 + $0x518] sm:$0xff]  ;;  %v943_v36 = vld [vmem:[%s10351_s24 + $0x520] sm:$0xff] }
  0x7c   : > { %940 = vst [vmem:[%s10356_s27 + $0x310] sm:$0xff] %v939_v34  ;;  %v945_v37 = vld [vmem:[%s10351_s24 + $0x528] sm:$0xff]  ;;  %942 = vst [vmem:[%s10356_s27 + $0x318] sm:$0xff] %v941_v35  ;;  %v947_v38 = vld [vmem:[%s10351_s24 + $0x530] sm:$0xff] }
  0x7d   : > { %944 = vst [vmem:[%s10356_s27 + $0x320] sm:$0xff] %v943_v36  ;;  %946 = vst [vmem:[%s10356_s27 + $0x328] sm:$0xff] %v945_v37  ;;  %v949_v39 = vld [vmem:[%s10351_s24 + $0x538] sm:$0xff]  ;;  %v951_v40 = vld [vmem:[%s10351_s24 + $0x540] sm:$0xff] }
  0x7e   : > { %948 = vst [vmem:[%s10356_s27 + $0x330] sm:$0xff] %v947_v38  ;;  %950 = vst [vmem:[%s10356_s27 + $0x338] sm:$0xff] %v949_v39  ;;  %v953_v41 = vld [vmem:[%s10351_s24 + $0x548] sm:$0xff]  ;;  %v955_v42 = vld [vmem:[%s10351_s24 + $0x550] sm:$0xff] }
  0x7f   : > { %952 = vst [vmem:[%s10356_s27 + $0x340] sm:$0xff] %v951_v40  ;;  %v957_v43 = vld [vmem:[%s10351_s24 + $0x558] sm:$0xff]  ;;  %954 = vst [vmem:[%s10356_s27 + $0x348] sm:$0xff] %v953_v41  ;;  %v959_v44 = vld [vmem:[%s10351_s24 + $0x560] sm:$0xff] }
  0x80   : > { %956 = vst [vmem:[%s10356_s27 + $0x350] sm:$0xff] %v955_v42  ;;  %958 = vst [vmem:[%s10356_s27 + $0x358] sm:$0xff] %v957_v43  ;;  %v961_v45 = vld [vmem:[%s10351_s24 + $0x568] sm:$0xff]  ;;  %v963_v46 = vld [vmem:[%s10351_s24 + $0x570] sm:$0xff] }
  0x81   : > { %960 = vst [vmem:[%s10356_s27 + $0x360] sm:$0xff] %v959_v44  ;;  %962 = vst [vmem:[%s10356_s27 + $0x368] sm:$0xff] %v961_v45  ;;  %v965_v47 = vld [vmem:[%s10351_s24 + $0x578] sm:$0xff]  ;;  %v967_v48 = vld [vmem:[%s10351_s24 + $0x580] sm:$0xff] }
  0x82   : > { %964 = vst [vmem:[%s10356_s27 + $0x370] sm:$0xff] %v963_v46  ;;  %v969_v49 = vld [vmem:[%s10351_s24 + $0x588] sm:$0xff]  ;;  %966 = vst [vmem:[%s10356_s27 + $0x378] sm:$0xff] %v965_v47  ;;  %v971_v50 = vld [vmem:[%s10351_s24 + $0x590] sm:$0xff] }
  0x83   : > { %968 = vst [vmem:[%s10356_s27 + $0x380] sm:$0xff] %v967_v48  ;;  %970 = vst [vmem:[%s10356_s27 + $0x388] sm:$0xff] %v969_v49  ;;  %v973_v51 = vld [vmem:[%s10351_s24 + $0x598] sm:$0xff]  ;;  %v975_v52 = vld [vmem:[%s10351_s24 + $0x5a0] sm:$0xff] }
  0x84   : > { %972 = vst [vmem:[%s10356_s27 + $0x390] sm:$0xff] %v971_v50  ;;  %974 = vst [vmem:[%s10356_s27 + $0x398] sm:$0xff] %v973_v51  ;;  %v977_v53 = vld [vmem:[%s10351_s24 + $0x5a8] sm:$0xff]  ;;  %v979_v54 = vld [vmem:[%s10351_s24 + $0x5b0] sm:$0xff] }
  0x85   : > { %976 = vst [vmem:[%s10356_s27 + $0x3a0] sm:$0xff] %v975_v52  ;;  %v981_v55 = vld [vmem:[%s10351_s24 + $0x5b8] sm:$0xff]  ;;  %978 = vst [vmem:[%s10356_s27 + $0x3a8] sm:$0xff] %v977_v53  ;;  %v983_v56 = vld [vmem:[%s10351_s24 + $0x5c0] sm:$0xff] }
  0x86   : > { %980 = vst [vmem:[%s10356_s27 + $0x3b0] sm:$0xff] %v979_v54  ;;  %982 = vst [vmem:[%s10356_s27 + $0x3b8] sm:$0xff] %v981_v55  ;;  %v985_v57 = vld [vmem:[%s10351_s24 + $0x5c8] sm:$0xff]  ;;  %v987_v58 = vld [vmem:[%s10351_s24 + $0x5d0] sm:$0xff] }
  0x87   : > { %984 = vst [vmem:[%s10356_s27 + $0x3c0] sm:$0xff] %v983_v56  ;;  %986 = vst [vmem:[%s10356_s27 + $0x3c8] sm:$0xff] %v985_v57  ;;  %v989_v59 = vld [vmem:[%s10351_s24 + $0x5d8] sm:$0xff]  ;;  %v991_v60 = vld [vmem:[%s10351_s24 + $0x5e0] sm:$0xff] }
  0x88   : > { %988 = vst [vmem:[%s10356_s27 + $0x3d0] sm:$0xff] %v987_v58  ;;  %v993_v61 = vld [vmem:[%s10351_s24 + $0x5e8] sm:$0xff]  ;;  %990 = vst [vmem:[%s10356_s27 + $0x3d8] sm:$0xff] %v989_v59  ;;  %v995_v62 = vld [vmem:[%s10351_s24 + $0x5f0] sm:$0xff] }
  0x89   : > { %992 = vst [vmem:[%s10356_s27 + $0x3e0] sm:$0xff] %v991_v60  ;;  %994 = vst [vmem:[%s10356_s27 + $0x3e8] sm:$0xff] %v993_v61  ;;  %v997_v63 = vld [vmem:[%s10351_s24 + $0x5f8] sm:$0xff] }
  0x8a   : > { %996 = vst [vmem:[%s10356_s27 + $0x3f0] sm:$0xff] %v995_v62  ;;  %998 = vst [vmem:[%s10356_s27 + $0x3f8] sm:$0xff] %v997_v63 }
  0x8b PF: > { %p7437_p5 = scmp.ge.s32.totalorder %s10064_s23, 1  ;;  %p1003_p6 = scmp.lt.s32.totalorder %s10064_s23, 3 }
  0x8d   : > { %p1004_p7 = pnand %p7437_p5, %p1003_p6 }
  0x8f   : > { %1007 = sbr.rel (%p1004_p7) target bundleno = 4165 (0x1045), region = 138 }
  0x96   : > { %s16930_s28 = sld [smem:[#allocation47_spill]]  ;;  %s16931_s0 = sadd.s32 4294967295, %s10064_s23   ;;  %v16763_v7 = vmov 0.0   ;;  %vm1153_vm0 = vcmask 392192   ;;  %v1143_v35 = vlaneseq  ;;  %v1685_v55 = vld [vmem:[%s16724_s7 + $0x8] sm:$0xff]  ;;  %v1687_v56 = vld [vmem:[%s16724_s7 + $0x18] sm:$0xff] }
  0x97   : > { %s7440_s21 = sshll.u32 %s16931_s0, 4  ;;  %1266 = vmatprep.mubr.f32.mxu0 %v16763_v7  ;;  %1523 = vmatprep.mubr.f32.mxu1 %v16763_v7  ;;  %s16932_s29 = sld [smem:[#allocation43_spill]]  ;;  %v1684_v57 = vld [vmem:[%s16724_s7] sm:$0xff]  ;;  %v8203_v60 = vpack.c.bf16 %v1687_v56, %v1685_v55  ;;  %v1686_v61 = vld [vmem:[%s16724_s7 + $0x10] sm:$0xff]  ;;  %v1689_v62 = vld [vmem:[%s16724_s7 + $0x28] sm:$0xff] }
  0x98   : > { %p1084_p8 = scmp.lt.s32.totalorder %s7440_s21, 31  ;;  %v10710_v36 = vshrl.u32 %v1143_v35, 7  ;;  %s16934_s5 = sld [smem:[#allocation48_spill]]  ;;  %v1691_v63 = vld [vmem:[%s16724_s7 + $0x38] sm:$0xff] }
  0x99   : > { %s16796_s30 = sand.u32 1, %s10056_s1   ;;  %s16973_s25 = sld [smem:[#allocation46_spill]] }
  0x9a   : > { %s17175_s21 = smov (!%p1084_p8, %s7440_s21), 31  ;;  %v10713_v37 = vsub.s32 1, %v10710_v36  ;;  %v10719_v39 = vsub.s32 0, %v10710_v36  ;;  %s7438_s0 = sshll.u32 %s16796_s30, 9 }
  0x9b   : > { %s16794_s23 = sshll.u32 %s17175_s21, 3  ;;  %s10739_s27 = scalar_lea.vmem [#allocation2], %s7438_s0 }
  0x9c   : > { %v1130_v0 = vld [vmem:[%s16930_s28 + $0x8] sm:$0xff]  ;;  %v1132_v1 = vld [vmem:[%s16930_s28 + $0x18] sm:$0xff]  ;;  %v1129_v2 = vld [vmem:[%s16930_s28] sm:$0xff]  ;;  %16933 = vst [vmem:[#allocation7_spill] sm:$0xff] %v10713_v37 }
  0x9d   : > { %v8159_v3 = vpack.c.bf16 %v1132_v1, %v1130_v0  ;;  %v1131_v4 = vld [vmem:[%s16930_s28 + $0x10] sm:$0xff]  ;;  %v1134_v5 = vld [vmem:[%s16930_s28 + $0x28] sm:$0xff]  ;;  %v1136_v6 = vld [vmem:[%s16930_s28 + $0x38] sm:$0xff]  ;;  %s10661_s22 = scalar_lea.vmem %s16932_s29, %s16794_s23  ;;  %16935 = vst [vmem:[#allocation8_spill] sm:$0xff] %v10719_v39  ;;  %s17020_s23 = sand.u32 1, %s10056_s1  }
  0x9e   : > { %v8161_v8 = vpack.c.bf16 %v1131_v4, %v1129_v2  ;;  %v8163_v9 = vpack.c.bf16 %v1136_v6, %v1134_v5  ;;  %v1133_v10 = vld [vmem:[%s16930_s28 + $0x20] sm:$0xff]  ;;  %v1135_v11 = vld [vmem:[%s16930_s28 + $0x30] sm:$0xff]  ;;  %v1138_v12 = vld [vmem:[%s16930_s28 + $0x48] sm:$0xff]  ;;  %v8205_v2 = vpack.c.bf16 %v1686_v61, %v1684_v57 }
  0x9f   : > { %8160 = vmatprep.subr.bf16.mxu0 %v8159_v3  ;;  %v1140_v13 = vld [vmem:[%s16930_s28 + $0x58] sm:$0xff]  ;;  %v8165_v14 = vpack.c.bf16 %v1135_v11, %v1133_v10  ;;  %v1137_v16 = vld [vmem:[%s16930_s28 + $0x40] sm:$0xff]  ;;  %v1139_v17 = vld [vmem:[%s16930_s28 + $0x50] sm:$0xff]  ;;  %v8207_v3 = vpack.c.bf16 %v1691_v63, %v1689_v62 }
  0xa0   : > { %8162 = vmatpush1.bf16.msra.mxu0 %v8161_v8  ;;  %v8167_v15 = vpack.c.bf16 %v1140_v13, %v1138_v12  ;;  %v8169_v18 = vpack.c.bf16 %v1139_v17, %v1137_v16  ;;  %v1113_v19 = vld [vmem:[%s10661_s22] sm:$0xff]  ;;  %v1114_v20 = vld [vmem:[%s10661_s22 + $0x8] sm:$0xff]  ;;  %v1115_v21 = vld [vmem:[%s10661_s22 + $0x10] sm:$0xff] }
  0xa1   : > { %8164 = vmatprep.subr.bf16.mxu0 %v8163_v9  ;;  %v1116_v22 = vld [vmem:[%s10661_s22 + $0x18] sm:$0xff]  ;;  %v1117_v23 = vld [vmem:[%s10661_s22 + $0x20] sm:$0xff]  ;;  %v1118_v24 = vld [vmem:[%s10661_s22 + $0x28] sm:$0xff] }
  0xa2   : > { %v1119_v25 = vld [vmem:[%s10661_s22 + $0x30] sm:$0xff]  ;;  %v1120_v26 = vld [vmem:[%s10661_s22 + $0x38] sm:$0xff]  ;;  %v1121_v27 = vld [vmem:[%s10661_s22 + $0x40] sm:$0xff] }
  0xa3   : > { %v1122_v28 = vld [vmem:[%s10661_s22 + $0x48] sm:$0xff]  ;;  %v1123_v29 = vld [vmem:[%s10661_s22 + $0x50] sm:$0xff]  ;;  %v1124_v30 = vld [vmem:[%s10661_s22 + $0x58] sm:$0xff] }
  0xa4   : > { %8166 = vmatpush1.bf16.msra.mxu0 %v8165_v14  ;;  %v1125_v31 = vld [vmem:[%s10661_s22 + $0x60] sm:$0xff]  ;;  %v1126_v32 = vld [vmem:[%s10661_s22 + $0x68] sm:$0xff]  ;;  %v1127_v33 = vld [vmem:[%s10661_s22 + $0x70] sm:$0xff] }
  0xa5   : > { %8168 = vmatprep.subr.bf16.mxu0 %v8167_v15  ;;  %v1128_v34 = vld [vmem:[%s10661_s22 + $0x78] sm:$0xff]  ;;  %v1141_v38 = vld [vmem:[%s16934_s5] sm:$0x3]  ;;  %v1396_v49 = vld [vmem:[%s10739_s27 + $0x8] sm:$0xff]  ;;  %s7439_s22 = sshll.u32 %s17020_s23, 10 }
  0xa6   : > { %v10723_v40 = vrot.slane %v1141_v38, %v10713_v37  ;;  %v10726_v41 = vrot.slane %v1141_v38, %v10719_v39  ;;  %v1398_v50 = vld [vmem:[%s10739_s27 + $0x18] sm:$0xff]  ;;  %v1397_v51 = vld [vmem:[%s10739_s27 + $0x10] sm:$0xff]  ;;  %v1395_v54 = vld [vmem:[%s10739_s27] sm:$0xff]  ;;  %s13306_s30 = scalar_lea.vmem [#allocation3], %s7439_s22 }
  0xa7   : > { %v1688_v4 = vld [vmem:[%s16724_s7 + $0x20] sm:$0xff]  ;;  %v1690_v5 = vld [vmem:[%s16724_s7 + $0x30] sm:$0xff]  ;;  %v1693_v6 = vld [vmem:[%s16724_s7 + $0x48] sm:$0xff] }
  0xa8   : > { %8170 = vmatpush1.bf16.msra.mxu0 %v8169_v18  ;;  %v1695_v10 = vld [vmem:[%s16724_s7 + $0x58] sm:$0xff]  ;;  %v8209_v14 = vpack.c.bf16 %v1690_v5, %v1688_v4  ;;  %v1692_v18 = vld [vmem:[%s16724_s7 + $0x40] sm:$0xff]  ;;  %v1705_v5 = vld [vmem:[%s16724_s7 + $0xa8] sm:$0xff] }
  0xa9   : > { %8204 = vmatprep.subr.bf16.mxu0 %v8203_v60  ;;  %v8211_v17 = vpack.c.bf16 %v1695_v10, %v1693_v6  ;;  %v1696_v38 = vld [vmem:[%s16724_s7 + $0x60] sm:$0xff]  ;;  %v1707_v6 = vld [vmem:[%s16724_s7 + $0xb8] sm:$0xff] }
  0xab   : > { %7444 = vmatmul.mubr.msk.f32.vlgmr.msra.gmra.mrb[0].mxu0 %vm1153_vm0, %v1113_v19  ;;  %v1694_v19 = vld [vmem:[%s16724_s7 + $0x50] sm:$0xff] }
  0xac   : > { %1272 = vmatprep.mubr.f32.mxu0 %v16763_v7  ;;  %8206 = vmatpush1.bf16.msra.mxu0 %v8205_v2  ;;  %v1702_v2 = vld [vmem:[%s16724_s7 + $0x90] sm:$0xff] }
  0xad   : > { %8208 = vmatprep.subr.bf16.mxu0 %v8207_v3 }
  0xaf   : > { %7445 = vmatmul.mubr.msk.f32.gmra.mrb[2].mxu0 %vm1153_vm0, %v1114_v20 }
  0xb0   : > { %1278 = vmatprep.mubr.f32.mxu0 %v16763_v7  ;;  %8210 = vmatpush1.bf16.msra.mxu0 %v8209_v14 }
  0xb1   : > { %8212 = vmatprep.subr.bf16.mxu0 %v8211_v17 }
  0xb3   : > { %7446 = vmatmul.mubr.msk.f32.gmra.mrb[4].mxu0 %vm1153_vm0, %v1115_v21 }
  0xb4   : > { %1284 = vmatprep.mubr.f32.mxu0 %v16763_v7 }
  0xb7   : > { %7447 = vmatmul.mubr.msk.f32.gmra.mrb[6].mxu0 %vm1153_vm0, %v1116_v22  ;;  %v1697_v22 = vld [vmem:[%s16724_s7 + $0x68] sm:$0xff] }
  0xb8   : > { %1290 = vmatprep.mubr.f32.mxu0 %v16763_v7 }
  0xbb   : > { %7448 = vmatmul.mubr.msk.f32.gmra.mrb[8].mxu0 %vm1153_vm0, %v1117_v23  ;;  %v1699_v23 = vld [vmem:[%s16724_s7 + $0x78] sm:$0xff] }
  0xbc   : > { %1296 = vmatprep.mubr.f32.mxu0 %v16763_v7  ;;  %v8215_v35 = vpack.c.bf16 %v1699_v23, %v1697_v22 }
  0xbf   : > { %7449 = vmatmul.mubr.msk.f32.gmra.mrb[10].mxu0 %vm1153_vm0, %v1118_v24 }
  0xc0   : > { %1302 = vmatprep.mubr.f32.mxu0 %v16763_v7 }
  0xc3   : > { %7450 = vmatmul.mubr.msk.f32.gmra.mrb[12].mxu0 %vm1153_vm0, %v1119_v25 }
  0xc4   : > { %1308 = vmatprep.mubr.f32.mxu0 %v16763_v7 }
  0xc7   : > { %7451 = vmatmul.mubr.msk.f32.gmra.mrb[14].mxu0 %vm1153_vm0, %v1120_v26 }
  0xc8   : > { %1314 = vmatprep.mubr.f32.mxu0 %v16763_v7 }
  0xcb   : > { %7452 = vmatmul.mubr.msk.f32.gmra.mrb[16].mxu0 %vm1153_vm0, %v1121_v27 }
  0xcc   : > { %1320 = vmatprep.mubr.f32.mxu0 %v16763_v7 }
  0xcf   : > { %7453 = vmatmul.mubr.msk.f32.gmra.mrb[18].mxu0 %vm1153_vm0, %v1122_v28  ;;  %v1400_v28 = vld [vmem:[%s10739_s27 + $0x28] sm:$0xff] }
  0xd0   : > { %1326 = vmatprep.mubr.f32.mxu0 %v16763_v7 }
  0xd3   : > { %7454 = vmatmul.mubr.msk.f32.gmra.mrb[20].mxu0 %vm1153_vm0, %v1123_v29  ;;  %v1401_v29 = vld [vmem:[%s10739_s27 + $0x30] sm:$0xff] }
  0xd4   : > { %1332 = vmatprep.mubr.f32.mxu0 %v16763_v7 }
  0xd7   : > { %7455 = vmatmul.mubr.msk.f32.gmra.mrb[22].mxu0 %vm1153_vm0, %v1124_v30 }
  0xd8   : > { %1338 = vmatprep.mubr.f32.mxu0 %v16763_v7 }
  0xdb   : > { %7456 = vmatmul.mubr.msk.f32.gmra.mrb[24].mxu0 %vm1153_vm0, %v1125_v31  ;;  %v8213_v31 = vpack.c.bf16 %v1694_v19, %v1692_v18  ;;  %v1404_v18 = vld [vmem:[%s10739_s27 + $0x48] sm:$0xff]  ;;  %v1405_v19 = vld [vmem:[%s10739_s27 + $0x50] sm:$0xff] }
  0xdc   : > { %1344 = vmatprep.mubr.f32.mxu0 %v16763_v7 }
  0xdd   : > { %8214 = vmatpush1.bf16.msra.mxu0 %v8213_v31  ;;  %v1403_v31 = vld [vmem:[%s10739_s27 + $0x40] sm:$0xff] }
  0xde   : > { %8216 = vmatprep.subr.bf16.mxu0 %v8215_v35 }
  0xdf   : > { %7457 = vmatmul.mubr.msk.f32.gmra.mrb[26].mxu0 %vm1153_vm0, %v1126_v32 }
  0xe0   : > { %1350 = vmatprep.mubr.f32.mxu0 %v16763_v7 }
  0xe3   : > { %7458 = vmatmul.mubr.msk.f32.gmra.mrb[28].mxu0 %vm1153_vm0, %v1127_v33 }
  0xe4   : > { %1356 = vmatprep.mubr.f32.mxu0 %v16763_v7 }
  0xe7   : > { %7459 = vmatmul.mubr.msk.f32.gmra.mrb[30].mxu0 %vm1153_vm0, %v1128_v34  ;;  %v1402_v34 = vld [vmem:[%s10739_s27 + $0x38] sm:$0xff] }
 0x17e   : > { %v1268_v42 = vpop.f32.mrb[0].mxu0 }
 0x17f   : > { %v1270_v43 = vpop.f32.mrb[1].mxu0  ;;  %v10734_v45 = vadd.f32 %v1268_v42, %v10726_v41  ;;  %v1698_v42 = vld [vmem:[%s16724_s7 + $0x70] sm:$0xff] }
 0x180   : > { %v10731_v44 = vadd.f32 %v1270_v43, %v10723_v40  ;;  %v1399_v43 = vld [vmem:[%s10739_s27 + $0x20] sm:$0xff]  ;;  %v8217_v60 = vpack.c.bf16 %v1698_v42, %v1696_v38  ;;  %v1709_v38 = vld [vmem:[%s16724_s7 + $0xc8] sm:$0xff]  ;;  %v1711_v42 = vld [vmem:[%s16724_s7 + $0xd8] sm:$0xff] }
 0x181   : > { %16937 = vst [vmem:[#allocation10_spill] sm:$0xff] %v10734_v45  ;;  %v16762_v58 = vmax.f32 %v10734_v45, 0.0 }
 0x182   : > { %16936 = vst [vmem:[#allocation9_spill] sm:$0xff] %v10731_v44  ;;  %v1274_v46 = vpop.f32.mrb[2].mxu0  ;;  %v16757_v53 = vmax.f32 %v10731_v44, 0.0  ;;  %8218 = vmatpush1.bf16.msra.mxu0 %v8217_v60  ;;  %v1633_v44 = vld [vmem:[%s16723_s6 + $0x68] sm:$0xff] }
 0x183   : > { %v10737_v47 = vadd.f32 %v1274_v46, %v10726_v41  ;;  %v1276_v48 = vpop.f32.mrb[3].mxu0  ;;  %v10802_v16 = vadd.f32 %v1395_v54, %v16762_v58 }
 0x184   : > { %v10745_v52 = vadd.f32 %v1276_v48, %v10723_v40  ;;  %v10791_v12 = vadd.f32 %v1396_v49, %v16757_v53  ;;  %v1701_v49 = vld [vmem:[%s16724_s7 + $0x88] sm:$0xff] }
 0x185   : > { %16938 = vst [vmem:[#allocation11_spill] sm:$0xff] %v10737_v47  ;;  %v16756_v59 = vmax.f32 %v10737_v47, 0.0  ;;  %v1628_v47 = vld [vmem:[%s16723_s6 + $0x40] sm:$0xff] }
 0x186   : > { %16939 = vst [vmem:[#allocation12_spill] sm:$0xff] %v10745_v52  ;;  %v1280_v0 = vpop.f32.mrb[4].mxu0  ;;  %v16755_v1 = vmax.f32 %v10745_v52, 0.0  ;;  %v1631_v52 = vld [vmem:[%s16723_s6 + $0x58] sm:$0xff] }
 0x187   : > { %v1282_v8 = vpop.f32.mrb[5].mxu0  ;;  %v10781_v9 = vadd.f32 %v1397_v51, %v16756_v59  ;;  %v10798_v15 = vadd.f32 %v1280_v0, %v10726_v41  ;;  %v1700_v0 = vld [vmem:[%s16724_s7 + $0x80] sm:$0xff] }
 0x188   : > { %v10787_v11 = vadd.f32 %v1282_v8, %v10723_v40  ;;  %v10795_v13 = vadd.f32 %v1398_v50, %v16755_v1  ;;  %v1703_v50 = vld [vmem:[%s16724_s7 + $0x98] sm:$0xff]  ;;  %v1411_v1 = vld [vmem:[%s10739_s27 + $0x80] sm:$0xff] }
 0x189   : > { %16941 = vst [vmem:[#allocation14_spill] sm:$0xff] %v10798_v15  ;;  %v8173_v26 = vpack.c.bf16 %v10781_v9, %v10802_v16  ;;  %v16753_v32 = vmax.f32 %v10798_v15, 0.0  ;;  %v8219_v63 = vpack.c.bf16 %v1703_v50, %v1701_v49  ;;  %v1626_v15 = vld [vmem:[%s16723_s6 + $0x30] sm:$0xff] }
 0x18a   : > { %16940 = vst [vmem:[#allocation13_spill] sm:$0xff] %v10787_v11  ;;  %v1286_v20 = vpop.f32.mrb[6].mxu0  ;;  %v8171_v21 = vpack.c.bf16 %v10795_v13, %v10791_v12  ;;  %v16754_v27 = vmax.f32 %v10787_v11, 0.0  ;;  %v1629_v11 = vld [vmem:[%s16723_s6 + $0x48] sm:$0xff] }
 0x18b   : > { %v10819_v24 = vadd.f32 %v1286_v20, %v10726_v41  ;;  %v1288_v25 = vpop.f32.mrb[7].mxu0  ;;  %v10863_v61 = vadd.f32 %v1399_v43, %v16753_v32  ;;  %8220 = vmatprep.subr.bf16.mxu0 %v8219_v63 }
 0x18c   : > { %v10827_v30 = vadd.f32 %v1288_v25, %v10723_v40  ;;  %8172 = vmatprep.subr.bf16.mxu1 %v8171_v21  ;;  %v10852_v55 = vadd.f32 %v1400_v28, %v16754_v27  ;;  %v8221_v21 = vpack.c.bf16 %v1702_v2, %v1700_v0  ;;  %v1406_v25 = vld [vmem:[%s10739_s27 + $0x58] sm:$0xff]  ;;  %v1704_v28 = vld [vmem:[%s16724_s7 + $0xa0] sm:$0xff]  ;;  %v8227_v2 = vpack.c.bf16 %v1711_v42, %v1709_v38 }
 0x18d   : > { %16942 = vst [vmem:[#allocation15_spill] sm:$0xff] %v10819_v24  ;;  %v16752_v33 = vmax.f32 %v10819_v24, 0.0  ;;  %8174 = vmatpush1.bf16.msra.mxu1 %v8173_v26  ;;  %v8223_v26 = vpack.c.bf16 %v1707_v6, %v1705_v5  ;;  %v1410_v42 = vld [vmem:[%s10739_s27 + $0x78] sm:$0xff]  ;;  %v1720_v27 = vld [vmem:[%s16724_s7 + $0x120] sm:$0xff] }
 0x18e   : > { %16943 = vst [vmem:[#allocation16_spill] sm:$0xff] %v10827_v30  ;;  %v16751_v46 = vmax.f32 %v10827_v30, 0.0  ;;  %v1292_v48 = vpop.f32.mrb[8].mxu0  ;;  %8222 = vmatpush1.bf16.msra.mxu0 %v8221_v21  ;;  %v1622_v30 = vld [vmem:[%s16723_s6 + $0x10] sm:$0xff] }
 0x18f   : > { %v10848_v51 = vadd.f32 %v1401_v29, %v16752_v33  ;;  %v1294_v54 = vpop.f32.mrb[9].mxu0  ;;  %v10866_v62 = vadd.f32 %v1292_v48, %v10726_v41  ;;  %v1706_v29 = vld [vmem:[%s16724_s7 + $0xb0] sm:$0xff]  ;;  %8224 = vmatprep.subr.bf16.mxu0 %v8223_v26  ;;  %v1408_v26 = vld [vmem:[%s10739_s27 + $0x68] sm:$0xff]  ;;  %v1414_v33 = vld [vmem:[%s10739_s27 + $0x98] sm:$0xff] }
 0x190   : > { %v10856_v56 = vadd.f32 %v1402_v34, %v16751_v46  ;;  %v10859_v57 = vadd.f32 %v1294_v54, %v10723_v40  ;;  %v8225_v60 = vpack.c.bf16 %v1706_v29, %v1704_v28  ;;  %v1409_v28 = vld [vmem:[%s10739_s27 + $0x70] sm:$0xff] }
 0x191   : > { %16945 = vst [vmem:[#allocation18_spill] sm:$0xff] %v10866_v62  ;;  %v8177_v14 = vpack.c.bf16 %v10848_v51, %v10863_v61  ;;  %v16745_v22 = vmax.f32 %v10866_v62, 0.0 }
 0x192   : > { %16944 = vst [vmem:[#allocation17_spill] sm:$0xff] %v10859_v57  ;;  %v1298_v3 = vpop.f32.mrb[10].mxu0  ;;  %v8175_v4 = vpack.c.bf16 %v10856_v56, %v10852_v55  ;;  %v16750_v17 = vmax.f32 %v10859_v57, 0.0  ;;  %8226 = vmatpush1.bf16.msra.mxu0 %v8225_v60  ;;  %v1620_v57 = vld [vmem:[%s16723_s6] sm:$0xff] }
 0x193   : > { %v10883_v8 = vadd.f32 %v1298_v3, %v10726_v41  ;;  %v1300_v10 = vpop.f32.mrb[11].mxu0  ;;  %v10927_v63 = vadd.f32 %v1403_v31, %v16745_v22  ;;  %v1708_v3 = vld [vmem:[%s16724_s7 + $0xc0] sm:$0xff]  ;;  %8228 = vmatprep.subr.bf16.mxu0 %v8227_v2  ;;  %v1719_v2 = vld [vmem:[%s16724_s7 + $0x118] sm:$0xff]  ;;  %v8269_v24 = vpack.c.bf16 %v1622_v30, %v1620_v57 }
 0x194   : > { %v10891_v20 = vadd.f32 %v1300_v10, %v10723_v40  ;;  %8176 = vmatprep.subr.bf16.mxu1 %v8175_v4  ;;  %v10916_v49 = vadd.f32 %v1404_v18, %v16750_v17  ;;  %v1710_v4 = vld [vmem:[%s16724_s7 + $0xd0] sm:$0xff]  ;;  %v1713_v10 = vld [vmem:[%s16724_s7 + $0xe8] sm:$0xff] }
 0x195   : > { %16946 = vst [vmem:[#allocation19_spill] sm:$0xff] %v10883_v8  ;;  %v16744_v23 = vmax.f32 %v10883_v8, 0.0  ;;  %8178 = vmatpush1.bf16.msra.mxu1 %v8177_v14  ;;  %v1715_v14 = vld [vmem:[%s16724_s7 + $0xf8] sm:$0xff]  ;;  %v8229_v31 = vpack.c.bf16 %v1710_v4, %v1708_v3  ;;  %v1717_v4 = vld [vmem:[%s16724_s7 + $0x108] sm:$0xff] }
 0x196   : > { %16947 = vst [vmem:[#allocation20_spill] sm:$0xff] %v10891_v20  ;;  %v16743_v34 = vmax.f32 %v10891_v20, 0.0  ;;  %v1304_v35 = vpop.f32.mrb[12].mxu0 }
 0x197   : > { %v10912_v43 = vadd.f32 %v1405_v19, %v16744_v23  ;;  %v1306_v48 = vpop.f32.mrb[13].mxu0  ;;  %v10930_v0 = vadd.f32 %v1304_v35, %v10726_v41  ;;  %8230 = vmatpush1.bf16.msra.mxu0 %v8229_v31  ;;  %v1718_v31 = vld [vmem:[%s16724_s7 + $0x110] sm:$0xff] }
 0x198   : > { %v10920_v50 = vadd.f32 %v1406_v25, %v16743_v34  ;;  %v10923_v54 = vadd.f32 %v1306_v48, %v10723_v40  ;;  %v8231_v48 = vpack.c.bf16 %v1715_v14, %v1713_v10  ;;  %v1407_v34 = vld [vmem:[%s10739_s27 + $0x60] sm:$0xff] }
 0x199   : > { %16949 = vst [vmem:[#allocation22_spill] sm:$0xff] %v10930_v0  ;;  %v8181_v21 = vpack.c.bf16 %v10912_v43, %v10927_v63  ;;  %v16748_v35 = vmax.f32 %v10930_v0, 0.0  ;;  %v1419_v0 = vld [vmem:[%s10739_s27 + $0xc0] sm:$0xff] }
 0x19a   : > { %16948 = vst [vmem:[#allocation21_spill] sm:$0xff] %v10923_v54  ;;  %v1310_v5 = vpop.f32.mrb[14].mxu0  ;;  %v8179_v6 = vpack.c.bf16 %v10920_v50, %v10916_v49  ;;  %v16749_v25 = vmax.f32 %v10923_v54, 0.0  ;;  %8232 = vmatprep.subr.bf16.mxu0 %v8231_v48  ;;  %v1723_v48 = vld [vmem:[%s16724_s7 + $0x138] sm:$0xff] }
 0x19b   : > { %v10947_v18 = vadd.f32 %v1310_v5, %v10726_v41  ;;  %v1312_v19 = vpop.f32.mrb[15].mxu0  ;;  %v1712_v5 = vld [vmem:[%s16724_s7 + $0xe0] sm:$0xff] }
 0x19c   : > { %v10955_v29 = vadd.f32 %v1312_v19, %v10723_v40  ;;  %8180 = vmatprep.subr.bf16.mxu1 %v8179_v6  ;;  %v1714_v19 = vld [vmem:[%s16724_s7 + $0xf0] sm:$0xff]  ;;  %v10980_v14 = vadd.f32 %v1408_v26, %v16749_v25  ;;  %v8235_v26 = vpack.c.bf16 %v1719_v2, %v1717_v4 }
 0x19d   : > { %16950 = vst [vmem:[#allocation23_spill] sm:$0xff] %v10947_v18  ;;  %v16746_v38 = vmax.f32 %v10947_v18, 0.0  ;;  %8182 = vmatpush1.bf16.msra.mxu1 %v8181_v21  ;;  %v8233_v22 = vpack.c.bf16 %v1714_v19, %v1712_v5 }
 0x19e   : > { %16951 = vst [vmem:[#allocation24_spill] sm:$0xff] %v10955_v29  ;;  %v16747_v60 = vmax.f32 %v10955_v29, 0.0  ;;  %v1316_v3 = vpop.f32.mrb[16].mxu0 }
 0x19f   : > { %v10976_v6 = vadd.f32 %v1409_v28, %v16746_v38  ;;  %v1318_v10 = vpop.f32.mrb[17].mxu0  ;;  %v10991_v28 = vadd.f32 %v1407_v34, %v16748_v35  ;;  %v10994_v38 = vadd.f32 %v1316_v3, %v10726_v41  ;;  %v1721_v34 = vld [vmem:[%s16724_s7 + $0x128] sm:$0xff]  ;;  %v1413_v35 = vld [vmem:[%s10739_s27 + $0x90] sm:$0xff]  ;;  %8234 = vmatpush1.bf16.msra.mxu0 %v8233_v22 }
 0x1a0   : > { %v10984_v21 = vadd.f32 %v1410_v42, %v16747_v60  ;;  %v10987_v23 = vadd.f32 %v1318_v10, %v10723_v40  ;;  %v1716_v42 = vld [vmem:[%s16724_s7 + $0x100] sm:$0xff]  ;;  %v1412_v60 = vld [vmem:[%s10739_s27 + $0x88] sm:$0xff]  ;;  %8236 = vmatprep.subr.bf16.mxu0 %v8235_v26  ;;  %v8239_v32 = vpack.c.bf16 %v1723_v48, %v1721_v34  ;;  %v1727_v26 = vld [vmem:[%s16724_s7 + $0x158] sm:$0xff] }
 0x1a1   : > { %16953 = vst [vmem:[#allocation26_spill] sm:$0xff] %v10994_v38  ;;  %v8185_v4 = vpack.c.bf16 %v10976_v6, %v10991_v28  ;;  %v8237_v17 = vpack.c.bf16 %v1718_v31, %v1716_v42  ;;  %v16760_v46 = vmax.f32 %v10994_v38, 0.0  ;;  %v1725_v31 = vld [vmem:[%s16724_s7 + $0x148] sm:$0xff]  ;;  %v1415_v38 = vld [vmem:[%s10739_s27 + $0xa0] sm:$0xff] }
 0x1a2   : > { %16952 = vst [vmem:[#allocation25_spill] sm:$0xff] %v10987_v23  ;;  %v1322_v10 = vpop.f32.mrb[18].mxu0  ;;  %v8183_v5 = vpack.c.bf16 %v10984_v21, %v10980_v14  ;;  %v16761_v2 = vmax.f32 %v10987_v23, 0.0 }
 0x1a3   : > { %v11011_v19 = vadd.f32 %v1322_v10, %v10726_v41  ;;  %v1324_v3 = vpop.f32.mrb[19].mxu0  ;;  %8238 = vmatpush1.bf16.msra.mxu0 %v8237_v17  ;;  %v1726_v17 = vld [vmem:[%s16724_s7 + $0x150] sm:$0xff] }
 0x1a4   : > { %v11019_v25 = vadd.f32 %v1324_v3, %v10723_v40  ;;  %8184 = vmatprep.subr.bf16.mxu1 %v8183_v5  ;;  %v1722_v3 = vld [vmem:[%s16724_s7 + $0x130] sm:$0xff]  ;;  %v11044_v48 = vadd.f32 %v1412_v60, %v16761_v2  ;;  %8240 = vmatprep.subr.bf16.mxu0 %v8239_v32  ;;  %v8243_v60 = vpack.c.bf16 %v1727_v26, %v1725_v31  ;;  %v1731_v32 = vld [vmem:[%s16724_s7 + $0x178] sm:$0xff]  ;;  %v1728_v26 = vld [vmem:[%s16724_s7 + $0x160] sm:$0xff] }
 0x1a5   : > { %16954 = vst [vmem:[#allocation27_spill] sm:$0xff] %v11011_v19  ;;  %v16758_v10 = vmax.f32 %v11011_v19, 0.0  ;;  %8186 = vmatpush1.bf16.msra.mxu1 %v8185_v4  ;;  %v8241_v53 = vpack.c.bf16 %v1722_v3, %v1720_v27 }
 0x1a6   : > { %16955 = vst [vmem:[#allocation28_spill] sm:$0xff] %v11019_v25  ;;  %v16759_v22 = vmax.f32 %v11019_v25, 0.0  ;;  %v1328_v42 = vpop.f32.mrb[20].mxu0  ;;  %v1418_v25 = vld [vmem:[%s10739_s27 + $0xb8] sm:$0xff] }
 0x1a7   : > { %v11040_v5 = vadd.f32 %v1413_v35, %v16758_v10  ;;  %v1330_v34 = vpop.f32.mrb[21].mxu0  ;;  %v11055_v35 = vadd.f32 %v1411_v1, %v16760_v46  ;;  %v11058_v10 = vadd.f32 %v1328_v42, %v10726_v41  ;;  %v1729_v1 = vld [vmem:[%s16724_s7 + $0x168] sm:$0xff]  ;;  %v1417_v46 = vld [vmem:[%s10739_s27 + $0xb0] sm:$0xff]  ;;  %8242 = vmatpush1.bf16.msra.mxu0 %v8241_v53 }
 0x1a8   : > { %v11048_v4 = vadd.f32 %v1414_v33, %v16759_v22  ;;  %v11051_v59 = vadd.f32 %v1330_v34, %v10723_v40  ;;  %v1724_v33 = vld [vmem:[%s16724_s7 + $0x140] sm:$0xff]  ;;  %v1416_v22 = vld [vmem:[%s10739_s27 + $0xa8] sm:$0xff]  ;;  %8244 = vmatprep.subr.bf16.mxu0 %v8243_v60  ;;  %v8247_v19 = vpack.c.bf16 %v1731_v32, %v1729_v1  ;;  %v1735_v60 = vld [vmem:[%s16724_s7 + $0x198] sm:$0xff] }
 0x1a9   : > { %16957 = vst [vmem:[#allocation30_spill] sm:$0xff] %v11058_v10  ;;  %v8189_v31 = vpack.c.bf16 %v11040_v5, %v11055_v35  ;;  %v8245_v58 = vpack.c.bf16 %v1726_v17, %v1724_v33  ;;  %v1733_v17 = vld [vmem:[%s16724_s7 + $0x188] sm:$0xff]  ;;  %v16962_v18 = vmax.f32 %v11058_v10, 0.0  ;;  %v1422_v10 = vld [vmem:[%s10739_s27 + $0xd8] sm:$0xff] }
 0x1aa   : > { %16956 = vst [vmem:[#allocation29_spill] sm:$0xff] %v11051_v59  ;;  %v1334_v34 = vpop.f32.mrb[22].mxu0  ;;  %v8187_v27 = vpack.c.bf16 %v11048_v4, %v11044_v48  ;;  %v16960_v32 = vmax.f32 %v11051_v59, 0.0 }
 0x1ab   : > { %v11075_v3 = vadd.f32 %v1334_v34, %v10726_v41  ;;  %v1336_v42 = vpop.f32.mrb[23].mxu0  ;;  %8246 = vmatpush1.bf16.msra.mxu0 %v8245_v58  ;;  %v1734_v58 = vld [vmem:[%s16724_s7 + $0x190] sm:$0xff] }
 0x1ac   : > { %v11083_v2 = vadd.f32 %v1336_v42, %v10723_v40  ;;  %8188 = vmatprep.subr.bf16.mxu1 %v8187_v27  ;;  %v1730_v42 = vld [vmem:[%s16724_s7 + $0x170] sm:$0xff]  ;;  %8248 = vmatprep.subr.bf16.mxu0 %v8247_v19 }
 0x1ad   : > { %16958 = vst [vmem:[#allocation31_spill] sm:$0xff] %v11075_v3  ;;  %v16771_v34 = vmax.f32 %v11075_v3, 0.0  ;;  %8190 = vmatpush1.bf16.msra.mxu1 %v8189_v31  ;;  %v11108_v31 = vadd.f32 %v1416_v22, %v16960_v32  ;;  %v8249_v29 = vpack.c.bf16 %v1730_v42, %v1728_v26  ;;  %v8251_v22 = vpack.c.bf16 %v1735_v60, %v1733_v17  ;;  %v1420_v60 = vld [vmem:[%s10739_s27 + $0xc8] sm:$0xff]  ;;  %v1421_v32 = vld [vmem:[%s10739_s27 + $0xd0] sm:$0xff]  ;;  %v1736_v17 = vld [vmem:[%s16724_s7 + $0x1a0] sm:$0xff] }
 0x1ae   : > { %16959 = vst [vmem:[#allocation32_spill] sm:$0xff] %v11083_v2  ;;  %v16772_v53 = vmax.f32 %v11083_v2, 0.0  ;;  %v1340_v33 = vpop.f32.mrb[24].mxu0 }
 0x1af   : > { %v11104_v27 = vadd.f32 %v1417_v46, %v16771_v34  ;;  %v1342_v1 = vpop.f32.mrb[25].mxu0  ;;  %v11119_v46 = vadd.f32 %v1415_v38, %v16962_v18  ;;  %v11122_v34 = vadd.f32 %v1340_v33, %v10726_v41  ;;  %v1737_v18 = vld [vmem:[%s16724_s7 + $0x1a8] sm:$0xff]  ;;  %v1739_v38 = vld [vmem:[%s16724_s7 + $0x1b8] sm:$0xff]  ;;  %8250 = vmatpush1.bf16.msra.mxu0 %v8249_v29 }
 0x1b0   : > { %v11112_v7 = vadd.f32 %v1418_v25, %v16772_v53  ;;  %v11115_v23 = vadd.f32 %v1342_v1, %v10723_v40  ;;  %v1732_v25 = vld [vmem:[%s16724_s7 + $0x180] sm:$0xff]  ;;  %8252 = vmatprep.subr.bf16.mxu0 %v8251_v22  ;;  %v8255_v59 = vpack.c.bf16 %v1739_v38, %v1737_v18  ;;  %v1743_v22 = vld [vmem:[%s16724_s7 + $0x1d8] sm:$0xff] }
 0x1b1   : > { %16963 = vst [vmem:[#allocation34_spill] sm:$0xff] %v11122_v34  ;;  %v8193_v33 = vpack.c.bf16 %v11104_v27, %v11119_v46  ;;  %v8253_v2 = vpack.c.bf16 %v1734_v58, %v1732_v25  ;;  %v1741_v58 = vld [vmem:[%s16724_s7 + $0x1c8] sm:$0xff]  ;;  %v16968_v8 = vmax.f32 %v11122_v34, 0.0 }
 0x1b2   : > { %16961 = vst [vmem:[#allocation33_spill] sm:$0xff] %v11115_v23  ;;  %v1346_v1 = vpop.f32.mrb[26].mxu0  ;;  %v8191_v26 = vpack.c.bf16 %v11112_v7, %v11108_v31  ;;  %v16966_v38 = vmax.f32 %v11115_v23, 0.0  ;;  %v1423_v23 = vld [vmem:[%s10739_s27 + $0xe0] sm:$0xff] }
 0x1b3   : > { %v11139_v19 = vadd.f32 %v1346_v1, %v10726_v41  ;;  %v1348_v42 = vpop.f32.mrb[27].mxu0  ;;  %8254 = vmatpush1.bf16.msra.mxu0 %v8253_v2  ;;  %v1742_v2 = vld [vmem:[%s16724_s7 + $0x1d0] sm:$0xff] }
 0x1b4   : > { %v11147_v53 = vadd.f32 %v1348_v42, %v10723_v40  ;;  %8192 = vmatprep.subr.bf16.mxu1 %v8191_v26  ;;  %v1738_v42 = vld [vmem:[%s16724_s7 + $0x1b0] sm:$0xff]  ;;  %8256 = vmatprep.subr.bf16.mxu0 %v8255_v59  ;;  %v1747_v59 = vld [vmem:[%s16724_s7 + $0x1f8] sm:$0xff] }
 0x1b5   : > { %16964 = vst [vmem:[#allocation35_spill] sm:$0xff] %v11139_v19  ;;  %v16783_v1 = vmax.f32 %v11139_v19, 0.0  ;;  %8194 = vmatpush1.bf16.msra.mxu1 %v8193_v33  ;;  %v11172_v33 = vadd.f32 %v1420_v60, %v16966_v38  ;;  %v8257_v20 = vpack.c.bf16 %v1738_v42, %v1736_v17  ;;  %v11183_v19 = vadd.f32 %v1419_v0, %v16968_v8  ;;  %v1745_v0 = vld [vmem:[%s16724_s7 + $0x1e8] sm:$0xff] }
 0x1b6   : > { %16965 = vst [vmem:[#allocation36_spill] sm:$0xff] %v11147_v53  ;;  %v16782_v29 = vmax.f32 %v11147_v53, 0.0  ;;  %v1352_v25 = vpop.f32.mrb[28].mxu0  ;;  %v8259_v60 = vpack.c.bf16 %v1743_v22, %v1741_v58  ;;  %v1425_v22 = vld [vmem:[%s10739_s27 + $0xf0] sm:$0xff]  ;;  %v1424_v53 = vld [vmem:[%s10739_s27 + $0xe8] sm:$0xff]  ;;  %v8263_v34 = vpack.c.bf16 %v1747_v59, %v1745_v0  ;;  %v11262_v0 = vld [vmem:[%s16973_s25 + $0x18] sm:$0xff] }
 0x1b7   : > { %v11168_v26 = vadd.f32 %v1421_v32, %v16783_v1  ;;  %v1354_v18 = vpop.f32.mrb[29].mxu0  ;;  %v11186_v32 = vadd.f32 %v1352_v25, %v10726_v41  ;;  %8258 = vmatpush1.bf16.msra.mxu0 %v8257_v20  ;;  %v11269_v59 = vld [vmem:[%s16973_s25 + $0x20] sm:$0xff] }
 0x1b8   : > { %v11176_v3 = vadd.f32 %v1422_v10, %v16782_v29  ;;  %v11179_v54 = vadd.f32 %v1354_v18, %v10723_v40  ;;  %v1740_v10 = vld [vmem:[%s16724_s7 + $0x1c0] sm:$0xff]  ;;  %8260 = vmatprep.subr.bf16.mxu0 %v8259_v60 }
 0x1b9   : > { %16969 = vst [vmem:[#allocation38_spill] sm:$0xff] %v11186_v32  ;;  %v8197_v25 = vpack.c.bf16 %v11168_v26, %v11183_v19  ;;  %v8261_v29 = vpack.c.bf16 %v1742_v2, %v1740_v10  ;;  %v16790_v1 = vmax.f32 %v11186_v32, 0.0 }
 0x1ba   : > { %16967 = vst [vmem:[#allocation37_spill] sm:$0xff] %v11179_v54  ;;  %v1358_v18 = vpop.f32.mrb[30].mxu0  ;;  %v8195_v8 = vpack.c.bf16 %v11176_v3, %v11172_v33 }
 0x1bb   : > { %v11203_v17 = vadd.f32 %v1358_v18, %v10726_v41  ;;  %v1360_v42 = vpop.f32.mrb[31].mxu0  ;;  %v1426_v18 = vld [vmem:[%s10739_s27 + $0xf8] sm:$0xff]  ;;  %8262 = vmatpush1.bf16.msra.mxu0 %v8261_v29  ;;  %v11232_v60 = vadd.f32 %v1423_v23, %v16790_v1  ;;  %v16974_v29 = vmov 0.0   ;;  %v11248_v23 = vld [vmem:[%s16973_s25 + $0x8] sm:$0xff]  ;;  %v1111_v1 = vld [vmem:[%s16973_s25 + $0x70] sm:$0xff] }
 0x1bc   : > { %v11210_v38 = vadd.f32 %v1360_v42, %v10723_v40  ;;  %8196 = vmatprep.subr.bf16.mxu1 %v8195_v8  ;;  %v16972_v40 = vmax.f32 %v11179_v54, 0.0  ;;  %8264 = vmatprep.subr.bf16.mxu0 %v8263_v34  ;;  %v11255_v34 = vld [vmem:[%s16973_s25 + $0x10] sm:$0xff]  ;;  %v11276_v42 = vld [vmem:[%s16973_s25 + $0x28] sm:$0xff] }
 0x1bd   : > { %16970 = vst [vmem:[#allocation39_spill] sm:$0xff] %v11203_v17  ;;  %v16789_v41 = vmax.f32 %v11203_v17, 0.0  ;;  %8198 = vmatpush1.bf16.msra.mxu1 %v8197_v25  ;;  %v11283_v25 = vld [vmem:[%s16973_s25 + $0x30] sm:$0xff] }
 0x1be   : > { %16971 = vst [vmem:[#allocation40_spill] sm:$0xff] %v11210_v38  ;;  %v16788_v62 = vmax.f32 %v11210_v38, 0.0  ;;  %v11224_v20 = vadd.f32 %v1424_v53, %v16972_v40  ;;  %v11241_v53 = vld [vmem:[%s16973_s25] sm:$0xff]  ;;  %v11304_v40 = vld [vmem:[%s16973_s25 + $0x48] sm:$0xff]  ;;  %v1112_v38 = vld [vmem:[%s16973_s25 + $0x78] sm:$0xff] }
 0x1bf   : > { %v11220_v58 = vadd.f32 %v1425_v22, %v16789_v41  ;;  %v11290_v22 = vld [vmem:[%s16973_s25 + $0x38] sm:$0xff]  ;;  %v1110_v41 = vld [vmem:[%s16973_s25 + $0x68] sm:$0xff]  ;;  %v1746_v17 = vld [vmem:[%s16724_s7 + $0x1f0] sm:$0xff] }
 0x1c0   : > { %v11228_v10 = vadd.f32 %v1426_v18, %v16788_v62  ;;  %v11297_v18 = vld [vmem:[%s16973_s25 + $0x40] sm:$0xff] }
 0x1c1   : > { %v8201_v8 = vpack.c.bf16 %v11220_v58, %v11232_v60  ;;  %v11325_v62 = vld [vmem:[%s16973_s25 + $0x60] sm:$0xff] }
 0x1c2   : > { %v8199_v2 = vpack.c.bf16 %v11228_v10, %v11224_v20 }
 0x1c4   : > { %8200 = vmatprep.subr.bf16.mxu1 %v8199_v2  ;;  %v11311_v2 = vld [vmem:[%s16973_s25 + $0x50] sm:$0xff] }
 0x1c5   : > { %8202 = vmatpush1.bf16.msra.mxu1 %v8201_v8  ;;  %v11318_v8 = vld [vmem:[%s16973_s25 + $0x58] sm:$0xff] }
 0x1c8   : > { %1524 = vmatmul.mubr.f32.vlgmr.msra.gmra.mrb[0].mxu1 %v11241_v53 }
 0x1c9   : > { %1529 = vmatprep.mubr.f32.mxu1 %v16974_v29 }
 0x1cc   : > { %1530 = vmatmul.mubr.f32.gmra.mrb[2].mxu1 %v11248_v23 }
 0x1cd   : > { %1535 = vmatprep.mubr.f32.mxu1 %v16974_v29 }
 0x1d0   : > { %1536 = vmatmul.mubr.f32.gmra.mrb[4].mxu1 %v11255_v34 }
 0x1d1   : > { %1541 = vmatprep.mubr.f32.mxu1 %v16974_v29 }
 0x1d4   : > { %1542 = vmatmul.mubr.f32.gmra.mrb[6].mxu1 %v11262_v0 }
 0x1d5   : > { %1547 = vmatprep.mubr.f32.mxu1 %v16974_v29 }
 0x1d8   : > { %1548 = vmatmul.mubr.f32.gmra.mrb[8].mxu1 %v11269_v59 }
 0x1d9   : > { %1553 = vmatprep.mubr.f32.mxu1 %v16974_v29 }
 0x1dc   : > { %1554 = vmatmul.mubr.f32.gmra.mrb[10].mxu1 %v11276_v42 }
 0x1dd   : > { %1559 = vmatprep.mubr.f32.mxu1 %v16974_v29 }
 0x1e0   : > { %1560 = vmatmul.mubr.f32.gmra.mrb[12].mxu1 %v11283_v25 }
 0x1e1   : > { %1565 = vmatprep.mubr.f32.mxu1 %v16974_v29 }
 0x1e4   : > { %1566 = vmatmul.mubr.f32.gmra.mrb[14].mxu1 %v11290_v22 }
 0x1e5   : > { %1571 = vmatprep.mubr.f32.mxu1 %v16974_v29 }
 0x1e8   : > { %1572 = vmatmul.mubr.f32.gmra.mrb[16].mxu1 %v11297_v18 }
 0x1e9   : > { %1577 = vmatprep.mubr.f32.mxu1 %v16974_v29 }
 0x1ec   : > { %1578 = vmatmul.mubr.f32.gmra.mrb[18].mxu1 %v11304_v40 }
 0x1ed   : > { %1583 = vmatprep.mubr.f32.mxu1 %v16974_v29 }
 0x1f0   : > { %1584 = vmatmul.mubr.f32.gmra.mrb[20].mxu1 %v11311_v2 }
 0x1f1   : > { %1589 = vmatprep.mubr.f32.mxu1 %v16974_v29 }
 0x1f4   : > { %1590 = vmatmul.mubr.f32.gmra.mrb[22].mxu1 %v11318_v8 }
 0x1f5   : > { %1595 = vmatprep.mubr.f32.mxu1 %v16974_v29 }
 0x1f8   : > { %1596 = vmatmul.mubr.f32.gmra.mrb[24].mxu1 %v11325_v62 }
 0x1f9   : > { %1601 = vmatprep.mubr.f32.mxu1 %v16974_v29 }
 0x1fc   : > { %1602 = vmatmul.mubr.f32.gmra.mrb[26].mxu1 %v1110_v41  ;;  %v1744_v41 = vld [vmem:[%s16724_s7 + $0x1e0] sm:$0xff] }
 0x1fd   : > { %1607 = vmatprep.mubr.f32.mxu1 %v16974_v29  ;;  %v8265_v32 = vpack.c.bf16 %v1746_v17, %v1744_v41  ;;  %v1627_v17 = vld [vmem:[%s16723_s6 + $0x38] sm:$0xff] }
 0x1ff   : > { %8266 = vmatpush1.bf16.msra.mxu0 %v8265_v32  ;;  %v1625_v32 = vld [vmem:[%s16723_s6 + $0x28] sm:$0xff] }
 0x200   : > { %1608 = vmatmul.mubr.f32.gmra.mrb[28].mxu1 %v1111_v1  ;;  %v1621_v1 = vld [vmem:[%s16723_s6 + $0x8] sm:$0xff] }
 0x201   : > { %1613 = vmatprep.mubr.f32.mxu1 %v16974_v29 }
 0x204   : > { %1614 = vmatmul.mubr.f32.gmra.mrb[30].mxu1 %v1112_v38  ;;  %v1623_v38 = vld [vmem:[%s16723_s6 + $0x18] sm:$0xff] }
 0x205   : > { %2210 = vmatprep.mubr.f32.mxu1 %v16974_v29  ;;  %v8267_v54 = vpack.c.bf16 %v1623_v38, %v1621_v1  ;;  %v1624_v38 = vld [vmem:[%s16723_s6 + $0x20] sm:$0xff] }
 0x206   : > { %v8273_v57 = vpack.c.bf16 %v1626_v15, %v1624_v38  ;;  %v1635_v15 = vld [vmem:[%s16723_s6 + $0x78] sm:$0xff]  ;;  %v1634_v38 = vld [vmem:[%s16723_s6 + $0x70] sm:$0xff] }
 0x207   : > { %8268 = vmatprep.subr.bf16.mxu0 %v8267_v54  ;;  %v8271_v54 = vpack.c.bf16 %v1627_v17, %v1625_v32  ;;  %v8275_v17 = vpack.c.bf16 %v1631_v52, %v1629_v11 }
 0x29b   : > { %v1525_v41 = vpop.f32.mrb[0].mxu1 }
 0x29c   : > { %v1527_v1 = vpop.f32.mrb[1].mxu1 }
 0x29d   : > { %1812 = vmatprep.mubr.f32.mxu0 %v1527_v1  ;;  %v1630_v1 = vld [vmem:[%s16723_s6 + $0x50] sm:$0xff] }
 0x29e   : > { %1813 = vmatmul.mubr.f32.vlgmr.msra.gmra.mrb[32].mxu0 %v1525_v41  ;;  %v8277_v52 = vpack.c.bf16 %v1630_v1, %v1628_v47  ;;  %v8279_v41 = vpack.c.bf16 %v1635_v15, %v1633_v44  ;;  %v1639_v47 = vld [vmem:[%s16723_s6 + $0x98] sm:$0xff]  ;;  %v1636_v1 = vld [vmem:[%s16723_s6 + $0x80] sm:$0xff]  ;;  %v1638_v15 = vld [vmem:[%s16723_s6 + $0x90] sm:$0xff] }
 0x29f   : > { %v1531_v30 = vpop.f32.mrb[2].mxu1  ;;  %8270 = vmatpush1.bf16.msra.mxu0 %v8269_v24 }
 0x2a0   : > { %v1533_v32 = vpop.f32.mrb[3].mxu1  ;;  %8272 = vmatprep.subr.bf16.mxu0 %v8271_v54  ;;  %v1632_v54 = vld [vmem:[%s16723_s6 + $0x60] sm:$0xff] }
 0x2a1   : > { %1818 = vmatprep.mubr.f32.mxu0 %v1533_v32  ;;  %v1637_v32 = vld [vmem:[%s16723_s6 + $0x88] sm:$0xff]  ;;  %v8281_v44 = vpack.c.bf16 %v1634_v38, %v1632_v54 }
 0x2a2   : > { %1819 = vmatmul.mubr.f32.gmra.mrb[34].mxu0 %v1531_v30 }
 0x2a3   : > { %v1537_v24 = vpop.f32.mrb[4].mxu1  ;;  %8274 = vmatpush1.bf16.msra.mxu0 %v8273_v57 }
 0x2a4   : > { %v1539_v11 = vpop.f32.mrb[5].mxu1  ;;  %8276 = vmatprep.subr.bf16.mxu0 %v8275_v17  ;;  %v8283_v17 = vpack.c.bf16 %v1639_v47, %v1637_v32  ;;  %v1640_v32 = vld [vmem:[%s16723_s6 + $0xa0] sm:$0xff]  ;;  %v1642_v47 = vld [vmem:[%s16723_s6 + $0xb0] sm:$0xff] }
 0x2a5   : > { %1824 = vmatprep.mubr.f32.mxu0 %v1539_v11  ;;  %v1641_v11 = vld [vmem:[%s16723_s6 + $0xa8] sm:$0xff] }
 0x2a6   : > { %1825 = vmatmul.mubr.f32.gmra.mrb[36].mxu0 %v1537_v24  ;;  %v1643_v24 = vld [vmem:[%s16723_s6 + $0xb8] sm:$0xff] }
 0x2a7   : > { %v1543_v30 = vpop.f32.mrb[6].mxu1  ;;  %8278 = vmatpush1.bf16.msra.mxu0 %v8277_v52  ;;  %v8287_v38 = vpack.c.bf16 %v1643_v24, %v1641_v11  ;;  %v1644_v11 = vld [vmem:[%s16723_s6 + $0xc0] sm:$0xff]  ;;  %v1646_v24 = vld [vmem:[%s16723_s6 + $0xd0] sm:$0xff] }
 0x2a8   : > { %v1545_v57 = vpop.f32.mrb[7].mxu1  ;;  %8280 = vmatprep.subr.bf16.mxu0 %v8279_v41  ;;  %v8285_v41 = vpack.c.bf16 %v1638_v15, %v1636_v1 }
 0x2a9   : > { %1830 = vmatprep.mubr.f32.mxu0 %v1545_v57  ;;  %v1645_v57 = vld [vmem:[%s16723_s6 + $0xc8] sm:$0xff] }
 0x2aa   : > { %1831 = vmatmul.mubr.f32.gmra.mrb[38].mxu0 %v1543_v30  ;;  %v1647_v30 = vld [vmem:[%s16723_s6 + $0xd8] sm:$0xff] }
 0x2ab   : > { %v1549_v52 = vpop.f32.mrb[8].mxu1  ;;  %8282 = vmatpush1.bf16.msra.mxu0 %v8281_v44  ;;  %v8291_v15 = vpack.c.bf16 %v1647_v30, %v1645_v57  ;;  %v1648_v57 = vld [vmem:[%s16723_s6 + $0xe0] sm:$0xff]  ;;  %v1650_v30 = vld [vmem:[%s16723_s6 + $0xf0] sm:$0xff] }
 0x2ac   : > { %v1551_v54 = vpop.f32.mrb[9].mxu1  ;;  %8284 = vmatprep.subr.bf16.mxu0 %v8283_v17  ;;  %v8289_v17 = vpack.c.bf16 %v1642_v47, %v1640_v32 }
 0x2ad   : > { %1836 = vmatprep.mubr.f32.mxu0 %v1551_v54  ;;  %v1649_v54 = vld [vmem:[%s16723_s6 + $0xe8] sm:$0xff] }
 0x2ae   : > { %1837 = vmatmul.mubr.f32.gmra.mrb[40].mxu0 %v1549_v52  ;;  %v1651_v52 = vld [vmem:[%s16723_s6 + $0xf8] sm:$0xff] }
 0x2af   : > { %v1555_v44 = vpop.f32.mrb[10].mxu1  ;;  %8286 = vmatpush1.bf16.msra.mxu0 %v8285_v41  ;;  %v8295_v47 = vpack.c.bf16 %v1651_v52, %v1649_v54  ;;  %v1652_v54 = vld [vmem:[%s16723_s6 + $0x100] sm:$0xff]  ;;  %v1654_v52 = vld [vmem:[%s16723_s6 + $0x110] sm:$0xff] }
 0x2b0   : > { %v1557_v1 = vpop.f32.mrb[11].mxu1  ;;  %8288 = vmatprep.subr.bf16.mxu0 %v8287_v38  ;;  %v8293_v38 = vpack.c.bf16 %v1646_v24, %v1644_v11 }
 0x2b1   : > { %1842 = vmatprep.mubr.f32.mxu0 %v1557_v1  ;;  %v1653_v1 = vld [vmem:[%s16723_s6 + $0x108] sm:$0xff] }
 0x2b2   : > { %1843 = vmatmul.mubr.f32.gmra.mrb[42].mxu0 %v1555_v44  ;;  %v1655_v44 = vld [vmem:[%s16723_s6 + $0x118] sm:$0xff] }
 0x2b3   : > { %v1561_v41 = vpop.f32.mrb[12].mxu1  ;;  %8290 = vmatpush1.bf16.msra.mxu0 %v8289_v17  ;;  %v8299_v24 = vpack.c.bf16 %v1655_v44, %v1653_v1  ;;  %v1656_v1 = vld [vmem:[%s16723_s6 + $0x120] sm:$0xff]  ;;  %v1658_v44 = vld [vmem:[%s16723_s6 + $0x130] sm:$0xff] }
 0x2b4   : > { %v1563_v32 = vpop.f32.mrb[13].mxu1  ;;  %8292 = vmatprep.subr.bf16.mxu0 %v8291_v15  ;;  %v8297_v15 = vpack.c.bf16 %v1650_v30, %v1648_v57 }
 0x2b5   : > { %1848 = vmatprep.mubr.f32.mxu0 %v1563_v32  ;;  %v1657_v32 = vld [vmem:[%s16723_s6 + $0x128] sm:$0xff] }
 0x2b6   : > { %1849 = vmatmul.mubr.f32.gmra.mrb[44].mxu0 %v1561_v41  ;;  %v1659_v41 = vld [vmem:[%s16723_s6 + $0x138] sm:$0xff] }
 0x2b7   : > { %v1567_v17 = vpop.f32.mrb[14].mxu1  ;;  %8294 = vmatpush1.bf16.msra.mxu0 %v8293_v38  ;;  %v8303_v30 = vpack.c.bf16 %v1659_v41, %v1657_v32  ;;  %v1660_v32 = vld [vmem:[%s16723_s6 + $0x140] sm:$0xff]  ;;  %v1662_v41 = vld [vmem:[%s16723_s6 + $0x150] sm:$0xff] }
 0x2b8   : > { %v1569_v11 = vpop.f32.mrb[15].mxu1  ;;  %8296 = vmatprep.subr.bf16.mxu0 %v8295_v47  ;;  %v8301_v47 = vpack.c.bf16 %v1654_v52, %v1652_v54 }
 0x2b9   : > { %1854 = vmatprep.mubr.f32.mxu0 %v1569_v11  ;;  %v1661_v11 = vld [vmem:[%s16723_s6 + $0x148] sm:$0xff] }
 0x2ba   : > { %1855 = vmatmul.mubr.f32.gmra.mrb[46].mxu0 %v1567_v17  ;;  %v1663_v17 = vld [vmem:[%s16723_s6 + $0x158] sm:$0xff] }
 0x2bb   : > { %v1573_v38 = vpop.f32.mrb[16].mxu1  ;;  %8298 = vmatpush1.bf16.msra.mxu0 %v8297_v15  ;;  %v8307_v52 = vpack.c.bf16 %v1663_v17, %v1661_v11  ;;  %v1664_v11 = vld [vmem:[%s16723_s6 + $0x160] sm:$0xff]  ;;  %v1666_v17 = vld [vmem:[%s16723_s6 + $0x170] sm:$0xff] }
 0x2bc   : > { %v1575_v57 = vpop.f32.mrb[17].mxu1  ;;  %8300 = vmatprep.subr.bf16.mxu0 %v8299_v24  ;;  %v8305_v24 = vpack.c.bf16 %v1658_v44, %v1656_v1 }
 0x2bd   : > { %1860 = vmatprep.mubr.f32.mxu0 %v1575_v57  ;;  %v1665_v57 = vld [vmem:[%s16723_s6 + $0x168] sm:$0xff] }
 0x2be   : > { %1861 = vmatmul.mubr.f32.gmra.mrb[48].mxu0 %v1573_v38  ;;  %v1667_v38 = vld [vmem:[%s16723_s6 + $0x178] sm:$0xff] }
 0x2bf   : > { %v1579_v15 = vpop.f32.mrb[18].mxu1  ;;  %8302 = vmatpush1.bf16.msra.mxu0 %v8301_v47  ;;  %v8311_v44 = vpack.c.bf16 %v1667_v38, %v1665_v57  ;;  %v1668_v57 = vld [vmem:[%s16723_s6 + $0x180] sm:$0xff]  ;;  %v1670_v38 = vld [vmem:[%s16723_s6 + $0x190] sm:$0xff] }
 0x2c0   : > { %v1581_v54 = vpop.f32.mrb[19].mxu1  ;;  %8304 = vmatprep.subr.bf16.mxu0 %v8303_v30  ;;  %v8309_v30 = vpack.c.bf16 %v1662_v41, %v1660_v32 }
 0x2c1   : > { %1866 = vmatprep.mubr.f32.mxu0 %v1581_v54  ;;  %v1669_v54 = vld [vmem:[%s16723_s6 + $0x188] sm:$0xff] }
 0x2c2   : > { %1867 = vmatmul.mubr.f32.gmra.mrb[50].mxu0 %v1579_v15  ;;  %v1671_v15 = vld [vmem:[%s16723_s6 + $0x198] sm:$0xff] }
 0x2c3   : > { %v1585_v47 = vpop.f32.mrb[20].mxu1  ;;  %8306 = vmatpush1.bf16.msra.mxu0 %v8305_v24  ;;  %v8315_v41 = vpack.c.bf16 %v1671_v15, %v1669_v54  ;;  %v1672_v54 = vld [vmem:[%s16723_s6 + $0x1a0] sm:$0xff]  ;;  %v1674_v15 = vld [vmem:[%s16723_s6 + $0x1b0] sm:$0xff] }
 0x2c4   : > { %v1587_v1 = vpop.f32.mrb[21].mxu1  ;;  %8308 = vmatprep.subr.bf16.mxu0 %v8307_v52  ;;  %v8313_v52 = vpack.c.bf16 %v1666_v17, %v1664_v11 }
 0x2c5   : > { %1872 = vmatprep.mubr.f32.mxu0 %v1587_v1  ;;  %v1673_v1 = vld [vmem:[%s16723_s6 + $0x1a8] sm:$0xff] }
 0x2c6   : > { %1873 = vmatmul.mubr.f32.gmra.mrb[52].mxu0 %v1585_v47  ;;  %v1675_v47 = vld [vmem:[%s16723_s6 + $0x1b8] sm:$0xff] }
 0x2c7   : > { %v1591_v24 = vpop.f32.mrb[22].mxu1  ;;  %8310 = vmatpush1.bf16.msra.mxu0 %v8309_v30  ;;  %v8319_v17 = vpack.c.bf16 %v1675_v47, %v1673_v1  ;;  %v1676_v1 = vld [vmem:[%s16723_s6 + $0x1c0] sm:$0xff]  ;;  %v1678_v47 = vld [vmem:[%s16723_s6 + $0x1d0] sm:$0xff] }
 0x2c8   : > { %v1593_v32 = vpop.f32.mrb[23].mxu1  ;;  %8312 = vmatprep.subr.bf16.mxu0 %v8311_v44  ;;  %v8317_v44 = vpack.c.bf16 %v1670_v38, %v1668_v57 }
 0x2c9   : > { %1878 = vmatprep.mubr.f32.mxu0 %v1593_v32  ;;  %v1677_v32 = vld [vmem:[%s16723_s6 + $0x1c8] sm:$0xff] }
 0x2ca   : > { %1879 = vmatmul.mubr.f32.gmra.mrb[54].mxu0 %v1591_v24  ;;  %v1679_v24 = vld [vmem:[%s16723_s6 + $0x1d8] sm:$0xff] }
 0x2cb   : > { %v1597_v30 = vpop.f32.mrb[24].mxu1  ;;  %8314 = vmatpush1.bf16.msra.mxu0 %v8313_v52  ;;  %v8323_v38 = vpack.c.bf16 %v1679_v24, %v1677_v32  ;;  %v1680_v32 = vld [vmem:[%s16723_s6 + $0x1e0] sm:$0xff]  ;;  %v1682_v24 = vld [vmem:[%s16723_s6 + $0x1f0] sm:$0xff] }
 0x2cc   : > { %v1599_v11 = vpop.f32.mrb[25].mxu1  ;;  %8316 = vmatprep.subr.bf16.mxu0 %v8315_v41  ;;  %v8321_v41 = vpack.c.bf16 %v1674_v15, %v1672_v54  ;;  %v8329_v45 = vpack.c.bf16 %v1682_v24, %v1680_v32 }
 0x2cd   : > { %1884 = vmatprep.mubr.f32.mxu0 %v1599_v11  ;;  %v1681_v11 = vld [vmem:[%s16723_s6 + $0x1e8] sm:$0xff] }
 0x2ce   : > { %1885 = vmatmul.mubr.f32.gmra.mrb[56].mxu0 %v1597_v30  ;;  %v1683_v30 = vld [vmem:[%s16723_s6 + $0x1f8] sm:$0xff] }
 0x2cf   : > { %v1603_v52 = vpop.f32.mrb[26].mxu1  ;;  %8318 = vmatpush1.bf16.msra.mxu0 %v8317_v44  ;;  %v8327_v15 = vpack.c.bf16 %v1683_v30, %v1681_v11 }
 0x2d0   : > { %v1605_v57 = vpop.f32.mrb[27].mxu1  ;;  %8320 = vmatprep.subr.bf16.mxu0 %v8319_v17  ;;  %v8325_v17 = vpack.c.bf16 %v1678_v47, %v1676_v1 }
 0x2d1   : > { %1890 = vmatprep.mubr.f32.mxu0 %v1605_v57 }
 0x2d2   : > { %1891 = vmatmul.mubr.f32.gmra.mrb[58].mxu0 %v1603_v52 }
 0x2d3   : > { %v1609_v44 = vpop.f32.mrb[28].mxu1  ;;  %8322 = vmatpush1.bf16.msra.mxu0 %v8321_v41 }
 0x2d4   : > { %v1611_v54 = vpop.f32.mrb[29].mxu1  ;;  %8324 = vmatprep.subr.bf16.mxu0 %v8323_v38 }
 0x2d5   : > { %1896 = vmatprep.mubr.f32.mxu0 %v1611_v54 }
 0x2d6   : > { %1897 = vmatmul.mubr.f32.gmra.mrb[60].mxu0 %v1609_v44 }
 0x2d7   : > { %v1615_v57 = vpop.f32.mrb[30].mxu1  ;;  %8326 = vmatpush1.bf16.msra.mxu0 %v8325_v17 }
 0x2d8   : > { %v1617_v52 = vpop.f32.mrb[31].mxu1  ;;  %8328 = vmatprep.subr.bf16.mxu0 %v8327_v15 }
 0x2d9   : > { %1902 = vmatprep.mubr.f32.mxu0 %v1617_v52 }
 0x2da   : > { %1903 = vmatmul.mubr.f32.gmra.mrb[62].mxu0 %v1615_v57 }
 0x2db   : > { %8330 = vmatpush1.bf16.msra.mxu0 %v8329_v45  ;;  %1973 = vmatprep.mubr.f32.mxu0 %v10791_v12 }
 0x2de   : > { %1974 = vmatmul.mubr.f32.vlgmr.msra.gmra.mrb[32].mxu0 %v10802_v16 }
 0x2df   : > { %1979 = vmatprep.mubr.f32.mxu0 %v10795_v13 }
 0x2e2   : > { %1980 = vmatmul.mubr.f32.gmra.mrb[34].mxu0 %v10781_v9 }
 0x2e3   : > { %1985 = vmatprep.mubr.f32.mxu0 %v10852_v55 }
 0x2e6   : > { %1986 = vmatmul.mubr.f32.gmra.mrb[36].mxu0 %v10863_v61 }
 0x2e7   : > { %1991 = vmatprep.mubr.f32.mxu0 %v10856_v56 }
 0x2ea   : > { %1992 = vmatmul.mubr.f32.gmra.mrb[38].mxu0 %v10848_v51 }
 0x2eb   : > { %1997 = vmatprep.mubr.f32.mxu0 %v10916_v49 }
 0x2ee   : > { %1998 = vmatmul.mubr.f32.gmra.mrb[40].mxu0 %v10927_v63 }
 0x2ef   : > { %2003 = vmatprep.mubr.f32.mxu0 %v10920_v50 }
 0x2f2   : > { %2004 = vmatmul.mubr.f32.gmra.mrb[42].mxu0 %v10912_v43 }
 0x2f3   : > { %2009 = vmatprep.mubr.f32.mxu0 %v10980_v14 }
 0x2f6   : > { %2010 = vmatmul.mubr.f32.gmra.mrb[44].mxu0 %v10991_v28 }
 0x2f7   : > { %2015 = vmatprep.mubr.f32.mxu0 %v10984_v21 }
 0x2fa   : > { %2016 = vmatmul.mubr.f32.gmra.mrb[46].mxu0 %v10976_v6 }
 0x2fb   : > { %2021 = vmatprep.mubr.f32.mxu0 %v11044_v48 }
 0x2fe   : > { %2022 = vmatmul.mubr.f32.gmra.mrb[48].mxu0 %v11055_v35 }
 0x2ff   : > { %2027 = vmatprep.mubr.f32.mxu0 %v11048_v4 }
 0x302   : > { %2028 = vmatmul.mubr.f32.gmra.mrb[50].mxu0 %v11040_v5 }
 0x303   : > { %2033 = vmatprep.mubr.f32.mxu0 %v11108_v31 }
 0x306   : > { %2034 = vmatmul.mubr.f32.gmra.mrb[52].mxu0 %v11119_v46 }
 0x307   : > { %2039 = vmatprep.mubr.f32.mxu0 %v11112_v7  ;;  %v2070_v7 = vld [vmem:[%s16725_s8] sm:$0x3] }
 0x308   : > { %v11575_v9 = vrot.slane %v2070_v7, %v10713_v37  ;;  %v11578_v12 = vrot.slane %v2070_v7, %v10719_v39 }
 0x30a   : > { %2040 = vmatmul.mubr.f32.gmra.mrb[54].mxu0 %v11104_v27 }
 0x30b   : > { %2045 = vmatprep.mubr.f32.mxu0 %v11172_v33 }
 0x30e   : > { %2046 = vmatmul.mubr.f32.gmra.mrb[56].mxu0 %v11183_v19 }
 0x30f   : > { %2051 = vmatprep.mubr.f32.mxu0 %v11176_v3 }
 0x312   : > { %2052 = vmatmul.mubr.f32.gmra.mrb[58].mxu0 %v11168_v26 }
 0x313   : > { %2057 = vmatprep.mubr.f32.mxu0 %v11224_v20 }
 0x316   : > { %2058 = vmatmul.mubr.f32.gmra.mrb[60].mxu0 %v11232_v60 }
 0x317   : > { %2063 = vmatprep.mubr.f32.mxu0 %v11228_v10 }
 0x31a   : > { %2064 = vmatmul.mubr.f32.gmra.mrb[62].mxu0 %v11220_v58 }
 0x3b1   : > { %v1975_v45 = vpop.f32.mrb[32].mxu0 }
 0x3b2   : > { %v1977_v13 = vpop.f32.mrb[33].mxu0  ;;  %v11584_v55 = vadd.f32 %v11578_v12, %v1975_v45 }
 0x3b3   : > { %v11581_v16 = vadd.f32 %v11575_v9, %v1977_v13 }
 0x3b4   : > { %v2114_v14 = vmax.f32 %v11584_v55, 0.0 }
 0x3b5   : > { %v1981_v51 = vpop.f32.mrb[34].mxu0  ;;  %v2115_v50 = vmax.f32 %v11581_v16, 0.0 }
 0x3b6   : > { %v11587_v56 = vadd.f32 %v11578_v12, %v1981_v51  ;;  %v1983_v61 = vpop.f32.mrb[35].mxu0 }
 0x3b7   : > { %v11590_v43 = vadd.f32 %v11575_v9, %v1983_v61 }
 0x3b8   : > { %v16830_v49 = vmax.f32 %v11587_v56, 0.0 }
 0x3b9   : > { %v2117_v63 = vmax.f32 %v11590_v43, 0.0  ;;  %v1987_v6 = vpop.f32.mrb[36].mxu0 }
 0x3ba   : > { %v1989_v21 = vpop.f32.mrb[37].mxu0  ;;  %v8333_v5 = vpack.c.bf16 %v16830_v49, %v2114_v14  ;;  %v11608_v35 = vadd.f32 %v11578_v12, %v1987_v6  ;;  %v2376_v49 = vld [vmem:[%s16727_s10 + $0x28] sm:$0xff] }
 0x3bb   : > { %v8331_v28 = vpack.c.bf16 %v2117_v63, %v2115_v50  ;;  %v11605_v48 = vadd.f32 %v11575_v9, %v1989_v21 }
 0x3bc   : > { %v16824_v58 = vmax.f32 %v11608_v35, 0.0 }
 0x3bd   : > { %v1993_v4 = vpop.f32.mrb[38].mxu0  ;;  %8332 = vmatprep.subr.bf16.mxu1 %v8331_v28  ;;  %v16825_v19 = vmax.f32 %v11605_v48, 0.0 }
 0x3be   : > { %v11611_v3 = vadd.f32 %v11578_v12, %v1993_v4  ;;  %v1995_v27 = vpop.f32.mrb[39].mxu0  ;;  %8334 = vmatpush1.bf16.msra.mxu1 %v8333_v5 }
 0x3bf   : > { %v11614_v31 = vadd.f32 %v11575_v9, %v1995_v27 }
 0x3c0   : > { %v16822_v46 = vmax.f32 %v11611_v3, 0.0  ;;  %v16979_v16 = vmax.f32 %v11611_v3, 0.0 }
 0x3c1   : > { %v16823_v26 = vmax.f32 %v11614_v31, 0.0  ;;  %v1999_v33 = vpop.f32.mrb[40].mxu0 }
 0x3c2   : > { %v2001_v20 = vpop.f32.mrb[41].mxu0  ;;  %v8337_v60 = vpack.c.bf16 %v16822_v46, %v16824_v58  ;;  %v11632_v1 = vadd.f32 %v11578_v12, %v1999_v33 }
 0x3c3   : > { %v8335_v10 = vpack.c.bf16 %v16823_v26, %v16825_v19  ;;  %v11629_v41 = vadd.f32 %v11575_v9, %v2001_v20 }
 0x3c4   : > { %v16816_v32 = vmax.f32 %v11632_v1, 0.0  ;;  %v16981_v43 = vmax.f32 %v11632_v1, 0.0 }
 0x3c5   : > { %v2005_v38 = vpop.f32.mrb[42].mxu0  ;;  %8336 = vmatprep.subr.bf16.mxu1 %v8335_v10  ;;  %v16817_v17 = vmax.f32 %v11629_v41, 0.0  ;;  %v16980_v55 = vmax.f32 %v11629_v41, 0.0 }
 0x3c6   : > { %v11635_v47 = vadd.f32 %v11578_v12, %v2005_v38  ;;  %v2007_v11 = vpop.f32.mrb[43].mxu0  ;;  %8338 = vmatpush1.bf16.msra.mxu1 %v8337_v60 }
 0x3c7   : > { %v11638_v30 = vadd.f32 %v11575_v9, %v2007_v11 }
 0x3c8   : > { %v16814_v44 = vmax.f32 %v11635_v47, 0.0 }
 0x3c9   : > { %v16815_v54 = vmax.f32 %v11638_v30, 0.0  ;;  %v2011_v15 = vpop.f32.mrb[44].mxu0 }
 0x3ca   : > { %v2013_v24 = vpop.f32.mrb[45].mxu0  ;;  %v8341_v52 = vpack.c.bf16 %v16814_v44, %v16816_v32  ;;  %v11656_v13 = vadd.f32 %v11578_v12, %v2011_v15 }
 0x3cb   : > { %v8339_v57 = vpack.c.bf16 %v16815_v54, %v16817_v17  ;;  %v11653_v7 = vadd.f32 %v11575_v9, %v2013_v24 }
 0x3cc   : > { %v16808_v27 = vmax.f32 %v11656_v13, 0.0 }
 0x3cd   : > { %v2017_v45 = vpop.f32.mrb[46].mxu0  ;;  %8340 = vmatprep.subr.bf16.mxu1 %v8339_v57  ;;  %v16809_v28 = vmax.f32 %v11653_v7, 0.0 }
 0x3ce   : > { %v11659_v51 = vadd.f32 %v11578_v12, %v2017_v45  ;;  %v2019_v61 = vpop.f32.mrb[47].mxu0  ;;  %8342 = vmatpush1.bf16.msra.mxu1 %v8341_v52 }
 0x3cf   : > { %v11662_v6 = vadd.f32 %v11575_v9, %v2019_v61 }
 0x3d0   : > { %v16806_v21 = vmax.f32 %v11659_v51, 0.0 }
 0x3d1   : > { %v16807_v5 = vmax.f32 %v11662_v6, 0.0  ;;  %v2023_v4 = vpop.f32.mrb[48].mxu0 }
 0x3d2   : > { %v2025_v33 = vpop.f32.mrb[49].mxu0  ;;  %v8345_v10 = vpack.c.bf16 %v16806_v21, %v16808_v27  ;;  %v11680_v11 = vadd.f32 %v11578_v12, %v2023_v4 }
 0x3d3   : > { %v8343_v20 = vpack.c.bf16 %v16807_v5, %v16809_v28  ;;  %v11677_v60 = vadd.f32 %v11575_v9, %v2025_v33 }
 0x3d5   : > { %v2029_v38 = vpop.f32.mrb[50].mxu0  ;;  %8344 = vmatprep.subr.bf16.mxu1 %v8343_v20  ;;  %v16811_v45 = vmax.f32 %v11677_v60, 0.0  ;;  %v16813_v20 = vmax.f32 %v11680_v11, 0.0  ;;  %v16988_v3 = vmax.f32 %v11677_v60, 0.0 }
 0x3d6   : > { %v11683_v15 = vadd.f32 %v11578_v12, %v2029_v38  ;;  %v2031_v24 = vpop.f32.mrb[51].mxu0  ;;  %8346 = vmatpush1.bf16.msra.mxu1 %v8345_v10 }
 0x3d7   : > { %v11686_v57 = vadd.f32 %v11575_v9, %v2031_v24 }
 0x3d8   : > { %v16812_v52 = vmax.f32 %v11683_v15, 0.0  ;;  %v16991_v1 = vmax.f32 %v11683_v15, 0.0 }
 0x3d9   : > { %v16810_v61 = vmax.f32 %v11686_v57, 0.0  ;;  %v2035_v33 = vpop.f32.mrb[52].mxu0  ;;  %v16990_v41 = vmax.f32 %v11686_v57, 0.0 }
 0x3da   : > { %v2037_v21 = vpop.f32.mrb[53].mxu0  ;;  %v8349_v10 = vpack.c.bf16 %v16812_v52, %v16813_v20  ;;  %v11704_v5 = vadd.f32 %v11578_v12, %v2035_v33 }
 0x3db   : > { %v8347_v4 = vpack.c.bf16 %v16810_v61, %v16811_v45  ;;  %v11701_v38 = vadd.f32 %v11575_v9, %v2037_v21 }
 0x3dd   : > { %v2041_v24 = vpop.f32.mrb[54].mxu0  ;;  %8348 = vmatprep.subr.bf16.mxu1 %v8347_v4  ;;  %v16819_v52 = vmax.f32 %v11701_v38, 0.0  ;;  %v16821_v4 = vmax.f32 %v11704_v5, 0.0 }
 0x3de   : > { %v11707_v27 = vadd.f32 %v11578_v12, %v2041_v24  ;;  %v2043_v28 = vpop.f32.mrb[55].mxu0  ;;  %8350 = vmatpush1.bf16.msra.mxu1 %v8349_v10 }
 0x3df   : > { %v11710_v61 = vadd.f32 %v11575_v9, %v2043_v28 }
 0x3e0   : > { %v16820_v45 = vmax.f32 %v11707_v27, 0.0 }
 0x3e1   : > { %v16818_v21 = vmax.f32 %v11710_v61, 0.0  ;;  %v2047_v20 = vpop.f32.mrb[56].mxu0 }
 0x3e2   : > { %v2049_v44 = vpop.f32.mrb[57].mxu0  ;;  %v8353_v28 = vpack.c.bf16 %v16820_v45, %v16821_v4  ;;  %v11728_v54 = vadd.f32 %v11578_v12, %v2047_v20 }
 0x3e3   : > { %v8351_v33 = vpack.c.bf16 %v16818_v21, %v16819_v52  ;;  %v11725_v10 = vadd.f32 %v11575_v9, %v2049_v44 }
 0x3e5   : > { %v2053_v24 = vpop.f32.mrb[58].mxu0  ;;  %8352 = vmatprep.subr.bf16.mxu1 %v8351_v33  ;;  %v16827_v45 = vmax.f32 %v11725_v10, 0.0  ;;  %v16829_v33 = vmax.f32 %v11728_v54, 0.0 }
 0x3e6   : > { %v11731_v32 = vadd.f32 %v11578_v12, %v2053_v24  ;;  %v2055_v17 = vpop.f32.mrb[59].mxu0  ;;  %8354 = vmatpush1.bf16.msra.mxu1 %v8353_v28 }
 0x3e7   : > { %v11734_v21 = vadd.f32 %v11575_v9, %v2055_v17 }
 0x3e8   : > { %v16828_v52 = vmax.f32 %v11731_v32, 0.0 }
 0x3e9   : > { %v16826_v44 = vmax.f32 %v11734_v21, 0.0  ;;  %v2059_v4 = vpop.f32.mrb[60].mxu0  ;;  %v16998_v60 = vmax.f32 %v11734_v21, 0.0  ;;  %v2953_v21 = vld [vmem:[%s16729_s12 + $0x3c0] sm:$0xff] }
 0x3ea   : > { %v2061_v46 = vpop.f32.mrb[61].mxu0  ;;  %v8357_v17 = vpack.c.bf16 %v16828_v52, %v16829_v33  ;;  %v11752_v26 = vadd.f32 %v11578_v12, %v2059_v4  ;;  %v2373_v52 = vld [vmem:[%s16727_s10 + $0x10] sm:$0xff] }
 0x3eb   : > { %v8355_v20 = vpack.c.bf16 %v16826_v44, %v16827_v45  ;;  %v11749_v28 = vadd.f32 %v11575_v9, %v2061_v46  ;;  %v2372_v46 = vld [vmem:[%s16727_s10 + $0x8] sm:$0xff] }
 0x3ec   : > { %v17001_v15 = vmax.f32 %v11752_v26, 0.0 }
 0x3ed   : > { %v2065_v24 = vpop.f32.mrb[62].mxu0  ;;  %8356 = vmatprep.subr.bf16.mxu1 %v8355_v20  ;;  %v2374_v20 = vld [vmem:[%s16727_s10 + $0x18] sm:$0xff]  ;;  %v16832_v4 = vmax.f32 %v11749_v28, 0.0 }
 0x3ee   : > { %v11755_v58 = vadd.f32 %v11578_v12, %v2065_v24  ;;  %v2067_v19 = vpop.f32.mrb[63].mxu0  ;;  %8358 = vmatpush1.bf16.msra.mxu1 %v8357_v17  ;;  %v16834_v24 = vmax.f32 %v11752_v26, 0.0  ;;  %v2371_v17 = vld [vmem:[%s16727_s10] sm:$0xff]  ;;  %v2954_v26 = vld [vmem:[%s16729_s12 + $0x3c8] sm:$0xff] }
 0x3ef   : > { %v11758_v44 = vadd.f32 %v11575_v9, %v2067_v19  ;;  %v8363_v19 = vpack.c.bf16 %v2374_v20, %v2372_v46  ;;  %v2378_v46 = vld [vmem:[%s16727_s10 + $0x38] sm:$0xff]  ;;  %v8365_v20 = vpack.c.bf16 %v2373_v52, %v2371_v17  ;;  %v2384_v17 = vld [vmem:[%s16727_s10 + $0x68] sm:$0xff] }
 0x3f0   : > { %v16833_v45 = vmax.f32 %v11755_v58, 0.0  ;;  %v17003_v57 = vmax.f32 %v11755_v58, 0.0 }
 0x3f1   : > { %v16831_v12 = vmax.f32 %v11758_v44, 0.0 }
 0x3f2   : > { %v8361_v33 = vpack.c.bf16 %v16833_v45, %v16834_v24  ;;  %v2377_v45 = vld [vmem:[%s16727_s10 + $0x30] sm:$0xff]  ;;  %v2380_v24 = vld [vmem:[%s16727_s10 + $0x48] sm:$0xff] }
 0x3f3   : > { %v8359_v9 = vpack.c.bf16 %v16831_v12, %v16832_v4  ;;  %v8367_v12 = vpack.c.bf16 %v2378_v46, %v2376_v49  ;;  %v2375_v4 = vld [vmem:[%s16727_s10 + $0x20] sm:$0xff]  ;;  %v2388_v46 = vld [vmem:[%s16727_s10 + $0x88] sm:$0xff] }
 0x3f4   : > { %v8369_v49 = vpack.c.bf16 %v2377_v45, %v2375_v4 }
 0x3f5   : > { %8360 = vmatprep.subr.bf16.mxu1 %v8359_v9  ;;  %v2382_v9 = vld [vmem:[%s16727_s10 + $0x58] sm:$0xff] }
 0x3f6   : > { %8362 = vmatpush1.bf16.msra.mxu1 %v8361_v33  ;;  %v8371_v52 = vpack.c.bf16 %v2382_v9, %v2380_v24  ;;  %v2379_v33 = vld [vmem:[%s16727_s10 + $0x40] sm:$0xff]  ;;  %v2385_v24 = vld [vmem:[%s16727_s10 + $0x70] sm:$0xff] }
 0x3f7   : > { %8364 = vmatprep.subr.bf16.mxu1 %v8363_v19  ;;  %v2381_v19 = vld [vmem:[%s16727_s10 + $0x50] sm:$0xff] }
 0x3f8   : > { %v8373_v45 = vpack.c.bf16 %v2381_v19, %v2379_v33  ;;  %v2392_v33 = vld [vmem:[%s16727_s10 + $0xa8] sm:$0xff] }
 0x3f9   : > { %2211 = vmatmul.mubr.f32.vlgmr.msra.gmra.mrb[32].mxu1 %v11241_v53  ;;  %v2386_v53 = vld [vmem:[%s16727_s10 + $0x78] sm:$0xff] }
 0x3fa   : > { %2216 = vmatprep.mubr.f32.mxu1 %v16974_v29  ;;  %8366 = vmatpush1.bf16.msra.mxu1 %v8365_v20  ;;  %v8375_v4 = vpack.c.bf16 %v2386_v53, %v2384_v17  ;;  %v2391_v53 = vld [vmem:[%s16727_s10 + $0xa0] sm:$0xff] }
 0x3fb   : > { %8368 = vmatprep.subr.bf16.mxu1 %v8367_v12  ;;  %v2383_v12 = vld [vmem:[%s16727_s10 + $0x60] sm:$0xff] }
 0x3fc   : > { %v8377_v20 = vpack.c.bf16 %v2385_v24, %v2383_v12 }
 0x3fd   : > { %2217 = vmatmul.mubr.f32.gmra.mrb[34].mxu1 %v11248_v23  ;;  %v2390_v23 = vld [vmem:[%s16727_s10 + $0x98] sm:$0xff] }
 0x3fe   : > { %2222 = vmatprep.mubr.f32.mxu1 %v16974_v29  ;;  %8370 = vmatpush1.bf16.msra.mxu1 %v8369_v49  ;;  %v8379_v9 = vpack.c.bf16 %v2390_v23, %v2388_v46  ;;  %v2387_v49 = vld [vmem:[%s16727_s10 + $0x80] sm:$0xff]  ;;  %v2397_v23 = vld [vmem:[%s16727_s10 + $0xd0] sm:$0xff] }
 0x3ff   : > { %8372 = vmatprep.subr.bf16.mxu1 %v8371_v52  ;;  %v2389_v52 = vld [vmem:[%s16727_s10 + $0x90] sm:$0xff]  ;;  %v2395_v46 = vld [vmem:[%s16727_s10 + $0xc0] sm:$0xff] }
 0x400   : > { %v8381_v19 = vpack.c.bf16 %v2389_v52, %v2387_v49  ;;  %v2399_v52 = vld [vmem:[%s16727_s10 + $0xe0] sm:$0xff] }
 0x401   : > { %2223 = vmatmul.mubr.f32.gmra.mrb[36].mxu1 %v11255_v34  ;;  %v2394_v34 = vld [vmem:[%s16727_s10 + $0xb8] sm:$0xff] }
 0x402   : > { %2228 = vmatprep.mubr.f32.mxu1 %v16974_v29  ;;  %8374 = vmatpush1.bf16.msra.mxu1 %v8373_v45  ;;  %v8383_v17 = vpack.c.bf16 %v2394_v34, %v2392_v33  ;;  %v2393_v45 = vld [vmem:[%s16727_s10 + $0xb0] sm:$0xff]  ;;  %v2404_v34 = vld [vmem:[%s16727_s10 + $0x108] sm:$0xff] }
 0x403   : > { %8376 = vmatprep.subr.bf16.mxu1 %v8375_v4  ;;  %v2396_v4 = vld [vmem:[%s16727_s10 + $0xc8] sm:$0xff]  ;;  %v8385_v12 = vpack.c.bf16 %v2393_v45, %v2391_v53  ;;  %v2401_v33 = vld [vmem:[%s16727_s10 + $0xf0] sm:$0xff]  ;;  %v2403_v53 = vld [vmem:[%s16727_s10 + $0x100] sm:$0xff] }
 0x404   : > { %v2405_v45 = vld [vmem:[%s16727_s10 + $0x110] sm:$0xff] }
 0x405   : > { %2229 = vmatmul.mubr.f32.gmra.mrb[38].mxu1 %v11262_v0  ;;  %v2398_v0 = vld [vmem:[%s16727_s10 + $0xd8] sm:$0xff] }
 0x406   : > { %2234 = vmatprep.mubr.f32.mxu1 %v16974_v29  ;;  %8378 = vmatpush1.bf16.msra.mxu1 %v8377_v20  ;;  %v8387_v24 = vpack.c.bf16 %v2398_v0, %v2396_v4  ;;  %v2400_v20 = vld [vmem:[%s16727_s10 + $0xe8] sm:$0xff]  ;;  %v8397_v0 = vpack.c.bf16 %v2405_v45, %v2403_v53 }
 0x407   : > { %8380 = vmatprep.subr.bf16.mxu1 %v8379_v9  ;;  %v8389_v9 = vpack.c.bf16 %v2397_v23, %v2395_v46  ;;  %v2408_v4 = vld [vmem:[%s16727_s10 + $0x128] sm:$0xff]  ;;  %v2409_v46 = vld [vmem:[%s16727_s10 + $0x130] sm:$0xff] }
 0x408   : > { %v2412_v23 = vld [vmem:[%s16727_s10 + $0x148] sm:$0xff] }
 0x409   : > { %2235 = vmatmul.mubr.f32.gmra.mrb[40].mxu1 %v11269_v59  ;;  %v2402_v59 = vld [vmem:[%s16727_s10 + $0xf8] sm:$0xff] }
 0x40a   : > { %2240 = vmatprep.mubr.f32.mxu1 %v16974_v29  ;;  %8382 = vmatpush1.bf16.msra.mxu1 %v8381_v19  ;;  %v8391_v49 = vpack.c.bf16 %v2402_v59, %v2400_v20  ;;  %v8393_v19 = vpack.c.bf16 %v2401_v33, %v2399_v52  ;;  %v2416_v52 = vld [vmem:[%s16727_s10 + $0x168] sm:$0xff] }
 0x40b   : > { %8384 = vmatprep.subr.bf16.mxu1 %v8383_v17 }
 0x40d   : > { %2241 = vmatmul.mubr.f32.gmra.mrb[42].mxu1 %v11276_v42  ;;  %v2406_v42 = vld [vmem:[%s16727_s10 + $0x118] sm:$0xff] }
 0x40e   : > { %2246 = vmatprep.mubr.f32.mxu1 %v16974_v29  ;;  %8386 = vmatpush1.bf16.msra.mxu1 %v8385_v12  ;;  %v8395_v17 = vpack.c.bf16 %v2406_v42, %v2404_v34  ;;  %v2415_v42 = vld [vmem:[%s16727_s10 + $0x160] sm:$0xff] }
 0x40f   : > { %8388 = vmatprep.subr.bf16.mxu1 %v8387_v24  ;;  %v2407_v24 = vld [vmem:[%s16727_s10 + $0x120] sm:$0xff] }
 0x410   : > { %v8401_v20 = vpack.c.bf16 %v2409_v46, %v2407_v24  ;;  %v2423_v46 = vld [vmem:[%s16727_s10 + $0x1a0] sm:$0xff] }
 0x411   : > { %2247 = vmatmul.mubr.f32.gmra.mrb[44].mxu1 %v11283_v25  ;;  %v2410_v25 = vld [vmem:[%s16727_s10 + $0x138] sm:$0xff] }
 0x412   : > { %2252 = vmatprep.mubr.f32.mxu1 %v16974_v29  ;;  %8390 = vmatpush1.bf16.msra.mxu1 %v8389_v9  ;;  %v8399_v12 = vpack.c.bf16 %v2410_v25, %v2408_v4  ;;  %v2411_v9 = vld [vmem:[%s16727_s10 + $0x140] sm:$0xff]  ;;  %v2421_v25 = vld [vmem:[%s16727_s10 + $0x190] sm:$0xff] }
 0x413   : > { %8392 = vmatprep.subr.bf16.mxu1 %v8391_v49  ;;  %v2413_v49 = vld [vmem:[%s16727_s10 + $0x150] sm:$0xff]  ;;  %v2419_v4 = vld [vmem:[%s16727_s10 + $0x180] sm:$0xff] }
 0x414   : > { %v8405_v33 = vpack.c.bf16 %v2413_v49, %v2411_v9  ;;  %v2427_v9 = vld [vmem:[%s16727_s10 + $0x1c0] sm:$0xff]  ;;  %v2429_v49 = vld [vmem:[%s16727_s10 + $0x1d0] sm:$0xff] }
 0x415   : > { %2253 = vmatmul.mubr.f32.gmra.mrb[46].mxu1 %v11290_v22  ;;  %v2414_v22 = vld [vmem:[%s16727_s10 + $0x158] sm:$0xff] }
 0x416   : > { %2258 = vmatprep.mubr.f32.mxu1 %v16974_v29  ;;  %8394 = vmatpush1.bf16.msra.mxu1 %v8393_v19  ;;  %v8403_v59 = vpack.c.bf16 %v2414_v22, %v2412_v23  ;;  %v2417_v19 = vld [vmem:[%s16727_s10 + $0x170] sm:$0xff]  ;;  %v2428_v22 = vld [vmem:[%s16727_s10 + $0x1c8] sm:$0xff] }
 0x417   : > { %8396 = vmatprep.subr.bf16.mxu1 %v8395_v17  ;;  %v2420_v17 = vld [vmem:[%s16727_s10 + $0x188] sm:$0xff]  ;;  %v8409_v53 = vpack.c.bf16 %v2417_v19, %v2415_v42  ;;  %v2425_v23 = vld [vmem:[%s16727_s10 + $0x1b0] sm:$0xff]  ;;  %v10022_v19 = vld [vmem:[%s16973_s25 + $0x78] sm:$0xff] }
 0x418   : > { %v10021_v42 = vld [vmem:[%s16973_s25 + $0x70] sm:$0xff] }
 0x419   : > { %2259 = vmatmul.mubr.f32.gmra.mrb[48].mxu1 %v11297_v18  ;;  %v2418_v18 = vld [vmem:[%s16727_s10 + $0x178] sm:$0xff] }
 0x41a   : > { %2264 = vmatprep.mubr.f32.mxu1 %v16974_v29  ;;  %8398 = vmatpush1.bf16.msra.mxu1 %v8397_v0  ;;  %v8407_v34 = vpack.c.bf16 %v2418_v18, %v2416_v52  ;;  %v2424_v0 = vld [vmem:[%s16727_s10 + $0x1a8] sm:$0xff] }
 0x41b   : > { %8400 = vmatprep.subr.bf16.mxu1 %v8399_v12  ;;  %v8413_v12 = vpack.c.bf16 %v2421_v25, %v2419_v4  ;;  %v2432_v52 = vld [vmem:[%s16727_s10 + $0x1e8] sm:$0xff]  ;;  %v2310_v4 = vld [vmem:[%s16726_s9 + $0x18] sm:$0xff] }
 0x41c   : > { %v10020_v18 = vld [vmem:[%s16973_s25 + $0x68] sm:$0xff] }
 0x41d   : > { %2265 = vmatmul.mubr.f32.gmra.mrb[50].mxu1 %v11304_v40  ;;  %v2422_v40 = vld [vmem:[%s16727_s10 + $0x198] sm:$0xff] }
 0x41e   : > { %2270 = vmatprep.mubr.f32.mxu1 %v16974_v29  ;;  %8402 = vmatpush1.bf16.msra.mxu1 %v8401_v20  ;;  %v8411_v45 = vpack.c.bf16 %v2422_v40, %v2420_v17  ;;  %v8417_v20 = vpack.c.bf16 %v2425_v23, %v2423_v46  ;;  %v2431_v17 = vld [vmem:[%s16727_s10 + $0x1e0] sm:$0xff]  ;;  %v2433_v40 = vld [vmem:[%s16727_s10 + $0x1f0] sm:$0xff] }
 0x41f   : > { %8404 = vmatprep.subr.bf16.mxu1 %v8403_v59  ;;  %v2311_v46 = vld [vmem:[%s16726_s9 + $0x20] sm:$0xff]  ;;  %v2313_v23 = vld [vmem:[%s16726_s9 + $0x30] sm:$0xff] }
 0x421   : > { %2271 = vmatmul.mubr.f32.gmra.mrb[52].mxu1 %v11311_v2  ;;  %v2426_v2 = vld [vmem:[%s16727_s10 + $0x1b8] sm:$0xff] }
 0x422   : > { %2276 = vmatprep.mubr.f32.mxu1 %v16974_v29  ;;  %8406 = vmatpush1.bf16.msra.mxu1 %v8405_v33  ;;  %v8415_v24 = vpack.c.bf16 %v2426_v2, %v2424_v0  ;;  %v8421_v33 = vpack.c.bf16 %v2429_v49, %v2427_v9  ;;  %v2307_v0 = vld [vmem:[%s16726_s9] sm:$0xff]  ;;  %v2309_v2 = vld [vmem:[%s16726_s9 + $0x10] sm:$0xff] }
 0x423   : > { %8408 = vmatprep.subr.bf16.mxu1 %v8407_v34  ;;  %v8429_v9 = vpack.c.bf16 %v2309_v2, %v2307_v0 }
 0x425   : > { %2277 = vmatmul.mubr.f32.gmra.mrb[54].mxu1 %v11318_v8  ;;  %v2430_v8 = vld [vmem:[%s16727_s10 + $0x1d8] sm:$0xff] }
 0x426   : > { %2282 = vmatprep.mubr.f32.mxu1 %v16974_v29  ;;  %8410 = vmatpush1.bf16.msra.mxu1 %v8409_v53  ;;  %v8419_v59 = vpack.c.bf16 %v2430_v8, %v2428_v22  ;;  %v8425_v53 = vpack.c.bf16 %v2433_v40, %v2431_v17  ;;  %v2834_v22 = vld [vmem:[%s16729_s12 + $0x8] sm:$0xff]  ;;  %v2841_v17 = vld [vmem:[%s16729_s12 + $0x40] sm:$0xff] }
 0x427   : > { %8412 = vmatprep.subr.bf16.mxu1 %v8411_v45  ;;  %v2308_v45 = vld [vmem:[%s16726_s9 + $0x8] sm:$0xff]  ;;  %v2845_v40 = vld [vmem:[%s16729_s12 + $0x60] sm:$0xff] }
 0x428   : > { %v8427_v25 = vpack.c.bf16 %v2310_v4, %v2308_v45  ;;  %v2838_v8 = vld [vmem:[%s16729_s12 + $0x28] sm:$0xff]  ;;  %v2318_v4 = vld [vmem:[%s16726_s9 + $0x58] sm:$0xff]  ;;  %v8497_v0 = vpack.c.bf16 %v2845_v40, %v2841_v17  ;;  %v2857_v17 = vld [vmem:[%s16729_s12 + $0xc0] sm:$0xff] }
 0x429   : > { %2283 = vmatmul.mubr.f32.gmra.mrb[56].mxu1 %v11325_v62  ;;  %v2434_v62 = vld [vmem:[%s16727_s10 + $0x1f8] sm:$0xff]  ;;  %v8491_v49 = vpack.c.bf16 %v2838_v8, %v2834_v22  ;;  %v2316_v45 = vld [vmem:[%s16726_s9 + $0x48] sm:$0xff]  ;;  %v2849_v8 = vld [vmem:[%s16729_s12 + $0x80] sm:$0xff] }
 0x42a   : > { %2288 = vmatprep.mubr.f32.mxu1 %v16974_v29  ;;  %8414 = vmatpush1.bf16.msra.mxu1 %v8413_v12  ;;  %v8423_v34 = vpack.c.bf16 %v2434_v62, %v2432_v52  ;;  %v2312_v12 = vld [vmem:[%s16726_s9 + $0x28] sm:$0xff]  ;;  %v2837_v52 = vld [vmem:[%s16729_s12 + $0x20] sm:$0xff] }
 0x42b   : > { %8416 = vmatprep.subr.bf16.mxu1 %v8415_v24  ;;  %v2314_v24 = vld [vmem:[%s16726_s9 + $0x38] sm:$0xff]  ;;  %v2842_v62 = vld [vmem:[%s16729_s12 + $0x48] sm:$0xff]  ;;  %8492 = vmatprep.subr.bf16.mxu0 %v8491_v49  ;;  %v8435_v49 = vpack.c.bf16 %v2318_v4, %v2316_v45  ;;  %v2861_v40 = vld [vmem:[%s16729_s12 + $0xe0] sm:$0xff] }
 0x42c   : > { %v2321_v4 = vld [vmem:[%s16726_s9 + $0x70] sm:$0xff] }
 0x42d   : > { %2289 = vmatmul.mubr.f32.gmra.mrb[58].mxu1 %v10020_v18  ;;  %v2846_v18 = vld [vmem:[%s16729_s12 + $0x68] sm:$0xff] }
 0x42e   : > { %2294 = vmatprep.mubr.f32.mxu1 %v16974_v29  ;;  %8418 = vmatpush1.bf16.msra.mxu1 %v8417_v20  ;;  %v2833_v20 = vld [vmem:[%s16729_s12] sm:$0xff] }
 0x42f   : > { %8420 = vmatprep.subr.bf16.mxu1 %v8419_v59 }
 0x431   : > { %2295 = vmatmul.mubr.f32.gmra.mrb[60].mxu1 %v10021_v42  ;;  %v8493_v42 = vpack.c.bf16 %v2837_v52, %v2833_v20  ;;  %v2853_v20 = vld [vmem:[%s16729_s12 + $0xa0] sm:$0xff]  ;;  %v2320_v52 = vld [vmem:[%s16726_s9 + $0x68] sm:$0xff] }
 0x432   : > { %2300 = vmatprep.mubr.f32.mxu1 %v16974_v29  ;;  %8422 = vmatpush1.bf16.msra.mxu1 %v8421_v33 }
 0x433   : > { %8424 = vmatprep.subr.bf16.mxu1 %v8423_v34  ;;  %v8431_v34 = vpack.c.bf16 %v2314_v24, %v2312_v12  ;;  %8494 = vmatpush1.bf16.msra.mxu0 %v8493_v42  ;;  %v8433_v12 = vpack.c.bf16 %v2313_v23, %v2311_v46  ;;  %v2315_v24 = vld [vmem:[%s16726_s9 + $0x40] sm:$0xff]  ;;  %v2317_v46 = vld [vmem:[%s16726_s9 + $0x50] sm:$0xff]  ;;  %v2858_v23 = vld [vmem:[%s16729_s12 + $0xc8] sm:$0xff] }
 0x434   : > { %v2319_v42 = vld [vmem:[%s16726_s9 + $0x60] sm:$0xff] }
 0x435   : > { %2301 = vmatmul.mubr.f32.gmra.mrb[62].mxu1 %v10022_v19  ;;  %v8495_v19 = vpack.c.bf16 %v2846_v18, %v2842_v62  ;;  %v2322_v62 = vld [vmem:[%s16726_s9 + $0x78] sm:$0xff]  ;;  %v8501_v18 = vpack.c.bf16 %v2853_v20, %v2849_v8  ;;  %v8441_v8 = vpack.c.bf16 %v2321_v4, %v2319_v42  ;;  %v2323_v20 = vld [vmem:[%s16726_s9 + $0x80] sm:$0xff] }
 0x436   : > { %8426 = vmatpush1.bf16.msra.mxu1 %v8425_v53  ;;  %v2850_v53 = vld [vmem:[%s16729_s12 + $0x88] sm:$0xff]  ;;  %v8439_v45 = vpack.c.bf16 %v2322_v62, %v2320_v52  ;;  %v2325_v52 = vld [vmem:[%s16726_s9 + $0x90] sm:$0xff]  ;;  %v2877_v4 = vld [vmem:[%s16729_s12 + $0x160] sm:$0xff] }
 0x437   : > { %8428 = vmatprep.subr.bf16.mxu1 %v8427_v25  ;;  %v2854_v25 = vld [vmem:[%s16729_s12 + $0xa8] sm:$0xff]  ;;  %8496 = vmatprep.subr.bf16.mxu0 %v8495_v19 }
 0x438   : > { %v8499_v22 = vpack.c.bf16 %v2854_v25, %v2850_v53  ;;  %8498 = vmatpush1.bf16.msra.mxu0 %v8497_v0  ;;  %v2866_v25 = vld [vmem:[%s16729_s12 + $0x108] sm:$0xff] }
 0x439   : > { %v2870_v0 = vld [vmem:[%s16729_s12 + $0x128] sm:$0xff] }
 0x43a   : > { %8500 = vmatprep.subr.bf16.mxu0 %v8499_v22  ;;  %v2874_v62 = vld [vmem:[%s16729_s12 + $0x148] sm:$0xff] }
 0x43c   : > { %8502 = vmatpush1.bf16.msra.mxu0 %v8501_v18  ;;  %v2878_v18 = vld [vmem:[%s16729_s12 + $0x168] sm:$0xff] }
 0x4cc   : > { %v2212_v59 = vpop.f32.mrb[32].mxu1 }
 0x4cd   : > { %v2214_v33 = vpop.f32.mrb[33].mxu1 }
 0x4ce   : > { %2499 = vmatprep.mubr.f32.mxu1 %v2214_v33 }
 0x4cf   : > { %2500 = vmatmul.mubr.f32.vlgmr.msra.gmra.mrb[64].mxu1 %v2212_v59 }
 0x4d0   : > { %v2218_v2 = vpop.f32.mrb[34].mxu1  ;;  %8430 = vmatpush1.bf16.msra.mxu1 %v8429_v9  ;;  %v2862_v9 = vld [vmem:[%s16729_s12 + $0xe8] sm:$0xff] }
 0x4d1   : > { %v2220_v59 = vpop.f32.mrb[35].mxu1  ;;  %8432 = vmatprep.subr.bf16.mxu1 %v8431_v34  ;;  %v8437_v34 = vpack.c.bf16 %v2317_v46, %v2315_v24  ;;  %v8503_v19 = vpack.c.bf16 %v2862_v9, %v2858_v23  ;;  %v8505_v24 = vpack.c.bf16 %v2861_v40, %v2857_v17  ;;  %v2869_v46 = vld [vmem:[%s16729_s12 + $0x120] sm:$0xff]  ;;  %v8445_v17 = vpack.c.bf16 %v2325_v52, %v2323_v20 }
 0x4d2   : > { %2505 = vmatprep.mubr.f32.mxu1 %v2220_v59  ;;  %v8507_v59 = vpack.c.bf16 %v2870_v0, %v2866_v25  ;;  %v2327_v40 = vld [vmem:[%s16726_s9 + $0xa0] sm:$0xff] }
 0x4d3   : > { %2506 = vmatmul.mubr.f32.gmra.mrb[66].mxu1 %v2218_v2  ;;  %v2324_v2 = vld [vmem:[%s16726_s9 + $0x88] sm:$0xff]  ;;  %8504 = vmatprep.subr.bf16.mxu0 %v8503_v19  ;;  %v2885_v52 = vld [vmem:[%s16729_s12 + $0x1a0] sm:$0xff] }
 0x4d4   : > { %v2224_v33 = vpop.f32.mrb[36].mxu1  ;;  %8434 = vmatpush1.bf16.msra.mxu1 %v8433_v12  ;;  %v2326_v12 = vld [vmem:[%s16726_s9 + $0x98] sm:$0xff]  ;;  %8506 = vmatpush1.bf16.msra.mxu0 %v8505_v24  ;;  %v2886_v24 = vld [vmem:[%s16729_s12 + $0x1a8] sm:$0xff] }
 0x4d5   : > { %v2226_v53 = vpop.f32.mrb[37].mxu1  ;;  %8436 = vmatprep.subr.bf16.mxu1 %v8435_v49  ;;  %v2865_v49 = vld [vmem:[%s16729_s12 + $0x100] sm:$0xff]  ;;  %v8443_v9 = vpack.c.bf16 %v2326_v12, %v2324_v2  ;;  %8508 = vmatprep.subr.bf16.mxu0 %v8507_v59  ;;  %v2329_v2 = vld [vmem:[%s16726_s9 + $0xb0] sm:$0xff]  ;;  %v2882_v12 = vld [vmem:[%s16729_s12 + $0x188] sm:$0xff] }
 0x4d6   : > { %2511 = vmatprep.mubr.f32.mxu1 %v2226_v53  ;;  %v8509_v42 = vpack.c.bf16 %v2869_v46, %v2865_v49  ;;  %v8511_v53 = vpack.c.bf16 %v2878_v18, %v2874_v62  ;;  %v8449_v49 = vpack.c.bf16 %v2329_v2, %v2327_v40  ;;  %v2331_v46 = vld [vmem:[%s16726_s9 + $0xc0] sm:$0xff] }
 0x4d7   : > { %2512 = vmatmul.mubr.f32.gmra.mrb[68].mxu1 %v2224_v33  ;;  %v2328_v33 = vld [vmem:[%s16726_s9 + $0xa8] sm:$0xff]  ;;  %v2893_v2 = vld [vmem:[%s16729_s12 + $0x1e0] sm:$0xff] }
 0x4d8   : > { %v2230_v22 = vpop.f32.mrb[38].mxu1  ;;  %8438 = vmatpush1.bf16.msra.mxu1 %v8437_v34  ;;  %v2330_v34 = vld [vmem:[%s16726_s9 + $0xb8] sm:$0xff]  ;;  %8510 = vmatpush1.bf16.msra.mxu0 %v8509_v42  ;;  %v2894_v42 = vld [vmem:[%s16729_s12 + $0x1e8] sm:$0xff] }
 0x4d9   : > { %v2232_v23 = vpop.f32.mrb[39].mxu1  ;;  %8440 = vmatprep.subr.bf16.mxu1 %v8439_v45  ;;  %v2873_v45 = vld [vmem:[%s16729_s12 + $0x140] sm:$0xff]  ;;  %v8447_v0 = vpack.c.bf16 %v2330_v34, %v2328_v33  ;;  %8512 = vmatprep.subr.bf16.mxu0 %v8511_v53  ;;  %v2333_v33 = vld [vmem:[%s16726_s9 + $0xd0] sm:$0xff]  ;;  %v2890_v34 = vld [vmem:[%s16729_s12 + $0x1c8] sm:$0xff] }
 0x4da   : > { %2517 = vmatprep.mubr.f32.mxu1 %v2232_v23  ;;  %v8513_v20 = vpack.c.bf16 %v2877_v4, %v2873_v45  ;;  %v8515_v23 = vpack.c.bf16 %v2886_v24, %v2882_v12  ;;  %v8453_v45 = vpack.c.bf16 %v2333_v33, %v2331_v46  ;;  %v2335_v4 = vld [vmem:[%s16726_s9 + $0xe0] sm:$0xff] }
 0x4db   : > { %2518 = vmatmul.mubr.f32.gmra.mrb[70].mxu1 %v2230_v22  ;;  %v2332_v22 = vld [vmem:[%s16726_s9 + $0xc8] sm:$0xff]  ;;  %v2901_v33 = vld [vmem:[%s16729_s12 + $0x220] sm:$0xff] }
 0x4dc   : > { %v2236_v19 = vpop.f32.mrb[40].mxu1  ;;  %8442 = vmatpush1.bf16.msra.mxu1 %v8441_v8  ;;  %v2334_v8 = vld [vmem:[%s16726_s9 + $0xd8] sm:$0xff]  ;;  %8514 = vmatpush1.bf16.msra.mxu0 %v8513_v20  ;;  %v2902_v20 = vld [vmem:[%s16729_s12 + $0x228] sm:$0xff] }
 0x4dd   : > { %v2238_v25 = vpop.f32.mrb[41].mxu1  ;;  %8444 = vmatprep.subr.bf16.mxu1 %v8443_v9  ;;  %v2881_v9 = vld [vmem:[%s16729_s12 + $0x180] sm:$0xff]  ;;  %v8451_v18 = vpack.c.bf16 %v2334_v8, %v2332_v22  ;;  %8516 = vmatprep.subr.bf16.mxu0 %v8515_v23  ;;  %v2337_v22 = vld [vmem:[%s16726_s9 + $0xf0] sm:$0xff]  ;;  %v2898_v8 = vld [vmem:[%s16729_s12 + $0x208] sm:$0xff] }
 0x4de   : > { %2523 = vmatprep.mubr.f32.mxu1 %v2238_v25  ;;  %v8517_v40 = vpack.c.bf16 %v2885_v52, %v2881_v9  ;;  %v8519_v25 = vpack.c.bf16 %v2894_v42, %v2890_v34  ;;  %v8457_v9 = vpack.c.bf16 %v2337_v22, %v2335_v4  ;;  %v2339_v52 = vld [vmem:[%s16726_s9 + $0x100] sm:$0xff] }
 0x4df   : > { %2524 = vmatmul.mubr.f32.gmra.mrb[72].mxu1 %v2236_v19  ;;  %v2336_v19 = vld [vmem:[%s16726_s9 + $0xe8] sm:$0xff]  ;;  %v2909_v22 = vld [vmem:[%s16729_s12 + $0x260] sm:$0xff] }
 0x4e0   : > { %v2242_v59 = vpop.f32.mrb[42].mxu1  ;;  %8446 = vmatpush1.bf16.msra.mxu1 %v8445_v17  ;;  %v2338_v17 = vld [vmem:[%s16726_s9 + $0xf8] sm:$0xff]  ;;  %8518 = vmatpush1.bf16.msra.mxu0 %v8517_v40  ;;  %v2910_v40 = vld [vmem:[%s16729_s12 + $0x268] sm:$0xff] }
 0x4e1   : > { %v2244_v62 = vpop.f32.mrb[43].mxu1  ;;  %8448 = vmatprep.subr.bf16.mxu1 %v8447_v0  ;;  %v2889_v0 = vld [vmem:[%s16729_s12 + $0x1c0] sm:$0xff]  ;;  %v8455_v24 = vpack.c.bf16 %v2338_v17, %v2336_v19  ;;  %8520 = vmatprep.subr.bf16.mxu0 %v8519_v25  ;;  %v2341_v19 = vld [vmem:[%s16726_s9 + $0x110] sm:$0xff]  ;;  %v2906_v17 = vld [vmem:[%s16729_s12 + $0x248] sm:$0xff] }
 0x4e2   : > { %2529 = vmatprep.mubr.f32.mxu1 %v2244_v62  ;;  %v8521_v46 = vpack.c.bf16 %v2893_v2, %v2889_v0  ;;  %v8523_v62 = vpack.c.bf16 %v2902_v20, %v2898_v8  ;;  %v8461_v0 = vpack.c.bf16 %v2341_v19, %v2339_v52  ;;  %v2343_v2 = vld [vmem:[%s16726_s9 + $0x120] sm:$0xff] }
 0x4e3   : > { %2530 = vmatmul.mubr.f32.gmra.mrb[74].mxu1 %v2242_v59  ;;  %v2340_v59 = vld [vmem:[%s16726_s9 + $0x108] sm:$0xff]  ;;  %v2917_v19 = vld [vmem:[%s16729_s12 + $0x2a0] sm:$0xff] }
 0x4e4   : > { %v2248_v53 = vpop.f32.mrb[44].mxu1  ;;  %8450 = vmatpush1.bf16.msra.mxu1 %v8449_v49  ;;  %v2342_v49 = vld [vmem:[%s16726_s9 + $0x118] sm:$0xff]  ;;  %8522 = vmatpush1.bf16.msra.mxu0 %v8521_v46  ;;  %v2918_v46 = vld [vmem:[%s16729_s12 + $0x2a8] sm:$0xff] }
 0x4e5   : > { %v2250_v12 = vpop.f32.mrb[45].mxu1  ;;  %8452 = vmatprep.subr.bf16.mxu1 %v8451_v18  ;;  %v2897_v18 = vld [vmem:[%s16729_s12 + $0x200] sm:$0xff]  ;;  %v8459_v42 = vpack.c.bf16 %v2342_v49, %v2340_v59  ;;  %8524 = vmatprep.subr.bf16.mxu0 %v8523_v62  ;;  %v2345_v59 = vld [vmem:[%s16726_s9 + $0x130] sm:$0xff]  ;;  %v2914_v49 = vld [vmem:[%s16729_s12 + $0x288] sm:$0xff] }
 0x4e6   : > { %2535 = vmatprep.mubr.f32.mxu1 %v2250_v12  ;;  %v8525_v4 = vpack.c.bf16 %v2901_v33, %v2897_v18  ;;  %v8527_v12 = vpack.c.bf16 %v2910_v40, %v2906_v17  ;;  %v8465_v18 = vpack.c.bf16 %v2345_v59, %v2343_v2  ;;  %v2347_v33 = vld [vmem:[%s16726_s9 + $0x140] sm:$0xff] }
 0x4e7   : > { %2536 = vmatmul.mubr.f32.gmra.mrb[76].mxu1 %v2248_v53  ;;  %v2344_v53 = vld [vmem:[%s16726_s9 + $0x128] sm:$0xff]  ;;  %v2925_v59 = vld [vmem:[%s16729_s12 + $0x2e0] sm:$0xff] }
 0x4e8   : > { %v2254_v23 = vpop.f32.mrb[46].mxu1  ;;  %8454 = vmatpush1.bf16.msra.mxu1 %v8453_v45  ;;  %v2346_v45 = vld [vmem:[%s16726_s9 + $0x138] sm:$0xff]  ;;  %8526 = vmatpush1.bf16.msra.mxu0 %v8525_v4  ;;  %v2926_v4 = vld [vmem:[%s16729_s12 + $0x2e8] sm:$0xff] }
 0x4e9   : > { %v2256_v34 = vpop.f32.mrb[47].mxu1  ;;  %8456 = vmatprep.subr.bf16.mxu1 %v8455_v24  ;;  %v2905_v24 = vld [vmem:[%s16729_s12 + $0x240] sm:$0xff]  ;;  %v8463_v20 = vpack.c.bf16 %v2346_v45, %v2344_v53  ;;  %8528 = vmatprep.subr.bf16.mxu0 %v8527_v12  ;;  %v2349_v53 = vld [vmem:[%s16726_s9 + $0x150] sm:$0xff]  ;;  %v2922_v45 = vld [vmem:[%s16729_s12 + $0x2c8] sm:$0xff] }
 0x4ea   : > { %2541 = vmatprep.mubr.f32.mxu1 %v2256_v34  ;;  %v8529_v52 = vpack.c.bf16 %v2909_v22, %v2905_v24  ;;  %v8531_v34 = vpack.c.bf16 %v2918_v46, %v2914_v49  ;;  %v8469_v24 = vpack.c.bf16 %v2349_v53, %v2347_v33  ;;  %v2351_v22 = vld [vmem:[%s16726_s9 + $0x160] sm:$0xff] }
 0x4eb   : > { %2542 = vmatmul.mubr.f32.gmra.mrb[78].mxu1 %v2254_v23  ;;  %v2348_v23 = vld [vmem:[%s16726_s9 + $0x148] sm:$0xff]  ;;  %v2933_v53 = vld [vmem:[%s16729_s12 + $0x320] sm:$0xff] }
 0x4ec   : > { %v2260_v25 = vpop.f32.mrb[48].mxu1  ;;  %8458 = vmatpush1.bf16.msra.mxu1 %v8457_v9  ;;  %v2350_v9 = vld [vmem:[%s16726_s9 + $0x158] sm:$0xff]  ;;  %8530 = vmatpush1.bf16.msra.mxu0 %v8529_v52  ;;  %v2934_v52 = vld [vmem:[%s16729_s12 + $0x328] sm:$0xff] }
 0x4ed   : > { %v2262_v8 = vpop.f32.mrb[49].mxu1  ;;  %8460 = vmatprep.subr.bf16.mxu1 %v8459_v42  ;;  %v2913_v42 = vld [vmem:[%s16729_s12 + $0x280] sm:$0xff]  ;;  %v8467_v40 = vpack.c.bf16 %v2350_v9, %v2348_v23  ;;  %8532 = vmatprep.subr.bf16.mxu0 %v8531_v34  ;;  %v2353_v23 = vld [vmem:[%s16726_s9 + $0x170] sm:$0xff]  ;;  %v2930_v9 = vld [vmem:[%s16729_s12 + $0x308] sm:$0xff] }
 0x4ee   : > { %2547 = vmatprep.mubr.f32.mxu1 %v2262_v8  ;;  %v8533_v2 = vpack.c.bf16 %v2917_v19, %v2913_v42  ;;  %v8535_v8 = vpack.c.bf16 %v2926_v4, %v2922_v45  ;;  %v8473_v42 = vpack.c.bf16 %v2353_v23, %v2351_v22  ;;  %v2355_v19 = vld [vmem:[%s16726_s9 + $0x180] sm:$0xff] }
 0x4ef   : > { %2548 = vmatmul.mubr.f32.gmra.mrb[80].mxu1 %v2260_v25  ;;  %v2352_v25 = vld [vmem:[%s16726_s9 + $0x168] sm:$0xff]  ;;  %v2941_v23 = vld [vmem:[%s16729_s12 + $0x360] sm:$0xff] }
 0x4f0   : > { %v2266_v62 = vpop.f32.mrb[50].mxu1  ;;  %8462 = vmatpush1.bf16.msra.mxu1 %v8461_v0  ;;  %v2354_v0 = vld [vmem:[%s16726_s9 + $0x178] sm:$0xff]  ;;  %8534 = vmatpush1.bf16.msra.mxu0 %v8533_v2  ;;  %v2942_v2 = vld [vmem:[%s16729_s12 + $0x368] sm:$0xff] }
 0x4f1   : > { %v2268_v17 = vpop.f32.mrb[51].mxu1  ;;  %8464 = vmatprep.subr.bf16.mxu1 %v8463_v20  ;;  %v2921_v20 = vld [vmem:[%s16729_s12 + $0x2c0] sm:$0xff]  ;;  %v8471_v46 = vpack.c.bf16 %v2354_v0, %v2352_v25  ;;  %8536 = vmatprep.subr.bf16.mxu0 %v8535_v8  ;;  %v2357_v25 = vld [vmem:[%s16726_s9 + $0x190] sm:$0xff]  ;;  %v2938_v0 = vld [vmem:[%s16729_s12 + $0x348] sm:$0xff] }
 0x4f2   : > { %2553 = vmatprep.mubr.f32.mxu1 %v2268_v17  ;;  %v8537_v33 = vpack.c.bf16 %v2925_v59, %v2921_v20  ;;  %v8539_v17 = vpack.c.bf16 %v2934_v52, %v2930_v9  ;;  %v8477_v20 = vpack.c.bf16 %v2357_v25, %v2355_v19  ;;  %v2359_v59 = vld [vmem:[%s16726_s9 + $0x1a0] sm:$0xff] }
 0x4f3   : > { %2554 = vmatmul.mubr.f32.gmra.mrb[82].mxu1 %v2266_v62  ;;  %v2356_v62 = vld [vmem:[%s16726_s9 + $0x188] sm:$0xff]  ;;  %v2363_v25 = vld [vmem:[%s16726_s9 + $0x1c0] sm:$0xff] }
 0x4f4   : > { %v2272_v12 = vpop.f32.mrb[52].mxu1  ;;  %8466 = vmatpush1.bf16.msra.mxu1 %v8465_v18  ;;  %v2358_v18 = vld [vmem:[%s16726_s9 + $0x198] sm:$0xff]  ;;  %8538 = vmatpush1.bf16.msra.mxu0 %v8537_v33  ;;  %v2950_v33 = vld [vmem:[%s16729_s12 + $0x3a8] sm:$0xff] }
 0x4f5   : > { %v2274_v49 = vpop.f32.mrb[53].mxu1  ;;  %8468 = vmatprep.subr.bf16.mxu1 %v8467_v40  ;;  %v2929_v40 = vld [vmem:[%s16729_s12 + $0x300] sm:$0xff]  ;;  %v8475_v4 = vpack.c.bf16 %v2358_v18, %v2356_v62  ;;  %8540 = vmatprep.subr.bf16.mxu0 %v8539_v17  ;;  %v2361_v62 = vld [vmem:[%s16726_s9 + $0x1b0] sm:$0xff]  ;;  %v2946_v18 = vld [vmem:[%s16729_s12 + $0x388] sm:$0xff] }
 0x4f6   : > { %2559 = vmatprep.mubr.f32.mxu1 %v2274_v49  ;;  %v8541_v22 = vpack.c.bf16 %v2933_v53, %v2929_v40  ;;  %v8543_v49 = vpack.c.bf16 %v2942_v2, %v2938_v0  ;;  %v8481_v40 = vpack.c.bf16 %v2361_v62, %v2359_v59  ;;  %v8547_v53 = vpack.c.bf16 %v2950_v33, %v2946_v18  ;;  %v2365_v0 = vld [vmem:[%s16726_s9 + $0x1d0] sm:$0xff]  ;;  %v2368_v2 = vld [vmem:[%s16726_s9 + $0x1e8] sm:$0xff]  ;;  %v2367_v59 = vld [vmem:[%s16726_s9 + $0x1e0] sm:$0xff] }
 0x4f7   : > { %2560 = vmatmul.mubr.f32.gmra.mrb[84].mxu1 %v2272_v12  ;;  %v2360_v12 = vld [vmem:[%s16726_s9 + $0x1a8] sm:$0xff]  ;;  %v16976_v62 = vmax.f32 %v11605_v48, 0.0  ;;  %v16977_v18 = vmax.f32 %v11608_v35, 0.0  ;;  %v16978_v33 = vmax.f32 %v11614_v31, 0.0  ;;  %v16986_v48 = vmax.f32 %v11662_v6, 0.0 }
 0x4f8   : > { %v2278_v34 = vpop.f32.mrb[54].mxu1  ;;  %8470 = vmatpush1.bf16.msra.mxu1 %v8469_v24  ;;  %v2362_v24 = vld [vmem:[%s16726_s9 + $0x1b8] sm:$0xff]  ;;  %8542 = vmatpush1.bf16.msra.mxu0 %v8541_v22  ;;  %v8485_v22 = vpack.c.bf16 %v2365_v0, %v2363_v25  ;;  %v16987_v35 = vmax.f32 %v11659_v51, 0.0  ;;  %v16989_v31 = vmax.f32 %v11680_v11, 0.0  ;;  %v16996_v51 = vmax.f32 %v11725_v10, 0.0  ;;  %v2957_v10 = vld [vmem:[%s16729_s12 + $0x3e0] sm:$0xff] }
 0x4f9   : > { %v2280_v45 = vpop.f32.mrb[55].mxu1  ;;  %8472 = vmatprep.subr.bf16.mxu1 %v8471_v46  ;;  %v2937_v46 = vld [vmem:[%s16729_s12 + $0x340] sm:$0xff]  ;;  %v8479_v52 = vpack.c.bf16 %v2362_v24, %v2360_v12  ;;  %8544 = vmatprep.subr.bf16.mxu0 %v8543_v49  ;;  %v2370_v12 = vld [vmem:[%s16726_s9 + $0x1f8] sm:$0xff]  ;;  %v2369_v49 = vld [vmem:[%s16726_s9 + $0x1f0] sm:$0xff]  ;;  %v16997_v6 = vmax.f32 %v11728_v54, 0.0  ;;  %v16999_v11 = vmax.f32 %v11731_v32, 0.0 }
 0x4fa   : > { %2565 = vmatprep.mubr.f32.mxu1 %v2280_v45  ;;  %v8545_v19 = vpack.c.bf16 %v2941_v23, %v2937_v46  ;;  %v8489_v23 = vpack.c.bf16 %v2369_v49, %v2367_v59  ;;  %v2945_v54 = vld [vmem:[%s16729_s12 + $0x380] sm:$0xff]  ;;  %v2835_v25 = vld [vmem:[%s16729_s12 + $0x10] sm:$0xff] }
 0x4fb   : > { %2566 = vmatmul.mubr.f32.gmra.mrb[86].mxu1 %v2278_v34  ;;  %v2364_v34 = vld [vmem:[%s16726_s9 + $0x1c8] sm:$0xff]  ;;  %v2949_v32 = vld [vmem:[%s16729_s12 + $0x3a0] sm:$0xff]  ;;  %v2839_v0 = vld [vmem:[%s16729_s12 + $0x30] sm:$0xff] }
 0x4fc   : > { %v2284_v8 = vpop.f32.mrb[56].mxu1  ;;  %8474 = vmatpush1.bf16.msra.mxu1 %v8473_v42  ;;  %v2366_v42 = vld [vmem:[%s16726_s9 + $0x1d8] sm:$0xff]  ;;  %8546 = vmatpush1.bf16.msra.mxu0 %v8545_v19  ;;  %v2757_v19 = vld [vmem:[%s16728_s11] sm:$0x3] }
 0x4fd   : > { %v2286_v9 = vpop.f32.mrb[57].mxu1  ;;  %8476 = vmatprep.subr.bf16.mxu1 %v8475_v4  ;;  %v8483_v4 = vpack.c.bf16 %v2366_v42, %v2364_v34  ;;  %8548 = vmatprep.subr.bf16.mxu0 %v8547_v53  ;;  %v2840_v34 = vld [vmem:[%s16729_s12 + $0x38] sm:$0xff] }
 0x4fe   : > { %2571 = vmatprep.mubr.f32.mxu1 %v2286_v9 }
 0x4ff   : > { %2572 = vmatmul.mubr.f32.gmra.mrb[88].mxu1 %v2284_v8 }
 0x500   : > { %v2290_v17 = vpop.f32.mrb[58].mxu1  ;;  %8478 = vmatpush1.bf16.msra.mxu1 %v8477_v20  ;;  %v8487_v20 = vpack.c.bf16 %v2370_v12, %v2368_v2  ;;  %v2844_v12 = vld [vmem:[%s16729_s12 + $0x58] sm:$0xff] }
 0x501   : > { %v2292_v45 = vpop.f32.mrb[59].mxu1  ;;  %8480 = vmatprep.subr.bf16.mxu1 %v8479_v52  ;;  %v16975_v52 = vmax.f32 %v11587_v56, 0.0  ;;  %v16982_v56 = vmax.f32 %v11638_v30, 0.0  ;;  %v16993_v30 = vmax.f32 %v11704_v5, 0.0  ;;  %v17000_v5 = vmax.f32 %v11749_v28, 0.0  ;;  %v2836_v28 = vld [vmem:[%s16729_s12 + $0x18] sm:$0xff] }
 0x502   : > { %2577 = vmatprep.mubr.f32.mxu1 %v2292_v45  ;;  %v8555_v42 = vpack.c.bf16 %v2840_v34, %v2836_v28  ;;  %v2876_v28 = vld [vmem:[%s16729_s12 + $0x158] sm:$0xff] }
 0x503   : > { %2578 = vmatmul.mubr.f32.gmra.mrb[90].mxu1 %v2290_v17  ;;  %v12459_v17 = vrot.slane %v2757_v19, %v10719_v39  ;;  %v2880_v34 = vld [vmem:[%s16729_s12 + $0x178] sm:$0xff] }
 0x504   : > { %v2296_v24 = vpop.f32.mrb[60].mxu1  ;;  %8482 = vmatpush1.bf16.msra.mxu1 %v8481_v40  ;;  %v12462_v40 = vrot.slane %v2757_v19, %v10713_v37 }
 0x505   : > { %v2298_v8 = vpop.f32.mrb[61].mxu1  ;;  %8484 = vmatprep.subr.bf16.mxu1 %v8483_v4 }
 0x506   : > { %2583 = vmatprep.mubr.f32.mxu1 %v2298_v8 }
 0x507   : > { %2584 = vmatmul.mubr.f32.gmra.mrb[92].mxu1 %v2296_v24  ;;  %v2848_v24 = vld [vmem:[%s16729_s12 + $0x78] sm:$0xff] }
 0x508   : > { %v2302_v46 = vpop.f32.mrb[62].mxu1  ;;  %8486 = vmatpush1.bf16.msra.mxu1 %v8485_v22 }
 0x509   : > { %v2304_v9 = vpop.f32.mrb[63].mxu1  ;;  %8488 = vmatprep.subr.bf16.mxu1 %v8487_v20  ;;  %v8557_v20 = vpack.c.bf16 %v2839_v0, %v2835_v25 }
 0x50a   : > { %2589 = vmatprep.mubr.f32.mxu1 %v2304_v9  ;;  %v2843_v9 = vld [vmem:[%s16729_s12 + $0x50] sm:$0xff] }
 0x50b   : > { %2590 = vmatmul.mubr.f32.gmra.mrb[94].mxu1 %v2302_v46 }
 0x50c   : > { %8490 = vmatpush1.bf16.msra.mxu1 %v8489_v23  ;;  %2660 = vmatprep.mubr.f32.mxu1 %v2115_v50  ;;  %v16983_v50 = vmax.f32 %v11635_v47, 0.0  ;;  %v16992_v47 = vmax.f32 %v11701_v38, 0.0  ;;  %v2958_v38 = vld [vmem:[%s16729_s12 + $0x3e8] sm:$0xff]  ;;  %v8559_v23 = vpack.c.bf16 %v2848_v24, %v2844_v12  ;;  %v8575_v12 = vpack.c.bf16 %v2880_v34, %v2876_v28  ;;  %v2875_v24 = vld [vmem:[%s16729_s12 + $0x150] sm:$0xff] }
 0x50d   : > { %v8551_v58 = vpack.c.bf16 %v2958_v38, %v2954_v26 }
 0x50f   : > { %2661 = vmatmul.mubr.f32.vlgmr.msra.gmra.mrb[64].mxu1 %v2114_v14  ;;  %v16985_v14 = vmax.f32 %v11656_v13, 0.0  ;;  %v16995_v13 = vmax.f32 %v11707_v27, 0.0  ;;  %v17002_v27 = vmax.f32 %v11758_v44, 0.0  ;;  %v8553_v44 = vpack.c.bf16 %v2957_v10, %v2953_v21  ;;  %v2867_v21 = vld [vmem:[%s16729_s12 + $0x110] sm:$0xff] }
 0x510   : > { %2666 = vmatprep.mubr.f32.mxu1 %v2117_v63  ;;  %v16984_v63 = vmax.f32 %v11653_v7, 0.0  ;;  %v16994_v7 = vmax.f32 %v11710_v61, 0.0  ;;  %v8549_v61 = vpack.c.bf16 %v2949_v32, %v2945_v54  ;;  %v2871_v10 = vld [vmem:[%s16729_s12 + $0x130] sm:$0xff] }
 0x512   : > { %8550 = vmatpush1.bf16.msra.mxu0 %v8549_v61 }
 0x513   : > { %2667 = vmatmul.mubr.f32.gmra.mrb[66].mxu1 %v16975_v52  ;;  %8552 = vmatprep.subr.bf16.mxu0 %v8551_v58  ;;  %v2847_v52 = vld [vmem:[%s16729_s12 + $0x70] sm:$0xff] }
 0x514   : > { %2672 = vmatprep.mubr.f32.mxu1 %v16976_v62 }
 0x516   : > { %8554 = vmatpush1.bf16.msra.mxu0 %v8553_v44 }
 0x517   : > { %2673 = vmatmul.mubr.f32.gmra.mrb[68].mxu1 %v16977_v18  ;;  %8556 = vmatprep.subr.bf16.mxu0 %v8555_v42  ;;  %v2852_v18 = vld [vmem:[%s16729_s12 + $0x98] sm:$0xff] }
 0x518   : > { %2678 = vmatprep.mubr.f32.mxu1 %v16978_v33  ;;  %v2856_v33 = vld [vmem:[%s16729_s12 + $0xb8] sm:$0xff] }
 0x51b   : > { %2679 = vmatmul.mubr.f32.gmra.mrb[70].mxu1 %v16979_v16 }
 0x51c   : > { %2684 = vmatprep.mubr.f32.mxu1 %v16980_v55 }
 0x51f   : > { %2685 = vmatmul.mubr.f32.gmra.mrb[72].mxu1 %v16981_v43  ;;  %v8561_v43 = vpack.c.bf16 %v2847_v52, %v2843_v9 }
 0x520   : > { %2690 = vmatprep.mubr.f32.mxu1 %v16982_v56 }
 0x523   : > { %2691 = vmatmul.mubr.f32.gmra.mrb[74].mxu1 %v16983_v50 }
 0x524   : > { %2696 = vmatprep.mubr.f32.mxu1 %v16984_v63 }
 0x527   : > { %2697 = vmatmul.mubr.f32.gmra.mrb[76].mxu1 %v16985_v14  ;;  %v8563_v14 = vpack.c.bf16 %v2856_v33, %v2852_v18 }
 0x528   : > { %2702 = vmatprep.mubr.f32.mxu1 %v16986_v48  ;;  %v2851_v48 = vld [vmem:[%s16729_s12 + $0x90] sm:$0xff] }
 0x52b   : > { %2703 = vmatmul.mubr.f32.gmra.mrb[78].mxu1 %v16987_v35  ;;  %v2855_v35 = vld [vmem:[%s16729_s12 + $0xb0] sm:$0xff] }
 0x52c   : > { %2708 = vmatprep.mubr.f32.mxu1 %v16988_v3 }
 0x52f   : > { %2709 = vmatmul.mubr.f32.gmra.mrb[80].mxu1 %v16989_v31  ;;  %v2860_v31 = vld [vmem:[%s16729_s12 + $0xd8] sm:$0xff] }
 0x530   : > { %2714 = vmatprep.mubr.f32.mxu1 %v16990_v41  ;;  %v2864_v41 = vld [vmem:[%s16729_s12 + $0xf8] sm:$0xff] }
 0x533   : > { %2715 = vmatmul.mubr.f32.gmra.mrb[82].mxu1 %v16991_v1 }
 0x534   : > { %2720 = vmatprep.mubr.f32.mxu1 %v16992_v47 }
 0x537   : > { %2721 = vmatmul.mubr.f32.gmra.mrb[84].mxu1 %v16993_v30  ;;  %v8565_v30 = vpack.c.bf16 %v2855_v35, %v2851_v48  ;;  %v2887_v48 = vld [vmem:[%s16729_s12 + $0x1b0] sm:$0xff] }
 0x538   : > { %2726 = vmatprep.mubr.f32.mxu1 %v16994_v7 }
 0x53b   : > { %2727 = vmatmul.mubr.f32.gmra.mrb[86].mxu1 %v16995_v13 }
 0x53c   : > { %2732 = vmatprep.mubr.f32.mxu1 %v16996_v51 }
 0x53f   : > { %2733 = vmatmul.mubr.f32.gmra.mrb[88].mxu1 %v16997_v6  ;;  %v8567_v6 = vpack.c.bf16 %v2864_v41, %v2860_v31  ;;  %v2892_v31 = vld [vmem:[%s16729_s12 + $0x1d8] sm:$0xff] }
 0x540   : > { %2738 = vmatprep.mubr.f32.mxu1 %v16998_v60  ;;  %v2859_v60 = vld [vmem:[%s16729_s12 + $0xd0] sm:$0xff]  ;;  %v2896_v41 = vld [vmem:[%s16729_s12 + $0x1f8] sm:$0xff] }
 0x543   : > { %2739 = vmatmul.mubr.f32.gmra.mrb[90].mxu1 %v16999_v11  ;;  %v2863_v11 = vld [vmem:[%s16729_s12 + $0xf0] sm:$0xff] }
 0x544   : > { %2744 = vmatprep.mubr.f32.mxu1 %v17000_v5  ;;  %v8569_v32 = vpack.c.bf16 %v2863_v11, %v2859_v60 }
 0x547   : > { %2745 = vmatmul.mubr.f32.gmra.mrb[92].mxu1 %v17001_v15  ;;  %v2868_v15 = vld [vmem:[%s16729_s12 + $0x118] sm:$0xff] }
 0x548   : > { %2750 = vmatprep.mubr.f32.mxu1 %v17002_v27  ;;  %v2872_v27 = vld [vmem:[%s16729_s12 + $0x138] sm:$0xff] }
 0x549   : > { %v8571_v58 = vpack.c.bf16 %v2872_v27, %v2868_v15  ;;  %v8583_v15 = vpack.c.bf16 %v2896_v41, %v2892_v31  ;;  %v2891_v27 = vld [vmem:[%s16729_s12 + $0x1d0] sm:$0xff] }
 0x54a   : > { %v2907_v41 = vld [vmem:[%s16729_s12 + $0x250] sm:$0xff] }
 0x54b   : > { %2751 = vmatmul.mubr.f32.gmra.mrb[94].mxu1 %v17003_v57 }
 0x5e2   : > { %v2662_v53 = vpop.f32.mrb[64].mxu1 }
 0x5e3   : > { %v12465_v45 = vadd.f32 %v12459_v17, %v2662_v53  ;;  %v2664_v4 = vpop.f32.mrb[65].mxu1  ;;  %v8573_v53 = vpack.c.bf16 %v2871_v10, %v2867_v21 }
 0x5e4   : > { %v12474_v2 = vadd.f32 %v12462_v40, %v2664_v4 }
 0x5e5   : > { %v2801_v59 = vmax.f32 %v12465_v45, 0.0 }
 0x5e6   : > { %v2802_v22 = vmax.f32 %v12474_v2, 0.0  ;;  %v2668_v8 = vpop.f32.mrb[66].mxu1 }
 0x5e7   : > { %v12485_v49 = vadd.f32 %v12459_v17, %v2668_v8  ;;  %v2670_v46 = vpop.f32.mrb[67].mxu1  ;;  %v2879_v8 = vld [vmem:[%s16729_s12 + $0x170] sm:$0xff] }
 0x5e8   : > { %v12494_v62 = vadd.f32 %v12462_v40, %v2670_v46  ;;  %3047 = vmatprep.mubr.f32.mxu0 %v2802_v22  ;;  %v2884_v46 = vld [vmem:[%s16729_s12 + $0x198] sm:$0xff]  ;;  %v8577_v18 = vpack.c.bf16 %v2879_v8, %v2875_v24  ;;  %v2903_v24 = vld [vmem:[%s16729_s12 + $0x230] sm:$0xff] }
 0x5e9   : > { %3048 = vmatmul.mubr.f32.vlgmr.msra.gmra.mrb[64].mxu0 %v2801_v59  ;;  %v2803_v56 = vmax.f32 %v12485_v49, 0.0 }
 0x5ea   : > { %v2804_v16 = vmax.f32 %v12494_v62, 0.0  ;;  %v2674_v55 = vpop.f32.mrb[68].mxu1  ;;  %8558 = vmatpush1.bf16.msra.mxu0 %v8557_v20 }
 0x5eb   : > { %v12509_v50 = vadd.f32 %v12459_v17, %v2674_v55  ;;  %v2676_v63 = vpop.f32.mrb[69].mxu1  ;;  %8560 = vmatprep.subr.bf16.mxu0 %v8559_v23  ;;  %v2888_v23 = vld [vmem:[%s16729_s12 + $0x1b8] sm:$0xff] }
 0x5ec   : > { %v12518_v3 = vadd.f32 %v12462_v40, %v2676_v63  ;;  %3053 = vmatprep.mubr.f32.mxu0 %v2804_v16  ;;  %v8579_v63 = vpack.c.bf16 %v2888_v23, %v2884_v46  ;;  %v2908_v46 = vld [vmem:[%s16729_s12 + $0x258] sm:$0xff] }
 0x5ed   : > { %3054 = vmatmul.mubr.f32.gmra.mrb[66].mxu0 %v2803_v56  ;;  %v2805_v7 = vmax.f32 %v12509_v50, 0.0  ;;  %v2912_v23 = vld [vmem:[%s16729_s12 + $0x278] sm:$0xff]  ;;  %v3690_v50 = vld [vmem:[%s16731_s14 + $0x8] sm:$0xff] }
 0x5ee   : > { %v2806_v1 = vmax.f32 %v12518_v3, 0.0  ;;  %v2680_v47 = vpop.f32.mrb[70].mxu1  ;;  %8562 = vmatpush1.bf16.msra.mxu0 %v8561_v43  ;;  %v8591_v31 = vpack.c.bf16 %v2912_v23, %v2908_v46  ;;  %v2924_v46 = vld [vmem:[%s16729_s12 + $0x2d8] sm:$0xff]  ;;  %v3694_v3 = vld [vmem:[%s16731_s14 + $0x28] sm:$0xff] }
 0x5ef   : > { %v12533_v13 = vadd.f32 %v12459_v17, %v2680_v47  ;;  %v2682_v51 = vpop.f32.mrb[71].mxu1  ;;  %8564 = vmatprep.subr.bf16.mxu0 %v8563_v14  ;;  %v2883_v14 = vld [vmem:[%s16729_s12 + $0x190] sm:$0xff]  ;;  %v2928_v23 = vld [vmem:[%s16729_s12 + $0x2f8] sm:$0xff] }
 0x5f0   : > { %v12542_v5 = vadd.f32 %v12462_v40, %v2682_v51  ;;  %3059 = vmatprep.mubr.f32.mxu0 %v2806_v1  ;;  %v8581_v51 = vpack.c.bf16 %v2887_v48, %v2883_v14 }
 0x5f1   : > { %3060 = vmatmul.mubr.f32.gmra.mrb[68].mxu0 %v2805_v7  ;;  %v2807_v61 = vmax.f32 %v12533_v13, 0.0  ;;  %v3696_v13 = vld [vmem:[%s16731_s14 + $0x38] sm:$0xff] }
 0x5f2   : > { %v2808_v57 = vmax.f32 %v12542_v5, 0.0  ;;  %v2686_v54 = vpop.f32.mrb[72].mxu1  ;;  %8566 = vmatpush1.bf16.msra.mxu0 %v8565_v30  ;;  %v3689_v5 = vld [vmem:[%s16731_s14] sm:$0xff] }
 0x5f3   : > { %v12557_v26 = vadd.f32 %v12459_v17, %v2686_v54  ;;  %v2688_v38 = vpop.f32.mrb[73].mxu1  ;;  %8568 = vmatprep.subr.bf16.mxu0 %v8567_v6  ;;  %v2895_v54 = vld [vmem:[%s16729_s12 + $0x1f0] sm:$0xff] }
 0x5f4   : > { %v12566_v44 = vadd.f32 %v12462_v40, %v2688_v38  ;;  %3065 = vmatprep.mubr.f32.mxu0 %v2808_v57  ;;  %v2900_v38 = vld [vmem:[%s16729_s12 + $0x218] sm:$0xff]  ;;  %v8585_v28 = vpack.c.bf16 %v2895_v54, %v2891_v27 }
 0x5f5   : > { %3066 = vmatmul.mubr.f32.gmra.mrb[70].mxu0 %v2807_v61  ;;  %v2809_v4 = vmax.f32 %v12557_v26, 0.0  ;;  %v3693_v26 = vld [vmem:[%s16731_s14 + $0x20] sm:$0xff] }
 0x5f6   : > { %v2810_v42 = vmax.f32 %v12566_v44, 0.0  ;;  %v2692_v19 = vpop.f32.mrb[74].mxu1  ;;  %8570 = vmatpush1.bf16.msra.mxu0 %v8569_v32  ;;  %v3691_v44 = vld [vmem:[%s16731_s14 + $0x10] sm:$0xff] }
 0x5f7   : > { %v12581_v25 = vadd.f32 %v12459_v17, %v2692_v19  ;;  %v2694_v0 = vpop.f32.mrb[75].mxu1  ;;  %8572 = vmatprep.subr.bf16.mxu0 %v8571_v58  ;;  %v2904_v58 = vld [vmem:[%s16729_s12 + $0x238] sm:$0xff] }
 0x5f8   : > { %v12590_v20 = vadd.f32 %v12462_v40, %v2694_v0  ;;  %3071 = vmatprep.mubr.f32.mxu0 %v2810_v42  ;;  %v8587_v0 = vpack.c.bf16 %v2904_v58, %v2900_v38 }
 0x5f9   : > { %3072 = vmatmul.mubr.f32.gmra.mrb[72].mxu0 %v2809_v4  ;;  %v2811_v33 = vmax.f32 %v12581_v25, 0.0  ;;  %v3695_v25 = vld [vmem:[%s16731_s14 + $0x30] sm:$0xff] }
 0x5fa   : > { %v2812_v9 = vmax.f32 %v12590_v20, 0.0  ;;  %v2698_v52 = vpop.f32.mrb[76].mxu1  ;;  %8574 = vmatpush1.bf16.msra.mxu0 %v8573_v53  ;;  %v8685_v20 = vpack.c.bf16 %v3695_v25, %v3691_v44  ;;  %v3732_v25 = vld [vmem:[%s16731_s14 + $0x158] sm:$0xff] }
 0x5fb   : > { %v12605_v55 = vadd.f32 %v12459_v17, %v2698_v52  ;;  %v2700_v43 = vpop.f32.mrb[77].mxu1  ;;  %8576 = vmatprep.subr.bf16.mxu0 %v8575_v12  ;;  %v2899_v12 = vld [vmem:[%s16729_s12 + $0x210] sm:$0xff] }
 0x5fc   : > { %v12614_v35 = vadd.f32 %v12462_v40, %v2700_v43  ;;  %3077 = vmatprep.mubr.f32.mxu0 %v2812_v9  ;;  %v8589_v43 = vpack.c.bf16 %v2903_v24, %v2899_v12  ;;  %v2919_v12 = vld [vmem:[%s16729_s12 + $0x2b0] sm:$0xff] }
 0x5fd   : > { %3078 = vmatmul.mubr.f32.gmra.mrb[74].mxu0 %v2811_v33  ;;  %v16849_v6 = vmax.f32 %v12605_v55, 0.0  ;;  %v17005_v45 = vmax.f32 %v12605_v55, 0.0  ;;  %v3700_v55 = vld [vmem:[%s16731_s14 + $0x58] sm:$0xff] }
 0x5fe   : > { %v16851_v47 = vmax.f32 %v12614_v35, 0.0  ;;  %v2704_v30 = vpop.f32.mrb[78].mxu1  ;;  %8578 = vmatpush1.bf16.msra.mxu0 %v8577_v18 }
 0x5ff   : > { %v12629_v60 = vadd.f32 %v12459_v17, %v2704_v30  ;;  %v2706_v11 = vpop.f32.mrb[79].mxu1  ;;  %8580 = vmatprep.subr.bf16.mxu0 %v8579_v63  ;;  %v2911_v30 = vld [vmem:[%s16729_s12 + $0x270] sm:$0xff] }
 0x600   : > { %v12638_v32 = vadd.f32 %v12462_v40, %v2706_v11  ;;  %3083 = vmatprep.mubr.f32.mxu0 %v16851_v47  ;;  %v2916_v11 = vld [vmem:[%s16729_s12 + $0x298] sm:$0xff]  ;;  %v8593_v38 = vpack.c.bf16 %v2911_v30, %v2907_v41 }
 0x601   : > { %3084 = vmatmul.mubr.f32.gmra.mrb[76].mxu0 %v16849_v6  ;;  %v16845_v34 = vmax.f32 %v12629_v60, 0.0  ;;  %v2955_v6 = vld [vmem:[%s16729_s12 + $0x3d0] sm:$0xff] }
 0x602   : > { %v16847_v21 = vmax.f32 %v12638_v32, 0.0  ;;  %v2710_v10 = vpop.f32.mrb[80].mxu1  ;;  %8582 = vmatpush1.bf16.msra.mxu0 %v8581_v51  ;;  %v17006_v2 = vmax.f32 %v12638_v32, 0.0 }
 0x603   : > { %v12653_v19 = vadd.f32 %v12459_v17, %v2710_v10  ;;  %v2712_v53 = vpop.f32.mrb[81].mxu1  ;;  %8584 = vmatprep.subr.bf16.mxu0 %v8583_v15  ;;  %v2920_v15 = vld [vmem:[%s16729_s12 + $0x2b8] sm:$0xff] }
 0x604   : > { %v12662_v8 = vadd.f32 %v12462_v40, %v2712_v53  ;;  %3089 = vmatprep.mubr.f32.mxu0 %v16847_v21  ;;  %v8595_v53 = vpack.c.bf16 %v2920_v15, %v2916_v11  ;;  %v8599_v11 = vpack.c.bf16 %v2928_v23, %v2924_v46  ;;  %v2923_v15 = vld [vmem:[%s16729_s12 + $0x2d0] sm:$0xff] }
 0x605   : > { %3090 = vmatmul.mubr.f32.gmra.mrb[78].mxu0 %v16845_v34  ;;  %v16841_v63 = vmax.f32 %v12653_v19, 0.0  ;;  %v2947_v34 = vld [vmem:[%s16729_s12 + $0x390] sm:$0xff]  ;;  %v17009_v49 = vmax.f32 %v12653_v19, 0.0 }
 0x606   : > { %v16843_v52 = vmax.f32 %v12662_v8, 0.0  ;;  %v2716_v18 = vpop.f32.mrb[82].mxu1  ;;  %8586 = vmatpush1.bf16.msra.mxu0 %v8585_v28 }
 0x607   : > { %v12677_v14 = vadd.f32 %v12459_v17, %v2716_v18  ;;  %v2718_v48 = vpop.f32.mrb[83].mxu1  ;;  %8588 = vmatprep.subr.bf16.mxu0 %v8587_v0  ;;  %v2915_v0 = vld [vmem:[%s16729_s12 + $0x290] sm:$0xff] }
 0x608   : > { %v12686_v51 = vadd.f32 %v12462_v40, %v2718_v48  ;;  %3095 = vmatprep.mubr.f32.mxu0 %v16843_v52  ;;  %v8597_v48 = vpack.c.bf16 %v2919_v12, %v2915_v0 }
 0x609   : > { %3096 = vmatmul.mubr.f32.gmra.mrb[80].mxu0 %v16841_v63  ;;  %v16837_v58 = vmax.f32 %v12677_v14, 0.0  ;;  %v2939_v63 = vld [vmem:[%s16729_s12 + $0x350] sm:$0xff] }
 0x60a   : > { %v16839_v27 = vmax.f32 %v12686_v51, 0.0  ;;  %v2722_v54 = vpop.f32.mrb[84].mxu1  ;;  %8590 = vmatpush1.bf16.msra.mxu0 %v8589_v43  ;;  %v17010_v62 = vmax.f32 %v12686_v51, 0.0 }
 0x60b   : > { %v12701_v10 = vadd.f32 %v12459_v17, %v2722_v54  ;;  %v2724_v28 = vpop.f32.mrb[85].mxu1  ;;  %8592 = vmatprep.subr.bf16.mxu0 %v8591_v31  ;;  %v2927_v54 = vld [vmem:[%s16729_s12 + $0x2f0] sm:$0xff] }
 0x60c   : > { %v12710_v24 = vadd.f32 %v12462_v40, %v2724_v28  ;;  %3101 = vmatprep.mubr.f32.mxu0 %v16839_v27  ;;  %v8601_v46 = vpack.c.bf16 %v2927_v54, %v2923_v15 }
 0x60d   : > { %3102 = vmatmul.mubr.f32.gmra.mrb[82].mxu0 %v16837_v58  ;;  %v16838_v31 = vmax.f32 %v12701_v10, 0.0  ;;  %v2931_v58 = vld [vmem:[%s16729_s12 + $0x310] sm:$0xff] }
 0x60e   : > { %v16836_v18 = vmax.f32 %v12710_v24, 0.0  ;;  %v2728_v43 = vpop.f32.mrb[86].mxu1  ;;  %8594 = vmatpush1.bf16.msra.mxu0 %v8593_v38  ;;  %v2932_v38 = vld [vmem:[%s16729_s12 + $0x318] sm:$0xff] }
 0x60f   : > { %v12725_v41 = vadd.f32 %v12459_v17, %v2728_v43  ;;  %v2730_v30 = vpop.f32.mrb[87].mxu1  ;;  %8596 = vmatprep.subr.bf16.mxu0 %v8595_v53  ;;  %v2936_v53 = vld [vmem:[%s16729_s12 + $0x338] sm:$0xff] }
 0x610   : > { %v12734_v28 = vadd.f32 %v12462_v40, %v2730_v30  ;;  %3107 = vmatprep.mubr.f32.mxu0 %v16836_v18  ;;  %v8603_v18 = vpack.c.bf16 %v2936_v53, %v2932_v38 }
 0x611   : > { %3108 = vmatmul.mubr.f32.gmra.mrb[84].mxu0 %v16838_v31  ;;  %v16842_v23 = vmax.f32 %v12725_v41, 0.0  ;;  %v2935_v31 = vld [vmem:[%s16729_s12 + $0x330] sm:$0xff]  ;;  %v17015_v32 = vmax.f32 %v12725_v41, 0.0 }
 0x612   : > { %v16840_v0 = vmax.f32 %v12734_v28, 0.0  ;;  %v2734_v12 = vpop.f32.mrb[88].mxu1  ;;  %8598 = vmatpush1.bf16.msra.mxu0 %v8597_v48  ;;  %v2940_v48 = vld [vmem:[%s16729_s12 + $0x358] sm:$0xff]  ;;  %v8605_v38 = vpack.c.bf16 %v2935_v31, %v2931_v58 }
 0x613   : > { %v12749_v43 = vadd.f32 %v12459_v17, %v2734_v12  ;;  %v2736_v30 = vpop.f32.mrb[89].mxu1  ;;  %8600 = vmatprep.subr.bf16.mxu0 %v8599_v11  ;;  %v2944_v11 = vld [vmem:[%s16729_s12 + $0x378] sm:$0xff] }
 0x614   : > { %v12758_v27 = vadd.f32 %v12462_v40, %v2736_v30  ;;  %3113 = vmatprep.mubr.f32.mxu0 %v16840_v0  ;;  %v8607_v0 = vpack.c.bf16 %v2944_v11, %v2940_v48  ;;  %v2948_v58 = vld [vmem:[%s16729_s12 + $0x398] sm:$0xff] }
 0x615   : > { %3114 = vmatmul.mubr.f32.gmra.mrb[86].mxu0 %v16842_v23  ;;  %v16846_v53 = vmax.f32 %v12749_v43, 0.0  ;;  %v2943_v23 = vld [vmem:[%s16729_s12 + $0x370] sm:$0xff] }
 0x616   : > { %v16844_v15 = vmax.f32 %v12758_v27, 0.0  ;;  %v2740_v54 = vpop.f32.mrb[90].mxu1  ;;  %8602 = vmatpush1.bf16.msra.mxu0 %v8601_v46  ;;  %v8609_v48 = vpack.c.bf16 %v2943_v23, %v2939_v63  ;;  %v2956_v63 = vld [vmem:[%s16729_s12 + $0x3d8] sm:$0xff]  ;;  %v17016_v51 = vmax.f32 %v12758_v27, 0.0 }
 0x617   : > { %v12773_v12 = vadd.f32 %v12459_v17, %v2740_v54  ;;  %v2742_v30 = vpop.f32.mrb[91].mxu1  ;;  %8604 = vmatprep.subr.bf16.mxu0 %v8603_v18  ;;  %v2952_v18 = vld [vmem:[%s16729_s12 + $0x3b8] sm:$0xff] }
 0x618   : > { %v12782_v52 = vadd.f32 %v12462_v40, %v2742_v30  ;;  %3119 = vmatprep.mubr.f32.mxu0 %v16844_v15  ;;  %v8611_v15 = vpack.c.bf16 %v2952_v18, %v2948_v58  ;;  %v3708_v27 = vld [vmem:[%s16731_s14 + $0x98] sm:$0xff] }
 0x619   : > { %3120 = vmatmul.mubr.f32.gmra.mrb[88].mxu0 %v16846_v53  ;;  %v16850_v11 = vmax.f32 %v12773_v12, 0.0  ;;  %v2951_v53 = vld [vmem:[%s16729_s12 + $0x3b0] sm:$0xff] }
 0x61a   : > { %v16848_v31 = vmax.f32 %v12782_v52, 0.0  ;;  %v2746_v46 = vpop.f32.mrb[92].mxu1  ;;  %8606 = vmatpush1.bf16.msra.mxu0 %v8605_v38  ;;  %v8613_v58 = vpack.c.bf16 %v2951_v53, %v2947_v34  ;;  %v3710_v53 = vld [vmem:[%s16731_s14 + $0xa8] sm:$0xff] }
 0x61b   : > { %v12797_v54 = vadd.f32 %v12459_v17, %v2746_v46  ;;  %v2748_v30 = vpop.f32.mrb[93].mxu1  ;;  %8608 = vmatprep.subr.bf16.mxu0 %v8607_v0  ;;  %v2960_v0 = vld [vmem:[%s16729_s12 + $0x3f8] sm:$0xff] }
 0x61c   : > { %v12806_v21 = vadd.f32 %v12462_v40, %v2748_v30  ;;  %3125 = vmatprep.mubr.f32.mxu0 %v16848_v31  ;;  %v8615_v31 = vpack.c.bf16 %v2960_v0, %v2956_v63  ;;  %v17017_v63 = vmax.f32 %v12749_v43, 0.0 }
 0x61d   : > { %3126 = vmatmul.mubr.f32.gmra.mrb[90].mxu0 %v16850_v11  ;;  %v2829_v18 = vmax.f32 %v12797_v54, 0.0  ;;  %v2959_v11 = vld [vmem:[%s16729_s12 + $0x3f0] sm:$0xff] }
 0x61e   : > { %v2830_v23 = vmax.f32 %v12806_v21, 0.0  ;;  %v2752_v38 = vpop.f32.mrb[94].mxu1  ;;  %8610 = vmatpush1.bf16.msra.mxu0 %v8609_v48  ;;  %v8617_v34 = vpack.c.bf16 %v2959_v11, %v2955_v6  ;;  %v3704_v6 = vld [vmem:[%s16731_s14 + $0x78] sm:$0xff]  ;;  %v3705_v11 = vld [vmem:[%s16731_s14 + $0x80] sm:$0xff]  ;;  %v3727_v54 = vld [vmem:[%s16731_s14 + $0x130] sm:$0xff] }
 0x61f   : > { %v12821_v46 = vadd.f32 %v12459_v17, %v2752_v38  ;;  %v2754_v30 = vpop.f32.mrb[95].mxu1  ;;  %8612 = vmatprep.subr.bf16.mxu0 %v8611_v15  ;;  %v8687_v19 = vpack.c.bf16 %v3704_v6, %v3700_v55  ;;  %v3712_v48 = vld [vmem:[%s16731_s14 + $0xb8] sm:$0xff]  ;;  %v3709_v38 = vld [vmem:[%s16731_s14 + $0xa0] sm:$0xff] }
 0x620   : > { %v12830_v47 = vadd.f32 %v12462_v40, %v2754_v30  ;;  %3131 = vmatprep.mubr.f32.mxu0 %v2830_v23  ;;  %v17004_v40 = vmax.f32 %v12614_v35, 0.0  ;;  %v8691_v0 = vpack.c.bf16 %v3712_v48, %v3708_v27  ;;  %v17018_v30 = vmax.f32 %v12782_v52, 0.0  ;;  %v3716_v52 = vld [vmem:[%s16731_s14 + $0xd8] sm:$0xff]  ;;  %v3750_v48 = vld [vmem:[%s16731_s14 + $0x1e8] sm:$0xff] }
 0x621   : > { %3132 = vmatmul.mubr.f32.gmra.mrb[92].mxu0 %v2829_v18  ;;  %v2831_v15 = vmax.f32 %v12821_v46, 0.0  ;;  %v3724_v21 = vld [vmem:[%s16731_s14 + $0x118] sm:$0xff]  ;;  %v3733_v46 = vld [vmem:[%s16731_s14 + $0x160] sm:$0xff] }
 0x622   : > { %v2832_v17 = vmax.f32 %v12830_v47, 0.0  ;;  %8614 = vmatpush1.bf16.msra.mxu0 %v8613_v58  ;;  %v3707_v58 = vld [vmem:[%s16731_s14 + $0x90] sm:$0xff]  ;;  %v3734_v47 = vld [vmem:[%s16731_s14 + $0x168] sm:$0xff] }
 0x623   : > { %8616 = vmatprep.subr.bf16.mxu0 %v8615_v31 }
 0x624   : > { %3137 = vmatprep.mubr.f32.mxu0 %v2832_v17 }
 0x625   : > { %3138 = vmatmul.mubr.f32.gmra.mrb[94].mxu0 %v2831_v15 }
 0x626   : > { %8618 = vmatpush1.bf16.msra.mxu0 %v8617_v34  ;;  %3208 = vmatprep.mubr.f32.mxu0 %v2802_v22  ;;  %v17007_v22 = vmax.f32 %v12629_v60, 0.0  ;;  %v3697_v60 = vld [vmem:[%s16731_s14 + $0x40] sm:$0xff]  ;;  %v8629_v34 = vpack.c.bf16 %v3709_v38, %v3705_v11  ;;  %v3748_v11 = vld [vmem:[%s16731_s14 + $0x1d8] sm:$0xff] }
 0x627   : > { %v3745_v38 = vld [vmem:[%s16731_s14 + $0x1c0] sm:$0xff] }
 0x629   : > { %3209 = vmatmul.mubr.f32.vlgmr.msra.gmra.mrb[96].mxu0 %v2801_v59  ;;  %v17008_v59 = vmax.f32 %v12662_v8, 0.0  ;;  %v3701_v8 = vld [vmem:[%s16731_s14 + $0x60] sm:$0xff] }
 0x62a   : > { %3214 = vmatprep.mubr.f32.mxu0 %v2804_v16  ;;  %v17011_v16 = vmax.f32 %v12677_v14, 0.0  ;;  %v3699_v14 = vld [vmem:[%s16731_s14 + $0x50] sm:$0xff] }
 0x62d   : > { %3215 = vmatmul.mubr.f32.gmra.mrb[98].mxu0 %v2803_v56  ;;  %v17012_v56 = vmax.f32 %v12710_v24, 0.0  ;;  %v3703_v24 = vld [vmem:[%s16731_s14 + $0x70] sm:$0xff] }
 0x62e   : > { %3220 = vmatprep.mubr.f32.mxu0 %v2806_v1  ;;  %v3692_v1 = vld [vmem:[%s16731_s14 + $0x18] sm:$0xff]  ;;  %v8689_v41 = vpack.c.bf16 %v3703_v24, %v3699_v14  ;;  %v3741_v24 = vld [vmem:[%s16731_s14 + $0x1a0] sm:$0xff] }
 0x62f   : > { %v3744_v14 = vld [vmem:[%s16731_s14 + $0x1b8] sm:$0xff] }
 0x631   : > { %3221 = vmatmul.mubr.f32.gmra.mrb[100].mxu0 %v2805_v7  ;;  %v8619_v7 = vpack.c.bf16 %v3694_v3, %v3690_v50  ;;  %v3715_v50 = vld [vmem:[%s16731_s14 + $0xd0] sm:$0xff] }
 0x632   : > { %3226 = vmatprep.mubr.f32.mxu0 %v2808_v57  ;;  %v17013_v57 = vmax.f32 %v12701_v10, 0.0  ;;  %v8625_v10 = vpack.c.bf16 %v3701_v8, %v3697_v60  ;;  %v3738_v60 = vld [vmem:[%s16731_s14 + $0x188] sm:$0xff] }
 0x633   : > { %8620 = vmatprep.subr.bf16.mxu1 %v8619_v7  ;;  %v3722_v7 = vld [vmem:[%s16731_s14 + $0x108] sm:$0xff] }
 0x635   : > { %3227 = vmatmul.mubr.f32.gmra.mrb[102].mxu0 %v2807_v61  ;;  %v8683_v61 = vpack.c.bf16 %v3696_v13, %v3692_v1  ;;  %v3719_v1 = vld [vmem:[%s16731_s14 + $0xf0] sm:$0xff]  ;;  %v3726_v13 = vld [vmem:[%s16731_s14 + $0x128] sm:$0xff] }
 0x636   : > { %3232 = vmatprep.mubr.f32.mxu0 %v2810_v42  ;;  %v17014_v42 = vmax.f32 %v12734_v28, 0.0  ;;  %v3706_v28 = vld [vmem:[%s16731_s14 + $0x88] sm:$0xff] }
 0x637   : > { %8684 = vmatprep.subr.bf16.mxu0 %v8683_v61  ;;  %v8627_v31 = vpack.c.bf16 %v3710_v53, %v3706_v28  ;;  %v3721_v61 = vld [vmem:[%s16731_s14 + $0x100] sm:$0xff]  ;;  %v3743_v53 = vld [vmem:[%s16731_s14 + $0x1b0] sm:$0xff] }
 0x638   : > { %8686 = vmatpush1.bf16.msra.mxu0 %v8685_v20  ;;  %v3736_v20 = vld [vmem:[%s16731_s14 + $0x178] sm:$0xff] }
 0x639   : > { %3233 = vmatmul.mubr.f32.gmra.mrb[104].mxu0 %v2809_v4  ;;  %v8621_v4 = vpack.c.bf16 %v3693_v26, %v3689_v5  ;;  %8688 = vmatprep.subr.bf16.mxu0 %v8687_v19  ;;  %v3728_v5 = vld [vmem:[%s16731_s14 + $0x138] sm:$0xff]  ;;  %v3725_v26 = vld [vmem:[%s16731_s14 + $0x120] sm:$0xff] }
 0x63a   : > { %3238 = vmatprep.mubr.f32.mxu0 %v2812_v9  ;;  %v3698_v9 = vld [vmem:[%s16731_s14 + $0x48] sm:$0xff]  ;;  %v8637_v44 = vpack.c.bf16 %v3725_v26, %v3721_v61  ;;  %v3740_v19 = vld [vmem:[%s16731_s14 + $0x198] sm:$0xff]  ;;  %v3765_v26 = vld [vmem:[%s16731_s14 + $0x260] sm:$0xff] }
 0x63b   : > { %8622 = vmatpush1.bf16.msra.mxu1 %v8621_v4  ;;  %v3730_v4 = vld [vmem:[%s16731_s14 + $0x148] sm:$0xff] }
 0x63c   : > { %8690 = vmatpush1.bf16.msra.mxu0 %v8689_v41  ;;  %v3739_v41 = vld [vmem:[%s16731_s14 + $0x190] sm:$0xff] }
 0x63d   : > { %3239 = vmatmul.mubr.f32.gmra.mrb[106].mxu0 %v2811_v33  ;;  %v3702_v33 = vld [vmem:[%s16731_s14 + $0x68] sm:$0xff]  ;;  %8692 = vmatprep.subr.bf16.mxu0 %v8691_v0  ;;  %v8709_v27 = vpack.c.bf16 %v3743_v53, %v3739_v41  ;;  %v3752_v0 = vld [vmem:[%s16731_s14 + $0x1f8] sm:$0xff]  ;;  %v3779_v41 = vld [vmem:[%s16731_s14 + $0x2d0] sm:$0xff] }
 0x63e   : > { %3244 = vmatprep.mubr.f32.mxu0 %v17004_v40  ;;  %v8623_v35 = vpack.c.bf16 %v3702_v33, %v3698_v9  ;;  %v3711_v40 = vld [vmem:[%s16731_s14 + $0xb0] sm:$0xff]  ;;  %v8703_v9 = vpack.c.bf16 %v3736_v20, %v3732_v25  ;;  %v3729_v33 = vld [vmem:[%s16731_s14 + $0x140] sm:$0xff]  ;;  %v3776_v20 = vld [vmem:[%s16731_s14 + $0x2b8] sm:$0xff] }
 0x63f   : > { %v8693_v43 = vpack.c.bf16 %v3711_v40, %v3707_v58  ;;  %v8641_v55 = vpack.c.bf16 %v3733_v46, %v3729_v33  ;;  %v8711_v58 = vpack.c.bf16 %v3752_v0, %v3748_v11  ;;  %v3773_v46 = vld [vmem:[%s16731_s14 + $0x2a0] sm:$0xff]  ;;  %v3783_v53 = vld [vmem:[%s16731_s14 + $0x2f0] sm:$0xff]  ;;  %v3792_v0 = vld [vmem:[%s16731_s14 + $0x338] sm:$0xff] }
 0x640   : > { %8624 = vmatprep.subr.bf16.mxu1 %v8623_v35  ;;  %v3735_v35 = vld [vmem:[%s16731_s14 + $0x170] sm:$0xff] }
 0x641   : > { %3245 = vmatmul.mubr.f32.gmra.mrb[108].mxu0 %v17005_v45  ;;  %8626 = vmatpush1.bf16.msra.mxu1 %v8625_v10  ;;  %v3714_v45 = vld [vmem:[%s16731_s14 + $0xc8] sm:$0xff]  ;;  %v8707_v10 = vpack.c.bf16 %v3744_v14, %v3740_v19  ;;  %v3784_v14 = vld [vmem:[%s16731_s14 + $0x2f8] sm:$0xff] }
 0x642   : > { %3250 = vmatprep.mubr.f32.mxu0 %v17006_v2  ;;  %8628 = vmatprep.subr.bf16.mxu1 %v8627_v31  ;;  %v3718_v2 = vld [vmem:[%s16731_s14 + $0xe8] sm:$0xff] }
 0x643   : > { %8694 = vmatpush1.bf16.msra.mxu0 %v8693_v43  ;;  %v3746_v31 = vld [vmem:[%s16731_s14 + $0x1c8] sm:$0xff]  ;;  %v3751_v43 = vld [vmem:[%s16731_s14 + $0x1f0] sm:$0xff] }
 0x645   : > { %3251 = vmatmul.mubr.f32.gmra.mrb[110].mxu0 %v17007_v22  ;;  %8630 = vmatpush1.bf16.msra.mxu1 %v8629_v34  ;;  %v8631_v22 = vpack.c.bf16 %v3718_v2, %v3714_v45  ;;  %v3747_v34 = vld [vmem:[%s16731_s14 + $0x1d0] sm:$0xff]  ;;  %v3754_v2 = vld [vmem:[%s16731_s14 + $0x208] sm:$0xff] }
 0x646   : > { %3256 = vmatprep.mubr.f32.mxu0 %v17008_v59  ;;  %v3720_v59 = vld [vmem:[%s16731_s14 + $0xf8] sm:$0xff]  ;;  %v8713_v45 = vpack.c.bf16 %v3751_v43, %v3747_v34  ;;  %v3787_v34 = vld [vmem:[%s16731_s14 + $0x310] sm:$0xff] }
 0x647   : > { %8632 = vmatprep.subr.bf16.mxu1 %v8631_v22  ;;  %v3756_v22 = vld [vmem:[%s16731_s14 + $0x218] sm:$0xff]  ;;  %v3791_v43 = vld [vmem:[%s16731_s14 + $0x330] sm:$0xff] }
 0x649   : > { %3257 = vmatmul.mubr.f32.gmra.mrb[112].mxu0 %v17009_v49  ;;  %v3713_v49 = vld [vmem:[%s16731_s14 + $0xc0] sm:$0xff] }
 0x64a   : > { %3262 = vmatprep.mubr.f32.mxu0 %v17010_v62  ;;  %v17019_v62 = vmax.f32 %v12773_v12, 0.0  ;;  %v8697_v12 = vpack.c.bf16 %v3719_v1, %v3715_v50  ;;  %v3755_v50 = vld [vmem:[%s16731_s14 + $0x210] sm:$0xff] }
 0x64b   : > { %v3759_v1 = vld [vmem:[%s16731_s14 + $0x230] sm:$0xff] }
 0x64d   : > { %3263 = vmatmul.mubr.f32.gmra.mrb[114].mxu0 %v17011_v16  ;;  %v8695_v16 = vpack.c.bf16 %v3720_v59, %v3716_v52  ;;  %v3758_v52 = vld [vmem:[%s16731_s14 + $0x228] sm:$0xff] }
 0x64e   : > { %3268 = vmatprep.mubr.f32.mxu0 %v17012_v56  ;;  %v3717_v56 = vld [vmem:[%s16731_s14 + $0xe0] sm:$0xff]  ;;  %v8651_v59 = vpack.c.bf16 %v3758_v52, %v3754_v2  ;;  %v3794_v2 = vld [vmem:[%s16731_s14 + $0x348] sm:$0xff] }
 0x64f   : > { %v8633_v3 = vpack.c.bf16 %v3717_v56, %v3713_v49  ;;  %8696 = vmatprep.subr.bf16.mxu0 %v8695_v16  ;;  %v3760_v49 = vld [vmem:[%s16731_s14 + $0x238] sm:$0xff]  ;;  %v3757_v56 = vld [vmem:[%s16731_s14 + $0x220] sm:$0xff]  ;;  %v3798_v52 = vld [vmem:[%s16731_s14 + $0x368] sm:$0xff] }
 0x650   : > { %8698 = vmatpush1.bf16.msra.mxu0 %v8697_v12  ;;  %v8715_v16 = vpack.c.bf16 %v3760_v49, %v3756_v22  ;;  %v8717_v12 = vpack.c.bf16 %v3759_v1, %v3755_v50  ;;  %v3796_v22 = vld [vmem:[%s16731_s14 + $0x358] sm:$0xff]  ;;  %v3795_v50 = vld [vmem:[%s16731_s14 + $0x350] sm:$0xff] }
 0x651   : > { %3269 = vmatmul.mubr.f32.gmra.mrb[116].mxu0 %v17013_v57  ;;  %8634 = vmatpush1.bf16.msra.mxu1 %v8633_v3  ;;  %v8699_v57 = vpack.c.bf16 %v3728_v5, %v3724_v21  ;;  %v3764_v21 = vld [vmem:[%s16731_s14 + $0x258] sm:$0xff]  ;;  %v3799_v1 = vld [vmem:[%s16731_s14 + $0x370] sm:$0xff] }
 0x652   : > { %3274 = vmatprep.mubr.f32.mxu0 %v17014_v42  ;;  %v3723_v42 = vld [vmem:[%s16731_s14 + $0x110] sm:$0xff]  ;;  %v3768_v5 = vld [vmem:[%s16731_s14 + $0x278] sm:$0xff] }
 0x653   : > { %8700 = vmatprep.subr.bf16.mxu0 %v8699_v57  ;;  %v3761_v57 = vld [vmem:[%s16731_s14 + $0x240] sm:$0xff]  ;;  %v8719_v61 = vpack.c.bf16 %v3768_v5, %v3764_v21  ;;  %v3800_v49 = vld [vmem:[%s16731_s14 + $0x378] sm:$0xff] }
 0x654   : > { %v3804_v21 = vld [vmem:[%s16731_s14 + $0x398] sm:$0xff] }
 0x655   : > { %3275 = vmatmul.mubr.f32.gmra.mrb[118].mxu0 %v17015_v32  ;;  %v3742_v32 = vld [vmem:[%s16731_s14 + $0x1a8] sm:$0xff]  ;;  %v3808_v5 = vld [vmem:[%s16731_s14 + $0x3b8] sm:$0xff] }
 0x656   : > { %3280 = vmatprep.mubr.f32.mxu0 %v17016_v51  ;;  %v8643_v8 = vpack.c.bf16 %v3742_v32, %v3738_v60  ;;  %v3737_v51 = vld [vmem:[%s16731_s14 + $0x180] sm:$0xff]  ;;  %v3778_v60 = vld [vmem:[%s16731_s14 + $0x2c8] sm:$0xff] }
 0x657   : > { %v8645_v28 = vpack.c.bf16 %v3741_v24, %v3737_v51  ;;  %v3782_v32 = vld [vmem:[%s16731_s14 + $0x2e8] sm:$0xff]  ;;  %v3781_v24 = vld [vmem:[%s16731_s14 + $0x2e0] sm:$0xff] }
 0x658   : > { %v8663_v19 = vpack.c.bf16 %v3782_v32, %v3778_v60 }
 0x659   : > { %3281 = vmatmul.mubr.f32.gmra.mrb[120].mxu0 %v17017_v63  ;;  %v8647_v63 = vpack.c.bf16 %v3750_v48, %v3746_v31  ;;  %v3786_v31 = vld [vmem:[%s16731_s14 + $0x308] sm:$0xff] }
 0x65a   : > { %3286 = vmatprep.mubr.f32.mxu0 %v17018_v30  ;;  %v3749_v30 = vld [vmem:[%s16731_s14 + $0x1e0] sm:$0xff]  ;;  %v3790_v48 = vld [vmem:[%s16731_s14 + $0x328] sm:$0xff] }
 0x65b   : > { %v8649_v40 = vpack.c.bf16 %v3749_v30, %v3745_v38  ;;  %v8667_v11 = vpack.c.bf16 %v3790_v48, %v3786_v31  ;;  %v3785_v38 = vld [vmem:[%s16731_s14 + $0x300] sm:$0xff] }
 0x65c   : > { %v3789_v30 = vld [vmem:[%s16731_s14 + $0x320] sm:$0xff] }
 0x65d   : > { %3287 = vmatmul.mubr.f32.gmra.mrb[122].mxu0 %v17019_v62  ;;  %v3753_v62 = vld [vmem:[%s16731_s14 + $0x200] sm:$0xff] }
 0x65e   : > { %3292 = vmatprep.mubr.f32.mxu0 %v2830_v23  ;;  %v8635_v23 = vpack.c.bf16 %v3726_v13, %v3722_v7  ;;  %v8653_v3 = vpack.c.bf16 %v3757_v56, %v3753_v62  ;;  %v3762_v7 = vld [vmem:[%s16731_s14 + $0x248] sm:$0xff]  ;;  %v3793_v62 = vld [vmem:[%s16731_s14 + $0x340] sm:$0xff] }
 0x65f   : > { %v3766_v13 = vld [vmem:[%s16731_s14 + $0x268] sm:$0xff]  ;;  %v3797_v56 = vld [vmem:[%s16731_s14 + $0x360] sm:$0xff] }
 0x660   : > { %8636 = vmatprep.subr.bf16.mxu1 %v8635_v23  ;;  %v8655_v23 = vpack.c.bf16 %v3766_v13, %v3762_v7  ;;  %v3802_v7 = vld [vmem:[%s16731_s14 + $0x388] sm:$0xff] }
 0x661   : > { %3293 = vmatmul.mubr.f32.gmra.mrb[124].mxu0 %v2829_v18  ;;  %v8701_v18 = vpack.c.bf16 %v3727_v54, %v3723_v42  ;;  %8638 = vmatpush1.bf16.msra.mxu1 %v8637_v44  ;;  %v3763_v44 = vld [vmem:[%s16731_s14 + $0x250] sm:$0xff]  ;;  %v8657_v42 = vpack.c.bf16 %v3765_v26, %v3761_v57  ;;  %v3806_v13 = vld [vmem:[%s16731_s14 + $0x3a8] sm:$0xff]  ;;  %v3801_v57 = vld [vmem:[%s16731_s14 + $0x380] sm:$0xff] }
 0x662   : > { %3298 = vmatprep.mubr.f32.mxu0 %v2832_v17  ;;  %v8639_v17 = vpack.c.bf16 %v3734_v47, %v3730_v4  ;;  %v3767_v54 = vld [vmem:[%s16731_s14 + $0x270] sm:$0xff]  ;;  %v3770_v4 = vld [vmem:[%s16731_s14 + $0x288] sm:$0xff]  ;;  %v3805_v26 = vld [vmem:[%s16731_s14 + $0x3a0] sm:$0xff] }
 0x663   : > { %8702 = vmatpush1.bf16.msra.mxu0 %v8701_v18  ;;  %v8721_v18 = vpack.c.bf16 %v3767_v54, %v3763_v44  ;;  %v3774_v47 = vld [vmem:[%s16731_s14 + $0x2a8] sm:$0xff]  ;;  %v3803_v44 = vld [vmem:[%s16731_s14 + $0x390] sm:$0xff] }
 0x664   : > { %8640 = vmatprep.subr.bf16.mxu1 %v8639_v17  ;;  %8704 = vmatprep.subr.bf16.mxu0 %v8703_v9  ;;  %v3772_v17 = vld [vmem:[%s16731_s14 + $0x298] sm:$0xff]  ;;  %v8659_v25 = vpack.c.bf16 %v3774_v47, %v3770_v4  ;;  %v3769_v9 = vld [vmem:[%s16731_s14 + $0x280] sm:$0xff]  ;;  %v3807_v54 = vld [vmem:[%s16731_s14 + $0x3b0] sm:$0xff] }
 0x665   : > { %3299 = vmatmul.mubr.f32.gmra.mrb[126].mxu0 %v2831_v15  ;;  %v3731_v15 = vld [vmem:[%s16731_s14 + $0x150] sm:$0xff]  ;;  %8642 = vmatpush1.bf16.msra.mxu1 %v8641_v55  ;;  %v8723_v33 = vpack.c.bf16 %v3776_v20, %v3772_v17  ;;  %v8661_v55 = vpack.c.bf16 %v3773_v46, %v3769_v9  ;;  %v3810_v4 = vld [vmem:[%s16731_s14 + $0x3c8] sm:$0xff]  ;;  %v3812_v17 = vld [vmem:[%s16731_s14 + $0x3d8] sm:$0xff] }
 0x666   : > { %v8705_v6 = vpack.c.bf16 %v3735_v35, %v3731_v15  ;;  %8644 = vmatprep.subr.bf16.mxu1 %v8643_v8  ;;  %v3771_v15 = vld [vmem:[%s16731_s14 + $0x290] sm:$0xff]  ;;  %v3780_v8 = vld [vmem:[%s16731_s14 + $0x2d8] sm:$0xff]  ;;  %v3814_v47 = vld [vmem:[%s16731_s14 + $0x3e8] sm:$0xff] }
 0x667   : > { %v3775_v35 = vld [vmem:[%s16731_s14 + $0x2b0] sm:$0xff]  ;;  %v8727_v51 = vpack.c.bf16 %v3784_v14, %v3780_v8  ;;  %v3816_v20 = vld [vmem:[%s16731_s14 + $0x3f8] sm:$0xff]  ;;  %v3809_v9 = vld [vmem:[%s16731_s14 + $0x3c0] sm:$0xff] }
 0x668   : > { %8706 = vmatpush1.bf16.msra.mxu0 %v8705_v6  ;;  %v8725_v6 = vpack.c.bf16 %v3775_v35, %v3771_v15  ;;  %v3813_v46 = vld [vmem:[%s16731_s14 + $0x3e0] sm:$0xff]  ;;  %v3811_v15 = vld [vmem:[%s16731_s14 + $0x3d0] sm:$0xff] }
 0x669   : > { %8708 = vmatprep.subr.bf16.mxu0 %v8707_v10  ;;  %8646 = vmatpush1.bf16.msra.mxu1 %v8645_v28  ;;  %v3777_v10 = vld [vmem:[%s16731_s14 + $0x2c0] sm:$0xff]  ;;  %v3815_v35 = vld [vmem:[%s16731_s14 + $0x3f0] sm:$0xff] }
 0x66a   : > { %8648 = vmatprep.subr.bf16.mxu1 %v8647_v63  ;;  %v8665_v28 = vpack.c.bf16 %v3781_v24, %v3777_v10  ;;  %v3788_v63 = vld [vmem:[%s16731_s14 + $0x318] sm:$0xff]  ;;  %v13293_v10 = vld [vmem:[%s16730_s13] sm:$0xf] }
 0x66c   : > { %8710 = vmatpush1.bf16.msra.mxu0 %v8709_v27  ;;  %v8729_v27 = vpack.c.bf16 %v3783_v53, %v3779_v41  ;;  %v13299_v41 = vrot.slane %v13293_v10, %v10719_v39  ;;  %v13303_v53 = vrot.slane %v13293_v10, %v10713_v37 }
 0x66d   : > { %8712 = vmatprep.subr.bf16.mxu0 %v8711_v58  ;;  %8650 = vmatpush1.bf16.msra.mxu1 %v8649_v40  ;;  %v8731_v58 = vpack.c.bf16 %v3792_v0, %v3788_v63  ;;  %v8669_v40 = vpack.c.bf16 %v3789_v30, %v3785_v38 }
 0x66e   : > { %8652 = vmatprep.subr.bf16.mxu1 %v8651_v59  ;;  %v8671_v59 = vpack.c.bf16 %v3798_v52, %v3794_v2  ;;  %v3310_v2 = vld [vmem:[%s13306_s30 + $0x28] sm:$0xff] }
 0x670   : > { %8714 = vmatpush1.bf16.msra.mxu0 %v8713_v45  ;;  %v8733_v45 = vpack.c.bf16 %v3791_v43, %v3787_v34 }
 0x671   : > { %8716 = vmatprep.subr.bf16.mxu0 %v8715_v16  ;;  %8654 = vmatpush1.bf16.msra.mxu1 %v8653_v3  ;;  %v8735_v16 = vpack.c.bf16 %v3800_v49, %v3796_v22  ;;  %v8673_v3 = vpack.c.bf16 %v3797_v56, %v3793_v62  ;;  %v3313_v49 = vld [vmem:[%s13306_s30 + $0x40] sm:$0xff] }
 0x672   : > { %8656 = vmatprep.subr.bf16.mxu1 %v8655_v23  ;;  %v8675_v23 = vpack.c.bf16 %v3806_v13, %v3802_v7 }
 0x674   : > { %8718 = vmatpush1.bf16.msra.mxu0 %v8717_v12  ;;  %v8737_v12 = vpack.c.bf16 %v3799_v1, %v3795_v50 }
 0x675   : > { %8720 = vmatprep.subr.bf16.mxu0 %v8719_v61  ;;  %8658 = vmatpush1.bf16.msra.mxu1 %v8657_v42  ;;  %v8739_v61 = vpack.c.bf16 %v3808_v5, %v3804_v21  ;;  %v8677_v42 = vpack.c.bf16 %v3805_v26, %v3801_v57  ;;  %v3317_v21 = vld [vmem:[%s13306_s30 + $0x60] sm:$0xff] }
 0x676   : > { %8660 = vmatprep.subr.bf16.mxu1 %v8659_v25  ;;  %v8679_v25 = vpack.c.bf16 %v3814_v47, %v3810_v4 }
 0x678   : > { %8722 = vmatpush1.bf16.msra.mxu0 %v8721_v18  ;;  %v8741_v18 = vpack.c.bf16 %v3807_v54, %v3803_v44  ;;  %v3321_v54 = vld [vmem:[%s13306_s30 + $0x80] sm:$0xff] }
 0x679   : > { %8724 = vmatprep.subr.bf16.mxu0 %v8723_v33  ;;  %8662 = vmatpush1.bf16.msra.mxu1 %v8661_v55  ;;  %v8743_v33 = vpack.c.bf16 %v3816_v20, %v3812_v17  ;;  %v8681_v55 = vpack.c.bf16 %v3813_v46, %v3809_v9  ;;  %v3322_v17 = vld [vmem:[%s13306_s30 + $0x88] sm:$0xff] }
 0x67a   : > { %8664 = vmatprep.subr.bf16.mxu1 %v8663_v19 }
 0x67c   : > { %8726 = vmatpush1.bf16.msra.mxu0 %v8725_v6  ;;  %v8745_v6 = vpack.c.bf16 %v3815_v35, %v3811_v15 }
 0x67d   : > { %8728 = vmatprep.subr.bf16.mxu0 %v8727_v51  ;;  %8666 = vmatpush1.bf16.msra.mxu1 %v8665_v28 }
 0x67e   : > { %8668 = vmatprep.subr.bf16.mxu1 %v8667_v11  ;;  %v3305_v11 = vld [vmem:[%s13306_s30] sm:$0xff] }
 0x680   : > { %8730 = vmatpush1.bf16.msra.mxu0 %v8729_v27 }
 0x681   : > { %8732 = vmatprep.subr.bf16.mxu0 %v8731_v58  ;;  %8670 = vmatpush1.bf16.msra.mxu1 %v8669_v40  ;;  %v3306_v58 = vld [vmem:[%s13306_s30 + $0x8] sm:$0xff]  ;;  %v3309_v40 = vld [vmem:[%s13306_s30 + $0x20] sm:$0xff] }
 0x682   : > { %8672 = vmatprep.subr.bf16.mxu1 %v8671_v59 }
 0x684   : > { %8734 = vmatpush1.bf16.msra.mxu0 %v8733_v45 }
 0x685   : > { %8736 = vmatprep.subr.bf16.mxu0 %v8735_v16  ;;  %8674 = vmatpush1.bf16.msra.mxu1 %v8673_v3 }
 0x686   : > { %8676 = vmatprep.subr.bf16.mxu1 %v8675_v23 }
 0x688   : > { %8738 = vmatpush1.bf16.msra.mxu0 %v8737_v12  ;;  %v3314_v12 = vld [vmem:[%s13306_s30 + $0x48] sm:$0xff] }
 0x689   : > { %8740 = vmatprep.subr.bf16.mxu0 %v8739_v61  ;;  %8678 = vmatpush1.bf16.msra.mxu1 %v8677_v42  ;;  %v3318_v61 = vld [vmem:[%s13306_s30 + $0x68] sm:$0xff] }
 0x68a   : > { %8680 = vmatprep.subr.bf16.mxu1 %v8679_v25 }
 0x68c   : > { %8742 = vmatpush1.bf16.msra.mxu0 %v8741_v18 }
 0x68d   : > { %8744 = vmatprep.subr.bf16.mxu0 %v8743_v33  ;;  %8682 = vmatpush1.bf16.msra.mxu1 %v8681_v55  ;;  %v3325_v33 = vld [vmem:[%s13306_s30 + $0xa0] sm:$0xff] }
 0x690   : > { %8746 = vmatpush1.bf16.msra.mxu0 %v8745_v6 }
 0x6bc   : > { %v3049_v60 = vpop.f32.mrb[64].mxu0 }
 0x6bd   : > { %v3051_v32 = vpop.f32.mrb[65].mxu0  ;;  %v3050_v31 = vadd.f32 %v3049_v60, %v13299_v41 }
 0x6be   : > { %v3052_v63 = vadd.f32 %v3051_v32, %v13303_v53 }
 0x6bf   : > { %v3369_v38 = vadd.f32 %v3305_v11, %v3050_v31 }
 0x6c0   : > { %v3055_v19 = vpop.f32.mrb[66].mxu0  ;;  %v3370_v45 = vadd.f32 %v3306_v58, %v3052_v63 }
 0x6c1   : > { %v3057_v8 = vpop.f32.mrb[67].mxu0  ;;  %v3056_v34 = vadd.f32 %v3055_v19, %v13299_v41  ;;  %v7460_v59 = vmul.f32 -1.442695, %v3369_v38  ;;  %v3326_v19 = vld [vmem:[%s13306_s30 + $0xa8] sm:$0xff] }
 0x6c2   : > { %v3058_v43 = vadd.f32 %v3057_v8, %v13303_v53  ;;  %v7461_v3 = vmul.f32 -1.442695, %v3370_v45 }
 0x6c3   : > { %v3373_v16 = vadd.f32 %v3309_v40, %v3056_v34  ;;  %9636 = vpow2.f32 %v7460_v59 }
 0x6c4   : > { %v3061_v14 = vpop.f32.mrb[68].mxu0  ;;  %v3374_v56 = vadd.f32 %v3310_v2, %v3058_v43  ;;  %9638 = vpow2.f32 %v7461_v3 }
 0x6c5   : > { %v3063_v51 = vpop.f32.mrb[69].mxu0  ;;  %v3062_v52 = vadd.f32 %v3061_v14, %v13299_v41  ;;  %v7462_v57 = vmul.f32 -1.442695, %v3373_v16  ;;  %v3334_v16 = vld [vmem:[%s13306_s30 + $0xe8] sm:$0xff] }
 0x6c6   : > { %v3064_v50 = vadd.f32 %v3063_v51, %v13303_v53  ;;  %v7463_v44 = vmul.f32 -1.442695, %v3374_v56 }
 0x6c7   : > { %v3377_v1 = vadd.f32 %v3313_v49, %v3062_v52  ;;  %9640 = vpow2.f32 %v7462_v57 }
 0x6c8   : > { %v3067_v24 = vpop.f32.mrb[70].mxu0  ;;  %v3378_v42 = vadd.f32 %v3314_v12, %v3064_v50  ;;  %9642 = vpow2.f32 %v7463_v44 }
 0x6c9   : > { %v3069_v28 = vpop.f32.mrb[71].mxu0  ;;  %v3068_v7 = vadd.f32 %v3067_v24, %v13299_v41  ;;  %v7464_v4 = vmul.f32 -1.442695, %v3377_v1  ;;  %v3329_v24 = vld [vmem:[%s13306_s30 + $0xc0] sm:$0xff] }
 0x6ca   : > { %v3070_v23 = vadd.f32 %v3069_v28, %v13303_v53  ;;  %v7465_v55 = vmul.f32 -1.442695, %v3378_v42 }
 0x6cb   : > { %v3381_v47 = vadd.f32 %v3317_v21, %v3068_v7  ;;  %9644 = vpow2.f32 %v7464_v4 }
 0x6cc   : > { %v3073_v27 = vpop.f32.mrb[72].mxu0  ;;  %v3382_v9 = vadd.f32 %v3318_v61, %v3070_v23  ;;  %9646 = vpow2.f32 %v7465_v55 }
 0x6cd   : > { %v3075_v48 = vpop.f32.mrb[73].mxu0  ;;  %v3074_v26 = vadd.f32 %v3073_v27, %v13299_v41  ;;  %v7466_v60 = vmul.f32 -1.442695, %v3381_v47 }
 0x6ce   : > { %v3076_v18 = vadd.f32 %v3075_v48, %v13303_v53  ;;  %v7467_v51 = vmul.f32 -1.442695, %v3382_v9  ;;  %v9637_v48 = vpop.eup %9636 }
 0x6cf   : > { %v3385_v15 = vadd.f32 %v3321_v54, %v3074_v26  ;;  %9648 = vpow2.f32 %v7466_v60  ;;  %v9639_v40 = vpop.eup %9638  ;;  %v3529_v43 = vadd.f32 1.0, %v9637_v48 }
 0x6d0   : > { %v3079_v0 = vpop.f32.mrb[74].mxu0  ;;  %v3386_v35 = vadd.f32 %v3322_v17, %v3076_v18  ;;  %9650 = vpow2.f32 %v7467_v51  ;;  %v3530_v3 = vadd.f32 1.0, %v9639_v40  ;;  %v3337_v17 = vld [vmem:[%s13306_s30 + $0x100] sm:$0xff] }
 0x6d1   : > { %v3081_v30 = vpop.f32.mrb[75].mxu0  ;;  %v3080_v25 = vadd.f32 %v3079_v0, %v13299_v41  ;;  %v7468_v27 = vmul.f32 -1.442695, %v3385_v15  ;;  %v3330_v0 = vld [vmem:[%s13306_s30 + $0xc8] sm:$0xff]  ;;  %v9641_v49 = vpop.eup %9640 }
 0x6d2   : > { %v3082_v6 = vadd.f32 %v3081_v30, %v13303_v53  ;;  %v7469_v11 = vmul.f32 -1.442695, %v3386_v35  ;;  %v9643_v50 = vpop.eup %9642  ;;  %v3338_v15 = vld [vmem:[%s13306_s30 + $0x108] sm:$0xff] }
 0x6d3   : > { %v3389_v32 = vadd.f32 %v3325_v33, %v3080_v25  ;;  %9652 = vpow2.f32 %v7468_v27  ;;  %v3532_v57 = vadd.f32 1.0, %v9643_v50 }
 0x6d4   : > { %v3085_v22 = vpop.f32.mrb[76].mxu0  ;;  %v3390_v63 = vadd.f32 %v3326_v19, %v3082_v6  ;;  %9654 = vpow2.f32 %v7469_v11 }
 0x6d5   : > { %v3087_v62 = vpop.f32.mrb[77].mxu0  ;;  %v3086_v8 = vadd.f32 %v3085_v22, %v13299_v41  ;;  %v7470_v38 = vmul.f32 -1.442695, %v3389_v32  ;;  %v3333_v22 = vld [vmem:[%s13306_s30 + $0xe0] sm:$0xff]  ;;  %v9645_v12 = vpop.eup %9644 }
 0x6d6   : > { %v3088_v31 = vadd.f32 %v3087_v62, %v13303_v53  ;;  %v7471_v52 = vmul.f32 -1.442695, %v3390_v63  ;;  %v9647_v61 = vpop.eup %9646  ;;  %v3533_v26 = vadd.f32 1.0, %v9645_v12  ;;  %v13379_v63 = vsub.s32 2, %v10710_v36 }
 0x6d7   : > { %v3393_v58 = vadd.f32 %v3329_v24, %v3086_v8  ;;  %9656 = vpow2.f32 %v7470_v38  ;;  %v3534_v33 = vadd.f32 1.0, %v9647_v61  ;;  %v3341_v24 = vld [vmem:[%s13306_s30 + $0x120] sm:$0xff]  ;;  %v3342_v38 = vld [vmem:[%s13306_s30 + $0x128] sm:$0xff] }
 0x6d8   : > { %v3091_v13 = vpop.f32.mrb[78].mxu0  ;;  %v3394_v45 = vadd.f32 %v3330_v0, %v3088_v31  ;;  %9658 = vrcp.f32 %v3529_v43  ;;  %17021 = vst [vmem:[#allocation41_spill] sm:$0xff] %v13379_v63  ;;  %v13387_v43 = vsub.s32 3, %v10710_v36 }
 0x6d9   : > { %v3093_v5 = vpop.f32.mrb[79].mxu0  ;;  %v3092_v2 = vadd.f32 %v3091_v13, %v13299_v41  ;;  %v7472_v62 = vmul.f32 -1.442695, %v3393_v58  ;;  %v3531_v13 = vadd.f32 1.0, %v9641_v49  ;;  %9660 = vpow2.f32 %v7471_v52  ;;  %v9649_v42 = vpop.eup %9648  ;;  %v3345_v52 = vld [vmem:[%s13306_s30 + $0x140] sm:$0xff] }
 0x6da   : > { %v3094_v59 = vadd.f32 %v3093_v5, %v13303_v53  ;;  %v7473_v7 = vmul.f32 -1.442695, %v3394_v45  ;;  %v9651_v4 = vpop.eup %9650  ;;  %v3535_v6 = vadd.f32 1.0, %v9649_v42  ;;  %17022 = vst [vmem:[#allocation42_spill] sm:$0xff] %v13387_v43  ;;  %v13409_v61 = vrot.slane %v13293_v10, %v13387_v43  ;;  %v7537_v43 = vld [vmem:[%s16723_s6 + $0x268] sm:$0xff] }
 0x6db   : > { %v3397_v21 = vadd.f32 %v3333_v22, %v3092_v2  ;;  %9662 = vpow2.f32 %v7472_v62  ;;  %v3536_v32 = vadd.f32 1.0, %v9651_v4  ;;  %v3346_v62 = vld [vmem:[%s13306_s30 + $0x148] sm:$0xff] }
 0x6dc   : > { %v13328_v20 = vpop.f32.mrb[80].mxu0  ;;  %v3398_v23 = vadd.f32 %v3334_v16, %v3094_v59  ;;  %9664 = vrcp.f32 %v3530_v3 }
 0x6dd   : > { %v13331_v46 = vpop.f32.mrb[81].mxu0  ;;  %9666 = vpow2.f32 %v7473_v7  ;;  %v7474_v54 = vmul.f32 -1.442695, %v3397_v21  ;;  %v3098_v18 = vadd.f32 %v13328_v20, %v13299_v41  ;;  %v9653_v9 = vpop.eup %9652 }
 0x6de   : > { %9668 = vrcp.f32 %v3531_v13  ;;  %v7475_v47 = vmul.f32 -1.442695, %v3398_v23  ;;  %v3100_v25 = vadd.f32 %v13331_v46, %v13303_v53  ;;  %v9655_v35 = vpop.eup %9654  ;;  %v3537_v8 = vadd.f32 1.0, %v9653_v9  ;;  %v3349_v9 = vld [vmem:[%s13306_s30 + $0x160] sm:$0xff] }
 0x6df   : > { %9670 = vrcp.f32 %v3532_v57  ;;  %v3401_v19 = vadd.f32 %v3337_v17, %v3098_v18  ;;  %v3538_v31 = vadd.f32 1.0, %v9655_v35 }
 0x6e0   : > { %v13336_v14 = vpop.f32.mrb[82].mxu0  ;;  %9672 = vrcp.f32 %v3533_v26  ;;  %v3402_v51 = vadd.f32 %v3338_v15, %v3100_v25 }
 0x6e1   : > { %v13339_v28 = vpop.f32.mrb[83].mxu0  ;;  %v9657_v20 = vpop.eup %9656  ;;  %9674 = vpow2.f32 %v7474_v54  ;;  %v3104_v46 = vadd.f32 %v13336_v14, %v13299_v41 }
 0x6e2   : > { %9676 = vpow2.f32 %v7475_v47  ;;  %v13372_v27 = vpop.eup %9658  ;;  %v3106_v48 = vadd.f32 %v13339_v28, %v13303_v53  ;;  %v3539_v14 = vadd.f32 1.0, %v9657_v20  ;;  %v7476_v28 = vmul.f32 -1.442695, %v3401_v19  ;;  %v3350_v20 = vld [vmem:[%s13306_s30 + $0x168] sm:$0xff] }
 0x6e3   : > { %9678 = vrcp.f32 %v3534_v33  ;;  %v9661_v0 = vpop.eup %9660  ;;  %v3405_v2 = vadd.f32 %v3341_v24, %v3104_v46  ;;  %v7477_v49 = vmul.f32 -1.442695, %v3402_v51 }
 0x6e4   : > { %v13343_v30 = vpop.f32.mrb[84].mxu0  ;;  %9680 = vrcp.f32 %v3535_v6  ;;  %v3406_v50 = vadd.f32 %v3342_v38, %v3106_v48  ;;  %v3311_v48 = vld [vmem:[%s13306_s30 + $0x30] sm:$0xff] }
 0x6e5   : > { %v13345_v34 = vpop.f32.mrb[85].mxu0  ;;  %v3110_v58 = vadd.f32 %v13343_v30, %v13299_v41  ;;  %v9663_v45 = vpop.eup %9662  ;;  %9682 = vrcp.f32 %v3536_v32  ;;  %v3540_v30 = vadd.f32 1.0, %v9661_v0  ;;  %v7478_v23 = vmul.f32 -1.442695, %v3405_v2  ;;  %v3307_v32 = vld [vmem:[%s13306_s30 + $0x10] sm:$0xff] }
 0x6e6   : > { %v3112_v22 = vadd.f32 %v13345_v34, %v13303_v53  ;;  %v13392_v59 = vpop.eup %9664  ;;  %9684 = vrcp.f32 %v3537_v8  ;;  %v3541_v12 = vadd.f32 1.0, %v9663_v45  ;;  %v13403_v34 = vrot.slane %v13293_v10, %v13379_v63  ;;  %v3308_v8 = vld [vmem:[%s13306_s30 + $0x18] sm:$0xff] }
 0x6e7   : > { %v9667_v16 = vpop.eup %9666  ;;  %9686 = vrcp.f32 %v3538_v31  ;;  %v3409_v7 = vadd.f32 %v3345_v52, %v3110_v58  ;;  %v7479_v18 = vmul.f32 -1.442695, %v3406_v50 }
 0x6e8   : > { %v13351_v56 = vpop.f32.mrb[86].mxu0  ;;  %v13397_v36 = vpop.eup %9668  ;;  %9688 = vrcp.f32 %v3539_v14  ;;  %v3410_v57 = vadd.f32 %v3346_v62, %v3112_v22  ;;  %v3542_v42 = vadd.f32 1.0, %v9667_v16  ;;  %v3312_v62 = vld [vmem:[%s13306_s30 + $0x38] sm:$0xff] }
 0x6e9   : > { %v13353_v1 = vpop.f32.mrb[87].mxu0  ;;  %v13405_v13 = vpop.eup %9670  ;;  %9690 = vpow2.f32 %v7476_v28  ;;  %v3116_v4 = vadd.f32 %v13351_v56, %v13299_v41  ;;  %v7480_v25 = vmul.f32 -1.442695, %v3409_v7  ;;  %v3315_v7 = vld [vmem:[%s13306_s30 + $0x50] sm:$0xff] }
 0x6ea   : > { %v13411_v26 = vpop.eup %9672  ;;  %9692 = vpow2.f32 %v7477_v49  ;;  %v3118_v10 = vadd.f32 %v13353_v1, %v13303_v53  ;;  %v7481_v6 = vmul.f32 -1.442695, %v3410_v57 }
 0x6eb   : > { %v9675_v54 = vpop.eup %9674  ;;  %9694 = vrcp.f32 %v3540_v30  ;;  %v3413_v24 = vadd.f32 %v3349_v9, %v3116_v4 }
 0x6ec   : > { %v13355_v5 = vpop.f32.mrb[88].mxu0  ;;  %v9677_v17 = vpop.eup %9676  ;;  %9696 = vrcp.f32 %v3541_v12  ;;  %v3543_v46 = vadd.f32 1.0, %v9675_v54  ;;  %v3414_v14 = vadd.f32 %v3350_v20, %v3118_v10  ;;  %v3316_v10 = vld [vmem:[%s13306_s30 + $0x58] sm:$0xff]  ;;  %v3354_v20 = vld [vmem:[%s13306_s30 + $0x188] sm:$0xff] }
 0x6ed   : > { %v13357_v44 = vpop.f32.mrb[89].mxu0  ;;  %v13419_v35 = vpop.eup %9678  ;;  %9698 = vpow2.f32 %v7478_v23  ;;  %v3544_v1 = vadd.f32 1.0, %v9677_v17  ;;  %v7482_v30 = vmul.f32 -1.442695, %v3413_v24  ;;  %v3122_v50 = vadd.f32 %v13355_v5, %v13299_v41 }
 0x6ee   : > { %v13424_v19 = vpop.eup %9680  ;;  %9700 = vrcp.f32 %v3542_v42  ;;  %v7483_v57 = vmul.f32 -1.442695, %v3414_v14  ;;  %v3353_v42 = vld [vmem:[%s13306_s30 + $0x180] sm:$0xff]  ;;  %v3124_v5 = vadd.f32 %v13357_v44, %v13303_v53  ;;  %v3320_v14 = vld [vmem:[%s13306_s30 + $0x78] sm:$0xff] }
 0x6ef   : > { %v13427_v51 = vpop.eup %9682  ;;  %9702 = vpow2.f32 %v7479_v18 }
 0x6f0   : > { %v13365_v55 = vpop.f32.mrb[90].mxu0  ;;  %v13430_v0 = vpop.eup %9684  ;;  %9704 = vpow2.f32 %v7480_v25 }
 0x6f1   : > { %v13367_v60 = vpop.f32.mrb[91].mxu0  ;;  %v13433_v28 = vpop.eup %9686  ;;  %9706 = vpow2.f32 %v7481_v6  ;;  %v3417_v6 = vadd.f32 %v3353_v42, %v3122_v50  ;;  %v3357_v50 = vld [vmem:[%s13306_s30 + $0x1a0] sm:$0xff] }
 0x6f2   : > { %v13436_v22 = vpop.eup %9688  ;;  %9708 = vrcp.f32 %v3543_v46 }
 0x6f3   : > { %v9691_v16 = vpop.eup %9690  ;;  %9710 = vrcp.f32 %v3544_v1 }
 0x6f4   : > { %v13376_v11 = vpop.f32.mrb[92].mxu0  ;;  %v9693_v23 = vpop.eup %9692 }
 0x6f5   : > { %v13384_v40 = vpop.f32.mrb[93].mxu0  ;;  %v13444_v4 = vpop.eup %9694 }
 0x6f6   : > { %v13447_v25 = vpop.eup %9696 }
 0x6f8   : > { %v13395_v3 = vpop.f32.mrb[94].mxu0 }
 0x6f9   : > { %v13399_v21 = vpop.f32.mrb[95].mxu0 }
 0x6fc   : > { %v3210_v47 = vpop.f32.mrb[96].mxu0 }
 0x6fd   : > { %v3211_v33 = vadd.f32 %v3210_v47, %v13403_v34  ;;  %v3212_v15 = vpop.f32.mrb[97].mxu0 }
 0x6fe   : > { %v3213_v56 = vadd.f32 %v3212_v15, %v13409_v61  ;;  %v3545_v15 = vadd.f32 1.0, %v9691_v16  ;;  %v3323_v16 = vld [vmem:[%s13306_s30 + $0x90] sm:$0xff] }
 0x6ff   : > { %v3371_v38 = vadd.f32 %v3307_v32, %v3211_v33  ;;  %v9699_v33 = vpop.eup %9698 }
 0x700   : > { %v3216_v31 = vpop.f32.mrb[98].mxu0  ;;  %v3372_v2 = vadd.f32 %v3308_v8, %v3213_v56  ;;  %v3319_v56 = vld [vmem:[%s13306_s30 + $0x70] sm:$0xff]  ;;  %v13454_v46 = vpop.eup %9700  ;;  %v3546_v8 = vadd.f32 1.0, %v9693_v23 }
 0x701   : > { %v3217_v58 = vadd.f32 %v3216_v31, %v13403_v34  ;;  %v3218_v45 = vpop.f32.mrb[99].mxu0  ;;  %9712 = vtanh.f32 %v3371_v38  ;;  %v13457_v44 = vpop.eup %9702 }
 0x702   : > { %v3219_v52 = vadd.f32 %v3218_v45, %v13409_v61  ;;  %9714 = vtanh.f32 %v3372_v2  ;;  %v13461_v38 = vpop.eup %9704 }
 0x703   : > { %v3375_v49 = vadd.f32 %v3311_v48, %v3217_v58  ;;  %v3418_v58 = vadd.f32 %v3354_v20, %v3124_v5  ;;  %v13463_v2 = vpop.eup %9706 }
 0x704   : > { %v3222_v12 = vpop.f32.mrb[100].mxu0  ;;  %v3376_v47 = vadd.f32 %v3312_v62, %v3219_v52  ;;  %v7484_v52 = vmul.f32 -1.442695, %v3417_v6 }
 0x705   : > { %v3223_v54 = vadd.f32 %v3222_v12, %v13403_v34  ;;  %v3224_v18 = vpop.f32.mrb[101].mxu0  ;;  %9716 = vtanh.f32 %v3375_v49  ;;  %v3128_v49 = vadd.f32 %v13365_v55, %v13299_v41  ;;  %v7485_v55 = vmul.f32 -1.442695, %v3418_v58 }
 0x706   : > { %v3225_v17 = vadd.f32 %v3224_v18, %v13409_v61  ;;  %9718 = vpow2.f32 %v7482_v30  ;;  %v13468_v30 = vpop.eup %9708  ;;  %v3130_v58 = vadd.f32 %v13367_v60, %v13303_v53 }
 0x707   : > { %v3379_v9 = vadd.f32 %v3315_v7, %v3223_v54  ;;  %9720 = vpow2.f32 %v7483_v57  ;;  %v3324_v57 = vld [vmem:[%s13306_s30 + $0x98] sm:$0xff]  ;;  %v13473_v42 = vpop.eup %9710  ;;  %v3421_v5 = vadd.f32 %v3357_v50, %v3128_v49  ;;  %v3358_v49 = vld [vmem:[%s13306_s30 + $0x1a8] sm:$0xff] }
 0x708   : > { %v3228_v32 = vpop.f32.mrb[102].mxu0  ;;  %9722 = vtanh.f32 %v3376_v47  ;;  %v3380_v31 = vadd.f32 %v3316_v10, %v3225_v17 }
 0x709   : > { %v3229_v1 = vadd.f32 %v3228_v32, %v13403_v34  ;;  %v3230_v24 = vpop.f32.mrb[103].mxu0  ;;  %9724 = vtanh.f32 %v3379_v9 }
 0x70a   : > { %v3231_v48 = vadd.f32 %v3230_v24, %v13409_v61  ;;  %9726 = vrcp.f32 %v3545_v15  ;;  %v3327_v15 = vld [vmem:[%s13306_s30 + $0xb0] sm:$0xff] }
 0x70b   : > { %v3383_v45 = vadd.f32 %v3319_v56, %v3229_v1  ;;  %9728 = vrcp.f32 %v3546_v8  ;;  %v9713_v18 = vpop.eup %9712  ;;  %v3328_v1 = vld [vmem:[%s13306_s30 + $0xb8] sm:$0xff] }
 0x70c   : > { %v3234_v62 = vpop.f32.mrb[104].mxu0  ;;  %v3384_v12 = vadd.f32 %v3320_v14, %v3231_v48  ;;  %9730 = vtanh.f32 %v3380_v31  ;;  %v9715_v17 = vpop.eup %9714  ;;  %v3657_v6 = vmul.f32 %v9713_v18, %v13372_v27  ;;  %v3547_v27 = vadd.f32 1.0, %v9699_v33 }
 0x70d   : > { %v3235_v7 = vadd.f32 %v3234_v62, %v13403_v34  ;;  %v3236_v23 = vpop.f32.mrb[105].mxu0  ;;  %9732 = vtanh.f32 %v3383_v45  ;;  %v3658_v32 = vmul.f32 %v9715_v17, %v13392_v59  ;;  %v3361_v17 = vld [vmem:[%s13306_s30 + $0x1c0] sm:$0xff] }
 0x70e   : > { %v3237_v54 = vadd.f32 %v3236_v23, %v13409_v61  ;;  %9734 = vpow2.f32 %v7484_v52  ;;  %v7486_v52 = vmul.f32 -1.442695, %v3421_v5 }
 0x70f   : > { %v3387_v47 = vadd.f32 %v3323_v16, %v3235_v7  ;;  %v9717_v20 = vpop.eup %9716  ;;  %9736 = vtanh.f32 %v3384_v12  ;;  %3903 = vmatprep.mubr.f32.mxu1 %v3658_v32  ;;  %4064 = vmatprep.mubr.f32.mxu0 %v3658_v32  ;;  %v3331_v16 = vld [vmem:[%s13306_s30 + $0xd0] sm:$0xff]  ;;  %v3332_v7 = vld [vmem:[%s13306_s30 + $0xd8] sm:$0xff] }
 0x710   : > { %v3388_v9 = vadd.f32 %v3324_v57, %v3237_v54  ;;  %v3240_v10 = vpop.f32.mrb[106].mxu0  ;;  %v13481_v24 = vpop.eup %9718  ;;  %v3659_v48 = vmul.f32 %v9717_v20, %v13397_v36  ;;  %3904 = vmatmul.mubr.f32.vlgmr.msra.gmra.mrb[96].mxu1 %v3657_v6  ;;  %4065 = vmatmul.mubr.f32.vlgmr.msra.gmra.mrb[128].mxu0 %v3657_v6  ;;  %v3134_v57 = vadd.f32 %v13376_v11, %v13299_v41  ;;  %v3549_v11 = vadd.f32 1.0, %v13461_v38 }
 0x711   : > { %v3241_v56 = vadd.f32 %v3240_v10, %v13403_v34  ;;  %v3242_v8 = vpop.f32.mrb[107].mxu0  ;;  %9738 = vtanh.f32 %v3387_v47  ;;  %v13485_v14 = vpop.eup %9720  ;;  %v3422_v47 = vadd.f32 %v3358_v49, %v3130_v58 }
 0x712   : > { %v3243_v31 = vadd.f32 %v3242_v8, %v13409_v61  ;;  %9740 = vtanh.f32 %v3388_v9  ;;  %v9723_v45 = vpop.eup %9722  ;;  %v3336_v8 = vld [vmem:[%s13306_s30 + $0xf8] sm:$0xff]  ;;  %v3425_v38 = vadd.f32 %v3361_v17, %v3134_v57 }
 0x713   : > { %v3391_v59 = vadd.f32 %v3327_v15, %v3241_v56  ;;  %9742 = vpow2.f32 %v7485_v55  ;;  %v9725_v50 = vpop.eup %9724  ;;  %v3660_v33 = vmul.f32 %v9723_v45, %v13405_v13  ;;  %v3548_v13 = vadd.f32 1.0, %v13457_v44  ;;  %v3335_v15 = vld [vmem:[%s13306_s30 + $0xf0] sm:$0xff] }
 0x714   : > { %v3392_v62 = vadd.f32 %v3328_v1, %v3243_v31  ;;  %v3246_v36 = vpop.f32.mrb[108].mxu0  ;;  %v13494_v23 = vpop.eup %9726  ;;  %v3661_v18 = vmul.f32 %v9725_v50, %v13411_v26  ;;  %v3136_v44 = vadd.f32 %v13384_v40, %v13303_v53  ;;  %v3362_v31 = vld [vmem:[%s13306_s30 + $0x1c8] sm:$0xff]  ;;  %v3550_v40 = vadd.f32 1.0, %v13463_v2  ;;  %v3365_v50 = vld [vmem:[%s13306_s30 + $0x1e0] sm:$0xff] }
 0x715   : > { %9744 = vtanh.f32 %v3391_v59  ;;  %v3247_v60 = vadd.f32 %v3246_v36, %v13403_v34  ;;  %v3248_v12 = vpop.f32.mrb[109].mxu0  ;;  %v13500_v55 = vpop.eup %9728  ;;  %3909 = vmatprep.mubr.f32.mxu1 %v3660_v33  ;;  %4070 = vmatprep.mubr.f32.mxu0 %v3660_v33  ;;  %v3339_v36 = vld [vmem:[%s13306_s30 + $0x110] sm:$0xff] }
 0x716   : > { %9746 = vtanh.f32 %v3392_v62  ;;  %v3249_v54 = vadd.f32 %v3248_v12, %v13409_v61  ;;  %v9731_v9 = vpop.eup %9730  ;;  %3910 = vmatmul.mubr.f32.gmra.mrb[98].mxu1 %v3659_v48  ;;  %4071 = vmatmul.mubr.f32.gmra.mrb[130].mxu0 %v3659_v48  ;;  %v3426_v2 = vadd.f32 %v3362_v31, %v3136_v44  ;;  %v3340_v12 = vld [vmem:[%s13306_s30 + $0x118] sm:$0xff] }
 0x717   : > { %9748 = vrcp.f32 %v3547_v27  ;;  %v3395_v5 = vadd.f32 %v3331_v16, %v3247_v60  ;;  %v9733_v6 = vpop.eup %9732  ;;  %v3662_v20 = vmul.f32 %v9731_v9, %v13419_v35  ;;  %v7487_v35 = vmul.f32 -1.442695, %v3422_v47 }
 0x718   : > { %9750 = vpow2.f32 %v7486_v52  ;;  %v3396_v26 = vadd.f32 %v3332_v7, %v3249_v54  ;;  %v3252_v10 = vpop.f32.mrb[110].mxu0  ;;  %v13511_v1 = vpop.eup %9734  ;;  %v3663_v27 = vmul.f32 %v9733_v6, %v13424_v19  ;;  %v3140_v52 = vadd.f32 %v13395_v3, %v13299_v41 }
 0x719   : > { %9752 = vtanh.f32 %v3395_v5  ;;  %v3253_v32 = vadd.f32 %v3252_v10, %v13403_v34  ;;  %v3254_v56 = vpop.f32.mrb[111].mxu0  ;;  %v9737_v58 = vpop.eup %9736  ;;  %3915 = vmatprep.mubr.f32.mxu1 %v3662_v20  ;;  %4076 = vmatprep.mubr.f32.mxu0 %v3662_v20  ;;  %v7488_v41 = vmul.f32 -1.442695, %v3425_v38  ;;  %v3366_v5 = vld [vmem:[%s13306_s30 + $0x1e8] sm:$0xff] }
 0x71a   : > { %9754 = vtanh.f32 %v3396_v26  ;;  %v3255_v48 = vadd.f32 %v3254_v56, %v13409_v61  ;;  %3916 = vmatmul.mubr.f32.gmra.mrb[100].mxu1 %v3661_v18  ;;  %4077 = vmatmul.mubr.f32.gmra.mrb[132].mxu0 %v3661_v18  ;;  %v3664_v19 = vmul.f32 %v9737_v58, %v13427_v51  ;;  %v3551_v18 = vadd.f32 1.0, %v13481_v24  ;;  %v3343_v26 = vld [vmem:[%s13306_s30 + $0x130] sm:$0xff]  ;;  %v3344_v24 = vld [vmem:[%s13306_s30 + $0x138] sm:$0xff] }
 0x71b   : > { %9756 = vrcp.f32 %v3548_v13  ;;  %v3399_v59 = vadd.f32 %v3335_v15, %v3253_v32  ;;  %v9739_v45 = vpop.eup %9738  ;;  %v3142_v13 = vadd.f32 %v13399_v21, %v13303_v53  ;;  %v3429_v17 = vadd.f32 %v3365_v50, %v3140_v52 }
 0x71c   : > { %9758 = vrcp.f32 %v3549_v11  ;;  %v3400_v49 = vadd.f32 %v3336_v8, %v3255_v48  ;;  %v3258_v62 = vpop.f32.mrb[112].mxu0  ;;  %v9741_v16 = vpop.eup %9740  ;;  %v3665_v7 = vmul.f32 %v9739_v45, %v13430_v0  ;;  %3921 = vmatprep.mubr.f32.mxu1 %v3664_v19  ;;  %4082 = vmatprep.mubr.f32.mxu0 %v3664_v19 }
 0x71d   : > { %9760 = vtanh.f32 %v3399_v59  ;;  %v3259_v33 = vadd.f32 %v3258_v62, %v13403_v34  ;;  %v3260_v60 = vpop.f32.mrb[113].mxu0  ;;  %v13525_v57 = vpop.eup %9742  ;;  %v3666_v51 = vmul.f32 %v9741_v16, %v13433_v28  ;;  %v3430_v32 = vadd.f32 %v3366_v5, %v3142_v13  ;;  %v3348_v59 = vld [vmem:[%s13306_s30 + $0x158] sm:$0xff]  ;;  %v3355_v5 = vld [vmem:[%s13306_s30 + $0x190] sm:$0xff] }
 0x71e   : > { %9762 = vtanh.f32 %v3400_v49  ;;  %v3261_v3 = vadd.f32 %v3260_v60, %v13409_v61  ;;  %3922 = vmatmul.mubr.f32.gmra.mrb[102].mxu1 %v3663_v27  ;;  %4083 = vmatmul.mubr.f32.gmra.mrb[134].mxu0 %v3663_v27  ;;  %v7490_v38 = vmul.f32 -1.442695, %v3429_v17  ;;  %v3552_v16 = vadd.f32 1.0, %v13485_v14 }
 0x71f   : > { %v9745_v54 = vpop.eup %9744  ;;  %9764 = vrcp.f32 %v3550_v40  ;;  %v3403_v0 = vadd.f32 %v3339_v36, %v3259_v33  ;;  %3927 = vmatprep.mubr.f32.mxu1 %v3666_v51  ;;  %4088 = vmatprep.mubr.f32.mxu0 %v3666_v51  ;;  %v3351_v33 = vld [vmem:[%s13306_s30 + $0x170] sm:$0xff] }
 0x720   : > { %v9747_v47 = vpop.eup %9746  ;;  %9766 = vpow2.f32 %v7487_v35  ;;  %v3404_v9 = vadd.f32 %v3340_v12, %v3261_v3  ;;  %v3264_v11 = vpop.f32.mrb[114].mxu0  ;;  %v3667_v28 = vmul.f32 %v9745_v54, %v13436_v22  ;;  %v7489_v22 = vmul.f32 -1.442695, %v3426_v2 }
 0x721   : > { %v13535_v10 = vpop.eup %9748  ;;  %9768 = vtanh.f32 %v3403_v0  ;;  %v3265_v53 = vadd.f32 %v3264_v11, %v13403_v34  ;;  %v3266_v21 = vpop.f32.mrb[115].mxu0  ;;  %v3668_v15 = vmul.f32 %v9747_v47, %v13444_v4  ;;  %v3347_v4 = vld [vmem:[%s13306_s30 + $0x150] sm:$0xff]  ;;  %v3554_v0 = vadd.f32 1.0, %v13525_v57 }
 0x722   : > { %v13540_v6 = vpop.eup %9750  ;;  %9770 = vtanh.f32 %v3404_v9  ;;  %v3267_v44 = vadd.f32 %v3266_v21, %v13409_v61  ;;  %3928 = vmatmul.mubr.f32.gmra.mrb[104].mxu1 %v3665_v7  ;;  %4089 = vmatmul.mubr.f32.gmra.mrb[136].mxu0 %v3665_v7 }
 0x723   : > { %v9753_v20 = vpop.eup %9752  ;;  %9772 = vpow2.f32 %v7488_v41  ;;  %v3407_v56 = vadd.f32 %v3343_v26, %v3265_v53  ;;  %3933 = vmatprep.mubr.f32.mxu1 %v3668_v15  ;;  %4094 = vmatprep.mubr.f32.mxu0 %v3668_v15  ;;  %v3352_v41 = vld [vmem:[%s13306_s30 + $0x178] sm:$0xff] }
 0x724   : > { %v9755_v8 = vpop.eup %9754  ;;  %9774 = vrcp.f32 %v3551_v18  ;;  %v3408_v31 = vadd.f32 %v3344_v24, %v3267_v44  ;;  %v3270_v48 = vpop.f32.mrb[116].mxu0  ;;  %v3669_v27 = vmul.f32 %v9753_v20, %v13447_v25  ;;  %v7491_v25 = vmul.f32 -1.442695, %v3430_v32  ;;  %v3356_v26 = vld [vmem:[%s13306_s30 + $0x198] sm:$0xff]  ;;  %v3359_v32 = vld [vmem:[%s13306_s30 + $0x1b0] sm:$0xff] }
 0x725   : > { %v13545_v58 = vpop.eup %9756  ;;  %9776 = vtanh.f32 %v3407_v56  ;;  %v3271_v40 = vadd.f32 %v3270_v48, %v13403_v34  ;;  %v3272_v35 = vpop.f32.mrb[117].mxu0  ;;  %v3670_v45 = vmul.f32 %v9755_v8, %v13454_v46  ;;  %v3553_v18 = vadd.f32 1.0, %v13511_v1 }
 0x726   : > { %v13550_v52 = vpop.eup %9758  ;;  %9778 = vtanh.f32 %v3408_v31  ;;  %v3273_v49 = vadd.f32 %v3272_v35, %v13409_v61  ;;  %3934 = vmatmul.mubr.f32.gmra.mrb[106].mxu1 %v3667_v28  ;;  %4095 = vmatmul.mubr.f32.gmra.mrb[138].mxu0 %v3667_v28 }
 0x727   : > { %v9761_v19 = vpop.eup %9760  ;;  %9780 = vpow2.f32 %v7489_v22  ;;  %v3411_v62 = vadd.f32 %v3347_v4, %v3271_v40  ;;  %3939 = vmatprep.mubr.f32.mxu1 %v3670_v45  ;;  %4100 = vmatprep.mubr.f32.mxu0 %v3670_v45 }
 0x728   : > { %v9763_v36 = vpop.eup %9762  ;;  %9782 = vpow2.f32 %v7490_v38  ;;  %v3412_v2 = vadd.f32 %v3348_v59, %v3273_v49  ;;  %v3276_v50 = vpop.f32.mrb[118].mxu0  ;;  %v3671_v46 = vmul.f32 %v9761_v19, %v13468_v30  ;;  %v3363_v19 = vld [vmem:[%s13306_s30 + $0x1d0] sm:$0xff] }
 0x729   : > { %v13556_v60 = vpop.eup %9764  ;;  %9784 = vtanh.f32 %v3411_v62  ;;  %v3277_v12 = vadd.f32 %v3276_v50, %v13403_v34  ;;  %v3278_v7 = vpop.f32.mrb[119].mxu0  ;;  %v3672_v14 = vmul.f32 %v9763_v36, %v13473_v42 }
 0x72a   : > { %v9767_v3 = vpop.eup %9766  ;;  %9786 = vtanh.f32 %v3412_v2  ;;  %v3279_v51 = vadd.f32 %v3278_v7, %v13409_v61  ;;  %3940 = vmatmul.mubr.f32.gmra.mrb[108].mxu1 %v3669_v27  ;;  %4101 = vmatmul.mubr.f32.gmra.mrb[140].mxu0 %v3669_v27 }
 0x72b   : > { %v9769_v54 = vpop.eup %9768  ;;  %9788 = vpow2.f32 %v7491_v25  ;;  %v3415_v30 = vadd.f32 %v3351_v33, %v3277_v12  ;;  %3945 = vmatprep.mubr.f32.mxu1 %v3672_v14  ;;  %4106 = vmatprep.mubr.f32.mxu0 %v3672_v14  ;;  %v3556_v44 = vadd.f32 1.0, %v9767_v3 }
 0x72c   : > { %v9771_v13 = vpop.eup %9770  ;;  %9790 = vrcp.f32 %v3552_v16  ;;  %v3416_v47 = vadd.f32 %v3352_v41, %v3279_v51  ;;  %v3282_v17 = vpop.f32.mrb[120].mxu0  ;;  %v3673_v42 = vmul.f32 %v9769_v54, %v13494_v23  ;;  %v3555_v23 = vadd.f32 1.0, %v13540_v6  ;;  %v3360_v6 = vld [vmem:[%s13306_s30 + $0x1b8] sm:$0xff]  ;;  %v3367_v51 = vld [vmem:[%s13306_s30 + $0x1f0] sm:$0xff] }
 0x72d   : > { %v9773_v9 = vpop.eup %9772  ;;  %9792 = vtanh.f32 %v3415_v30  ;;  %v3283_v1 = vadd.f32 %v3282_v17, %v13403_v34  ;;  %v3284_v11 = vpop.f32.mrb[121].mxu0  ;;  %v3674_v28 = vmul.f32 %v9771_v13, %v13500_v55  ;;  %v3364_v16 = vld [vmem:[%s13306_s30 + $0x1d8] sm:$0xff] }
 0x72e   : > { %v13569_v53 = vpop.eup %9774  ;;  %9794 = vtanh.f32 %v3416_v47  ;;  %v3285_v57 = vadd.f32 %v3284_v11, %v13409_v61  ;;  %3946 = vmatmul.mubr.f32.gmra.mrb[110].mxu1 %v3671_v46  ;;  %4107 = vmatmul.mubr.f32.gmra.mrb[142].mxu0 %v3671_v46  ;;  %v3557_v40 = vadd.f32 1.0, %v9773_v9  ;;  %v3368_v13 = vld [vmem:[%s13306_s30 + $0x1f8] sm:$0xff] }
 0x72f   : > { %v9777_v21 = vpop.eup %9776  ;;  %9796 = vrcp.f32 %v3553_v18  ;;  %v3419_v24 = vadd.f32 %v3355_v5, %v3283_v1  ;;  %3951 = vmatprep.mubr.f32.mxu1 %v3674_v28  ;;  %4112 = vmatprep.mubr.f32.mxu0 %v3674_v28 }
 0x730   : > { %v9779_v15 = vpop.eup %9778  ;;  %9798 = vrcp.f32 %v3554_v0  ;;  %v3420_v20 = vadd.f32 %v3356_v26, %v3285_v57  ;;  %v3288_v22 = vpop.f32.mrb[122].mxu0  ;;  %v3675_v55 = vmul.f32 %v9777_v21, %v13535_v10 }
 0x731   : > { %v9781_v56 = vpop.eup %9780  ;;  %9800 = vtanh.f32 %v3419_v24  ;;  %v3289_v8 = vadd.f32 %v3288_v22, %v13403_v34  ;;  %v3290_v38 = vpop.f32.mrb[123].mxu0  ;;  %v3676_v31 = vmul.f32 %v9779_v15, %v13545_v58 }
 0x732   : > { %v9783_v48 = vpop.eup %9782  ;;  %9802 = vtanh.f32 %v3420_v20  ;;  %v3291_v4 = vadd.f32 %v3290_v38, %v13409_v61  ;;  %v3558_v59 = vadd.f32 1.0, %v9781_v56  ;;  %3952 = vmatmul.mubr.f32.gmra.mrb[112].mxu1 %v3673_v42  ;;  %4113 = vmatmul.mubr.f32.gmra.mrb[144].mxu0 %v3673_v42 }
 0x733   : > { %v9785_v27 = vpop.eup %9784  ;;  %9804 = vrcp.f32 %v3555_v23  ;;  %v3423_v35 = vadd.f32 %v3359_v32, %v3289_v8  ;;  %3957 = vmatprep.mubr.f32.mxu1 %v3676_v31  ;;  %4118 = vmatprep.mubr.f32.mxu0 %v3676_v31  ;;  %v3559_v12 = vadd.f32 1.0, %v9783_v48  ;;  %v3817_v31 = vld [vmem:[%s16732_s15] sm:$0xf] }
 0x734   : > { %v9787_v10 = vpop.eup %9786  ;;  %9806 = vrcp.f32 %v3556_v44  ;;  %v3424_v45 = vadd.f32 %v3360_v6, %v3291_v4  ;;  %v3294_v49 = vpop.f32.mrb[124].mxu0  ;;  %v3677_v25 = vmul.f32 %v9785_v27, %v13550_v52  ;;  %v13595_v48 = vrot.slane %v3817_v31, %v10719_v39 }
 0x735   : > { %v9789_v58 = vpop.eup %9788  ;;  %9808 = vtanh.f32 %v3423_v35  ;;  %v3295_v62 = vadd.f32 %v3294_v49, %v13403_v34  ;;  %v3296_v36 = vpop.f32.mrb[125].mxu0  ;;  %v3678_v2 = vmul.f32 %v9787_v10, %v13556_v60  ;;  %v13598_v4 = vrot.slane %v3817_v31, %v10713_v37 }
 0x736   : > { %v9791_v50 = vpop.eup %9790  ;;  %9810 = vtanh.f32 %v3424_v45  ;;  %v3297_v33 = vadd.f32 %v3296_v36, %v13409_v61  ;;  %v3560_v41 = vadd.f32 1.0, %v9789_v58  ;;  %3958 = vmatmul.mubr.f32.gmra.mrb[114].mxu1 %v3675_v55  ;;  %4119 = vmatmul.mubr.f32.gmra.mrb[146].mxu0 %v3675_v55 }
 0x737   : > { %v9793_v46 = vpop.eup %9792  ;;  %9812 = vrcp.f32 %v3557_v40  ;;  %v3427_v7 = vadd.f32 %v3363_v19, %v3295_v62  ;;  %3963 = vmatprep.mubr.f32.mxu1 %v3678_v2  ;;  %4124 = vmatprep.mubr.f32.mxu0 %v3678_v2  ;;  %v17025_v19 = vld [vmem:[#allocation9_spill] sm:$0xff] }
 0x738   : > { %v9795_v52 = vpop.eup %9794  ;;  %9814 = vrcp.f32 %v3558_v59  ;;  %v3428_v14 = vadd.f32 %v3364_v16, %v3297_v33  ;;  %v3300_v3 = vpop.f32.mrb[126].mxu0  ;;  %v3679_v54 = vmul.f32 %v9793_v46, %v13569_v53  ;;  %v17023_v59 = vld [vmem:[#allocation10_spill] sm:$0xff]  ;;  %v7493_v33 = vld [vmem:[%s10739_s27 + $0x108] sm:$0xff]  ;;  %v17027_v46 = vld [vmem:[#allocation11_spill] sm:$0xff] }
 0x739   : > { %v9797_v60 = vpop.eup %9796  ;;  %9816 = vtanh.f32 %v3427_v7  ;;  %v3301_v18 = vadd.f32 %v3300_v3, %v13403_v34  ;;  %v3302_v30 = vpop.f32.mrb[127].mxu0  ;;  %v3680_v0 = vmul.f32 %v9795_v52, %v9791_v50  ;;  %v17024_v45 = vmax.f32 %v17023_v59, 0.0  ;;  %v7494_v52 = vld [vmem:[%s10739_s27 + $0x110] sm:$0xff] }
 0x73a   : > { %v9799_v47 = vpop.eup %9798  ;;  %9818 = vtanh.f32 %v3428_v14  ;;  %v3303_v17 = vadd.f32 %v3302_v30, %v13409_v61  ;;  %3964 = vmatmul.mubr.f32.gmra.mrb[116].mxu1 %v3677_v25  ;;  %4125 = vmatmul.mubr.f32.gmra.mrb[148].mxu0 %v3677_v25  ;;  %v17026_v25 = vmax.f32 %v17025_v19, 0.0  ;;  %v7492_v14 = vld [vmem:[%s10739_s27 + $0x100] sm:$0xff]  ;;  %v7589_v30 = vld [vmem:[%s16724_s7 + $0x208] sm:$0xff]  ;;  %v7598_v59 = vld [vmem:[%s16724_s7 + $0x250] sm:$0xff] }
 0x73b   : > { %v9801_v5 = vpop.eup %9800  ;;  %9820 = vrcp.f32 %v3559_v12  ;;  %v3431_v42 = vadd.f32 %v3367_v51, %v3301_v18  ;;  %3969 = vmatprep.mubr.f32.mxu1 %v3680_v0  ;;  %4130 = vmatprep.mubr.f32.mxu0 %v3680_v0  ;;  %v17028_v12 = vmax.f32 %v17027_v46, 0.0  ;;  %v17029_v51 = vld [vmem:[#allocation12_spill] sm:$0xff]  ;;  %v7588_v0 = vld [vmem:[%s16724_s7 + $0x200] sm:$0xff] }
 0x73c   : > { %v9803_v9 = vpop.eup %9802  ;;  %9822 = vrcp.f32 %v3560_v41  ;;  %v3432_v1 = vadd.f32 %v3368_v13, %v3303_v17  ;;  %v3681_v11 = vmul.f32 %v9801_v5, %v9797_v60  ;;  %v7495_v41 = vld [vmem:[%s10739_s27 + $0x118] sm:$0xff]  ;;  %v7601_v19 = vld [vmem:[%s16724_s7 + $0x268] sm:$0xff] }
 0x73d   : > { %v9805_v26 = vpop.eup %9804  ;;  %9824 = vtanh.f32 %v3431_v42  ;;  %v3682_v34 = vmul.f32 %v9803_v9, %v9799_v47  ;;  %v7591_v13 = vld [vmem:[%s16724_s7 + $0x218] sm:$0xff]  ;;  %v7590_v9 = vld [vmem:[%s16724_s7 + $0x210] sm:$0xff]  ;;  %v17037_v46 = vld [vmem:[#allocation16_spill] sm:$0xff] }
 0x73e   : > { %v9807_v28 = vpop.eup %9806  ;;  %9826 = vtanh.f32 %v3432_v1  ;;  %3970 = vmatmul.mubr.f32.gmra.mrb[118].mxu1 %v3679_v54  ;;  %4131 = vmatmul.mubr.f32.gmra.mrb[150].mxu0 %v3679_v54  ;;  %v17030_v54 = vmax.f32 %v17029_v51, 0.0  ;;  %v8779_v42 = vpack.c.bf16 %v7591_v13, %v7589_v30  ;;  %v7593_v1 = vld [vmem:[%s16724_s7 + $0x228] sm:$0xff]  ;;  %v7602_v13 = vld [vmem:[%s16724_s7 + $0x270] sm:$0xff] }
 0x73f   : > { %v9809_v53 = vpop.eup %9808  ;;  %3975 = vmatprep.mubr.f32.mxu1 %v3682_v34  ;;  %4136 = vmatprep.mubr.f32.mxu0 %v3682_v34 }
 0x740   : > { %v9811_v57 = vpop.eup %9810  ;;  %v3683_v61 = vmul.f32 %v9809_v53, %v9805_v26  ;;  %8780 = vmatprep.subr.bf16.mxu0 %v8779_v42  ;;  %v7607_v42 = vld [vmem:[%s16724_s7 + $0x298] sm:$0xff] }
 0x741   : > { %v9813_v21 = vpop.eup %9812  ;;  %v3684_v23 = vmul.f32 %v9811_v57, %v9807_v28  ;;  %v8781_v28 = vpack.c.bf16 %v7590_v9, %v7588_v0  ;;  %v7592_v57 = vld [vmem:[%s16724_s7 + $0x220] sm:$0xff] }
 0x742   : > { %v9815_v24 = vpop.eup %9814  ;;  %3976 = vmatmul.mubr.f32.gmra.mrb[120].mxu1 %v3681_v11  ;;  %4137 = vmatmul.mubr.f32.gmra.mrb[152].mxu0 %v3681_v11  ;;  %v7595_v11 = vld [vmem:[%s16724_s7 + $0x238] sm:$0xff]  ;;  %v7496_v0 = vld [vmem:[%s10739_s27 + $0x120] sm:$0xff] }
 0x743   : > { %v9817_v15 = vpop.eup %9816  ;;  %3981 = vmatprep.mubr.f32.mxu1 %v3684_v23  ;;  %4142 = vmatprep.mubr.f32.mxu0 %v3684_v23  ;;  %v8783_v53 = vpack.c.bf16 %v7595_v11, %v7593_v1 }
 0x744   : > { %v9819_v44 = vpop.eup %9818  ;;  %v3685_v20 = vmul.f32 %v9817_v15, %v9813_v21  ;;  %v7597_v21 = vld [vmem:[%s16724_s7 + $0x248] sm:$0xff]  ;;  %8782 = vmatpush1.bf16.msra.mxu0 %v8781_v28 }
 0x745   : > { %v9821_v22 = vpop.eup %9820  ;;  %v3686_v32 = vmul.f32 %v9819_v44, %v9815_v24  ;;  %v7599_v24 = vld [vmem:[%s16724_s7 + $0x258] sm:$0xff]  ;;  %8784 = vmatprep.subr.bf16.mxu0 %v8783_v53 }
 0x746   : > { %v9823_v55 = vpop.eup %9822  ;;  %3982 = vmatmul.mubr.f32.gmra.mrb[122].mxu1 %v3683_v61  ;;  %4143 = vmatmul.mubr.f32.gmra.mrb[154].mxu0 %v3683_v61  ;;  %v7594_v61 = vld [vmem:[%s16724_s7 + $0x230] sm:$0xff] }
 0x747   : > { %v9825_v56 = vpop.eup %9824  ;;  %3987 = vmatprep.mubr.f32.mxu1 %v3686_v32  ;;  %4148 = vmatprep.mubr.f32.mxu0 %v3686_v32 }
 0x748   : > { %v9827_v8 = vpop.eup %9826  ;;  %v3687_v38 = vmul.f32 %v9825_v56, %v9821_v22  ;;  %v8785_v56 = vpack.c.bf16 %v7594_v61, %v7592_v57 }
 0x749   : > { %v3688_v6 = vmul.f32 %v9827_v8, %v9823_v55 }
 0x74a   : > { %3988 = vmatmul.mubr.f32.gmra.mrb[124].mxu1 %v3685_v20  ;;  %4149 = vmatmul.mubr.f32.gmra.mrb[156].mxu0 %v3685_v20  ;;  %v17031_v20 = vld [vmem:[#allocation13_spill] sm:$0xff] }
 0x74b   : > { %3993 = vmatprep.mubr.f32.mxu1 %v3688_v6  ;;  %4154 = vmatprep.mubr.f32.mxu0 %v3688_v6  ;;  %v17032_v22 = vmax.f32 %v17031_v20, 0.0 }
 0x74c   : > { %8786 = vmatpush1.bf16.msra.mxu0 %v8785_v56  ;;  %v7604_v56 = vld [vmem:[%s16724_s7 + $0x280] sm:$0xff] }
 0x74e   : > { %3994 = vmatmul.mubr.f32.gmra.mrb[126].mxu1 %v3687_v38  ;;  %4155 = vmatmul.mubr.f32.gmra.mrb[158].mxu0 %v3687_v38  ;;  %v17033_v38 = vld [vmem:[#allocation14_spill] sm:$0xff] }
 0x74f   : > { %4386 = vmatprep.mubr.f32.mxu1 %v16974_v29  ;;  %v17034_v6 = vmax.f32 %v17033_v38, 0.0  ;;  %v7606_v38 = vld [vmem:[%s16724_s7 + $0x290] sm:$0xff] }
 0x7e3   : > { %v3905_v27 = vpop.f32.mrb[96].mxu1 }
 0x7e4   : > { %v3906_v40 = vadd.f32 %v3905_v27, %v13595_v48  ;;  %v3907_v35 = vpop.f32.mrb[97].mxu1 }
 0x7e5   : > { %v3908_v10 = vadd.f32 %v3907_v35, %v13598_v4  ;;  %v8787_v35 = vpack.c.bf16 %v7599_v24, %v7597_v21  ;;  %v17041_v21 = vld [vmem:[#allocation18_spill] sm:$0xff] }
 0x7e6   : > { %v4161_v49 = vadd.f32 %v3906_v40, %v17024_v45  ;;  %v17042_v24 = vmax.f32 %v17041_v21, 0.0 }
 0x7e7   : > { %v4162_v58 = vadd.f32 %v3908_v10, %v17026_v25  ;;  %v7596_v10 = vld [vmem:[%s16724_s7 + $0x240] sm:$0xff]  ;;  %v7603_v25 = vld [vmem:[%s16724_s7 + $0x278] sm:$0xff]  ;;  %8788 = vmatprep.subr.bf16.mxu0 %v8787_v35 }
 0x7e8   : > { %v4193_v50 = vmul.f32 0.70710677, %v4161_v49  ;;  %v8791_v30 = vpack.c.bf16 %v7603_v25, %v7601_v19  ;;  %v7502_v25 = vld [vmem:[%s10739_s27 + $0x150] sm:$0xff] }
 0x7e9   : > { %v3911_v62 = vpop.f32.mrb[98].mxu1  ;;  %v4194_v3 = vmul.f32 0.70710677, %v4162_v58 }
 0x7ea   : > { %v3912_v36 = vadd.f32 %v3911_v62, %v13595_v48  ;;  %v3913_v16 = vpop.f32.mrb[99].mxu1  ;;  %v13656_v8 = vadd.f32 %v7492_v14, %v4193_v50  ;;  %v7497_v62 = vld [vmem:[%s10739_s27 + $0x128] sm:$0xff]  ;;  %v8789_v14 = vpack.c.bf16 %v7598_v59, %v7596_v10  ;;  %v17043_v59 = vld [vmem:[#allocation19_spill] sm:$0xff] }
 0x7eb   : > { %v3914_v2 = vadd.f32 %v3913_v16, %v13598_v4  ;;  %v13650_v15 = vadd.f32 %v7493_v33, %v4194_v3  ;;  %v7498_v33 = vld [vmem:[%s10739_s27 + $0x130] sm:$0xff]  ;;  %v7600_v3 = vld [vmem:[%s16724_s7 + $0x260] sm:$0xff]  ;;  %v7501_v10 = vld [vmem:[%s10739_s27 + $0x148] sm:$0xff] }
 0x7ec   : > { %v4163_v7 = vadd.f32 %v3912_v36, %v17028_v12  ;;  %v17035_v36 = vld [vmem:[#allocation15_spill] sm:$0xff]  ;;  %v17038_v12 = vmax.f32 %v17037_v46, 0.0  ;;  %8790 = vmatpush1.bf16.msra.mxu0 %v8789_v14  ;;  %v8793_v57 = vpack.c.bf16 %v7602_v13, %v7600_v3  ;;  %v7610_v14 = vld [vmem:[%s16724_s7 + $0x2b0] sm:$0xff] }
 0x7ed   : > { %v4164_v60 = vadd.f32 %v3914_v2, %v17030_v54  ;;  %v3917_v18 = vpop.f32.mrb[100].mxu1  ;;  %v17036_v16 = vmax.f32 %v17035_v36, 0.0  ;;  %8792 = vmatprep.subr.bf16.mxu0 %v8791_v30  ;;  %v7500_v3 = vld [vmem:[%s10739_s27 + $0x140] sm:$0xff] }
 0x7ee   : > { %v4195_v47 = vmul.f32 0.70710677, %v4163_v7  ;;  %v3918_v17 = vadd.f32 %v3917_v18, %v13595_v48  ;;  %v3919_v5 = vpop.f32.mrb[101].mxu1 }
 0x7ef   : > { %v4196_v26 = vmul.f32 0.70710677, %v4164_v60  ;;  %v3920_v34 = vadd.f32 %v3919_v5, %v13598_v4  ;;  %v7605_v5 = vld [vmem:[%s16724_s7 + $0x288] sm:$0xff] }
 0x7f0   : > { %v13645_v23 = vadd.f32 %v7494_v52, %v4195_v47  ;;  %v4165_v31 = vadd.f32 %v3918_v17, %v17034_v6  ;;  %v7499_v52 = vld [vmem:[%s10739_s27 + $0x138] sm:$0xff]  ;;  %8794 = vmatpush1.bf16.msra.mxu0 %v8793_v57 }
 0x7f1   : > { %v13652_v44 = vadd.f32 %v7495_v41, %v4196_v26  ;;  %v4166_v32 = vadd.f32 %v3920_v34, %v17032_v22  ;;  %v3923_v55 = vpop.f32.mrb[102].mxu1  ;;  %v17039_v26 = vld [vmem:[#allocation17_spill] sm:$0xff] }
 0x7f2   : > { %v3924_v27 = vadd.f32 %v3923_v55, %v13595_v48  ;;  %v3925_v40 = vpop.f32.mrb[103].mxu1  ;;  %v8749_v58 = vpack.c.bf16 %v13645_v23, %v13656_v8  ;;  %v4197_v51 = vmul.f32 0.70710677, %v4165_v31  ;;  %v17040_v34 = vmax.f32 %v17039_v26, 0.0 }
 0x7f3   : > { %v3926_v45 = vadd.f32 %v3925_v40, %v13598_v4  ;;  %v8747_v49 = vpack.c.bf16 %v13652_v44, %v13650_v15  ;;  %v4198_v50 = vmul.f32 0.70710677, %v4166_v32  ;;  %v8795_v55 = vpack.c.bf16 %v7607_v42, %v7605_v5  ;;  %v7611_v40 = vld [vmem:[%s16724_s7 + $0x2b8] sm:$0xff] }
 0x7f4   : > { %v4167_v2 = vadd.f32 %v3924_v27, %v17036_v16  ;;  %v13708_v61 = vadd.f32 %v7496_v0, %v4197_v51  ;;  %v7609_v27 = vld [vmem:[%s16724_s7 + $0x2a8] sm:$0xff]  ;;  %v7503_v16 = vld [vmem:[%s10739_s27 + $0x158] sm:$0xff] }
 0x7f5   : > { %v4168_v7 = vadd.f32 %v3926_v45, %v17038_v12  ;;  %v3929_v41 = vpop.f32.mrb[104].mxu1  ;;  %8748 = vmatprep.subr.bf16.mxu1 %v8747_v49  ;;  %v13702_v1 = vadd.f32 %v7497_v62, %v4198_v50  ;;  %v17044_v45 = vmax.f32 %v17043_v59, 0.0  ;;  %v8797_v50 = vpack.c.bf16 %v7606_v38, %v7604_v56  ;;  %8796 = vmatprep.subr.bf16.mxu0 %v8795_v55  ;;  %v7617_v38 = vld [vmem:[%s16724_s7 + $0x2e8] sm:$0xff] }
 0x7f6   : > { %v4199_v54 = vmul.f32 0.70710677, %v4167_v2  ;;  %v3930_v60 = vadd.f32 %v3929_v41, %v13595_v48  ;;  %v3931_v18 = vpop.f32.mrb[105].mxu1  ;;  %8750 = vmatpush1.bf16.msra.mxu1 %v8749_v58  ;;  %v17045_v58 = vld [vmem:[#allocation20_spill] sm:$0xff]  ;;  %v8799_v41 = vpack.c.bf16 %v7611_v40, %v7609_v27  ;;  %v17051_v40 = vld [vmem:[#allocation23_spill] sm:$0xff] }
 0x7f7   : > { %v4200_v47 = vmul.f32 0.70710677, %v4168_v7  ;;  %v3932_v17 = vadd.f32 %v3931_v18, %v13598_v4  ;;  %v17046_v62 = vmax.f32 %v17045_v58, 0.0  ;;  %v7615_v18 = vld [vmem:[%s16724_s7 + $0x2d8] sm:$0xff]  ;;  %8798 = vmatpush1.bf16.msra.mxu0 %v8797_v50  ;;  %v7505_v27 = vld [vmem:[%s10739_s27 + $0x168] sm:$0xff] }
 0x7f8   : > { %v13700_v9 = vadd.f32 %v7498_v33, %v4199_v54  ;;  %v4169_v20 = vadd.f32 %v3930_v60, %v17042_v24  ;;  %v7608_v33 = vld [vmem:[%s16724_s7 + $0x2a0] sm:$0xff]  ;;  %v7613_v60 = vld [vmem:[%s16724_s7 + $0x2c8] sm:$0xff]  ;;  %8800 = vmatprep.subr.bf16.mxu0 %v8799_v41  ;;  %v7507_v58 = vld [vmem:[%s10739_s27 + $0x178] sm:$0xff] }
 0x7f9   : > { %v13704_v11 = vadd.f32 %v7499_v52, %v4200_v47  ;;  %v4170_v28 = vadd.f32 %v3932_v17, %v17040_v34  ;;  %v3935_v53 = vpop.f32.mrb[106].mxu1  ;;  %v17047_v47 = vld [vmem:[#allocation21_spill] sm:$0xff]  ;;  %v8801_v26 = vpack.c.bf16 %v7610_v14, %v7608_v33 }
 0x7fa   : > { %v3936_v22 = vadd.f32 %v3935_v53, %v13595_v48  ;;  %v3937_v32 = vpop.f32.mrb[107].mxu1  ;;  %v8753_v35 = vpack.c.bf16 %v13700_v9, %v13708_v61  ;;  %v4201_v46 = vmul.f32 0.70710677, %v4169_v20  ;;  %v17048_v17 = vmax.f32 %v17047_v47, 0.0  ;;  %v17055_v47 = vld [vmem:[#allocation25_spill] sm:$0xff] }
 0x7fb   : > { %v3938_v6 = vadd.f32 %v3937_v32, %v13598_v4  ;;  %v8751_v31 = vpack.c.bf16 %v13704_v11, %v13702_v1  ;;  %v4202_v19 = vmul.f32 0.70710677, %v4170_v28  ;;  %v17049_v28 = vld [vmem:[#allocation22_spill] sm:$0xff]  ;;  %v8803_v20 = vpack.c.bf16 %v7615_v18, %v7613_v60  ;;  %v7614_v32 = vld [vmem:[%s16724_s7 + $0x2d0] sm:$0xff]  ;;  %8802 = vmatpush1.bf16.msra.mxu0 %v8801_v26 }
 0x7fc   : > { %v4171_v49 = vadd.f32 %v3936_v22, %v17044_v45  ;;  %v13760_v34 = vadd.f32 %v7500_v3, %v4201_v46  ;;  %v17050_v53 = vmax.f32 %v17049_v28, 0.0  ;;  %v7612_v22 = vld [vmem:[%s16724_s7 + $0x2c0] sm:$0xff]  ;;  %v7506_v45 = vld [vmem:[%s10739_s27 + $0x170] sm:$0xff]  ;;  %v7621_v3 = vld [vmem:[%s16724_s7 + $0x308] sm:$0xff] }
 0x7fd   : > { %v4172_v36 = vadd.f32 %v3938_v6, %v17046_v62  ;;  %v3941_v2 = vpop.f32.mrb[108].mxu1  ;;  %8752 = vmatprep.subr.bf16.mxu1 %v8751_v31  ;;  %v13754_v13 = vadd.f32 %v7501_v10, %v4202_v19  ;;  %v7619_v6 = vld [vmem:[%s16724_s7 + $0x2f8] sm:$0xff]  ;;  %8804 = vmatprep.subr.bf16.mxu0 %v8803_v20 }
 0x7fe   : > { %v4203_v12 = vmul.f32 0.70710677, %v4171_v49  ;;  %v3942_v7 = vadd.f32 %v3941_v2, %v13595_v48  ;;  %v3943_v52 = vpop.f32.mrb[109].mxu1  ;;  %8754 = vmatpush1.bf16.msra.mxu1 %v8753_v35  ;;  %v17052_v35 = vmax.f32 %v17051_v40, 0.0  ;;  %v17053_v49 = vld [vmem:[#allocation24_spill] sm:$0xff] }
 0x7ff   : > { %v4204_v51 = vmul.f32 0.70710677, %v4172_v36  ;;  %v3944_v54 = vadd.f32 %v3943_v52, %v13598_v4  ;;  %v17054_v19 = vmax.f32 %v17053_v49, 0.0  ;;  %v8805_v36 = vpack.c.bf16 %v7614_v32, %v7612_v22  ;;  %v7504_v52 = vld [vmem:[%s10739_s27 + $0x160] sm:$0xff]  ;;  %v7509_v40 = vld [vmem:[%s10739_s27 + $0x188] sm:$0xff]  ;;  %v7510_v49 = vld [vmem:[%s10739_s27 + $0x190] sm:$0xff] }
 0x800   : > { %v13752_v30 = vadd.f32 %v7502_v25, %v4203_v12  ;;  %v4173_v57 = vadd.f32 %v3942_v7, %v17050_v53  ;;  %v8807_v12 = vpack.c.bf16 %v7619_v6, %v7617_v38  ;;  %v7618_v7 = vld [vmem:[%s16724_s7 + $0x2f0] sm:$0xff]  ;;  %v17057_v53 = vld [vmem:[#allocation26_spill] sm:$0xff]  ;;  %v7620_v32 = vld [vmem:[%s16724_s7 + $0x300] sm:$0xff] }
 0x801   : > { %v13756_v0 = vadd.f32 %v7503_v16, %v4204_v51  ;;  %v4174_v5 = vadd.f32 %v3944_v54, %v17048_v17  ;;  %v3947_v42 = vpop.f32.mrb[110].mxu1  ;;  %v7616_v16 = vld [vmem:[%s16724_s7 + $0x2e0] sm:$0xff]  ;;  %v7623_v51 = vld [vmem:[%s16724_s7 + $0x318] sm:$0xff]  ;;  %v17056_v17 = vmax.f32 %v17055_v47, 0.0  ;;  %8806 = vmatpush1.bf16.msra.mxu0 %v8805_v36  ;;  %v7625_v6 = vld [vmem:[%s16724_s7 + $0x328] sm:$0xff] }
 0x802   : > { %v3948_v21 = vadd.f32 %v3947_v42, %v13595_v48  ;;  %v3949_v24 = vpop.f32.mrb[111].mxu1  ;;  %v8757_v31 = vpack.c.bf16 %v13752_v30, %v13760_v34  ;;  %v4205_v2 = vmul.f32 0.70710677, %v4173_v57  ;;  %v8809_v26 = vpack.c.bf16 %v7618_v7, %v7616_v16  ;;  %8808 = vmatprep.subr.bf16.mxu0 %v8807_v12  ;;  %v7631_v47 = vld [vmem:[%s16724_s7 + $0x358] sm:$0xff] }
 0x803   : > { %v3950_v55 = vadd.f32 %v3949_v24, %v13598_v4  ;;  %v8755_v56 = vpack.c.bf16 %v13756_v0, %v13754_v13  ;;  %v4206_v59 = vmul.f32 0.70710677, %v4174_v5  ;;  %v17058_v57 = vmax.f32 %v17057_v53, 0.0 }
 0x804   : > { %v4175_v10 = vadd.f32 %v3948_v21, %v17052_v35  ;;  %v13812_v28 = vadd.f32 %v7504_v52, %v4205_v2  ;;  %v8811_v22 = vpack.c.bf16 %v7623_v51, %v7621_v3  ;;  %v17059_v35 = vld [vmem:[#allocation27_spill] sm:$0xff]  ;;  %v7626_v52 = vld [vmem:[%s16724_s7 + $0x330] sm:$0xff]  ;;  %v7629_v51 = vld [vmem:[%s16724_s7 + $0x348] sm:$0xff] }
 0x805   : > { %v4176_v25 = vadd.f32 %v3950_v55, %v17054_v19  ;;  %v3953_v62 = vpop.f32.mrb[112].mxu1  ;;  %8756 = vmatprep.subr.bf16.mxu1 %v8755_v56  ;;  %v13806_v60 = vadd.f32 %v7505_v27, %v4206_v59  ;;  %v7622_v55 = vld [vmem:[%s16724_s7 + $0x310] sm:$0xff]  ;;  %v17061_v19 = vld [vmem:[#allocation28_spill] sm:$0xff]  ;;  %8810 = vmatpush1.bf16.msra.mxu0 %v8809_v26  ;;  %v7624_v2 = vld [vmem:[%s16724_s7 + $0x320] sm:$0xff] }
 0x806   : > { %v4207_v50 = vmul.f32 0.70710677, %v4175_v10  ;;  %v3954_v33 = vadd.f32 %v3953_v62, %v13595_v48  ;;  %v3955_v46 = vpop.f32.mrb[113].mxu1  ;;  %8758 = vmatpush1.bf16.msra.mxu1 %v8757_v31  ;;  %v7627_v31 = vld [vmem:[%s16724_s7 + $0x338] sm:$0xff]  ;;  %v17060_v10 = vmax.f32 %v17059_v35, 0.0  ;;  %v8813_v16 = vpack.c.bf16 %v7622_v55, %v7620_v32  ;;  %8812 = vmatprep.subr.bf16.mxu0 %v8811_v22  ;;  %v17063_v26 = vld [vmem:[#allocation29_spill] sm:$0xff] }
 0x807   : > { %v4208_v41 = vmul.f32 0.70710677, %v4176_v25  ;;  %v3956_v14 = vadd.f32 %v3955_v46, %v13598_v4  ;;  %v17062_v25 = vmax.f32 %v17061_v19, 0.0  ;;  %v7511_v62 = vld [vmem:[%s10739_s27 + $0x198] sm:$0xff]  ;;  %v8815_v7 = vpack.c.bf16 %v7627_v31, %v7625_v6  ;;  %v7628_v31 = vld [vmem:[%s16724_s7 + $0x340] sm:$0xff] }
 0x808   : > { %v13804_v54 = vadd.f32 %v7506_v45, %v4207_v50  ;;  %v4177_v21 = vadd.f32 %v3954_v33, %v17058_v57  ;;  %v17064_v53 = vmax.f32 %v17063_v26, 0.0  ;;  %v17065_v22 = vld [vmem:[#allocation30_spill] sm:$0xff]  ;;  %v8819_v6 = vpack.c.bf16 %v7631_v47, %v7629_v51  ;;  %v17067_v19 = vld [vmem:[#allocation31_spill] sm:$0xff]  ;;  %v7634_v47 = vld [vmem:[%s16724_s7 + $0x370] sm:$0xff] }
 0x809   : > { %v13808_v18 = vadd.f32 %v7507_v58, %v4208_v41  ;;  %v4178_v5 = vadd.f32 %v3956_v14, %v17056_v17  ;;  %v3959_v42 = vpop.f32.mrb[114].mxu1  ;;  %v7508_v41 = vld [vmem:[%s10739_s27 + $0x180] sm:$0xff]  ;;  %8814 = vmatpush1.bf16.msra.mxu0 %v8813_v16  ;;  %v17066_v32 = vmax.f32 %v17065_v22, 0.0  ;;  %v17069_v16 = vld [vmem:[#allocation32_spill] sm:$0xff] }
 0x80a   : > { %v3960_v24 = vadd.f32 %v3959_v42, %v13595_v48  ;;  %v3961_v20 = vpop.f32.mrb[115].mxu1  ;;  %v8761_v27 = vpack.c.bf16 %v13804_v54, %v13812_v28  ;;  %v4209_v50 = vmul.f32 0.70710677, %v4177_v21  ;;  %8816 = vmatprep.subr.bf16.mxu0 %v8815_v7  ;;  %v7632_v7 = vld [vmem:[%s16724_s7 + $0x360] sm:$0xff] }
 0x80b   : > { %v3962_v56 = vadd.f32 %v3961_v20, %v13598_v4  ;;  %v8759_v38 = vpack.c.bf16 %v13808_v18, %v13806_v60  ;;  %v4210_v45 = vmul.f32 0.70710677, %v4178_v5  ;;  %v7512_v26 = vld [vmem:[%s10739_s27 + $0x1a0] sm:$0xff] }
 0x80c   : > { %v4179_v59 = vadd.f32 %v3960_v24, %v17060_v10  ;;  %v8817_v24 = vpack.c.bf16 %v7626_v52, %v7624_v2  ;;  %v13864_v20 = vadd.f32 %v7508_v41, %v4209_v50  ;;  %v7633_v10 = vld [vmem:[%s16724_s7 + $0x368] sm:$0xff]  ;;  %v17070_v2 = vmax.f32 %v17069_v16, 0.0 }
 0x80d   : > { %v4180_v58 = vadd.f32 %v3962_v56, %v17062_v25  ;;  %v3965_v36 = vpop.f32.mrb[116].mxu1  ;;  %8760 = vmatprep.subr.bf16.mxu1 %v8759_v38  ;;  %v13858_v5 = vadd.f32 %v7509_v40, %v4210_v45  ;;  %v17068_v25 = vmax.f32 %v17067_v19, 0.0  ;;  %v7641_v16 = vld [vmem:[%s16724_s7 + $0x3a8] sm:$0xff] }
 0x80e   : > { %v4211_v33 = vmul.f32 0.70710677, %v4179_v59  ;;  %v3966_v46 = vadd.f32 %v3965_v36, %v13595_v48  ;;  %v3967_v12 = vpop.f32.mrb[117].mxu1  ;;  %8762 = vmatpush1.bf16.msra.mxu1 %v8761_v27  ;;  %v7630_v27 = vld [vmem:[%s16724_s7 + $0x350] sm:$0xff]  ;;  %v7635_v59 = vld [vmem:[%s16724_s7 + $0x378] sm:$0xff]  ;;  %8818 = vmatpush1.bf16.msra.mxu0 %v8817_v24 }
 0x80f   : > { %v4212_v14 = vmul.f32 0.70710677, %v4180_v58  ;;  %v3968_v3 = vadd.f32 %v3967_v12, %v13598_v4  ;;  %v7514_v36 = vld [vmem:[%s10739_s27 + $0x1b0] sm:$0xff]  ;;  %v8821_v12 = vpack.c.bf16 %v7630_v27, %v7628_v31  ;;  %8820 = vmatprep.subr.bf16.mxu0 %v8819_v6  ;;  %v8823_v51 = vpack.c.bf16 %v7635_v59, %v7633_v10  ;;  %v7639_v24 = vld [vmem:[%s16724_s7 + $0x398] sm:$0xff] }
 0x810   : > { %v13856_v17 = vadd.f32 %v7510_v49, %v4211_v33  ;;  %v4181_v55 = vadd.f32 %v3966_v46, %v17066_v32  ;;  %v7513_v49 = vld [vmem:[%s10739_s27 + $0x1a8] sm:$0xff]  ;;  %v7515_v33 = vld [vmem:[%s10739_s27 + $0x1b8] sm:$0xff]  ;;  %v8825_v27 = vpack.c.bf16 %v7634_v47, %v7632_v7 }
 0x811   : > { %v13860_v42 = vadd.f32 %v7511_v62, %v4212_v14  ;;  %v4182_v57 = vadd.f32 %v3968_v3, %v17064_v53  ;;  %v3971_v21 = vpop.f32.mrb[118].mxu1  ;;  %v7519_v47 = vld [vmem:[%s10739_s27 + $0x1d8] sm:$0xff] }
 0x812   : > { %v3972_v56 = vadd.f32 %v3971_v21, %v13595_v48  ;;  %v3973_v38 = vpop.f32.mrb[119].mxu1  ;;  %v8765_v45 = vpack.c.bf16 %v13856_v17, %v13864_v20  ;;  %v4213_v52 = vmul.f32 0.70710677, %v4181_v55  ;;  %v7637_v21 = vld [vmem:[%s16724_s7 + $0x388] sm:$0xff]  ;;  %8822 = vmatpush1.bf16.msra.mxu0 %v8821_v12 }
 0x813   : > { %v3974_v40 = vadd.f32 %v3973_v38, %v13598_v4  ;;  %v8763_v35 = vpack.c.bf16 %v13860_v42, %v13858_v5  ;;  %v4214_v62 = vmul.f32 0.70710677, %v4182_v57  ;;  %8824 = vmatprep.subr.bf16.mxu0 %v8823_v51  ;;  %v8827_v19 = vpack.c.bf16 %v7639_v24, %v7637_v21 }
 0x814   : > { %v4183_v58 = vadd.f32 %v3972_v56, %v17068_v25  ;;  %v17071_v56 = vld [vmem:[#allocation33_spill] sm:$0xff]  ;;  %v7636_v25 = vld [vmem:[%s16724_s7 + $0x380] sm:$0xff] }
 0x815   : > { %v4184_v50 = vadd.f32 %v3974_v40, %v17070_v2  ;;  %v3977_v46 = vpop.f32.mrb[120].mxu1  ;;  %8764 = vmatprep.subr.bf16.mxu1 %v8763_v35  ;;  %v13910_v32 = vadd.f32 %v7513_v49, %v4214_v62  ;;  %v17072_v38 = vmax.f32 %v17071_v56, 0.0  ;;  %v13916_v40 = vadd.f32 %v7512_v26, %v4213_v52  ;;  %v17073_v35 = vld [vmem:[#allocation34_spill] sm:$0xff] }
 0x816   : > { %v4215_v41 = vmul.f32 0.70710677, %v4183_v58  ;;  %v3978_v14 = vadd.f32 %v3977_v46, %v13595_v48  ;;  %v3979_v3 = vpop.f32.mrb[121].mxu1  ;;  %8766 = vmatpush1.bf16.msra.mxu1 %v8765_v45  ;;  %v17074_v10 = vmax.f32 %v17073_v35, 0.0  ;;  %v7638_v58 = vld [vmem:[%s16724_s7 + $0x390] sm:$0xff]  ;;  %v7643_v2 = vld [vmem:[%s16724_s7 + $0x3b8] sm:$0xff]  ;;  %8826 = vmatpush1.bf16.msra.mxu0 %v8825_v27 }
 0x817   : > { %v4216_v53 = vmul.f32 0.70710677, %v4184_v50  ;;  %v3980_v57 = vadd.f32 %v3979_v3, %v13598_v4  ;;  %v17075_v46 = vld [vmem:[#allocation35_spill] sm:$0xff]  ;;  %8828 = vmatprep.subr.bf16.mxu0 %v8827_v19 }
 0x818   : > { %v13908_v22 = vadd.f32 %v7514_v36, %v4215_v41  ;;  %v4185_v59 = vadd.f32 %v3978_v14, %v17074_v10  ;;  %v17076_v12 = vmax.f32 %v17075_v46, 0.0  ;;  %v7518_v41 = vld [vmem:[%s10739_s27 + $0x1d0] sm:$0xff]  ;;  %v17077_v14 = vld [vmem:[#allocation36_spill] sm:$0xff]  ;;  %v7516_v35 = vld [vmem:[%s10739_s27 + $0x1c0] sm:$0xff] }
 0x819   : > { %v13912_v55 = vadd.f32 %v7515_v33, %v4216_v53  ;;  %v4186_v6 = vadd.f32 %v3980_v57, %v17072_v38  ;;  %v3983_v31 = vpop.f32.mrb[122].mxu1  ;;  %v7517_v33 = vld [vmem:[%s10739_s27 + $0x1c8] sm:$0xff]  ;;  %v17078_v3 = vmax.f32 %v17077_v14, 0.0  ;;  %v8829_v53 = vpack.c.bf16 %v7638_v58, %v7636_v25  ;;  %v7640_v57 = vld [vmem:[%s16724_s7 + $0x3a0] sm:$0xff]  ;;  %v17079_v58 = vld [vmem:[#allocation37_spill] sm:$0xff] }
 0x81a   : > { %v3984_v45 = vadd.f32 %v3983_v31, %v13595_v48  ;;  %v3985_v49 = vpop.f32.mrb[123].mxu1  ;;  %v8769_v50 = vpack.c.bf16 %v13908_v22, %v13916_v40  ;;  %v4217_v21 = vmul.f32 0.70710677, %v4185_v59  ;;  %v7642_v31 = vld [vmem:[%s16724_s7 + $0x3b0] sm:$0xff]  ;;  %v7647_v59 = vld [vmem:[%s16724_s7 + $0x3d8] sm:$0xff] }
 0x81b   : > { %v3986_v62 = vadd.f32 %v3985_v49, %v13598_v4  ;;  %v8767_v36 = vpack.c.bf16 %v13912_v55, %v13910_v32  ;;  %v4218_v52 = vmul.f32 0.70710677, %v4186_v6  ;;  %v8831_v6 = vpack.c.bf16 %v7643_v2, %v7641_v16  ;;  %8830 = vmatpush1.bf16.msra.mxu0 %v8829_v53  ;;  %v17081_v46 = vld [vmem:[#allocation38_spill] sm:$0xff] }
 0x81c   : > { %v4187_v7 = vadd.f32 %v3984_v45, %v17076_v12  ;;  %v7645_v45 = vld [vmem:[%s16724_s7 + $0x3c8] sm:$0xff]  ;;  %v8833_v2 = vpack.c.bf16 %v7642_v31, %v7640_v57  ;;  %v17082_v12 = vmax.f32 %v17081_v46, 0.0  ;;  %v17083_v57 = vld [vmem:[#allocation39_spill] sm:$0xff] }
 0x81d   : > { %v4188_v51 = vadd.f32 %v3986_v62, %v17078_v3  ;;  %v3989_v26 = vpop.f32.mrb[124].mxu1  ;;  %8768 = vmatprep.subr.bf16.mxu1 %v8767_v36  ;;  %v13962_v19 = vadd.f32 %v7517_v33, %v4218_v52  ;;  %v17080_v62 = vmax.f32 %v17079_v58, 0.0  ;;  %8832 = vmatprep.subr.bf16.mxu0 %v8831_v6  ;;  %v8835_v33 = vpack.c.bf16 %v7647_v59, %v7645_v45  ;;  %v7644_v52 = vld [vmem:[%s16724_s7 + $0x3c0] sm:$0xff]  ;;  %v7646_v3 = vld [vmem:[%s16724_s7 + $0x3d0] sm:$0xff]  ;;  %v7523_v59 = vld [vmem:[%s10739_s27 + $0x1f8] sm:$0xff] }
 0x81e   : > { %v4219_v24 = vmul.f32 0.70710677, %v4187_v7  ;;  %v3990_v56 = vadd.f32 %v3989_v26, %v13595_v48  ;;  %v3991_v38 = vpop.f32.mrb[125].mxu1  ;;  %8770 = vmatpush1.bf16.msra.mxu1 %v8769_v50  ;;  %v13968_v50 = vadd.f32 %v7516_v35, %v4217_v21  ;;  %v7651_v26 = vld [vmem:[%s16724_s7 + $0x3f8] sm:$0xff]  ;;  %v17084_v21 = vmax.f32 %v17083_v57, 0.0  ;;  %v14076_v57 = vld [vmem:[%s16973_s25 + $0x48] sm:$0xff] }
 0x81f   : > { %v4220_v10 = vmul.f32 0.70710677, %v4188_v51  ;;  %v3992_v27 = vadd.f32 %v3991_v38, %v13598_v4  ;;  %v17085_v38 = vld [vmem:[#allocation40_spill] sm:$0xff]  ;;  %8834 = vmatpush1.bf16.msra.mxu0 %v8833_v2  ;;  %v8837_v35 = vpack.c.bf16 %v7646_v3, %v7644_v52  ;;  %v14027_v52 = vld [vmem:[%s16973_s25 + $0x10] sm:$0xff]  ;;  %v14034_v3 = vld [vmem:[%s16973_s25 + $0x18] sm:$0xff] }
 0x820   : > { %v13960_v49 = vadd.f32 %v7518_v41, %v4219_v24  ;;  %v4189_v7 = vadd.f32 %v3990_v56, %v17082_v12  ;;  %v17086_v6 = vmax.f32 %v17085_v38, 0.0  ;;  %8836 = vmatprep.subr.bf16.mxu0 %v8835_v33  ;;  %v14020_v33 = vld [vmem:[%s16973_s25 + $0x8] sm:$0xff]  ;;  %v10037_v38 = vld [vmem:[%s16973_s25 + $0x70] sm:$0xff] }
 0x821   : > { %v13964_v25 = vadd.f32 %v7519_v47, %v4220_v10  ;;  %v4190_v36 = vadd.f32 %v3992_v27, %v17080_v62  ;;  %v3995_v16 = vpop.f32.mrb[126].mxu1  ;;  %v7521_v27 = vld [vmem:[%s10739_s27 + $0x1e8] sm:$0xff]  ;;  %v7520_v62 = vld [vmem:[%s10739_s27 + $0x1e0] sm:$0xff] }
 0x822   : > { %v3996_v14 = vadd.f32 %v3995_v16, %v13595_v48  ;;  %v3997_v41 = vpop.f32.mrb[127].mxu1  ;;  %v7649_v48 = vld [vmem:[%s16724_s7 + $0x3e8] sm:$0xff]  ;;  %v8773_v53 = vpack.c.bf16 %v13960_v49, %v13968_v50  ;;  %v4221_v10 = vmul.f32 0.70710677, %v4189_v7 }
 0x823   : > { %v3998_v51 = vadd.f32 %v3997_v41, %v13598_v4  ;;  %v8771_v47 = vpack.c.bf16 %v13964_v25, %v13962_v19  ;;  %v4222_v56 = vmul.f32 0.70710677, %v4190_v36  ;;  %v7522_v4 = vld [vmem:[%s10739_s27 + $0x1f0] sm:$0xff]  ;;  %v8839_v58 = vpack.c.bf16 %v7651_v26, %v7649_v48  ;;  %8838 = vmatpush1.bf16.msra.mxu0 %v8837_v35  ;;  %v14013_v41 = vld [vmem:[%s16973_s25] sm:$0xff]  ;;  %v14062_v26 = vld [vmem:[%s16973_s25 + $0x38] sm:$0xff] }
 0x824   : > { %v4191_v24 = vadd.f32 %v3996_v14, %v17084_v21  ;;  %v14004_v14 = vadd.f32 %v7520_v62, %v4221_v10  ;;  %v14055_v48 = vld [vmem:[%s16973_s25 + $0x30] sm:$0xff] }
 0x825   : > { %v4192_v31 = vadd.f32 %v3998_v51, %v17086_v6  ;;  %8772 = vmatprep.subr.bf16.mxu1 %v8771_v47  ;;  %v14000_v12 = vadd.f32 %v7521_v27, %v4222_v56  ;;  %8840 = vmatprep.subr.bf16.mxu0 %v8839_v58  ;;  %v14041_v51 = vld [vmem:[%s16973_s25 + $0x20] sm:$0xff]  ;;  %v14048_v47 = vld [vmem:[%s16973_s25 + $0x28] sm:$0xff]  ;;  %v14083_v21 = vld [vmem:[%s16973_s25 + $0x50] sm:$0xff] }
 0x826   : > { %v4223_v45 = vmul.f32 0.70710677, %v4191_v24  ;;  %8774 = vmatpush1.bf16.msra.mxu1 %v8773_v53  ;;  %v14069_v53 = vld [vmem:[%s16973_s25 + $0x40] sm:$0xff]  ;;  %v14090_v24 = vld [vmem:[%s16973_s25 + $0x58] sm:$0xff]  ;;  %v7650_v35 = vld [vmem:[%s16724_s7 + $0x3f0] sm:$0xff] }
 0x827   : > { %v4224_v16 = vmul.f32 0.70710677, %v4192_v31  ;;  %v14097_v56 = vld [vmem:[%s16973_s25 + $0x60] sm:$0xff]  ;;  %v10038_v6 = vld [vmem:[%s16973_s25 + $0x78] sm:$0xff]  ;;  %v7525_v27 = vld [vmem:[%s16723_s6 + $0x208] sm:$0xff] }
 0x828   : > { %v13998_v46 = vadd.f32 %v7522_v4, %v4223_v45  ;;  %v14104_v4 = vld [vmem:[%s16973_s25 + $0x68] sm:$0xff]  ;;  %v7648_v31 = vld [vmem:[%s16724_s7 + $0x3e0] sm:$0xff]  ;;  %v7527_v45 = vld [vmem:[%s16723_s6 + $0x218] sm:$0xff] }
 0x829   : > { %v14002_v36 = vadd.f32 %v7523_v59, %v4224_v16  ;;  %v8841_v10 = vpack.c.bf16 %v7650_v35, %v7648_v31  ;;  %v8843_v59 = vpack.c.bf16 %v7527_v45, %v7525_v27  ;;  %v7524_v58 = vld [vmem:[%s16723_s6 + $0x200] sm:$0xff]  ;;  %v7526_v62 = vld [vmem:[%s16723_s6 + $0x210] sm:$0xff]  ;;  %v7529_v16 = vld [vmem:[%s16723_s6 + $0x228] sm:$0xff] }
 0x82a   : > { %v8777_v7 = vpack.c.bf16 %v13998_v46, %v14004_v14  ;;  %v7528_v35 = vld [vmem:[%s16723_s6 + $0x220] sm:$0xff]  ;;  %v7533_v27 = vld [vmem:[%s16723_s6 + $0x248] sm:$0xff]  ;;  %v7535_v45 = vld [vmem:[%s16723_s6 + $0x258] sm:$0xff] }
 0x82b   : > { %v8775_v2 = vpack.c.bf16 %v14002_v36, %v14000_v12  ;;  %8842 = vmatpush1.bf16.msra.mxu0 %v8841_v10  ;;  %v7530_v10 = vld [vmem:[%s16723_s6 + $0x230] sm:$0xff] }
 0x82c   : > { %8844 = vmatprep.subr.bf16.mxu0 %v8843_v59 }
 0x82d   : > { %8776 = vmatprep.subr.bf16.mxu1 %v8775_v2  ;;  %v7531_v2 = vld [vmem:[%s16723_s6 + $0x238] sm:$0xff] }
 0x82e   : > { %8778 = vmatpush1.bf16.msra.mxu1 %v8777_v7  ;;  %v8847_v31 = vpack.c.bf16 %v7531_v2, %v7529_v16  ;;  %v8851_v16 = vpack.c.bf16 %v7535_v45, %v7533_v27  ;;  %v7532_v2 = vld [vmem:[%s16723_s6 + $0x240] sm:$0xff]  ;;  %v7538_v45 = vld [vmem:[%s16723_s6 + $0x270] sm:$0xff] }
 0x82f   : > { %v7536_v27 = vld [vmem:[%s16723_s6 + $0x260] sm:$0xff] }
 0x831   : > { %4387 = vmatmul.mubr.f32.vlgmr.msra.gmra.mrb[128].mxu1 %v14013_v41 }
 0x832   : > { %4392 = vmatprep.mubr.f32.mxu1 %v16974_v29 }
 0x835   : > { %4393 = vmatmul.mubr.f32.gmra.mrb[130].mxu1 %v14020_v33 }
 0x836   : > { %4398 = vmatprep.mubr.f32.mxu1 %v16974_v29 }
 0x839   : > { %4399 = vmatmul.mubr.f32.gmra.mrb[132].mxu1 %v14027_v52 }
 0x83a   : > { %4404 = vmatprep.mubr.f32.mxu1 %v16974_v29 }
 0x83d   : > { %4405 = vmatmul.mubr.f32.gmra.mrb[134].mxu1 %v14034_v3 }
 0x83e   : > { %4410 = vmatprep.mubr.f32.mxu1 %v16974_v29 }
 0x841   : > { %4411 = vmatmul.mubr.f32.gmra.mrb[136].mxu1 %v14041_v51 }
 0x842   : > { %4416 = vmatprep.mubr.f32.mxu1 %v16974_v29 }
 0x845   : > { %4417 = vmatmul.mubr.f32.gmra.mrb[138].mxu1 %v14048_v47 }
 0x846   : > { %4422 = vmatprep.mubr.f32.mxu1 %v16974_v29 }
 0x849   : > { %4423 = vmatmul.mubr.f32.gmra.mrb[140].mxu1 %v14055_v48 }
 0x84a   : > { %4428 = vmatprep.mubr.f32.mxu1 %v16974_v29 }
 0x84d   : > { %4429 = vmatmul.mubr.f32.gmra.mrb[142].mxu1 %v14062_v26 }
 0x84e   : > { %4434 = vmatprep.mubr.f32.mxu1 %v16974_v29 }
 0x851   : > { %4435 = vmatmul.mubr.f32.gmra.mrb[144].mxu1 %v14069_v53 }
 0x852   : > { %4440 = vmatprep.mubr.f32.mxu1 %v16974_v29 }
 0x855   : > { %4441 = vmatmul.mubr.f32.gmra.mrb[146].mxu1 %v14076_v57 }
 0x856   : > { %4446 = vmatprep.mubr.f32.mxu1 %v16974_v29 }
 0x859   : > { %4447 = vmatmul.mubr.f32.gmra.mrb[148].mxu1 %v14083_v21 }
 0x85a   : > { %4452 = vmatprep.mubr.f32.mxu1 %v16974_v29 }
 0x85d   : > { %4453 = vmatmul.mubr.f32.gmra.mrb[150].mxu1 %v14090_v24 }
 0x85e   : > { %4458 = vmatprep.mubr.f32.mxu1 %v16974_v29 }
 0x861   : > { %4459 = vmatmul.mubr.f32.gmra.mrb[152].mxu1 %v14097_v56 }
 0x862   : > { %4464 = vmatprep.mubr.f32.mxu1 %v16974_v29 }
 0x865   : > { %4465 = vmatmul.mubr.f32.gmra.mrb[154].mxu1 %v14104_v4 }
 0x866   : > { %4470 = vmatprep.mubr.f32.mxu1 %v16974_v29 }
 0x869   : > { %4471 = vmatmul.mubr.f32.gmra.mrb[156].mxu1 %v10037_v38  ;;  %v8845_v38 = vpack.c.bf16 %v7526_v62, %v7524_v58  ;;  %v8849_v58 = vpack.c.bf16 %v7530_v10, %v7528_v35 }
 0x86a   : > { %4476 = vmatprep.mubr.f32.mxu1 %v16974_v29 }
 0x86d   : > { %4477 = vmatmul.mubr.f32.gmra.mrb[158].mxu1 %v10038_v6 }
 0x86e   : > { %5076 = vmatprep.mubr.f32.mxu1 %v16974_v29 }
 0x904   : > { %v4388_v7 = vpop.f32.mrb[128].mxu1 }
 0x905   : > { %v4390_v6 = vpop.f32.mrb[129].mxu1 }
 0x906   : > { %4677 = vmatprep.mubr.f32.mxu0 %v4390_v6  ;;  %v7534_v6 = vld [vmem:[%s16723_s6 + $0x250] sm:$0xff] }
 0x907   : > { %4678 = vmatmul.mubr.f32.vlgmr.msra.gmra.mrb[160].mxu0 %v4388_v7  ;;  %v7539_v7 = vld [vmem:[%s16723_s6 + $0x278] sm:$0xff] }
 0x908   : > { %v4394_v59 = vpop.f32.mrb[130].mxu1  ;;  %8846 = vmatpush1.bf16.msra.mxu0 %v8845_v38  ;;  %v8855_v10 = vpack.c.bf16 %v7539_v7, %v7537_v43  ;;  %v8857_v43 = vpack.c.bf16 %v7538_v45, %v7536_v27  ;;  %v7542_v7 = vld [vmem:[%s16723_s6 + $0x290] sm:$0xff] }
 0x909   : > { %v4396_v62 = vpop.f32.mrb[131].mxu1  ;;  %8848 = vmatprep.subr.bf16.mxu0 %v8847_v31  ;;  %v8853_v31 = vpack.c.bf16 %v7534_v6, %v7532_v2  ;;  %v7540_v6 = vld [vmem:[%s16723_s6 + $0x280] sm:$0xff] }
 0x90a   : > { %4683 = vmatprep.mubr.f32.mxu0 %v4396_v62  ;;  %v7541_v62 = vld [vmem:[%s16723_s6 + $0x288] sm:$0xff] }
 0x90b   : > { %4684 = vmatmul.mubr.f32.gmra.mrb[162].mxu0 %v4394_v59  ;;  %v7543_v59 = vld [vmem:[%s16723_s6 + $0x298] sm:$0xff] }
 0x90c   : > { %v4400_v38 = vpop.f32.mrb[132].mxu1  ;;  %8850 = vmatpush1.bf16.msra.mxu0 %v8849_v58  ;;  %v8859_v2 = vpack.c.bf16 %v7543_v59, %v7541_v62  ;;  %v7544_v62 = vld [vmem:[%s16723_s6 + $0x2a0] sm:$0xff]  ;;  %v7546_v59 = vld [vmem:[%s16723_s6 + $0x2b0] sm:$0xff] }
 0x90d   : > { %v4402_v35 = vpop.f32.mrb[133].mxu1  ;;  %8852 = vmatprep.subr.bf16.mxu0 %v8851_v16 }
 0x90e   : > { %4689 = vmatprep.mubr.f32.mxu0 %v4402_v35  ;;  %v7545_v35 = vld [vmem:[%s16723_s6 + $0x2a8] sm:$0xff] }
 0x90f   : > { %4690 = vmatmul.mubr.f32.gmra.mrb[164].mxu0 %v4400_v38  ;;  %v7547_v38 = vld [vmem:[%s16723_s6 + $0x2b8] sm:$0xff] }
 0x910   : > { %v4406_v58 = vpop.f32.mrb[134].mxu1  ;;  %8854 = vmatpush1.bf16.msra.mxu0 %v8853_v31  ;;  %v8863_v45 = vpack.c.bf16 %v7547_v38, %v7545_v35  ;;  %v7548_v35 = vld [vmem:[%s16723_s6 + $0x2c0] sm:$0xff]  ;;  %v7550_v38 = vld [vmem:[%s16723_s6 + $0x2d0] sm:$0xff] }
 0x911   : > { %v4408_v16 = vpop.f32.mrb[135].mxu1  ;;  %8856 = vmatprep.subr.bf16.mxu0 %v8855_v10  ;;  %v8861_v10 = vpack.c.bf16 %v7542_v7, %v7540_v6 }
 0x912   : > { %4695 = vmatprep.mubr.f32.mxu0 %v4408_v16  ;;  %v7549_v16 = vld [vmem:[%s16723_s6 + $0x2c8] sm:$0xff] }
 0x913   : > { %4696 = vmatmul.mubr.f32.gmra.mrb[166].mxu0 %v4406_v58  ;;  %v7551_v58 = vld [vmem:[%s16723_s6 + $0x2d8] sm:$0xff] }
 0x914   : > { %v4412_v31 = vpop.f32.mrb[136].mxu1  ;;  %8858 = vmatpush1.bf16.msra.mxu0 %v8857_v43  ;;  %v8867_v7 = vpack.c.bf16 %v7551_v58, %v7549_v16  ;;  %v7552_v16 = vld [vmem:[%s16723_s6 + $0x2e0] sm:$0xff]  ;;  %v7554_v58 = vld [vmem:[%s16723_s6 + $0x2f0] sm:$0xff] }
 0x915   : > { %v4414_v27 = vpop.f32.mrb[137].mxu1  ;;  %8860 = vmatprep.subr.bf16.mxu0 %v8859_v2  ;;  %v8865_v2 = vpack.c.bf16 %v7546_v59, %v7544_v62 }
 0x916   : > { %4701 = vmatprep.mubr.f32.mxu0 %v4414_v27  ;;  %v7553_v27 = vld [vmem:[%s16723_s6 + $0x2e8] sm:$0xff] }
 0x917   : > { %4702 = vmatmul.mubr.f32.gmra.mrb[168].mxu0 %v4412_v31  ;;  %v7555_v31 = vld [vmem:[%s16723_s6 + $0x2f8] sm:$0xff] }
 0x918   : > { %v4418_v43 = vpop.f32.mrb[138].mxu1  ;;  %8862 = vmatpush1.bf16.msra.mxu0 %v8861_v10  ;;  %v8871_v59 = vpack.c.bf16 %v7555_v31, %v7553_v27  ;;  %v7556_v27 = vld [vmem:[%s16723_s6 + $0x300] sm:$0xff]  ;;  %v7558_v31 = vld [vmem:[%s16723_s6 + $0x310] sm:$0xff] }
 0x919   : > { %v4420_v6 = vpop.f32.mrb[139].mxu1  ;;  %8864 = vmatprep.subr.bf16.mxu0 %v8863_v45  ;;  %v8869_v45 = vpack.c.bf16 %v7550_v38, %v7548_v35 }
 0x91a   : > { %4707 = vmatprep.mubr.f32.mxu0 %v4420_v6  ;;  %v7557_v6 = vld [vmem:[%s16723_s6 + $0x308] sm:$0xff] }
 0x91b   : > { %4708 = vmatmul.mubr.f32.gmra.mrb[170].mxu0 %v4418_v43  ;;  %v7559_v43 = vld [vmem:[%s16723_s6 + $0x318] sm:$0xff] }
 0x91c   : > { %v4424_v10 = vpop.f32.mrb[140].mxu1  ;;  %8866 = vmatpush1.bf16.msra.mxu0 %v8865_v2  ;;  %v8875_v38 = vpack.c.bf16 %v7559_v43, %v7557_v6  ;;  %v7560_v6 = vld [vmem:[%s16723_s6 + $0x320] sm:$0xff]  ;;  %v7562_v43 = vld [vmem:[%s16723_s6 + $0x330] sm:$0xff] }
 0x91d   : > { %v4426_v62 = vpop.f32.mrb[141].mxu1  ;;  %8868 = vmatprep.subr.bf16.mxu0 %v8867_v7  ;;  %v8873_v7 = vpack.c.bf16 %v7554_v58, %v7552_v16 }
 0x91e   : > { %4713 = vmatprep.mubr.f32.mxu0 %v4426_v62  ;;  %v7561_v62 = vld [vmem:[%s16723_s6 + $0x328] sm:$0xff] }
 0x91f   : > { %4714 = vmatmul.mubr.f32.gmra.mrb[172].mxu0 %v4424_v10  ;;  %v7563_v10 = vld [vmem:[%s16723_s6 + $0x338] sm:$0xff] }
 0x920   : > { %v4430_v2 = vpop.f32.mrb[142].mxu1  ;;  %8870 = vmatpush1.bf16.msra.mxu0 %v8869_v45  ;;  %v8879_v58 = vpack.c.bf16 %v7563_v10, %v7561_v62  ;;  %v7564_v62 = vld [vmem:[%s16723_s6 + $0x340] sm:$0xff]  ;;  %v7566_v10 = vld [vmem:[%s16723_s6 + $0x350] sm:$0xff] }
 0x921   : > { %v4432_v35 = vpop.f32.mrb[143].mxu1  ;;  %8872 = vmatprep.subr.bf16.mxu0 %v8871_v59  ;;  %v8877_v59 = vpack.c.bf16 %v7558_v31, %v7556_v27 }
 0x922   : > { %4719 = vmatprep.mubr.f32.mxu0 %v4432_v35  ;;  %v7565_v35 = vld [vmem:[%s16723_s6 + $0x348] sm:$0xff] }
 0x923   : > { %4720 = vmatmul.mubr.f32.gmra.mrb[174].mxu0 %v4430_v2  ;;  %v7567_v2 = vld [vmem:[%s16723_s6 + $0x358] sm:$0xff] }
 0x924   : > { %v4436_v45 = vpop.f32.mrb[144].mxu1  ;;  %8874 = vmatpush1.bf16.msra.mxu0 %v8873_v7  ;;  %v8883_v31 = vpack.c.bf16 %v7567_v2, %v7565_v35  ;;  %v7568_v35 = vld [vmem:[%s16723_s6 + $0x360] sm:$0xff]  ;;  %v7570_v2 = vld [vmem:[%s16723_s6 + $0x370] sm:$0xff] }
 0x925   : > { %v4438_v16 = vpop.f32.mrb[145].mxu1  ;;  %8876 = vmatprep.subr.bf16.mxu0 %v8875_v38  ;;  %v8881_v38 = vpack.c.bf16 %v7562_v43, %v7560_v6 }
 0x926   : > { %4725 = vmatprep.mubr.f32.mxu0 %v4438_v16  ;;  %v7569_v16 = vld [vmem:[%s16723_s6 + $0x368] sm:$0xff] }
 0x927   : > { %4726 = vmatmul.mubr.f32.gmra.mrb[176].mxu0 %v4436_v45  ;;  %v7571_v45 = vld [vmem:[%s16723_s6 + $0x378] sm:$0xff] }
 0x928   : > { %v4442_v7 = vpop.f32.mrb[146].mxu1  ;;  %8878 = vmatpush1.bf16.msra.mxu0 %v8877_v59  ;;  %v8887_v43 = vpack.c.bf16 %v7571_v45, %v7569_v16  ;;  %v7572_v16 = vld [vmem:[%s16723_s6 + $0x380] sm:$0xff]  ;;  %v7574_v45 = vld [vmem:[%s16723_s6 + $0x390] sm:$0xff] }
 0x929   : > { %v4444_v27 = vpop.f32.mrb[147].mxu1  ;;  %8880 = vmatprep.subr.bf16.mxu0 %v8879_v58  ;;  %v8885_v58 = vpack.c.bf16 %v7566_v10, %v7564_v62 }
 0x92a   : > { %4731 = vmatprep.mubr.f32.mxu0 %v4444_v27  ;;  %v7573_v27 = vld [vmem:[%s16723_s6 + $0x388] sm:$0xff] }
 0x92b   : > { %4732 = vmatmul.mubr.f32.gmra.mrb[178].mxu0 %v4442_v7  ;;  %v7575_v7 = vld [vmem:[%s16723_s6 + $0x398] sm:$0xff] }
 0x92c   : > { %v4448_v59 = vpop.f32.mrb[148].mxu1  ;;  %8882 = vmatpush1.bf16.msra.mxu0 %v8881_v38  ;;  %v8891_v10 = vpack.c.bf16 %v7575_v7, %v7573_v27  ;;  %v7576_v27 = vld [vmem:[%s16723_s6 + $0x3a0] sm:$0xff]  ;;  %v7578_v7 = vld [vmem:[%s16723_s6 + $0x3b0] sm:$0xff] }
 0x92d   : > { %v4450_v6 = vpop.f32.mrb[149].mxu1  ;;  %8884 = vmatprep.subr.bf16.mxu0 %v8883_v31  ;;  %v8889_v31 = vpack.c.bf16 %v7570_v2, %v7568_v35 }
 0x92e   : > { %4737 = vmatprep.mubr.f32.mxu0 %v4450_v6  ;;  %v7577_v6 = vld [vmem:[%s16723_s6 + $0x3a8] sm:$0xff] }
 0x92f   : > { %4738 = vmatmul.mubr.f32.gmra.mrb[180].mxu0 %v4448_v59  ;;  %v7579_v59 = vld [vmem:[%s16723_s6 + $0x3b8] sm:$0xff] }
 0x930   : > { %v4454_v38 = vpop.f32.mrb[150].mxu1  ;;  %8886 = vmatpush1.bf16.msra.mxu0 %v8885_v58  ;;  %v8895_v2 = vpack.c.bf16 %v7579_v59, %v7577_v6  ;;  %v7580_v6 = vld [vmem:[%s16723_s6 + $0x3c0] sm:$0xff]  ;;  %v7582_v59 = vld [vmem:[%s16723_s6 + $0x3d0] sm:$0xff] }
 0x931   : > { %v4456_v62 = vpop.f32.mrb[151].mxu1  ;;  %8888 = vmatprep.subr.bf16.mxu0 %v8887_v43  ;;  %v8893_v43 = vpack.c.bf16 %v7574_v45, %v7572_v16 }
 0x932   : > { %4743 = vmatprep.mubr.f32.mxu0 %v4456_v62  ;;  %v7581_v62 = vld [vmem:[%s16723_s6 + $0x3c8] sm:$0xff] }
 0x933   : > { %4744 = vmatmul.mubr.f32.gmra.mrb[182].mxu0 %v4454_v38  ;;  %v7583_v38 = vld [vmem:[%s16723_s6 + $0x3d8] sm:$0xff] }
 0x934   : > { %v4460_v58 = vpop.f32.mrb[152].mxu1  ;;  %8890 = vmatpush1.bf16.msra.mxu0 %v8889_v31  ;;  %v8899_v45 = vpack.c.bf16 %v7583_v38, %v7581_v62  ;;  %v7584_v62 = vld [vmem:[%s16723_s6 + $0x3e0] sm:$0xff]  ;;  %v7586_v38 = vld [vmem:[%s16723_s6 + $0x3f0] sm:$0xff] }
 0x935   : > { %v4462_v35 = vpop.f32.mrb[153].mxu1  ;;  %8892 = vmatprep.subr.bf16.mxu0 %v8891_v10  ;;  %v8897_v10 = vpack.c.bf16 %v7578_v7, %v7576_v27  ;;  %v8905_v63 = vpack.c.bf16 %v7586_v38, %v7584_v62 }
 0x936   : > { %4749 = vmatprep.mubr.f32.mxu0 %v4462_v35  ;;  %v7585_v35 = vld [vmem:[%s16723_s6 + $0x3e8] sm:$0xff] }
 0x937   : > { %4750 = vmatmul.mubr.f32.gmra.mrb[184].mxu0 %v4460_v58  ;;  %v7587_v58 = vld [vmem:[%s16723_s6 + $0x3f8] sm:$0xff] }
 0x938   : > { %v4466_v31 = vpop.f32.mrb[154].mxu1  ;;  %8894 = vmatpush1.bf16.msra.mxu0 %v8893_v43  ;;  %v8903_v7 = vpack.c.bf16 %v7587_v58, %v7585_v35 }
 0x939   : > { %v4468_v16 = vpop.f32.mrb[155].mxu1  ;;  %8896 = vmatprep.subr.bf16.mxu0 %v8895_v2  ;;  %v8901_v2 = vpack.c.bf16 %v7582_v59, %v7580_v6 }
 0x93a   : > { %4755 = vmatprep.mubr.f32.mxu0 %v4468_v16 }
 0x93b   : > { %4756 = vmatmul.mubr.f32.gmra.mrb[186].mxu0 %v4466_v31 }
 0x93c   : > { %v4472_v43 = vpop.f32.mrb[156].mxu1  ;;  %8898 = vmatpush1.bf16.msra.mxu0 %v8897_v10 }
 0x93d   : > { %v4474_v27 = vpop.f32.mrb[157].mxu1  ;;  %8900 = vmatprep.subr.bf16.mxu0 %v8899_v45 }
 0x93e   : > { %4761 = vmatprep.mubr.f32.mxu0 %v4474_v27 }
 0x93f   : > { %4762 = vmatmul.mubr.f32.gmra.mrb[188].mxu0 %v4472_v43 }
 0x940   : > { %v4478_v16 = vpop.f32.mrb[158].mxu1  ;;  %8902 = vmatpush1.bf16.msra.mxu0 %v8901_v2 }
 0x941   : > { %v4480_v31 = vpop.f32.mrb[159].mxu1  ;;  %8904 = vmatprep.subr.bf16.mxu0 %v8903_v7 }
 0x942   : > { %4767 = vmatprep.mubr.f32.mxu0 %v4480_v31 }
 0x943   : > { %4768 = vmatmul.mubr.f32.gmra.mrb[190].mxu0 %v4478_v16 }
 0x944   : > { %8906 = vmatpush1.bf16.msra.mxu0 %v8905_v63  ;;  %4838 = vmatprep.mubr.f32.mxu0 %v13650_v15  ;;  %v7652_v63 = vld [vmem:[%s16725_s8 + $0x2] sm:$0x3] }
 0x945   : > { %v14350_v15 = vrot.slane %v7652_v63, %v10713_v37 }
 0x947   : > { %4839 = vmatmul.mubr.f32.vlgmr.msra.gmra.mrb[160].mxu0 %v13656_v8 }
 0x948   : > { %4844 = vmatprep.mubr.f32.mxu0 %v13652_v44  ;;  %v14353_v44 = vrot.slane %v7652_v63, %v10719_v39 }
 0x94b   : > { %4845 = vmatmul.mubr.f32.gmra.mrb[162].mxu0 %v13645_v23 }
 0x94c   : > { %4850 = vmatprep.mubr.f32.mxu0 %v13702_v1 }
 0x94f   : > { %4851 = vmatmul.mubr.f32.gmra.mrb[164].mxu0 %v13708_v61 }
 0x950   : > { %4856 = vmatprep.mubr.f32.mxu0 %v13704_v11 }
 0x953   : > { %4857 = vmatmul.mubr.f32.gmra.mrb[166].mxu0 %v13700_v9 }
 0x954   : > { %4862 = vmatprep.mubr.f32.mxu0 %v13754_v13 }
 0x957   : > { %4863 = vmatmul.mubr.f32.gmra.mrb[168].mxu0 %v13760_v34 }
 0x958   : > { %4868 = vmatprep.mubr.f32.mxu0 %v13756_v0 }
 0x95b   : > { %4869 = vmatmul.mubr.f32.gmra.mrb[170].mxu0 %v13752_v30 }
 0x95c   : > { %4874 = vmatprep.mubr.f32.mxu0 %v13806_v60 }
 0x95f   : > { %4875 = vmatmul.mubr.f32.gmra.mrb[172].mxu0 %v13812_v28 }
 0x960   : > { %4880 = vmatprep.mubr.f32.mxu0 %v13808_v18 }
 0x963   : > { %4881 = vmatmul.mubr.f32.gmra.mrb[174].mxu0 %v13804_v54 }
 0x964   : > { %4886 = vmatprep.mubr.f32.mxu0 %v13858_v5 }
 0x967   : > { %4887 = vmatmul.mubr.f32.gmra.mrb[176].mxu0 %v13864_v20 }
 0x968   : > { %4892 = vmatprep.mubr.f32.mxu0 %v13860_v42 }
 0x96b   : > { %4893 = vmatmul.mubr.f32.gmra.mrb[178].mxu0 %v13856_v17 }
 0x96c   : > { %4898 = vmatprep.mubr.f32.mxu0 %v13910_v32 }
 0x96f   : > { %4899 = vmatmul.mubr.f32.gmra.mrb[180].mxu0 %v13916_v40 }
 0x970   : > { %4904 = vmatprep.mubr.f32.mxu0 %v13912_v55 }
 0x973   : > { %4905 = vmatmul.mubr.f32.gmra.mrb[182].mxu0 %v13908_v22 }
 0x974   : > { %4910 = vmatprep.mubr.f32.mxu0 %v13962_v19 }
 0x977   : > { %4911 = vmatmul.mubr.f32.gmra.mrb[184].mxu0 %v13968_v50 }
 0x978   : > { %4916 = vmatprep.mubr.f32.mxu0 %v13964_v25 }
 0x97b   : > { %4917 = vmatmul.mubr.f32.gmra.mrb[186].mxu0 %v13960_v49 }
 0x97c   : > { %4922 = vmatprep.mubr.f32.mxu0 %v14000_v12 }
 0x97f   : > { %4923 = vmatmul.mubr.f32.gmra.mrb[188].mxu0 %v14004_v14 }
 0x980   : > { %4928 = vmatprep.mubr.f32.mxu0 %v14002_v36 }
 0x983   : > { %4929 = vmatmul.mubr.f32.gmra.mrb[190].mxu0 %v13998_v46 }
 0xa1a   : > { %v4840_v23 = vpop.f32.mrb[160].mxu0 }
 0xa1b   : > { %v4842_v8 = vpop.f32.mrb[161].mxu0  ;;  %v14359_v11 = vadd.f32 %v14353_v44, %v4840_v23 }
 0xa1c   : > { %v14356_v9 = vadd.f32 %v14350_v15, %v4842_v8 }
 0xa1d   : > { %v4980_v18 = vmax.f32 %v14359_v11, 0.0 }
 0xa1e   : > { %v4846_v1 = vpop.f32.mrb[162].mxu0  ;;  %v4981_v34 = vmax.f32 %v14356_v9, 0.0 }
 0xa1f   : > { %v14362_v61 = vadd.f32 %v14353_v44, %v4846_v1  ;;  %v4848_v30 = vpop.f32.mrb[163].mxu0 }
 0xa20   : > { %v14365_v13 = vadd.f32 %v14350_v15, %v4848_v30 }
 0xa21   : > { %v16880_v0 = vmax.f32 %v14362_v61, 0.0 }
 0xa22   : > { %v4983_v54 = vmax.f32 %v14365_v13, 0.0  ;;  %v4852_v60 = vpop.f32.mrb[164].mxu0 }
 0xa23   : > { %v4854_v28 = vpop.f32.mrb[165].mxu0  ;;  %v8909_v5 = vpack.c.bf16 %v16880_v0, %v4980_v18  ;;  %v14383_v22 = vadd.f32 %v14353_v44, %v4852_v60  ;;  %v7722_v0 = vld [vmem:[%s16727_s10 + $0x228] sm:$0xff] }
 0xa24   : > { %v8907_v17 = vpack.c.bf16 %v4983_v54, %v4981_v34  ;;  %v14380_v42 = vadd.f32 %v14350_v15, %v4854_v28 }
 0xa25   : > { %v16874_v46 = vmax.f32 %v14383_v22, 0.0 }
 0xa26   : > { %v4858_v20 = vpop.f32.mrb[166].mxu0  ;;  %8908 = vmatprep.subr.bf16.mxu1 %v8907_v17  ;;  %v16875_v19 = vmax.f32 %v14380_v42, 0.0 }
 0xa27   : > { %v14386_v32 = vadd.f32 %v14353_v44, %v4858_v20  ;;  %v4860_v55 = vpop.f32.mrb[167].mxu0  ;;  %8910 = vmatpush1.bf16.msra.mxu1 %v8909_v5 }
 0xa28   : > { %v14389_v40 = vadd.f32 %v14350_v15, %v4860_v55 }
 0xa29   : > { %v16872_v49 = vmax.f32 %v14386_v32, 0.0  ;;  %v17091_v9 = vmax.f32 %v14386_v32, 0.0 }
 0xa2a   : > { %v16873_v25 = vmax.f32 %v14389_v40, 0.0  ;;  %v4864_v50 = vpop.f32.mrb[168].mxu0 }
 0xa2b   : > { %v4866_v12 = vpop.f32.mrb[169].mxu0  ;;  %v8913_v14 = vpack.c.bf16 %v16872_v49, %v16874_v46  ;;  %v14407_v6 = vadd.f32 %v14353_v44, %v4864_v50 }
 0xa2c   : > { %v8911_v36 = vpack.c.bf16 %v16873_v25, %v16875_v19  ;;  %v14404_v10 = vadd.f32 %v14350_v15, %v4866_v12 }
 0xa2d   : > { %v16866_v62 = vmax.f32 %v14407_v6, 0.0  ;;  %v17093_v13 = vmax.f32 %v14407_v6, 0.0 }
 0xa2e   : > { %v4870_v45 = vpop.f32.mrb[170].mxu0  ;;  %8912 = vmatprep.subr.bf16.mxu1 %v8911_v36  ;;  %v16867_v2 = vmax.f32 %v14404_v10, 0.0  ;;  %v17092_v11 = vmax.f32 %v14404_v10, 0.0 }
 0xa2f   : > { %v14410_v59 = vadd.f32 %v14353_v44, %v4870_v45  ;;  %v4872_v35 = vpop.f32.mrb[171].mxu0  ;;  %8914 = vmatpush1.bf16.msra.mxu1 %v8913_v14 }
 0xa30   : > { %v14413_v58 = vadd.f32 %v14350_v15, %v4872_v35 }
 0xa31   : > { %v16864_v43 = vmax.f32 %v14410_v59, 0.0 }
 0xa32   : > { %v16865_v27 = vmax.f32 %v14413_v58, 0.0  ;;  %v4876_v7 = vpop.f32.mrb[172].mxu0 }
 0xa33   : > { %v4878_v38 = vpop.f32.mrb[173].mxu0  ;;  %v8917_v31 = vpack.c.bf16 %v16864_v43, %v16866_v62  ;;  %v14431_v8 = vadd.f32 %v14353_v44, %v4876_v7 }
 0xa34   : > { %v8915_v16 = vpack.c.bf16 %v16865_v27, %v16867_v2  ;;  %v14428_v63 = vadd.f32 %v14350_v15, %v4878_v38 }
 0xa35   : > { %v16858_v55 = vmax.f32 %v14431_v8, 0.0 }
 0xa36   : > { %v4882_v23 = vpop.f32.mrb[174].mxu0  ;;  %8916 = vmatprep.subr.bf16.mxu1 %v8915_v16  ;;  %v16859_v17 = vmax.f32 %v14428_v63, 0.0 }
 0xa37   : > { %v14434_v1 = vadd.f32 %v14353_v44, %v4882_v23  ;;  %v4884_v30 = vpop.f32.mrb[175].mxu0  ;;  %8918 = vmatpush1.bf16.msra.mxu1 %v8917_v31 }
 0xa38   : > { %v14437_v60 = vadd.f32 %v14350_v15, %v4884_v30 }
 0xa39   : > { %v16856_v28 = vmax.f32 %v14434_v1, 0.0 }
 0xa3a   : > { %v16857_v5 = vmax.f32 %v14437_v60, 0.0  ;;  %v4888_v20 = vpop.f32.mrb[176].mxu0 }
 0xa3b   : > { %v4890_v50 = vpop.f32.mrb[177].mxu0  ;;  %v8921_v36 = vpack.c.bf16 %v16856_v28, %v16858_v55  ;;  %v14455_v35 = vadd.f32 %v14353_v44, %v4888_v20 }
 0xa3c   : > { %v8919_v12 = vpack.c.bf16 %v16857_v5, %v16859_v17  ;;  %v14452_v14 = vadd.f32 %v14350_v15, %v4890_v50 }
 0xa3e   : > { %v4894_v45 = vpop.f32.mrb[178].mxu0  ;;  %8920 = vmatprep.subr.bf16.mxu1 %v8919_v12  ;;  %v16861_v23 = vmax.f32 %v14452_v14, 0.0  ;;  %v16863_v12 = vmax.f32 %v14455_v35, 0.0  ;;  %v17100_v32 = vmax.f32 %v14452_v14, 0.0 }
 0xa3f   : > { %v14458_v7 = vadd.f32 %v14353_v44, %v4894_v45  ;;  %v4896_v38 = vpop.f32.mrb[179].mxu0  ;;  %8922 = vmatpush1.bf16.msra.mxu1 %v8921_v36 }
 0xa40   : > { %v14461_v16 = vadd.f32 %v14350_v15, %v4896_v38 }
 0xa41   : > { %v16862_v31 = vmax.f32 %v14458_v7, 0.0  ;;  %v17103_v6 = vmax.f32 %v14458_v7, 0.0 }
 0xa42   : > { %v16860_v30 = vmax.f32 %v14461_v16, 0.0  ;;  %v4900_v50 = vpop.f32.mrb[180].mxu0  ;;  %v17102_v10 = vmax.f32 %v14461_v16, 0.0 }
 0xa43   : > { %v4902_v28 = vpop.f32.mrb[181].mxu0  ;;  %v8925_v36 = vpack.c.bf16 %v16862_v31, %v16863_v12  ;;  %v14479_v5 = vadd.f32 %v14353_v44, %v4900_v50 }
 0xa44   : > { %v8923_v20 = vpack.c.bf16 %v16860_v30, %v16861_v23  ;;  %v14476_v45 = vadd.f32 %v14350_v15, %v4902_v28 }
 0xa46   : > { %v4906_v38 = vpop.f32.mrb[182].mxu0  ;;  %8924 = vmatprep.subr.bf16.mxu1 %v8923_v20  ;;  %v16869_v31 = vmax.f32 %v14476_v45, 0.0  ;;  %v16871_v20 = vmax.f32 %v14479_v5, 0.0 }
 0xa47   : > { %v14482_v55 = vadd.f32 %v14353_v44, %v4906_v38  ;;  %v4908_v17 = vpop.f32.mrb[183].mxu0  ;;  %8926 = vmatpush1.bf16.msra.mxu1 %v8925_v36 }
 0xa48   : > { %v14485_v30 = vadd.f32 %v14350_v15, %v4908_v17 }
 0xa49   : > { %v16870_v23 = vmax.f32 %v14482_v55, 0.0 }
 0xa4a   : > { %v16868_v28 = vmax.f32 %v14485_v30, 0.0  ;;  %v4912_v12 = vpop.f32.mrb[184].mxu0 }
 0xa4b   : > { %v4914_v43 = vpop.f32.mrb[185].mxu0  ;;  %v8929_v17 = vpack.c.bf16 %v16870_v23, %v16871_v20  ;;  %v14503_v27 = vadd.f32 %v14353_v44, %v4912_v12 }
 0xa4c   : > { %v8927_v50 = vpack.c.bf16 %v16868_v28, %v16869_v31  ;;  %v14500_v36 = vadd.f32 %v14350_v15, %v4914_v43 }
 0xa4e   : > { %v4918_v38 = vpop.f32.mrb[186].mxu0  ;;  %8928 = vmatprep.subr.bf16.mxu1 %v8927_v50  ;;  %v16877_v23 = vmax.f32 %v14500_v36, 0.0  ;;  %v16879_v50 = vmax.f32 %v14503_v27, 0.0 }
 0xa4f   : > { %v14506_v62 = vadd.f32 %v14353_v44, %v4918_v38  ;;  %v4920_v2 = vpop.f32.mrb[187].mxu0  ;;  %8930 = vmatpush1.bf16.msra.mxu1 %v8929_v17 }
 0xa50   : > { %v14509_v28 = vadd.f32 %v14350_v15, %v4920_v2 }
 0xa51   : > { %v16878_v31 = vmax.f32 %v14506_v62, 0.0 }
 0xa52   : > { %v16876_v43 = vmax.f32 %v14509_v28, 0.0  ;;  %v4924_v20 = vpop.f32.mrb[188].mxu0  ;;  %v17110_v14 = vmax.f32 %v14509_v28, 0.0  ;;  %v7902_v28 = vld [vmem:[%s16729_s12 + $0x7c0] sm:$0xff] }
 0xa53   : > { %v4926_v49 = vpop.f32.mrb[189].mxu0  ;;  %v8933_v2 = vpack.c.bf16 %v16878_v31, %v16879_v50  ;;  %v14527_v25 = vadd.f32 %v14353_v44, %v4924_v20  ;;  %v7719_v31 = vld [vmem:[%s16727_s10 + $0x210] sm:$0xff] }
 0xa54   : > { %v8931_v12 = vpack.c.bf16 %v16876_v43, %v16877_v23  ;;  %v14524_v17 = vadd.f32 %v14350_v15, %v4926_v49  ;;  %v7718_v49 = vld [vmem:[%s16727_s10 + $0x208] sm:$0xff] }
 0xa55   : > { %v17113_v7 = vmax.f32 %v14527_v25, 0.0 }
 0xa56   : > { %v4930_v38 = vpop.f32.mrb[190].mxu0  ;;  %8932 = vmatprep.subr.bf16.mxu1 %v8931_v12  ;;  %v7720_v12 = vld [vmem:[%s16727_s10 + $0x218] sm:$0xff]  ;;  %v16882_v20 = vmax.f32 %v14524_v17, 0.0 }
 0xa57   : > { %v14530_v46 = vadd.f32 %v14353_v44, %v4930_v38  ;;  %v4932_v19 = vpop.f32.mrb[191].mxu0  ;;  %8934 = vmatpush1.bf16.msra.mxu1 %v8933_v2  ;;  %v16884_v38 = vmax.f32 %v14527_v25, 0.0  ;;  %v7717_v2 = vld [vmem:[%s16727_s10 + $0x200] sm:$0xff]  ;;  %v7903_v25 = vld [vmem:[%s16729_s12 + $0x7c8] sm:$0xff] }
 0xa58   : > { %v14533_v43 = vadd.f32 %v14350_v15, %v4932_v19  ;;  %v8939_v19 = vpack.c.bf16 %v7720_v12, %v7718_v49  ;;  %v7724_v49 = vld [vmem:[%s16727_s10 + $0x238] sm:$0xff]  ;;  %v8941_v12 = vpack.c.bf16 %v7719_v31, %v7717_v2  ;;  %v7730_v2 = vld [vmem:[%s16727_s10 + $0x268] sm:$0xff] }
 0xa59   : > { %v16883_v23 = vmax.f32 %v14530_v46, 0.0  ;;  %v17115_v16 = vmax.f32 %v14530_v46, 0.0 }
 0xa5a   : > { %v16881_v44 = vmax.f32 %v14533_v43, 0.0 }
 0xa5b   : > { %v8937_v50 = vpack.c.bf16 %v16883_v23, %v16884_v38  ;;  %v7723_v23 = vld [vmem:[%s16727_s10 + $0x230] sm:$0xff]  ;;  %v7726_v38 = vld [vmem:[%s16727_s10 + $0x248] sm:$0xff] }
 0xa5c   : > { %v8935_v15 = vpack.c.bf16 %v16881_v44, %v16882_v20  ;;  %v8943_v44 = vpack.c.bf16 %v7724_v49, %v7722_v0  ;;  %v7721_v20 = vld [vmem:[%s16727_s10 + $0x220] sm:$0xff]  ;;  %v7734_v49 = vld [vmem:[%s16727_s10 + $0x288] sm:$0xff] }
 0xa5d   : > { %v8945_v0 = vpack.c.bf16 %v7723_v23, %v7721_v20 }
 0xa5e   : > { %8936 = vmatprep.subr.bf16.mxu1 %v8935_v15  ;;  %v7728_v15 = vld [vmem:[%s16727_s10 + $0x258] sm:$0xff] }
 0xa5f   : > { %8938 = vmatpush1.bf16.msra.mxu1 %v8937_v50  ;;  %v8947_v31 = vpack.c.bf16 %v7728_v15, %v7726_v38  ;;  %v7725_v50 = vld [vmem:[%s16727_s10 + $0x240] sm:$0xff]  ;;  %v7731_v38 = vld [vmem:[%s16727_s10 + $0x270] sm:$0xff] }
 0xa60   : > { %8940 = vmatprep.subr.bf16.mxu1 %v8939_v19  ;;  %v7727_v19 = vld [vmem:[%s16727_s10 + $0x250] sm:$0xff] }
 0xa61   : > { %v8949_v23 = vpack.c.bf16 %v7727_v19, %v7725_v50  ;;  %v7738_v50 = vld [vmem:[%s16727_s10 + $0x2a8] sm:$0xff] }
 0xa62   : > { %5077 = vmatmul.mubr.f32.vlgmr.msra.gmra.mrb[160].mxu1 %v14013_v41  ;;  %v7732_v41 = vld [vmem:[%s16727_s10 + $0x278] sm:$0xff] }
 0xa63   : > { %5082 = vmatprep.mubr.f32.mxu1 %v16974_v29  ;;  %8942 = vmatpush1.bf16.msra.mxu1 %v8941_v12  ;;  %v8951_v20 = vpack.c.bf16 %v7732_v41, %v7730_v2  ;;  %v7737_v41 = vld [vmem:[%s16727_s10 + $0x2a0] sm:$0xff] }
 0xa64   : > { %8944 = vmatprep.subr.bf16.mxu1 %v8943_v44  ;;  %v7729_v44 = vld [vmem:[%s16727_s10 + $0x260] sm:$0xff] }
 0xa65   : > { %v8953_v12 = vpack.c.bf16 %v7731_v38, %v7729_v44 }
 0xa66   : > { %5083 = vmatmul.mubr.f32.gmra.mrb[162].mxu1 %v14020_v33  ;;  %v7736_v33 = vld [vmem:[%s16727_s10 + $0x298] sm:$0xff] }
 0xa67   : > { %5088 = vmatprep.mubr.f32.mxu1 %v16974_v29  ;;  %8946 = vmatpush1.bf16.msra.mxu1 %v8945_v0  ;;  %v8955_v15 = vpack.c.bf16 %v7736_v33, %v7734_v49  ;;  %v7733_v0 = vld [vmem:[%s16727_s10 + $0x280] sm:$0xff]  ;;  %v7743_v33 = vld [vmem:[%s16727_s10 + $0x2d0] sm:$0xff] }
 0xa68   : > { %8948 = vmatprep.subr.bf16.mxu1 %v8947_v31  ;;  %v7735_v31 = vld [vmem:[%s16727_s10 + $0x290] sm:$0xff]  ;;  %v7741_v49 = vld [vmem:[%s16727_s10 + $0x2c0] sm:$0xff] }
 0xa69   : > { %v8957_v19 = vpack.c.bf16 %v7735_v31, %v7733_v0  ;;  %v7745_v31 = vld [vmem:[%s16727_s10 + $0x2e0] sm:$0xff] }
 0xa6a   : > { %5089 = vmatmul.mubr.f32.gmra.mrb[164].mxu1 %v14027_v52  ;;  %v7740_v52 = vld [vmem:[%s16727_s10 + $0x2b8] sm:$0xff] }
 0xa6b   : > { %5094 = vmatprep.mubr.f32.mxu1 %v16974_v29  ;;  %8950 = vmatpush1.bf16.msra.mxu1 %v8949_v23  ;;  %v8959_v2 = vpack.c.bf16 %v7740_v52, %v7738_v50  ;;  %v7739_v23 = vld [vmem:[%s16727_s10 + $0x2b0] sm:$0xff]  ;;  %v7750_v52 = vld [vmem:[%s16727_s10 + $0x308] sm:$0xff] }
 0xa6c   : > { %8952 = vmatprep.subr.bf16.mxu1 %v8951_v20  ;;  %v7742_v20 = vld [vmem:[%s16727_s10 + $0x2c8] sm:$0xff]  ;;  %v8961_v44 = vpack.c.bf16 %v7739_v23, %v7737_v41  ;;  %v7747_v50 = vld [vmem:[%s16727_s10 + $0x2f0] sm:$0xff]  ;;  %v7749_v41 = vld [vmem:[%s16727_s10 + $0x300] sm:$0xff] }
 0xa6d   : > { %v7751_v23 = vld [vmem:[%s16727_s10 + $0x310] sm:$0xff] }
 0xa6e   : > { %5095 = vmatmul.mubr.f32.gmra.mrb[166].mxu1 %v14034_v3  ;;  %v7744_v3 = vld [vmem:[%s16727_s10 + $0x2d8] sm:$0xff] }
 0xa6f   : > { %5100 = vmatprep.mubr.f32.mxu1 %v16974_v29  ;;  %8954 = vmatpush1.bf16.msra.mxu1 %v8953_v12  ;;  %v8963_v38 = vpack.c.bf16 %v7744_v3, %v7742_v20  ;;  %v7746_v12 = vld [vmem:[%s16727_s10 + $0x2e8] sm:$0xff]  ;;  %v8973_v3 = vpack.c.bf16 %v7751_v23, %v7749_v41 }
 0xa70   : > { %8956 = vmatprep.subr.bf16.mxu1 %v8955_v15  ;;  %v8965_v15 = vpack.c.bf16 %v7743_v33, %v7741_v49  ;;  %v7754_v20 = vld [vmem:[%s16727_s10 + $0x328] sm:$0xff]  ;;  %v7755_v49 = vld [vmem:[%s16727_s10 + $0x330] sm:$0xff] }
 0xa71   : > { %v7758_v33 = vld [vmem:[%s16727_s10 + $0x348] sm:$0xff] }
 0xa72   : > { %5101 = vmatmul.mubr.f32.gmra.mrb[168].mxu1 %v14041_v51  ;;  %v7748_v51 = vld [vmem:[%s16727_s10 + $0x2f8] sm:$0xff] }
 0xa73   : > { %5106 = vmatprep.mubr.f32.mxu1 %v16974_v29  ;;  %8958 = vmatpush1.bf16.msra.mxu1 %v8957_v19  ;;  %v8967_v0 = vpack.c.bf16 %v7748_v51, %v7746_v12  ;;  %v8969_v19 = vpack.c.bf16 %v7747_v50, %v7745_v31  ;;  %v7762_v31 = vld [vmem:[%s16727_s10 + $0x368] sm:$0xff] }
 0xa74   : > { %8960 = vmatprep.subr.bf16.mxu1 %v8959_v2 }
 0xa76   : > { %5107 = vmatmul.mubr.f32.gmra.mrb[170].mxu1 %v14048_v47  ;;  %v7752_v47 = vld [vmem:[%s16727_s10 + $0x318] sm:$0xff] }
 0xa77   : > { %5112 = vmatprep.mubr.f32.mxu1 %v16974_v29  ;;  %8962 = vmatpush1.bf16.msra.mxu1 %v8961_v44  ;;  %v8971_v2 = vpack.c.bf16 %v7752_v47, %v7750_v52  ;;  %v7761_v47 = vld [vmem:[%s16727_s10 + $0x360] sm:$0xff] }
 0xa78   : > { %8964 = vmatprep.subr.bf16.mxu1 %v8963_v38  ;;  %v7753_v38 = vld [vmem:[%s16727_s10 + $0x320] sm:$0xff] }
 0xa79   : > { %v8977_v12 = vpack.c.bf16 %v7755_v49, %v7753_v38  ;;  %v7769_v49 = vld [vmem:[%s16727_s10 + $0x3a0] sm:$0xff] }
 0xa7a   : > { %5113 = vmatmul.mubr.f32.gmra.mrb[172].mxu1 %v14055_v48  ;;  %v7756_v48 = vld [vmem:[%s16727_s10 + $0x338] sm:$0xff] }
 0xa7b   : > { %5118 = vmatprep.mubr.f32.mxu1 %v16974_v29  ;;  %8966 = vmatpush1.bf16.msra.mxu1 %v8965_v15  ;;  %v8975_v44 = vpack.c.bf16 %v7756_v48, %v7754_v20  ;;  %v7757_v15 = vld [vmem:[%s16727_s10 + $0x340] sm:$0xff]  ;;  %v7767_v48 = vld [vmem:[%s16727_s10 + $0x390] sm:$0xff] }
 0xa7c   : > { %8968 = vmatprep.subr.bf16.mxu1 %v8967_v0  ;;  %v7759_v0 = vld [vmem:[%s16727_s10 + $0x350] sm:$0xff]  ;;  %v7765_v20 = vld [vmem:[%s16727_s10 + $0x380] sm:$0xff] }
 0xa7d   : > { %v8981_v50 = vpack.c.bf16 %v7759_v0, %v7757_v15  ;;  %v7773_v15 = vld [vmem:[%s16727_s10 + $0x3c0] sm:$0xff]  ;;  %v7775_v0 = vld [vmem:[%s16727_s10 + $0x3d0] sm:$0xff] }
 0xa7e   : > { %5119 = vmatmul.mubr.f32.gmra.mrb[174].mxu1 %v14062_v26  ;;  %v7760_v26 = vld [vmem:[%s16727_s10 + $0x358] sm:$0xff] }
 0xa7f   : > { %5124 = vmatprep.mubr.f32.mxu1 %v16974_v29  ;;  %8970 = vmatpush1.bf16.msra.mxu1 %v8969_v19  ;;  %v8979_v51 = vpack.c.bf16 %v7760_v26, %v7758_v33  ;;  %v7763_v19 = vld [vmem:[%s16727_s10 + $0x370] sm:$0xff]  ;;  %v7774_v26 = vld [vmem:[%s16727_s10 + $0x3c8] sm:$0xff] }
 0xa80   : > { %8972 = vmatprep.subr.bf16.mxu1 %v8971_v2  ;;  %v7766_v2 = vld [vmem:[%s16727_s10 + $0x388] sm:$0xff]  ;;  %v8985_v41 = vpack.c.bf16 %v7763_v19, %v7761_v47  ;;  %v7771_v33 = vld [vmem:[%s16727_s10 + $0x3b0] sm:$0xff]  ;;  %v10040_v47 = vld [vmem:[%s16973_s25 + $0x78] sm:$0xff] }
 0xa81   : > { %v7779_v19 = vld [vmem:[%s16727_s10 + $0x3f0] sm:$0xff] }
 0xa82   : > { %5125 = vmatmul.mubr.f32.gmra.mrb[176].mxu1 %v14069_v53  ;;  %v7764_v53 = vld [vmem:[%s16727_s10 + $0x378] sm:$0xff] }
 0xa83   : > { %5130 = vmatprep.mubr.f32.mxu1 %v16974_v29  ;;  %8974 = vmatpush1.bf16.msra.mxu1 %v8973_v3  ;;  %v8983_v52 = vpack.c.bf16 %v7764_v53, %v7762_v31  ;;  %v7770_v3 = vld [vmem:[%s16727_s10 + $0x3a8] sm:$0xff]  ;;  %v8997_v53 = vpack.c.bf16 %v7775_v0, %v7773_v15 }
 0xa84   : > { %8976 = vmatprep.subr.bf16.mxu1 %v8975_v44  ;;  %v8989_v44 = vpack.c.bf16 %v7767_v48, %v7765_v20  ;;  %v7778_v31 = vld [vmem:[%s16727_s10 + $0x3e8] sm:$0xff]  ;;  %v7655_v20 = vld [vmem:[%s16726_s9 + $0x210] sm:$0xff] }
 0xa85   : > { %v7658_v48 = vld [vmem:[%s16726_s9 + $0x228] sm:$0xff] }
 0xa86   : > { %5131 = vmatmul.mubr.f32.gmra.mrb[178].mxu1 %v14076_v57  ;;  %v7768_v57 = vld [vmem:[%s16727_s10 + $0x398] sm:$0xff]  ;;  %v7791_v15 = vld [vmem:[%s16729_s12 + $0x448] sm:$0xff] }
 0xa87   : > { %5136 = vmatprep.mubr.f32.mxu1 %v16974_v29  ;;  %8978 = vmatpush1.bf16.msra.mxu1 %v8977_v12  ;;  %v8987_v23 = vpack.c.bf16 %v7768_v57, %v7766_v2  ;;  %v8993_v12 = vpack.c.bf16 %v7771_v33, %v7769_v49  ;;  %v7656_v57 = vld [vmem:[%s16726_s9 + $0x218] sm:$0xff]  ;;  %v7787_v49 = vld [vmem:[%s16729_s12 + $0x428] sm:$0xff]  ;;  %v7782_v33 = vld [vmem:[%s16729_s12 + $0x400] sm:$0xff] }
 0xa88   : > { %8980 = vmatprep.subr.bf16.mxu1 %v8979_v51  ;;  %v7795_v0 = vld [vmem:[%s16729_s12 + $0x468] sm:$0xff] }
 0xa8a   : > { %5137 = vmatmul.mubr.f32.gmra.mrb[180].mxu1 %v14083_v21  ;;  %v7772_v21 = vld [vmem:[%s16727_s10 + $0x3b8] sm:$0xff] }
 0xa8b   : > { %5142 = vmatprep.mubr.f32.mxu1 %v16974_v29  ;;  %8982 = vmatpush1.bf16.msra.mxu1 %v8981_v50  ;;  %v8991_v38 = vpack.c.bf16 %v7772_v21, %v7770_v3  ;;  %v7660_v3 = vld [vmem:[%s16726_s9 + $0x238] sm:$0xff]  ;;  %v7657_v21 = vld [vmem:[%s16726_s9 + $0x220] sm:$0xff] }
 0xa8c   : > { %8984 = vmatprep.subr.bf16.mxu1 %v8983_v52  ;;  %v10039_v52 = vld [vmem:[%s16973_s25 + $0x70] sm:$0xff] }
 0xa8e   : > { %5143 = vmatmul.mubr.f32.gmra.mrb[182].mxu1 %v14090_v24  ;;  %v7776_v24 = vld [vmem:[%s16727_s10 + $0x3d8] sm:$0xff] }
 0xa8f   : > { %5148 = vmatprep.mubr.f32.mxu1 %v16974_v29  ;;  %8986 = vmatpush1.bf16.msra.mxu1 %v8985_v41  ;;  %v8995_v51 = vpack.c.bf16 %v7776_v24, %v7774_v26 }
 0xa90   : > { %8988 = vmatprep.subr.bf16.mxu1 %v8987_v23  ;;  %v7653_v23 = vld [vmem:[%s16726_s9 + $0x200] sm:$0xff] }
 0xa91   : > { %v9005_v24 = vpack.c.bf16 %v7655_v20, %v7653_v23  ;;  %v7661_v20 = vld [vmem:[%s16726_s9 + $0x240] sm:$0xff] }
 0xa92   : > { %5149 = vmatmul.mubr.f32.gmra.mrb[184].mxu1 %v14097_v56  ;;  %v7780_v56 = vld [vmem:[%s16727_s10 + $0x3f8] sm:$0xff] }
 0xa93   : > { %5154 = vmatprep.mubr.f32.mxu1 %v16974_v29  ;;  %8990 = vmatpush1.bf16.msra.mxu1 %v8989_v44  ;;  %v8999_v50 = vpack.c.bf16 %v7780_v56, %v7778_v31  ;;  %v7659_v44 = vld [vmem:[%s16726_s9 + $0x230] sm:$0xff]  ;;  %v9007_v56 = vpack.c.bf16 %v7660_v3, %v7658_v48  ;;  %v7798_v3 = vld [vmem:[%s16729_s12 + $0x480] sm:$0xff] }
 0xa94   : > { %8992 = vmatprep.subr.bf16.mxu1 %v8991_v38  ;;  %v7783_v38 = vld [vmem:[%s16729_s12 + $0x408] sm:$0xff]  ;;  %v9009_v23 = vpack.c.bf16 %v7659_v44, %v7657_v21  ;;  %v7663_v21 = vld [vmem:[%s16726_s9 + $0x250] sm:$0xff] }
 0xa95   : > { %v7807_v44 = vld [vmem:[%s16729_s12 + $0x4c8] sm:$0xff] }
 0xa96   : > { %5155 = vmatmul.mubr.f32.gmra.mrb[186].mxu1 %v14104_v4  ;;  %v7777_v4 = vld [vmem:[%s16727_s10 + $0x3e0] sm:$0xff] }
 0xa97   : > { %5160 = vmatprep.mubr.f32.mxu1 %v16974_v29  ;;  %8994 = vmatpush1.bf16.msra.mxu1 %v8993_v12  ;;  %v9001_v2 = vpack.c.bf16 %v7779_v19, %v7777_v4  ;;  %v9067_v12 = vpack.c.bf16 %v7787_v49, %v7783_v38  ;;  %v7799_v4 = vld [vmem:[%s16729_s12 + $0x488] sm:$0xff]  ;;  %v7802_v38 = vld [vmem:[%s16729_s12 + $0x4a0] sm:$0xff] }
 0xa98   : > { %8996 = vmatprep.subr.bf16.mxu1 %v8995_v51  ;;  %v7786_v51 = vld [vmem:[%s16729_s12 + $0x420] sm:$0xff]  ;;  %v7662_v19 = vld [vmem:[%s16726_s9 + $0x248] sm:$0xff] }
 0xa99   : > { %9068 = vmatprep.subr.bf16.mxu0 %v9067_v12  ;;  %v7668_v12 = vld [vmem:[%s16726_s9 + $0x278] sm:$0xff] }
 0xa9a   : > { %5161 = vmatmul.mubr.f32.gmra.mrb[188].mxu1 %v10039_v52  ;;  %v7790_v52 = vld [vmem:[%s16729_s12 + $0x440] sm:$0xff] }
 0xa9b   : > { %5166 = vmatprep.mubr.f32.mxu1 %v16974_v29  ;;  %8998 = vmatpush1.bf16.msra.mxu1 %v8997_v53  ;;  %v7654_v29 = vld [vmem:[%s16726_s9 + $0x208] sm:$0xff]  ;;  %v9069_v53 = vpack.c.bf16 %v7786_v51, %v7782_v33  ;;  %v9077_v51 = vpack.c.bf16 %v7802_v38, %v7798_v3  ;;  %v7814_v38 = vld [vmem:[%s16729_s12 + $0x500] sm:$0xff] }
 0xa9c   : > { %9000 = vmatprep.subr.bf16.mxu1 %v8999_v50  ;;  %v9003_v41 = vpack.c.bf16 %v7656_v57, %v7654_v29  ;;  %v9071_v50 = vpack.c.bf16 %v7795_v0, %v7791_v15  ;;  %v7803_v29 = vld [vmem:[%s16729_s12 + $0x4a8] sm:$0xff]  ;;  %v9013_v0 = vpack.c.bf16 %v7663_v21, %v7661_v20 }
 0xa9d   : > { %9070 = vmatpush1.bf16.msra.mxu0 %v9069_v53  ;;  %v9075_v48 = vpack.c.bf16 %v7803_v29, %v7799_v4  ;;  %v7806_v53 = vld [vmem:[%s16729_s12 + $0x4c0] sm:$0xff]  ;;  %v7667_v4 = vld [vmem:[%s16726_s9 + $0x270] sm:$0xff]  ;;  %v7670_v29 = vld [vmem:[%s16726_s9 + $0x288] sm:$0xff] }
 0xa9e   : > { %5167 = vmatmul.mubr.f32.gmra.mrb[190].mxu1 %v10040_v47  ;;  %v7794_v47 = vld [vmem:[%s16729_s12 + $0x460] sm:$0xff]  ;;  %9072 = vmatprep.subr.bf16.mxu0 %v9071_v50 }
 0xa9f   : > { %9002 = vmatpush1.bf16.msra.mxu1 %v9001_v2  ;;  %v7664_v2 = vld [vmem:[%s16726_s9 + $0x258] sm:$0xff]  ;;  %v9073_v57 = vpack.c.bf16 %v7794_v47, %v7790_v52  ;;  %v7810_v50 = vld [vmem:[%s16729_s12 + $0x4e0] sm:$0xff] }
 0xaa0   : > { %9004 = vmatprep.subr.bf16.mxu1 %v9003_v41  ;;  %v9011_v33 = vpack.c.bf16 %v7664_v2, %v7662_v19  ;;  %v7815_v19 = vld [vmem:[%s16729_s12 + $0x508] sm:$0xff] }
 0xaa1   : > { %9074 = vmatpush1.bf16.msra.mxu0 %v9073_v57  ;;  %v7819_v2 = vld [vmem:[%s16729_s12 + $0x528] sm:$0xff]  ;;  %v7672_v57 = vld [vmem:[%s16726_s9 + $0x298] sm:$0xff] }
 0xaa2   : > { %9076 = vmatprep.subr.bf16.mxu0 %v9075_v48  ;;  %v7669_v48 = vld [vmem:[%s16726_s9 + $0x280] sm:$0xff]  ;;  %v9083_v3 = vpack.c.bf16 %v7819_v2, %v7815_v19  ;;  %v9019_v21 = vpack.c.bf16 %v7672_v57, %v7670_v29  ;;  %v7675_v19 = vld [vmem:[%s16726_s9 + $0x2b0] sm:$0xff]  ;;  %v7831_v2 = vld [vmem:[%s16729_s12 + $0x588] sm:$0xff] }
 0xaa3   : > { %v7835_v29 = vld [vmem:[%s16729_s12 + $0x5a8] sm:$0xff] }
 0xaa4   : > { %v7678_v57 = vld [vmem:[%s16726_s9 + $0x2c8] sm:$0xff] }
 0xaa5   : > { %9078 = vmatpush1.bf16.msra.mxu0 %v9077_v51  ;;  %v7676_v51 = vld [vmem:[%s16726_s9 + $0x2b8] sm:$0xff] }
 0xb35   : > { %v5078_v26 = vpop.f32.mrb[160].mxu1 }
 0xb36   : > { %v5080_v31 = vpop.f32.mrb[161].mxu1 }
 0xb37   : > { %5367 = vmatprep.mubr.f32.mxu1 %v5080_v31  ;;  %v7665_v31 = vld [vmem:[%s16726_s9 + $0x260] sm:$0xff] }
 0xb38   : > { %5368 = vmatmul.mubr.f32.vlgmr.msra.gmra.mrb[192].mxu1 %v5078_v26  ;;  %v7811_v26 = vld [vmem:[%s16729_s12 + $0x4e8] sm:$0xff]  ;;  %v9017_v20 = vpack.c.bf16 %v7667_v4, %v7665_v31 }
 0xb39   : > { %v5084_v41 = vpop.f32.mrb[162].mxu1  ;;  %9006 = vmatpush1.bf16.msra.mxu1 %v9005_v24  ;;  %v7666_v24 = vld [vmem:[%s16726_s9 + $0x268] sm:$0xff] }
 0xb3a   : > { %v5086_v49 = vpop.f32.mrb[163].mxu1  ;;  %9008 = vmatprep.subr.bf16.mxu1 %v9007_v56  ;;  %v9079_v56 = vpack.c.bf16 %v7811_v26, %v7807_v44  ;;  %v9015_v47 = vpack.c.bf16 %v7668_v12, %v7666_v24  ;;  %v7671_v44 = vld [vmem:[%s16726_s9 + $0x290] sm:$0xff]  ;;  %v7823_v26 = vld [vmem:[%s16729_s12 + $0x548] sm:$0xff] }
 0xb3b   : > { %5373 = vmatprep.mubr.f32.mxu1 %v5086_v49  ;;  %v7818_v49 = vld [vmem:[%s16729_s12 + $0x520] sm:$0xff]  ;;  %v7827_v24 = vld [vmem:[%s16729_s12 + $0x568] sm:$0xff]  ;;  %v9021_v31 = vpack.c.bf16 %v7671_v44, %v7669_v48 }
 0xb3c   : > { %5374 = vmatmul.mubr.f32.gmra.mrb[194].mxu1 %v5084_v41  ;;  %v9081_v41 = vpack.c.bf16 %v7810_v50, %v7806_v53  ;;  %9080 = vmatprep.subr.bf16.mxu0 %v9079_v56  ;;  %v7674_v12 = vld [vmem:[%s16726_s9 + $0x2a8] sm:$0xff]  ;;  %v7673_v56 = vld [vmem:[%s16726_s9 + $0x2a0] sm:$0xff]  ;;  %v9087_v53 = vpack.c.bf16 %v7827_v24, %v7823_v26  ;;  %v7679_v26 = vld [vmem:[%s16726_s9 + $0x2d0] sm:$0xff] }
 0xb3d   : > { %v5090_v15 = vpop.f32.mrb[164].mxu1  ;;  %9010 = vmatpush1.bf16.msra.mxu1 %v9009_v23  ;;  %v7822_v50 = vld [vmem:[%s16729_s12 + $0x540] sm:$0xff]  ;;  %v9023_v4 = vpack.c.bf16 %v7676_v51, %v7674_v12  ;;  %v9025_v48 = vpack.c.bf16 %v7675_v19, %v7673_v56  ;;  %v7839_v24 = vld [vmem:[%s16729_s12 + $0x5c8] sm:$0xff] }
 0xb3e   : > { %v5092_v52 = vpop.f32.mrb[165].mxu1  ;;  %9012 = vmatprep.subr.bf16.mxu1 %v9011_v33  ;;  %9082 = vmatpush1.bf16.msra.mxu0 %v9081_v41  ;;  %v7680_v41 = vld [vmem:[%s16726_s9 + $0x2d8] sm:$0xff]  ;;  %v7843_v12 = vld [vmem:[%s16729_s12 + $0x5e8] sm:$0xff] }
 0xb3f   : > { %5379 = vmatprep.mubr.f32.mxu1 %v5092_v52  ;;  %9084 = vmatprep.subr.bf16.mxu0 %v9083_v3  ;;  %v7826_v52 = vld [vmem:[%s16729_s12 + $0x560] sm:$0xff]  ;;  %v9027_v44 = vpack.c.bf16 %v7680_v41, %v7678_v57  ;;  %v7682_v51 = vld [vmem:[%s16726_s9 + $0x2e8] sm:$0xff] }
 0xb40   : > { %5380 = vmatmul.mubr.f32.gmra.mrb[196].mxu1 %v5090_v15  ;;  %v9085_v15 = vpack.c.bf16 %v7818_v49, %v7814_v38  ;;  %v7677_v3 = vld [vmem:[%s16726_s9 + $0x2c0] sm:$0xff]  ;;  %v9091_v38 = vpack.c.bf16 %v7835_v29, %v7831_v2  ;;  %v7683_v2 = vld [vmem:[%s16726_s9 + $0x2f0] sm:$0xff]  ;;  %v7847_v29 = vld [vmem:[%s16729_s12 + $0x608] sm:$0xff] }
 0xb41   : > { %v5096_v23 = vpop.f32.mrb[166].mxu1  ;;  %9014 = vmatpush1.bf16.msra.mxu1 %v9013_v0  ;;  %v7830_v49 = vld [vmem:[%s16729_s12 + $0x580] sm:$0xff]  ;;  %v9029_v56 = vpack.c.bf16 %v7679_v26, %v7677_v3  ;;  %v7851_v57 = vld [vmem:[%s16729_s12 + $0x628] sm:$0xff] }
 0xb42   : > { %v5098_v33 = vpop.f32.mrb[167].mxu1  ;;  %9016 = vmatprep.subr.bf16.mxu1 %v9015_v47  ;;  %9086 = vmatpush1.bf16.msra.mxu0 %v9085_v15  ;;  %v7684_v15 = vld [vmem:[%s16726_s9 + $0x2f8] sm:$0xff]  ;;  %v7686_v41 = vld [vmem:[%s16726_s9 + $0x308] sm:$0xff] }
 0xb43   : > { %5385 = vmatprep.mubr.f32.mxu1 %v5098_v33  ;;  %9088 = vmatprep.subr.bf16.mxu0 %v9087_v53  ;;  %v7834_v33 = vld [vmem:[%s16729_s12 + $0x5a0] sm:$0xff]  ;;  %v9031_v19 = vpack.c.bf16 %v7684_v15, %v7682_v51  ;;  %v7859_v51 = vld [vmem:[%s16729_s12 + $0x668] sm:$0xff] }
 0xb44   : > { %5386 = vmatmul.mubr.f32.gmra.mrb[198].mxu1 %v5096_v23  ;;  %v9089_v23 = vpack.c.bf16 %v7826_v52, %v7822_v50  ;;  %v7681_v53 = vld [vmem:[%s16726_s9 + $0x2e0] sm:$0xff]  ;;  %v9095_v50 = vpack.c.bf16 %v7843_v12, %v7839_v24  ;;  %v7687_v24 = vld [vmem:[%s16726_s9 + $0x310] sm:$0xff]  ;;  %v7855_v12 = vld [vmem:[%s16729_s12 + $0x648] sm:$0xff] }
 0xb45   : > { %v5102_v0 = vpop.f32.mrb[168].mxu1  ;;  %9018 = vmatpush1.bf16.msra.mxu1 %v9017_v20  ;;  %v7838_v52 = vld [vmem:[%s16729_s12 + $0x5c0] sm:$0xff]  ;;  %v9033_v3 = vpack.c.bf16 %v7683_v2, %v7681_v53  ;;  %v7690_v15 = vld [vmem:[%s16726_s9 + $0x328] sm:$0xff] }
 0xb46   : > { %v5104_v47 = vpop.f32.mrb[169].mxu1  ;;  %9020 = vmatprep.subr.bf16.mxu1 %v9019_v21  ;;  %9090 = vmatpush1.bf16.msra.mxu0 %v9089_v23  ;;  %v7688_v23 = vld [vmem:[%s16726_s9 + $0x318] sm:$0xff] }
 0xb47   : > { %5391 = vmatprep.mubr.f32.mxu1 %v5104_v47  ;;  %9092 = vmatprep.subr.bf16.mxu0 %v9091_v38  ;;  %v7842_v47 = vld [vmem:[%s16729_s12 + $0x5e0] sm:$0xff]  ;;  %v9035_v26 = vpack.c.bf16 %v7688_v23, %v7686_v41  ;;  %v7867_v41 = vld [vmem:[%s16729_s12 + $0x6a8] sm:$0xff] }
 0xb48   : > { %5392 = vmatmul.mubr.f32.gmra.mrb[200].mxu1 %v5102_v0  ;;  %v9093_v0 = vpack.c.bf16 %v7834_v33, %v7830_v49  ;;  %v7685_v38 = vld [vmem:[%s16726_s9 + $0x300] sm:$0xff]  ;;  %v9099_v49 = vpack.c.bf16 %v7851_v57, %v7847_v29  ;;  %v7691_v29 = vld [vmem:[%s16726_s9 + $0x330] sm:$0xff]  ;;  %v7863_v57 = vld [vmem:[%s16729_s12 + $0x688] sm:$0xff] }
 0xb49   : > { %v5108_v20 = vpop.f32.mrb[170].mxu1  ;;  %9022 = vmatpush1.bf16.msra.mxu1 %v9021_v31  ;;  %v7846_v33 = vld [vmem:[%s16729_s12 + $0x600] sm:$0xff]  ;;  %v9037_v53 = vpack.c.bf16 %v7687_v24, %v7685_v38  ;;  %v7694_v23 = vld [vmem:[%s16726_s9 + $0x348] sm:$0xff] }
 0xb4a   : > { %v5110_v21 = vpop.f32.mrb[171].mxu1  ;;  %9024 = vmatprep.subr.bf16.mxu1 %v9023_v4  ;;  %9094 = vmatpush1.bf16.msra.mxu0 %v9093_v0  ;;  %v7692_v0 = vld [vmem:[%s16726_s9 + $0x338] sm:$0xff] }
 0xb4b   : > { %5397 = vmatprep.mubr.f32.mxu1 %v5110_v21  ;;  %9096 = vmatprep.subr.bf16.mxu0 %v9095_v50  ;;  %v7850_v21 = vld [vmem:[%s16729_s12 + $0x620] sm:$0xff]  ;;  %v9039_v2 = vpack.c.bf16 %v7692_v0, %v7690_v15  ;;  %v7875_v15 = vld [vmem:[%s16729_s12 + $0x6e8] sm:$0xff] }
 0xb4c   : > { %5398 = vmatmul.mubr.f32.gmra.mrb[202].mxu1 %v5108_v20  ;;  %v9097_v20 = vpack.c.bf16 %v7842_v47, %v7838_v52  ;;  %v7689_v50 = vld [vmem:[%s16726_s9 + $0x320] sm:$0xff]  ;;  %v9103_v52 = vpack.c.bf16 %v7859_v51, %v7855_v12  ;;  %v7695_v12 = vld [vmem:[%s16726_s9 + $0x350] sm:$0xff]  ;;  %v7871_v51 = vld [vmem:[%s16729_s12 + $0x6c8] sm:$0xff] }
 0xb4d   : > { %v5114_v31 = vpop.f32.mrb[172].mxu1  ;;  %9026 = vmatpush1.bf16.msra.mxu1 %v9025_v48  ;;  %v7854_v47 = vld [vmem:[%s16729_s12 + $0x640] sm:$0xff]  ;;  %v9041_v38 = vpack.c.bf16 %v7691_v29, %v7689_v50  ;;  %v7698_v0 = vld [vmem:[%s16726_s9 + $0x368] sm:$0xff] }
 0xb4e   : > { %v5116_v4 = vpop.f32.mrb[173].mxu1  ;;  %9028 = vmatprep.subr.bf16.mxu1 %v9027_v44  ;;  %9098 = vmatpush1.bf16.msra.mxu0 %v9097_v20  ;;  %v7696_v20 = vld [vmem:[%s16726_s9 + $0x358] sm:$0xff] }
 0xb4f   : > { %5403 = vmatprep.mubr.f32.mxu1 %v5116_v4  ;;  %9100 = vmatprep.subr.bf16.mxu0 %v9099_v49  ;;  %v7858_v4 = vld [vmem:[%s16729_s12 + $0x660] sm:$0xff]  ;;  %v9043_v24 = vpack.c.bf16 %v7696_v20, %v7694_v23  ;;  %v7883_v23 = vld [vmem:[%s16729_s12 + $0x728] sm:$0xff] }
 0xb50   : > { %5404 = vmatmul.mubr.f32.gmra.mrb[204].mxu1 %v5114_v31  ;;  %v9101_v31 = vpack.c.bf16 %v7850_v21, %v7846_v33  ;;  %v7693_v49 = vld [vmem:[%s16726_s9 + $0x340] sm:$0xff]  ;;  %v9107_v33 = vpack.c.bf16 %v7867_v41, %v7863_v57  ;;  %v7699_v57 = vld [vmem:[%s16726_s9 + $0x370] sm:$0xff]  ;;  %v7879_v41 = vld [vmem:[%s16729_s12 + $0x708] sm:$0xff] }
 0xb51   : > { %v5120_v48 = vpop.f32.mrb[174].mxu1  ;;  %9030 = vmatpush1.bf16.msra.mxu1 %v9029_v56  ;;  %v7862_v21 = vld [vmem:[%s16729_s12 + $0x680] sm:$0xff]  ;;  %v9045_v50 = vpack.c.bf16 %v7695_v12, %v7693_v49  ;;  %v7702_v20 = vld [vmem:[%s16726_s9 + $0x388] sm:$0xff] }
 0xb52   : > { %v5122_v44 = vpop.f32.mrb[175].mxu1  ;;  %9032 = vmatprep.subr.bf16.mxu1 %v9031_v19  ;;  %9102 = vmatpush1.bf16.msra.mxu0 %v9101_v31  ;;  %v7700_v31 = vld [vmem:[%s16726_s9 + $0x378] sm:$0xff] }
 0xb53   : > { %5409 = vmatprep.mubr.f32.mxu1 %v5122_v44  ;;  %9104 = vmatprep.subr.bf16.mxu0 %v9103_v52  ;;  %v7866_v44 = vld [vmem:[%s16729_s12 + $0x6a0] sm:$0xff]  ;;  %v9047_v29 = vpack.c.bf16 %v7700_v31, %v7698_v0  ;;  %v7891_v0 = vld [vmem:[%s16729_s12 + $0x768] sm:$0xff] }
 0xb54   : > { %5410 = vmatmul.mubr.f32.gmra.mrb[206].mxu1 %v5120_v48  ;;  %v9105_v48 = vpack.c.bf16 %v7858_v4, %v7854_v47  ;;  %v7697_v52 = vld [vmem:[%s16726_s9 + $0x360] sm:$0xff]  ;;  %v9111_v47 = vpack.c.bf16 %v7875_v15, %v7871_v51  ;;  %v7703_v51 = vld [vmem:[%s16726_s9 + $0x390] sm:$0xff]  ;;  %v7887_v15 = vld [vmem:[%s16729_s12 + $0x748] sm:$0xff] }
 0xb55   : > { %v5126_v56 = vpop.f32.mrb[176].mxu1  ;;  %9034 = vmatpush1.bf16.msra.mxu1 %v9033_v3  ;;  %v7870_v4 = vld [vmem:[%s16729_s12 + $0x6c0] sm:$0xff]  ;;  %v9049_v49 = vpack.c.bf16 %v7699_v57, %v7697_v52  ;;  %v7706_v31 = vld [vmem:[%s16726_s9 + $0x3a8] sm:$0xff] }
 0xb56   : > { %v5128_v19 = vpop.f32.mrb[177].mxu1  ;;  %9036 = vmatprep.subr.bf16.mxu1 %v9035_v26  ;;  %9106 = vmatpush1.bf16.msra.mxu0 %v9105_v48  ;;  %v7704_v48 = vld [vmem:[%s16726_s9 + $0x398] sm:$0xff] }
 0xb57   : > { %5415 = vmatprep.mubr.f32.mxu1 %v5128_v19  ;;  %9108 = vmatprep.subr.bf16.mxu0 %v9107_v33  ;;  %v7874_v19 = vld [vmem:[%s16729_s12 + $0x6e0] sm:$0xff]  ;;  %v9051_v12 = vpack.c.bf16 %v7704_v48, %v7702_v20  ;;  %v7899_v20 = vld [vmem:[%s16729_s12 + $0x7a8] sm:$0xff] }
 0xb58   : > { %5416 = vmatmul.mubr.f32.gmra.mrb[208].mxu1 %v5126_v56  ;;  %v9109_v56 = vpack.c.bf16 %v7866_v44, %v7862_v21  ;;  %v7701_v33 = vld [vmem:[%s16726_s9 + $0x380] sm:$0xff]  ;;  %v9115_v21 = vpack.c.bf16 %v7883_v23, %v7879_v41  ;;  %v7707_v41 = vld [vmem:[%s16726_s9 + $0x3b0] sm:$0xff]  ;;  %v7895_v23 = vld [vmem:[%s16729_s12 + $0x788] sm:$0xff] }
 0xb59   : > { %v5132_v3 = vpop.f32.mrb[178].mxu1  ;;  %9038 = vmatpush1.bf16.msra.mxu1 %v9037_v53  ;;  %v7878_v44 = vld [vmem:[%s16729_s12 + $0x700] sm:$0xff]  ;;  %v9053_v52 = vpack.c.bf16 %v7703_v51, %v7701_v33  ;;  %v7710_v48 = vld [vmem:[%s16726_s9 + $0x3c8] sm:$0xff] }
 0xb5a   : > { %v5134_v26 = vpop.f32.mrb[179].mxu1  ;;  %9040 = vmatprep.subr.bf16.mxu1 %v9039_v2  ;;  %9110 = vmatpush1.bf16.msra.mxu0 %v9109_v56  ;;  %v7708_v56 = vld [vmem:[%s16726_s9 + $0x3b8] sm:$0xff]  ;;  %v7714_v51 = vld [vmem:[%s16726_s9 + $0x3e8] sm:$0xff] }
 0xb5b   : > { %5421 = vmatprep.mubr.f32.mxu1 %v5134_v26  ;;  %9112 = vmatprep.subr.bf16.mxu0 %v9111_v47  ;;  %v7882_v26 = vld [vmem:[%s16729_s12 + $0x720] sm:$0xff]  ;;  %v9055_v57 = vpack.c.bf16 %v7708_v56, %v7706_v31 }
 0xb5c   : > { %5422 = vmatmul.mubr.f32.gmra.mrb[210].mxu1 %v5132_v3  ;;  %v9113_v3 = vpack.c.bf16 %v7874_v19, %v7870_v4  ;;  %v7705_v47 = vld [vmem:[%s16726_s9 + $0x3a0] sm:$0xff]  ;;  %v9119_v4 = vpack.c.bf16 %v7891_v0, %v7887_v15  ;;  %v7716_v15 = vld [vmem:[%s16726_s9 + $0x3f8] sm:$0xff] }
 0xb5d   : > { %v5138_v53 = vpop.f32.mrb[180].mxu1  ;;  %9042 = vmatpush1.bf16.msra.mxu1 %v9041_v38  ;;  %v7886_v19 = vld [vmem:[%s16729_s12 + $0x740] sm:$0xff]  ;;  %v9057_v33 = vpack.c.bf16 %v7707_v41, %v7705_v47  ;;  %v17090_v41 = vmax.f32 %v14389_v40, 0.0  ;;  %v17101_v40 = vmax.f32 %v14455_v35, 0.0  ;;  %v17111_v35 = vmax.f32 %v14506_v62, 0.0 }
 0xb5e   : > { %v5140_v2 = vpop.f32.mrb[181].mxu1  ;;  %9044 = vmatprep.subr.bf16.mxu1 %v9043_v24  ;;  %9114 = vmatpush1.bf16.msra.mxu0 %v9113_v3  ;;  %v7712_v3 = vld [vmem:[%s16726_s9 + $0x3d8] sm:$0xff]  ;;  %v7898_v62 = vld [vmem:[%s16729_s12 + $0x7a0] sm:$0xff] }
 0xb5f   : > { %5427 = vmatprep.mubr.f32.mxu1 %v5140_v2  ;;  %9116 = vmatprep.subr.bf16.mxu0 %v9115_v21  ;;  %v7890_v2 = vld [vmem:[%s16729_s12 + $0x760] sm:$0xff]  ;;  %v9123_v21 = vpack.c.bf16 %v7899_v20, %v7895_v23  ;;  %v7789_v23 = vld [vmem:[%s16729_s12 + $0x438] sm:$0xff] }
 0xb60   : > { %5428 = vmatmul.mubr.f32.gmra.mrb[212].mxu1 %v5138_v53  ;;  %v9117_v53 = vpack.c.bf16 %v7882_v26, %v7878_v44  ;;  %v9059_v26 = vpack.c.bf16 %v7712_v3, %v7710_v48  ;;  %v7781_v48 = vld [vmem:[%s16728_s11 + $0x2] sm:$0x3] }
 0xb61   : > { %v5144_v38 = vpop.f32.mrb[182].mxu1  ;;  %9046 = vmatpush1.bf16.msra.mxu1 %v9045_v50  ;;  %v15232_v3 = vrot.slane %v7781_v48, %v10719_v39 }
 0xb62   : > { %v5146_v24 = vpop.f32.mrb[183].mxu1  ;;  %9048 = vmatprep.subr.bf16.mxu1 %v9047_v29  ;;  %9118 = vmatpush1.bf16.msra.mxu0 %v9117_v53  ;;  %v9063_v53 = vpack.c.bf16 %v7716_v15, %v7714_v51  ;;  %v7797_v51 = vld [vmem:[%s16729_s12 + $0x478] sm:$0xff] }
 0xb63   : > { %5433 = vmatprep.mubr.f32.mxu1 %v5146_v24  ;;  %9120 = vmatprep.subr.bf16.mxu0 %v9119_v4  ;;  %v7709_v24 = vld [vmem:[%s16726_s9 + $0x3c0] sm:$0xff] }
 0xb64   : > { %5434 = vmatmul.mubr.f32.gmra.mrb[214].mxu1 %v5144_v38  ;;  %v9121_v38 = vpack.c.bf16 %v7890_v2, %v7886_v19  ;;  %v17087_v2 = vmax.f32 %v14362_v61, 0.0  ;;  %v17094_v61 = vmax.f32 %v14413_v58, 0.0  ;;  %v17105_v58 = vmax.f32 %v14479_v5, 0.0 }
 0xb65   : > { %v5150_v50 = vpop.f32.mrb[184].mxu1  ;;  %9050 = vmatpush1.bf16.msra.mxu1 %v9049_v49  ;;  %v17112_v5 = vmax.f32 %v14524_v17, 0.0  ;;  %v7785_v17 = vld [vmem:[%s16729_s12 + $0x418] sm:$0xff] }
 0xb66   : > { %v5152_v29 = vpop.f32.mrb[185].mxu1  ;;  %9052 = vmatprep.subr.bf16.mxu1 %v9051_v12  ;;  %v7711_v12 = vld [vmem:[%s16726_s9 + $0x3d0] sm:$0xff]  ;;  %9122 = vmatpush1.bf16.msra.mxu0 %v9121_v38  ;;  %v9131_v20 = vpack.c.bf16 %v7789_v23, %v7785_v17  ;;  %v15235_v38 = vrot.slane %v7781_v48, %v10713_v37 }
 0xb67   : > { %5439 = vmatprep.mubr.f32.mxu1 %v5152_v29  ;;  %v9061_v31 = vpack.c.bf16 %v7711_v12, %v7709_v24  ;;  %9124 = vmatprep.subr.bf16.mxu0 %v9123_v21  ;;  %v17088_v29 = vmax.f32 %v14380_v42, 0.0  ;;  %v17098_v42 = vmax.f32 %v14437_v60, 0.0  ;;  %v17109_v60 = vmax.f32 %v14503_v27, 0.0  ;;  %v7894_v27 = vld [vmem:[%s16729_s12 + $0x780] sm:$0xff]  ;;  %v7793_v12 = vld [vmem:[%s16729_s12 + $0x458] sm:$0xff] }
 0xb68   : > { %5440 = vmatmul.mubr.f32.gmra.mrb[216].mxu1 %v5150_v50  ;;  %v7713_v50 = vld [vmem:[%s16726_s9 + $0x3e0] sm:$0xff] }
 0xb69   : > { %v5156_v49 = vpop.f32.mrb[186].mxu1  ;;  %9054 = vmatpush1.bf16.msra.mxu1 %v9053_v52  ;;  %v7715_v52 = vld [vmem:[%s16726_s9 + $0x3f0] sm:$0xff] }
 0xb6a   : > { %v5158_v44 = vpop.f32.mrb[187].mxu1  ;;  %9056 = vmatprep.subr.bf16.mxu1 %v9055_v57  ;;  %v9065_v4 = vpack.c.bf16 %v7715_v52, %v7713_v50  ;;  %v17089_v57 = vmax.f32 %v14383_v22, 0.0  ;;  %v17099_v22 = vmax.f32 %v14434_v1, 0.0  ;;  %v17108_v1 = vmax.f32 %v14500_v36, 0.0  ;;  %v7906_v36 = vld [vmem:[%s16729_s12 + $0x7e0] sm:$0xff] }
 0xb6b   : > { %5445 = vmatprep.mubr.f32.mxu1 %v5158_v44  ;;  %v7784_v44 = vld [vmem:[%s16729_s12 + $0x410] sm:$0xff]  ;;  %v9135_v52 = vpack.c.bf16 %v7797_v51, %v7793_v12 }
 0xb6c   : > { %5446 = vmatmul.mubr.f32.gmra.mrb[218].mxu1 %v5156_v49  ;;  %v7828_v12 = vld [vmem:[%s16729_s12 + $0x570] sm:$0xff] }
 0xb6d   : > { %v5162_v0 = vpop.f32.mrb[188].mxu1  ;;  %9058 = vmatpush1.bf16.msra.mxu1 %v9057_v33 }
 0xb6e   : > { %v5164_v56 = vpop.f32.mrb[189].mxu1  ;;  %9060 = vmatprep.subr.bf16.mxu1 %v9059_v26  ;;  %v7788_v26 = vld [vmem:[%s16729_s12 + $0x430] sm:$0xff] }
 0xb6f   : > { %5451 = vmatprep.mubr.f32.mxu1 %v5164_v56 }
 0xb70   : > { %5452 = vmatmul.mubr.f32.gmra.mrb[220].mxu1 %v5162_v0 }
 0xb71   : > { %v5168_v47 = vpop.f32.mrb[190].mxu1  ;;  %9062 = vmatpush1.bf16.msra.mxu1 %v9061_v31  ;;  %v9133_v31 = vpack.c.bf16 %v7788_v26, %v7784_v44  ;;  %v7824_v26 = vld [vmem:[%s16729_s12 + $0x550] sm:$0xff] }
 0xb72   : > { %v5170_v19 = vpop.f32.mrb[191].mxu1  ;;  %9064 = vmatprep.subr.bf16.mxu1 %v9063_v53 }
 0xb73   : > { %5457 = vmatprep.mubr.f32.mxu1 %v5170_v19 }
 0xb74   : > { %5458 = vmatmul.mubr.f32.gmra.mrb[222].mxu1 %v5168_v47  ;;  %v7792_v47 = vld [vmem:[%s16729_s12 + $0x450] sm:$0xff] }
 0xb75   : > { %9066 = vmatpush1.bf16.msra.mxu1 %v9065_v4  ;;  %5528 = vmatprep.mubr.f32.mxu1 %v4981_v34  ;;  %v17095_v34 = vmax.f32 %v14410_v59, 0.0  ;;  %v17104_v59 = vmax.f32 %v14476_v45, 0.0  ;;  %v7907_v45 = vld [vmem:[%s16729_s12 + $0x7e8] sm:$0xff]  ;;  %v7796_v4 = vld [vmem:[%s16729_s12 + $0x470] sm:$0xff] }
 0xb76   : > { %v9127_v46 = vpack.c.bf16 %v7907_v45, %v7903_v25  ;;  %v7816_v45 = vld [vmem:[%s16729_s12 + $0x510] sm:$0xff] }
 0xb78   : > { %5529 = vmatmul.mubr.f32.vlgmr.msra.gmra.mrb[192].mxu1 %v4980_v18  ;;  %v17097_v18 = vmax.f32 %v14431_v8, 0.0  ;;  %v17107_v8 = vmax.f32 %v14482_v55, 0.0  ;;  %v17114_v55 = vmax.f32 %v14533_v43, 0.0  ;;  %v9129_v43 = vpack.c.bf16 %v7906_v36, %v7902_v28  ;;  %v7825_v36 = vld [vmem:[%s16729_s12 + $0x558] sm:$0xff] }
 0xb79   : > { %5534 = vmatprep.mubr.f32.mxu1 %v4983_v54  ;;  %v17096_v54 = vmax.f32 %v14428_v63, 0.0  ;;  %v17106_v63 = vmax.f32 %v14485_v30, 0.0  ;;  %v9125_v30 = vpack.c.bf16 %v7898_v62, %v7894_v27 }
 0xb7b   : > { %9126 = vmatpush1.bf16.msra.mxu0 %v9125_v30 }
 0xb7c   : > { %5535 = vmatmul.mubr.f32.gmra.mrb[194].mxu1 %v17087_v2  ;;  %9128 = vmatprep.subr.bf16.mxu0 %v9127_v46  ;;  %v7801_v2 = vld [vmem:[%s16729_s12 + $0x498] sm:$0xff]  ;;  %v7820_v46 = vld [vmem:[%s16729_s12 + $0x530] sm:$0xff] }
 0xb7d   : > { %5540 = vmatprep.mubr.f32.mxu1 %v17088_v29  ;;  %v7805_v29 = vld [vmem:[%s16729_s12 + $0x4b8] sm:$0xff] }
 0xb7f   : > { %9130 = vmatpush1.bf16.msra.mxu0 %v9129_v43  ;;  %v7829_v43 = vld [vmem:[%s16729_s12 + $0x578] sm:$0xff] }
 0xb80   : > { %5541 = vmatmul.mubr.f32.gmra.mrb[196].mxu1 %v17089_v57  ;;  %9132 = vmatprep.subr.bf16.mxu0 %v9131_v20  ;;  %v9149_v20 = vpack.c.bf16 %v7820_v46, %v7816_v45  ;;  %v9151_v44 = vpack.c.bf16 %v7829_v43, %v7825_v36 }
 0xb81   : > { %5546 = vmatprep.mubr.f32.mxu1 %v17090_v41 }
 0xb84   : > { %5547 = vmatmul.mubr.f32.gmra.mrb[198].mxu1 %v17091_v9  ;;  %v9137_v9 = vpack.c.bf16 %v7796_v4, %v7792_v47  ;;  %v9153_v47 = vpack.c.bf16 %v7828_v12, %v7824_v26  ;;  %v7857_v26 = vld [vmem:[%s16729_s12 + $0x658] sm:$0xff] }
 0xb85   : > { %5552 = vmatprep.mubr.f32.mxu1 %v17092_v11  ;;  %v7861_v12 = vld [vmem:[%s16729_s12 + $0x678] sm:$0xff] }
 0xb88   : > { %5553 = vmatmul.mubr.f32.gmra.mrb[200].mxu1 %v17093_v13 }
 0xb89   : > { %5558 = vmatprep.mubr.f32.mxu1 %v17094_v61 }
 0xb8c   : > { %5559 = vmatmul.mubr.f32.gmra.mrb[202].mxu1 %v17095_v34  ;;  %v9139_v34 = vpack.c.bf16 %v7805_v29, %v7801_v2 }
 0xb8d   : > { %5564 = vmatprep.mubr.f32.mxu1 %v17096_v54  ;;  %v7800_v54 = vld [vmem:[%s16729_s12 + $0x490] sm:$0xff] }
 0xb90   : > { %5565 = vmatmul.mubr.f32.gmra.mrb[204].mxu1 %v17097_v18  ;;  %v7804_v18 = vld [vmem:[%s16729_s12 + $0x4b0] sm:$0xff] }
 0xb91   : > { %5570 = vmatprep.mubr.f32.mxu1 %v17098_v42 }
 0xb94   : > { %5571 = vmatmul.mubr.f32.gmra.mrb[206].mxu1 %v17099_v22  ;;  %v7809_v22 = vld [vmem:[%s16729_s12 + $0x4d8] sm:$0xff] }
 0xb95   : > { %5576 = vmatprep.mubr.f32.mxu1 %v17100_v32  ;;  %v7813_v32 = vld [vmem:[%s16729_s12 + $0x4f8] sm:$0xff] }
 0xb98   : > { %5577 = vmatmul.mubr.f32.gmra.mrb[208].mxu1 %v17101_v40 }
 0xb99   : > { %5582 = vmatprep.mubr.f32.mxu1 %v17102_v10 }
 0xb9c   : > { %5583 = vmatmul.mubr.f32.gmra.mrb[210].mxu1 %v17103_v6  ;;  %v9141_v6 = vpack.c.bf16 %v7804_v18, %v7800_v54  ;;  %v7841_v54 = vld [vmem:[%s16729_s12 + $0x5d8] sm:$0xff] }
 0xb9d   : > { %5588 = vmatprep.mubr.f32.mxu1 %v17104_v59  ;;  %v7845_v18 = vld [vmem:[%s16729_s12 + $0x5f8] sm:$0xff] }
 0xba0   : > { %5589 = vmatmul.mubr.f32.gmra.mrb[212].mxu1 %v17105_v58 }
 0xba1   : > { %5594 = vmatprep.mubr.f32.mxu1 %v17106_v63 }
 0xba4   : > { %5595 = vmatmul.mubr.f32.gmra.mrb[214].mxu1 %v17107_v8  ;;  %v9143_v8 = vpack.c.bf16 %v7813_v32, %v7809_v22 }
 0xba5   : > { %5600 = vmatprep.mubr.f32.mxu1 %v17108_v1  ;;  %v7808_v1 = vld [vmem:[%s16729_s12 + $0x4d0] sm:$0xff] }
 0xba8   : > { %5601 = vmatmul.mubr.f32.gmra.mrb[216].mxu1 %v17109_v60  ;;  %v7812_v60 = vld [vmem:[%s16729_s12 + $0x4f0] sm:$0xff] }
 0xba9   : > { %5606 = vmatprep.mubr.f32.mxu1 %v17110_v14 }
 0xbac   : > { %5607 = vmatmul.mubr.f32.gmra.mrb[218].mxu1 %v17111_v35  ;;  %v7817_v35 = vld [vmem:[%s16729_s12 + $0x518] sm:$0xff] }
 0xbad   : > { %5612 = vmatprep.mubr.f32.mxu1 %v17112_v5  ;;  %v7821_v5 = vld [vmem:[%s16729_s12 + $0x538] sm:$0xff] }
 0xbae   : > { %v9147_v25 = vpack.c.bf16 %v7821_v5, %v7817_v35  ;;  %v7844_v35 = vld [vmem:[%s16729_s12 + $0x5f0] sm:$0xff] }
 0xbb0   : > { %5613 = vmatmul.mubr.f32.gmra.mrb[220].mxu1 %v17113_v7 }
 0xbb1   : > { %5618 = vmatprep.mubr.f32.mxu1 %v17114_v55 }
 0xbb4   : > { %5619 = vmatmul.mubr.f32.gmra.mrb[222].mxu1 %v17115_v16  ;;  %v9145_v16 = vpack.c.bf16 %v7812_v60, %v7808_v1  ;;  %v9159_v1 = vpack.c.bf16 %v7845_v18, %v7841_v54  ;;  %v7840_v60 = vld [vmem:[%s16729_s12 + $0x5d0] sm:$0xff] }
 0xbb5   : > { %v9161_v45 = vpack.c.bf16 %v7844_v35, %v7840_v60  ;;  %v7860_v54 = vld [vmem:[%s16729_s12 + $0x670] sm:$0xff] }
 0xc4b   : > { %v5530_v49 = vpop.f32.mrb[192].mxu1 }
 0xc4c   : > { %v15238_v33 = vadd.f32 %v15232_v3, %v5530_v49  ;;  %v5532_v21 = vpop.f32.mrb[193].mxu1 }
 0xc4d   : > { %v15247_v24 = vadd.f32 %v15235_v38, %v5532_v21 }
 0xc4e   : > { %v5670_v56 = vmax.f32 %v15238_v33, 0.0 }
 0xc4f   : > { %v5671_v15 = vmax.f32 %v15247_v24, 0.0  ;;  %v5536_v0 = vpop.f32.mrb[194].mxu1 }
 0xc50   : > { %v15258_v53 = vadd.f32 %v15232_v3, %v5536_v0  ;;  %v5538_v50 = vpop.f32.mrb[195].mxu1  ;;  %v7833_v0 = vld [vmem:[%s16729_s12 + $0x598] sm:$0xff] }
 0xc51   : > { %v15267_v19 = vadd.f32 %v15235_v38, %v5538_v50  ;;  %5918 = vmatprep.mubr.f32.mxu0 %v5671_v15 }
 0xc52   : > { %5919 = vmatmul.mubr.f32.vlgmr.msra.gmra.mrb[192].mxu0 %v5670_v56  ;;  %v5672_v11 = vmax.f32 %v15258_v53, 0.0 }
 0xc53   : > { %v5673_v57 = vmax.f32 %v15267_v19, 0.0  ;;  %v5542_v41 = vpop.f32.mrb[196].mxu1  ;;  %9134 = vmatpush1.bf16.msra.mxu0 %v9133_v31  ;;  %v7837_v31 = vld [vmem:[%s16729_s12 + $0x5b8] sm:$0xff] }
 0xc54   : > { %v15282_v13 = vadd.f32 %v15232_v3, %v5542_v41  ;;  %v5544_v61 = vpop.f32.mrb[197].mxu1  ;;  %9136 = vmatprep.subr.bf16.mxu0 %v9135_v52  ;;  %v9155_v41 = vpack.c.bf16 %v7837_v31, %v7833_v0 }
 0xc55   : > { %v15291_v42 = vadd.f32 %v15235_v38, %v5544_v61  ;;  %5924 = vmatprep.mubr.f32.mxu0 %v5673_v57  ;;  %v7836_v61 = vld [vmem:[%s16729_s12 + $0x5b0] sm:$0xff] }
 0xc56   : > { %5925 = vmatmul.mubr.f32.gmra.mrb[194].mxu0 %v5672_v11  ;;  %v5674_v59 = vmax.f32 %v15282_v13, 0.0 }
 0xc57   : > { %v5675_v40 = vmax.f32 %v15291_v42, 0.0  ;;  %v5548_v10 = vpop.f32.mrb[198].mxu1  ;;  %9138 = vmatpush1.bf16.msra.mxu0 %v9137_v9  ;;  %v7832_v9 = vld [vmem:[%s16729_s12 + $0x590] sm:$0xff] }
 0xc58   : > { %v15306_v58 = vadd.f32 %v15232_v3, %v5548_v10  ;;  %v5550_v63 = vpop.f32.mrb[199].mxu1  ;;  %9140 = vmatprep.subr.bf16.mxu0 %v9139_v34  ;;  %v9157_v10 = vpack.c.bf16 %v7836_v61, %v7832_v9  ;;  %v9167_v9 = vpack.c.bf16 %v7861_v12, %v7857_v26  ;;  %v7856_v61 = vld [vmem:[%s16729_s12 + $0x650] sm:$0xff] }
 0xc59   : > { %v15315_v14 = vadd.f32 %v15235_v38, %v5550_v63  ;;  %5930 = vmatprep.mubr.f32.mxu0 %v5675_v40  ;;  %v9169_v60 = vpack.c.bf16 %v7860_v54, %v7856_v61  ;;  %v7872_v54 = vld [vmem:[%s16729_s12 + $0x6d0] sm:$0xff] }
 0xc5a   : > { %5931 = vmatmul.mubr.f32.gmra.mrb[196].mxu0 %v5674_v59  ;;  %v5676_v27 = vmax.f32 %v15306_v58, 0.0  ;;  %v8007_v42 = vld [vmem:[%s16731_s14 + $0x410] sm:$0xff] }
 0xc5b   : > { %v5677_v7 = vmax.f32 %v15315_v14, 0.0  ;;  %v5554_v55 = vpop.f32.mrb[200].mxu1  ;;  %9142 = vmatpush1.bf16.msra.mxu0 %v9141_v6 }
 0xc5c   : > { %v15330_v62 = vadd.f32 %v15232_v3, %v5554_v55  ;;  %v5556_v30 = vpop.f32.mrb[201].mxu1  ;;  %9144 = vmatprep.subr.bf16.mxu0 %v9143_v8  ;;  %v7849_v55 = vld [vmem:[%s16729_s12 + $0x618] sm:$0xff] }
 0xc5d   : > { %v15339_v28 = vadd.f32 %v15235_v38, %v5556_v30  ;;  %5936 = vmatprep.mubr.f32.mxu0 %v5677_v7 }
 0xc5e   : > { %5937 = vmatmul.mubr.f32.gmra.mrb[198].mxu0 %v5676_v27  ;;  %v5678_v48 = vmax.f32 %v15330_v62, 0.0 }
 0xc5f   : > { %v5679_v17 = vmax.f32 %v15339_v28, 0.0  ;;  %v5560_v23 = vpop.f32.mrb[202].mxu1  ;;  %9146 = vmatpush1.bf16.msra.mxu0 %v9145_v16  ;;  %v7853_v16 = vld [vmem:[%s16729_s12 + $0x638] sm:$0xff]  ;;  %v8011_v28 = vld [vmem:[%s16731_s14 + $0x450] sm:$0xff] }
 0xc60   : > { %v15354_v49 = vadd.f32 %v15232_v3, %v5560_v23  ;;  %v5562_v21 = vpop.f32.mrb[203].mxu1  ;;  %9148 = vmatprep.subr.bf16.mxu0 %v9147_v25  ;;  %v9163_v23 = vpack.c.bf16 %v7853_v16, %v7849_v55 }
 0xc61   : > { %v15363_v51 = vadd.f32 %v15235_v38, %v5562_v21  ;;  %5942 = vmatprep.mubr.f32.mxu0 %v5679_v17  ;;  %v7852_v21 = vld [vmem:[%s16729_s12 + $0x630] sm:$0xff] }
 0xc62   : > { %5943 = vmatmul.mubr.f32.gmra.mrb[200].mxu0 %v5678_v48  ;;  %v5680_v4 = vmax.f32 %v15354_v49, 0.0 }
 0xc63   : > { %v5681_v50 = vmax.f32 %v15363_v51, 0.0  ;;  %v5566_v52 = vpop.f32.mrb[204].mxu1  ;;  %9150 = vmatpush1.bf16.msra.mxu0 %v9149_v20  ;;  %v7848_v20 = vld [vmem:[%s16729_s12 + $0x610] sm:$0xff] }
 0xc64   : > { %v15378_v2 = vadd.f32 %v15232_v3, %v5566_v52  ;;  %v5568_v29 = vpop.f32.mrb[205].mxu1  ;;  %9152 = vmatprep.subr.bf16.mxu0 %v9151_v44  ;;  %v9165_v52 = vpack.c.bf16 %v7852_v21, %v7848_v20  ;;  %v7873_v20 = vld [vmem:[%s16729_s12 + $0x6d8] sm:$0xff] }
 0xc65   : > { %v15387_v34 = vadd.f32 %v15235_v38, %v5568_v29  ;;  %5948 = vmatprep.mubr.f32.mxu0 %v5681_v50  ;;  %v7877_v21 = vld [vmem:[%s16729_s12 + $0x6f8] sm:$0xff] }
 0xc66   : > { %5949 = vmatmul.mubr.f32.gmra.mrb[202].mxu0 %v5680_v4  ;;  %v5682_v6 = vmax.f32 %v15378_v2, 0.0  ;;  %v9175_v61 = vpack.c.bf16 %v7877_v21, %v7873_v20 }
 0xc67   : > { %v5683_v22 = vmax.f32 %v15387_v34, 0.0  ;;  %v5572_v32 = vpop.f32.mrb[206].mxu1  ;;  %9154 = vmatpush1.bf16.msra.mxu0 %v9153_v47  ;;  %v8015_v34 = vld [vmem:[%s16731_s14 + $0x490] sm:$0xff] }
 0xc68   : > { %v15402_v63 = vadd.f32 %v15232_v3, %v5572_v32  ;;  %v5574_v8 = vpop.f32.mrb[207].mxu1  ;;  %9156 = vmatprep.subr.bf16.mxu0 %v9155_v41  ;;  %v7865_v32 = vld [vmem:[%s16729_s12 + $0x698] sm:$0xff] }
 0xc69   : > { %v15411_v5 = vadd.f32 %v15235_v38, %v5574_v8  ;;  %5954 = vmatprep.mubr.f32.mxu0 %v5683_v22 }
 0xc6a   : > { %5955 = vmatmul.mubr.f32.gmra.mrb[204].mxu0 %v5682_v6  ;;  %v16896_v46 = vmax.f32 %v15402_v63, 0.0  ;;  %v17117_v33 = vmax.f32 %v15402_v63, 0.0 }
 0xc6b   : > { %v16898_v30 = vmax.f32 %v15411_v5, 0.0  ;;  %v5578_v25 = vpop.f32.mrb[208].mxu1  ;;  %9158 = vmatpush1.bf16.msra.mxu0 %v9157_v10  ;;  %v7869_v10 = vld [vmem:[%s16729_s12 + $0x6b8] sm:$0xff] }
 0xc6c   : > { %v15426_v36 = vadd.f32 %v15232_v3, %v5578_v25  ;;  %v5580_v43 = vpop.f32.mrb[209].mxu1  ;;  %9160 = vmatprep.subr.bf16.mxu0 %v9159_v1  ;;  %v9171_v25 = vpack.c.bf16 %v7869_v10, %v7865_v32  ;;  %v7876_v32 = vld [vmem:[%s16729_s12 + $0x6f0] sm:$0xff] }
 0xc6d   : > { %v15435_v44 = vadd.f32 %v15235_v38, %v5580_v43  ;;  %5960 = vmatprep.mubr.f32.mxu0 %v16898_v30  ;;  %v7868_v43 = vld [vmem:[%s16729_s12 + $0x6b0] sm:$0xff] }
 0xc6e   : > { %5961 = vmatmul.mubr.f32.gmra.mrb[206].mxu0 %v16896_v46  ;;  %v16892_v47 = vmax.f32 %v15426_v36, 0.0  ;;  %v7904_v46 = vld [vmem:[%s16729_s12 + $0x7d0] sm:$0xff] }
 0xc6f   : > { %v16894_v0 = vmax.f32 %v15435_v44, 0.0  ;;  %v5584_v31 = vpop.f32.mrb[210].mxu1  ;;  %9162 = vmatpush1.bf16.msra.mxu0 %v9161_v45  ;;  %v7864_v45 = vld [vmem:[%s16729_s12 + $0x690] sm:$0xff]  ;;  %v17118_v24 = vmax.f32 %v15435_v44, 0.0 }
 0xc70   : > { %v15450_v29 = vadd.f32 %v15232_v3, %v5584_v31  ;;  %v5586_v41 = vpop.f32.mrb[211].mxu1  ;;  %9164 = vmatprep.subr.bf16.mxu0 %v9163_v23  ;;  %v9173_v31 = vpack.c.bf16 %v7868_v43, %v7864_v45  ;;  %v9177_v45 = vpack.c.bf16 %v7876_v32, %v7872_v54 }
 0xc71   : > { %v15459_v18 = vadd.f32 %v15235_v38, %v5586_v41  ;;  %5966 = vmatprep.mubr.f32.mxu0 %v16894_v0 }
 0xc72   : > { %5967 = vmatmul.mubr.f32.gmra.mrb[208].mxu0 %v16892_v47  ;;  %v16888_v35 = vmax.f32 %v15450_v29, 0.0  ;;  %v7896_v47 = vld [vmem:[%s16729_s12 + $0x790] sm:$0xff]  ;;  %v17121_v53 = vmax.f32 %v15450_v29, 0.0 }
 0xc73   : > { %v16890_v8 = vmax.f32 %v15459_v18, 0.0  ;;  %v5590_v1 = vpop.f32.mrb[212].mxu1  ;;  %9166 = vmatpush1.bf16.msra.mxu0 %v9165_v52  ;;  %v8019_v29 = vld [vmem:[%s16731_s14 + $0x4d0] sm:$0xff] }
 0xc74   : > { %v15474_v55 = vadd.f32 %v15232_v3, %v5590_v1  ;;  %v5592_v16 = vpop.f32.mrb[213].mxu1  ;;  %9168 = vmatprep.subr.bf16.mxu0 %v9167_v9  ;;  %v7881_v1 = vld [vmem:[%s16729_s12 + $0x718] sm:$0xff] }
 0xc75   : > { %v15483_v23 = vadd.f32 %v15235_v38, %v5592_v16  ;;  %5972 = vmatprep.mubr.f32.mxu0 %v16890_v8 }
 0xc76   : > { %5973 = vmatmul.mubr.f32.gmra.mrb[210].mxu0 %v16888_v35  ;;  %v16885_v52 = vmax.f32 %v15474_v55, 0.0  ;;  %v7888_v35 = vld [vmem:[%s16729_s12 + $0x750] sm:$0xff] }
 0xc77   : > { %v16886_v26 = vmax.f32 %v15483_v23, 0.0  ;;  %v5596_v12 = vpop.f32.mrb[214].mxu1  ;;  %9170 = vmatpush1.bf16.msra.mxu0 %v9169_v60  ;;  %v7885_v60 = vld [vmem:[%s16729_s12 + $0x738] sm:$0xff]  ;;  %v17122_v19 = vmax.f32 %v15483_v23, 0.0 }
 0xc78   : > { %v15498_v41 = vadd.f32 %v15232_v3, %v5596_v12  ;;  %v5598_v9 = vpop.f32.mrb[215].mxu1  ;;  %9172 = vmatprep.subr.bf16.mxu0 %v9171_v25  ;;  %v9179_v12 = vpack.c.bf16 %v7885_v60, %v7881_v1  ;;  %v8024_v23 = vld [vmem:[%s16731_s14 + $0x518] sm:$0xff] }
 0xc79   : > { %v15507_v10 = vadd.f32 %v15235_v38, %v5598_v9  ;;  %5978 = vmatprep.mubr.f32.mxu0 %v16886_v26  ;;  %v7880_v9 = vld [vmem:[%s16729_s12 + $0x710] sm:$0xff] }
 0xc7a   : > { %5979 = vmatmul.mubr.f32.gmra.mrb[212].mxu0 %v16885_v52  ;;  %v16889_v43 = vmax.f32 %v15498_v41, 0.0  ;;  %v7884_v52 = vld [vmem:[%s16729_s12 + $0x730] sm:$0xff] }
 0xc7b   : > { %v16887_v16 = vmax.f32 %v15507_v10, 0.0  ;;  %v5602_v25 = vpop.f32.mrb[216].mxu1  ;;  %9174 = vmatpush1.bf16.msra.mxu0 %v9173_v31  ;;  %v7889_v31 = vld [vmem:[%s16729_s12 + $0x758] sm:$0xff]  ;;  %v9181_v1 = vpack.c.bf16 %v7884_v52, %v7880_v9  ;;  %v17124_v14 = vmax.f32 %v15507_v10, 0.0  ;;  %v8023_v10 = vld [vmem:[%s16731_s14 + $0x510] sm:$0xff] }
 0xc7c   : > { %v15522_v20 = vadd.f32 %v15232_v3, %v5602_v25  ;;  %v5604_v21 = vpop.f32.mrb[217].mxu1  ;;  %9176 = vmatprep.subr.bf16.mxu0 %v9175_v61  ;;  %v7893_v61 = vld [vmem:[%s16729_s12 + $0x778] sm:$0xff] }
 0xc7d   : > { %v15531_v26 = vadd.f32 %v15235_v38, %v5604_v21  ;;  %5984 = vmatprep.mubr.f32.mxu0 %v16887_v16  ;;  %v9183_v16 = vpack.c.bf16 %v7893_v61, %v7889_v31  ;;  %v7897_v52 = vld [vmem:[%s16729_s12 + $0x798] sm:$0xff] }
 0xc7e   : > { %5985 = vmatmul.mubr.f32.gmra.mrb[214].mxu0 %v16889_v43  ;;  %v16893_v60 = vmax.f32 %v15522_v20, 0.0  ;;  %v7892_v43 = vld [vmem:[%s16729_s12 + $0x770] sm:$0xff] }
 0xc7f   : > { %v16891_v54 = vmax.f32 %v15531_v26, 0.0  ;;  %v5608_v32 = vpop.f32.mrb[218].mxu1  ;;  %9178 = vmatpush1.bf16.msra.mxu0 %v9177_v45  ;;  %v7901_v45 = vld [vmem:[%s16729_s12 + $0x7b8] sm:$0xff]  ;;  %v9185_v31 = vpack.c.bf16 %v7892_v43, %v7888_v35  ;;  %v17126_v51 = vmax.f32 %v15531_v26, 0.0 }
 0xc80   : > { %v15546_v25 = vadd.f32 %v15232_v3, %v5608_v32  ;;  %v5610_v21 = vpop.f32.mrb[219].mxu1  ;;  %9180 = vmatprep.subr.bf16.mxu0 %v9179_v12  ;;  %v7905_v35 = vld [vmem:[%s16729_s12 + $0x7d8] sm:$0xff] }
 0xc81   : > { %v15555_v8 = vadd.f32 %v15235_v38, %v5610_v21  ;;  %5990 = vmatprep.mubr.f32.mxu0 %v16891_v54  ;;  %v9187_v54 = vpack.c.bf16 %v7901_v45, %v7897_v52  ;;  %v8026_v26 = vld [vmem:[%s16731_s14 + $0x538] sm:$0xff] }
 0xc82   : > { %5991 = vmatmul.mubr.f32.gmra.mrb[216].mxu0 %v16893_v60  ;;  %v16897_v61 = vmax.f32 %v15546_v25, 0.0  ;;  %v7900_v60 = vld [vmem:[%s16729_s12 + $0x7b0] sm:$0xff] }
 0xc83   : > { %v16895_v12 = vmax.f32 %v15555_v8, 0.0  ;;  %v5614_v9 = vpop.f32.mrb[220].mxu1  ;;  %9182 = vmatpush1.bf16.msra.mxu0 %v9181_v1  ;;  %v9189_v52 = vpack.c.bf16 %v7900_v60, %v7896_v47  ;;  %v8028_v60 = vld [vmem:[%s16731_s14 + $0x558] sm:$0xff] }
 0xc84   : > { %v15570_v32 = vadd.f32 %v15232_v3, %v5614_v9  ;;  %v5616_v21 = vpop.f32.mrb[221].mxu1  ;;  %9184 = vmatprep.subr.bf16.mxu0 %v9183_v16  ;;  %v7909_v16 = vld [vmem:[%s16729_s12 + $0x7f8] sm:$0xff] }
 0xc85   : > { %v15579_v0 = vadd.f32 %v15235_v38, %v5616_v21  ;;  %5996 = vmatprep.mubr.f32.mxu0 %v16895_v12  ;;  %v9191_v12 = vpack.c.bf16 %v7909_v16, %v7905_v35  ;;  %v8034_v35 = vld [vmem:[%s16731_s14 + $0x5b8] sm:$0xff] }
 0xc86   : > { %5997 = vmatmul.mubr.f32.gmra.mrb[218].mxu0 %v16897_v61  ;;  %v5698_v45 = vmax.f32 %v15570_v32, 0.0  ;;  %v7908_v61 = vld [vmem:[%s16729_s12 + $0x7f0] sm:$0xff]  ;;  %v8032_v32 = vld [vmem:[%s16731_s14 + $0x598] sm:$0xff] }
 0xc87   : > { %v5699_v43 = vmax.f32 %v15579_v0, 0.0  ;;  %v5620_v1 = vpop.f32.mrb[222].mxu1  ;;  %9186 = vmatpush1.bf16.msra.mxu0 %v9185_v31  ;;  %v9193_v47 = vpack.c.bf16 %v7908_v61, %v7904_v46  ;;  %v8020_v46 = vld [vmem:[%s16731_s14 + $0x4d8] sm:$0xff]  ;;  %v8025_v0 = vld [vmem:[%s16731_s14 + $0x530] sm:$0xff]  ;;  %v9219_v16 = vpack.c.bf16 %v8034_v35, %v8032_v32 }
 0xc88   : > { %v15594_v9 = vadd.f32 %v15232_v3, %v5620_v1  ;;  %v5622_v21 = vpop.f32.mrb[223].mxu1  ;;  %9188 = vmatprep.subr.bf16.mxu0 %v9187_v54  ;;  %v8029_v31 = vld [vmem:[%s16731_s14 + $0x570] sm:$0xff] }
 0xc89   : > { %v15603_v30 = vadd.f32 %v15235_v38, %v5622_v21  ;;  %6002 = vmatprep.mubr.f32.mxu0 %v5699_v43  ;;  %v17116_v38 = vmax.f32 %v15411_v5, 0.0  ;;  %v17128_v5 = vmax.f32 %v15555_v8, 0.0  ;;  %v17129_v8 = vmax.f32 %v15546_v25, 0.0  ;;  %v8030_v25 = vld [vmem:[%s16731_s14 + $0x578] sm:$0xff]  ;;  %v8033_v1 = vld [vmem:[%s16731_s14 + $0x5b0] sm:$0xff] }
 0xc8a   : > { %6003 = vmatmul.mubr.f32.gmra.mrb[220].mxu0 %v5698_v45  ;;  %v5700_v54 = vmax.f32 %v15594_v9, 0.0  ;;  %v8038_v9 = vld [vmem:[%s16731_s14 + $0x5f8] sm:$0xff] }
 0xc8b   : > { %v5701_v3 = vmax.f32 %v15603_v30, 0.0  ;;  %9190 = vmatpush1.bf16.msra.mxu0 %v9189_v52  ;;  %v8027_v30 = vld [vmem:[%s16731_s14 + $0x550] sm:$0xff] }
 0xc8c   : > { %9192 = vmatprep.subr.bf16.mxu0 %v9191_v12  ;;  %v9215_v12 = vpack.c.bf16 %v8030_v25, %v8028_v60  ;;  %v9217_v61 = vpack.c.bf16 %v8029_v31, %v8027_v30  ;;  %v8067_v25 = vld [vmem:[%s16731_s14 + $0x7d0] sm:$0xff] }
 0xc8d   : > { %6008 = vmatprep.mubr.f32.mxu0 %v5701_v3 }
 0xc8e   : > { %6009 = vmatmul.mubr.f32.gmra.mrb[222].mxu0 %v5700_v54 }
 0xc8f   : > { %9194 = vmatpush1.bf16.msra.mxu0 %v9193_v47  ;;  %6079 = vmatprep.mubr.f32.mxu0 %v5671_v15  ;;  %v17119_v15 = vmax.f32 %v15426_v36, 0.0  ;;  %v8022_v36 = vld [vmem:[%s16731_s14 + $0x4f8] sm:$0xff]  ;;  %v8037_v47 = vld [vmem:[%s16731_s14 + $0x5f0] sm:$0xff] }
 0xc90   : > { %v9207_v44 = vpack.c.bf16 %v8022_v36, %v8020_v46  ;;  %v8062_v46 = vld [vmem:[%s16731_s14 + $0x778] sm:$0xff] }
 0xc92   : > { %6080 = vmatmul.mubr.f32.vlgmr.msra.gmra.mrb[224].mxu0 %v5670_v56  ;;  %v17120_v56 = vmax.f32 %v15459_v18, 0.0  ;;  %v8021_v18 = vld [vmem:[%s16731_s14 + $0x4f0] sm:$0xff] }
 0xc93   : > { %6085 = vmatprep.mubr.f32.mxu0 %v5673_v57  ;;  %v8008_v57 = vld [vmem:[%s16731_s14 + $0x418] sm:$0xff] }
 0xc96   : > { %6086 = vmatmul.mubr.f32.gmra.mrb[226].mxu0 %v5672_v11  ;;  %v8010_v11 = vld [vmem:[%s16731_s14 + $0x438] sm:$0xff] }
 0xc97   : > { %6091 = vmatprep.mubr.f32.mxu0 %v5675_v40  ;;  %v9195_v13 = vpack.c.bf16 %v8010_v11, %v8008_v57  ;;  %v8009_v40 = vld [vmem:[%s16731_s14 + $0x430] sm:$0xff]  ;;  %v8046_v57 = vld [vmem:[%s16731_s14 + $0x678] sm:$0xff] }
 0xc98   : > { %v9197_v58 = vpack.c.bf16 %v8009_v40, %v8007_v42  ;;  %v8045_v42 = vld [vmem:[%s16731_s14 + $0x670] sm:$0xff] }
 0xc99   : > { %9196 = vmatprep.subr.bf16.mxu0 %v9195_v13  ;;  %v8043_v13 = vld [vmem:[%s16731_s14 + $0x650] sm:$0xff] }
 0xc9a   : > { %6092 = vmatmul.mubr.f32.gmra.mrb[228].mxu0 %v5674_v59  ;;  %v17123_v59 = vmax.f32 %v15474_v55, 0.0  ;;  %v9209_v55 = vpack.c.bf16 %v8021_v18, %v8019_v29  ;;  %v9233_v40 = vpack.c.bf16 %v8045_v42, %v8043_v13  ;;  %v8061_v29 = vld [vmem:[%s16731_s14 + $0x770] sm:$0xff] }
 0xc9b   : > { %6097 = vmatprep.mubr.f32.mxu0 %v5677_v7  ;;  %9198 = vmatpush1.bf16.msra.mxu0 %v9197_v58  ;;  %v8012_v7 = vld [vmem:[%s16731_s14 + $0x458] sm:$0xff] }
 0xc9c   : > { %v8050_v58 = vld [vmem:[%s16731_s14 + $0x6b8] sm:$0xff] }
 0xc9e   : > { %6098 = vmatmul.mubr.f32.gmra.mrb[230].mxu0 %v5676_v27  ;;  %v8014_v27 = vld [vmem:[%s16731_s14 + $0x478] sm:$0xff] }
 0xc9f   : > { %6103 = vmatprep.mubr.f32.mxu0 %v5679_v17  ;;  %v9199_v62 = vpack.c.bf16 %v8014_v27, %v8012_v7  ;;  %v8013_v17 = vld [vmem:[%s16731_s14 + $0x470] sm:$0xff] }
 0xca0   : > { %v9201_v49 = vpack.c.bf16 %v8013_v17, %v8011_v28  ;;  %v8047_v7 = vld [vmem:[%s16731_s14 + $0x690] sm:$0xff]  ;;  %v8052_v28 = vld [vmem:[%s16731_s14 + $0x6d8] sm:$0xff] }
 0xca1   : > { %9200 = vmatprep.subr.bf16.mxu0 %v9199_v62  ;;  %v8049_v27 = vld [vmem:[%s16731_s14 + $0x6b0] sm:$0xff]  ;;  %v8054_v17 = vld [vmem:[%s16731_s14 + $0x6f8] sm:$0xff] }
 0xca2   : > { %6104 = vmatmul.mubr.f32.gmra.mrb[232].mxu0 %v5678_v48  ;;  %v17125_v48 = vmax.f32 %v15498_v41, 0.0  ;;  %v9211_v41 = vpack.c.bf16 %v8026_v26, %v8024_v23  ;;  %v9237_v62 = vpack.c.bf16 %v8049_v27, %v8047_v7  ;;  %v8063_v26 = vld [vmem:[%s16731_s14 + $0x790] sm:$0xff]  ;;  %v7916_v27 = vld [vmem:[%s13306_s30 + $0x228] sm:$0xff] }
 0xca3   : > { %6109 = vmatprep.mubr.f32.mxu0 %v5681_v50  ;;  %9202 = vmatpush1.bf16.msra.mxu0 %v9201_v49  ;;  %v8016_v50 = vld [vmem:[%s16731_s14 + $0x498] sm:$0xff]  ;;  %v8051_v49 = vld [vmem:[%s16731_s14 + $0x6d0] sm:$0xff] }
 0xca6   : > { %6110 = vmatmul.mubr.f32.gmra.mrb[234].mxu0 %v5680_v4  ;;  %v8018_v4 = vld [vmem:[%s16731_s14 + $0x4b8] sm:$0xff] }
 0xca7   : > { %6115 = vmatprep.mubr.f32.mxu0 %v5683_v22  ;;  %v9203_v2 = vpack.c.bf16 %v8018_v4, %v8016_v50  ;;  %v8017_v22 = vld [vmem:[%s16731_s14 + $0x4b0] sm:$0xff]  ;;  %v8056_v4 = vld [vmem:[%s16731_s14 + $0x718] sm:$0xff] }
 0xca8   : > { %v9205_v63 = vpack.c.bf16 %v8017_v22, %v8015_v34  ;;  %v8055_v22 = vld [vmem:[%s16731_s14 + $0x710] sm:$0xff] }
 0xca9   : > { %9204 = vmatprep.subr.bf16.mxu0 %v9203_v2  ;;  %v8058_v2 = vld [vmem:[%s16731_s14 + $0x738] sm:$0xff] }
 0xcaa   : > { %6116 = vmatmul.mubr.f32.gmra.mrb[236].mxu0 %v5682_v6  ;;  %v17127_v6 = vmax.f32 %v15522_v20, 0.0  ;;  %v9213_v20 = vpack.c.bf16 %v8025_v0, %v8023_v10  ;;  %v9243_v34 = vpack.c.bf16 %v8058_v2, %v8056_v4  ;;  %v8068_v0 = vld [vmem:[%s16731_s14 + $0x7d8] sm:$0xff]  ;;  %v6870_v4 = vld [vmem:[%s16733_s16 + $0x30] sm:$0xff] }
 0xcab   : > { %6121 = vmatprep.mubr.f32.mxu0 %v17116_v38  ;;  %9206 = vmatpush1.bf16.msra.mxu0 %v9205_v63  ;;  %v8040_v38 = vld [vmem:[%s16731_s14 + $0x618] sm:$0xff] }
 0xcac   : > { %9208 = vmatprep.subr.bf16.mxu0 %v9207_v44  ;;  %v8059_v44 = vld [vmem:[%s16731_s14 + $0x750] sm:$0xff] }
 0xcad   : > { %v9249_v18 = vpack.c.bf16 %v8061_v29, %v8059_v44  ;;  %v7920_v44 = vld [vmem:[%s13306_s30 + $0x248] sm:$0xff] }
 0xcae   : > { %6122 = vmatmul.mubr.f32.gmra.mrb[238].mxu0 %v17117_v33  ;;  %v8042_v33 = vld [vmem:[%s16731_s14 + $0x638] sm:$0xff] }
 0xcaf   : > { %6127 = vmatprep.mubr.f32.mxu0 %v17118_v24  ;;  %9210 = vmatpush1.bf16.msra.mxu0 %v9209_v55  ;;  %v9227_v24 = vpack.c.bf16 %v8042_v33, %v8040_v38  ;;  %v8066_v55 = vld [vmem:[%s16731_s14 + $0x7b8] sm:$0xff]  ;;  %v7911_v38 = vld [vmem:[%s13306_s30 + $0x200] sm:$0xff]  ;;  %v7912_v33 = vld [vmem:[%s13306_s30 + $0x208] sm:$0xff] }
 0xcb0   : > { %9212 = vmatprep.subr.bf16.mxu0 %v9211_v41  ;;  %v8065_v41 = vld [vmem:[%s16731_s14 + $0x7b0] sm:$0xff] }
 0xcb1   : > { %v9253_v10 = vpack.c.bf16 %v8065_v41, %v8063_v26  ;;  %v6872_v26 = vld [vmem:[%s16733_s16 + $0x40] sm:$0xff]  ;;  %v6874_v41 = vld [vmem:[%s16733_s16 + $0x50] sm:$0xff] }
 0xcb2   : > { %6128 = vmatmul.mubr.f32.gmra.mrb[240].mxu0 %v17119_v15  ;;  %v8039_v15 = vld [vmem:[%s16731_s14 + $0x610] sm:$0xff] }
 0xcb3   : > { %6133 = vmatprep.mubr.f32.mxu0 %v17120_v56  ;;  %9214 = vmatpush1.bf16.msra.mxu0 %v9213_v20  ;;  %v8041_v56 = vld [vmem:[%s16731_s14 + $0x630] sm:$0xff]  ;;  %v8070_v20 = vld [vmem:[%s16731_s14 + $0x7f8] sm:$0xff] }
 0xcb4   : > { %9216 = vmatprep.subr.bf16.mxu0 %v9215_v12  ;;  %v9255_v60 = vpack.c.bf16 %v8070_v20, %v8068_v0  ;;  %v8069_v12 = vld [vmem:[%s16731_s14 + $0x7f0] sm:$0xff]  ;;  %v7923_v0 = vld [vmem:[%s13306_s30 + $0x260] sm:$0xff] }
 0xcb5   : > { %v9257_v30 = vpack.c.bf16 %v8069_v12, %v8067_v25  ;;  %v6877_v25 = vld [vmem:[%s16733_s16 + $0x68] sm:$0xff]  ;;  %v6879_v12 = vld [vmem:[%s16733_s16 + $0x78] sm:$0xff] }
 0xcb6   : > { %6134 = vmatmul.mubr.f32.gmra.mrb[242].mxu0 %v17121_v53  ;;  %v9229_v53 = vpack.c.bf16 %v8041_v56, %v8039_v15  ;;  %v6865_v56 = vld [vmem:[%s16733_s16 + $0x8] sm:$0xff] }
 0xcb7   : > { %6139 = vmatprep.mubr.f32.mxu0 %v17122_v19  ;;  %9218 = vmatpush1.bf16.msra.mxu0 %v9217_v61  ;;  %v8044_v19 = vld [vmem:[%s16731_s14 + $0x658] sm:$0xff] }
 0xcb8   : > { %9220 = vmatprep.subr.bf16.mxu0 %v9219_v16  ;;  %v9231_v11 = vpack.c.bf16 %v8046_v57, %v8044_v19  ;;  %v6864_v19 = vld [vmem:[%s16733_s16] sm:$0xff] }
 0xcba   : > { %6140 = vmatmul.mubr.f32.gmra.mrb[244].mxu0 %v17123_v59  ;;  %v8048_v59 = vld [vmem:[%s16731_s14 + $0x698] sm:$0xff] }
 0xcbb   : > { %6145 = vmatprep.mubr.f32.mxu0 %v17124_v14  ;;  %v9235_v14 = vpack.c.bf16 %v8050_v58, %v8048_v59  ;;  %v6869_v59 = vld [vmem:[%s16733_s16 + $0x28] sm:$0xff]  ;;  %v6871_v58 = vld [vmem:[%s16733_s16 + $0x38] sm:$0xff] }
 0xcbe   : > { %6146 = vmatmul.mubr.f32.gmra.mrb[246].mxu0 %v17125_v48  ;;  %v9239_v48 = vpack.c.bf16 %v8054_v17, %v8052_v28 }
 0xcbf   : > { %6151 = vmatprep.mubr.f32.mxu0 %v17126_v51  ;;  %v8053_v51 = vld [vmem:[%s16731_s14 + $0x6f0] sm:$0xff] }
 0xcc0   : > { %v9241_v50 = vpack.c.bf16 %v8053_v51, %v8051_v49  ;;  %v15918_v51 = vpack.c.bf16 %v6871_v58, %v6869_v59 }
 0xcc2   : > { %6152 = vmatmul.mubr.f32.gmra.mrb[248].mxu0 %v17127_v6  ;;  %v8057_v6 = vld [vmem:[%s16731_s14 + $0x730] sm:$0xff] }
 0xcc3   : > { %6157 = vmatprep.mubr.f32.mxu0 %v17128_v5  ;;  %v9245_v63 = vpack.c.bf16 %v8057_v6, %v8055_v22  ;;  %v8060_v5 = vld [vmem:[%s16731_s14 + $0x758] sm:$0xff]  ;;  %v6873_v6 = vld [vmem:[%s16733_s16 + $0x48] sm:$0xff] }
 0xcc4   : > { %v9247_v36 = vpack.c.bf16 %v8062_v46, %v8060_v5 }
 0xcc6   : > { %6158 = vmatmul.mubr.f32.gmra.mrb[250].mxu0 %v17129_v8  ;;  %v8064_v8 = vld [vmem:[%s16731_s14 + $0x798] sm:$0xff] }
 0xcc7   : > { %6163 = vmatprep.mubr.f32.mxu0 %v5699_v43  ;;  %v8031_v43 = vld [vmem:[%s16731_s14 + $0x590] sm:$0xff]  ;;  %v9251_v23 = vpack.c.bf16 %v8066_v55, %v8064_v8 }
 0xcc8   : > { %v9221_v52 = vpack.c.bf16 %v8033_v1, %v8031_v43  ;;  %v15874_v1 = vld [vmem:[%s16730_s13 + $0x4] sm:$0xf] }
 0xcca   : > { %6164 = vmatmul.mubr.f32.gmra.mrb[252].mxu0 %v5698_v45  ;;  %v8036_v45 = vld [vmem:[%s16731_s14 + $0x5d8] sm:$0xff] }
 0xccb   : > { %6169 = vmatprep.mubr.f32.mxu0 %v5701_v3  ;;  %9222 = vmatpush1.bf16.msra.mxu0 %v9221_v52  ;;  %v9223_v21 = vpack.c.bf16 %v8038_v9, %v8036_v45  ;;  %v8035_v3 = vld [vmem:[%s16731_s14 + $0x5d0] sm:$0xff]  ;;  %v15878_v45 = vrot.slane %v15874_v1, %v10719_v39 }
 0xccd   : > { %9224 = vmatprep.subr.bf16.mxu0 %v9223_v21  ;;  %v15882_v21 = vrot.slane %v15874_v1, %v10713_v37 }
 0xcce   : > { %6170 = vmatmul.mubr.f32.gmra.mrb[254].mxu0 %v5700_v54  ;;  %v9225_v54 = vpack.c.bf16 %v8037_v47, %v8035_v3 }
 0xcd0   : > { %9226 = vmatpush1.bf16.msra.mxu0 %v9225_v54 }
 0xcd1   : > { %9228 = vmatprep.subr.bf16.mxu0 %v9227_v24 }
 0xcd4   : > { %9230 = vmatpush1.bf16.msra.mxu0 %v9229_v53  ;;  %v6867_v53 = vld [vmem:[%s16733_s16 + $0x18] sm:$0xff] }
 0xcd5   : > { %9232 = vmatprep.subr.bf16.mxu0 %v9231_v11  ;;  %v9259_v42 = vpack.c.bf16 %v6867_v53, %v6865_v56  ;;  %v6878_v56 = vld [vmem:[%s16733_s16 + $0x70] sm:$0xff]  ;;  %v7931_v53 = vld [vmem:[%s13306_s30 + $0x2a0] sm:$0xff] }
 0xcd7   : > { %9355 = vmatprep.subr.bf16.mxu1 %v9259_v42 }
 0xcd8   : > { %9234 = vmatpush1.bf16.msra.mxu0 %v9233_v40  ;;  %v6866_v40 = vld [vmem:[%s16733_s16 + $0x10] sm:$0xff] }
 0xcd9   : > { %9236 = vmatprep.subr.bf16.mxu0 %v9235_v14  ;;  %v7915_v14 = vld [vmem:[%s13306_s30 + $0x220] sm:$0xff]  ;;  %v15913_v28 = vpack.c.bf16 %v6866_v40, %v6864_v19 }
 0xcdb   : > { %9371 = vmatpush1.bf16.msra.mxu1 %v15913_v28 }
 0xcdc   : > { %9238 = vmatpush1.bf16.msra.mxu0 %v9237_v62  ;;  %9356 = vmatprep.subr.bf16.mxu1 %v15918_v51 }
 0xcdd   : > { %9240 = vmatprep.subr.bf16.mxu0 %v9239_v48  ;;  %v7919_v48 = vld [vmem:[%s13306_s30 + $0x240] sm:$0xff] }
 0xce0   : > { %9242 = vmatpush1.bf16.msra.mxu0 %v9241_v50  ;;  %v6868_v50 = vld [vmem:[%s16733_s16 + $0x20] sm:$0xff] }
 0xce1   : > { %9244 = vmatprep.subr.bf16.mxu0 %v9243_v34  ;;  %v15938_v29 = vpack.c.bf16 %v6870_v4, %v6868_v50  ;;  %v6880_v50 = vld [vmem:[%s16733_s16 + $0x80] sm:$0xff] }
 0xce3   : > { %9372 = vmatpush1.bf16.msra.mxu1 %v15938_v29 }
 0xce4   : > { %9246 = vmatpush1.bf16.msra.mxu0 %v9245_v63  ;;  %v6875_v63 = vld [vmem:[%s16733_s16 + $0x58] sm:$0xff] }
 0xce5   : > { %9248 = vmatprep.subr.bf16.mxu0 %v9247_v36 }
 0xce8   : > { %9250 = vmatpush1.bf16.msra.mxu0 %v9249_v18 }
 0xce9   : > { %9252 = vmatprep.subr.bf16.mxu0 %v9251_v23  ;;  %v15943_v23 = vpack.c.bf16 %v6875_v63, %v6873_v6  ;;  %v6887_v6 = vld [vmem:[%s16733_s16 + $0xb8] sm:$0xff] }
 0xceb   : > { %9357 = vmatprep.subr.bf16.mxu1 %v15943_v23 }
 0xcec   : > { %9254 = vmatpush1.bf16.msra.mxu0 %v9253_v10 }
 0xced   : > { %9256 = vmatprep.subr.bf16.mxu0 %v9255_v60 }
 0xcf0   : > { %9258 = vmatpush1.bf16.msra.mxu0 %v9257_v30 }
 0xcf1   : > { %9260 = vmatprep.subr.bf16.mxu0 %v9259_v42 }
 0xd25   : > { %v5920_v31 = vpop.f32.mrb[192].mxu0 }
 0xd26   : > { %v5922_v61 = vpop.f32.mrb[193].mxu0  ;;  %v5921_v47 = vadd.f32 %v5920_v31, %v15878_v45 }
 0xd27   : > { %v5923_v24 = vadd.f32 %v5922_v61, %v15882_v21  ;;  %v7924_v61 = vld [vmem:[%s13306_s30 + $0x268] sm:$0xff] }
 0xd28   : > { %v6241_v57 = vadd.f32 %v7911_v38, %v5921_v47  ;;  %v7928_v47 = vld [vmem:[%s13306_s30 + $0x288] sm:$0xff] }
 0xd29   : > { %v5926_v32 = vpop.f32.mrb[194].mxu0  ;;  %v6242_v17 = vadd.f32 %v7912_v33, %v5923_v24  ;;  %v15973_v24 = vpack.c.bf16 %v6879_v12, %v6877_v25  ;;  %v6889_v12 = vld [vmem:[%s16733_s16 + $0xc8] sm:$0xff] }
 0xd2a   : > { %v5928_v35 = vpop.f32.mrb[195].mxu0  ;;  %v5927_v11 = vadd.f32 %v5926_v32, %v15878_v45  ;;  %v7975_v2 = vmul.f32 -1.442695, %v6241_v57  ;;  %v6883_v57 = vld [vmem:[%s16733_s16 + $0x98] sm:$0xff] }
 0xd2b   : > { %v5929_v7 = vadd.f32 %v5928_v35, %v15882_v21  ;;  %v7976_v18 = vmul.f32 -1.442695, %v6242_v17 }
 0xd2c   : > { %v6245_v34 = vadd.f32 %v7915_v14, %v5927_v11  ;;  %9828 = vpow2.f32 %v7975_v2  ;;  %v7935_v2 = vld [vmem:[%s13306_s30 + $0x2c0] sm:$0xff] }
 0xd2d   : > { %v5932_v16 = vpop.f32.mrb[196].mxu0  ;;  %v6246_v5 = vadd.f32 %v7916_v27, %v5929_v7  ;;  %9830 = vpow2.f32 %v7976_v18  ;;  %v7932_v27 = vld [vmem:[%s13306_s30 + $0x2a8] sm:$0xff] }
 0xd2e   : > { %v5934_v43 = vpop.f32.mrb[197].mxu0  ;;  %v5933_v62 = vadd.f32 %v5932_v16, %v15878_v45  ;;  %v7977_v10 = vmul.f32 -1.442695, %v6245_v34  ;;  %v7927_v16 = vld [vmem:[%s13306_s30 + $0x280] sm:$0xff]  ;;  %v7936_v18 = vld [vmem:[%s13306_s30 + $0x2c8] sm:$0xff] }
 0xd2f   : > { %v5935_v46 = vadd.f32 %v5934_v43, %v15882_v21  ;;  %v7978_v30 = vmul.f32 -1.442695, %v6246_v5 }
 0xd30   : > { %v6249_v36 = vadd.f32 %v7919_v48, %v5933_v62  ;;  %9832 = vpow2.f32 %v7977_v10 }
 0xd31   : > { %v5938_v52 = vpop.f32.mrb[198].mxu0  ;;  %v6250_v31 = vadd.f32 %v7920_v44, %v5935_v46  ;;  %9834 = vpow2.f32 %v7978_v30  ;;  %v6891_v30 = vld [vmem:[%s16733_s16 + $0xd8] sm:$0xff] }
 0xd32   : > { %v5940_v9 = vpop.f32.mrb[199].mxu0  ;;  %v5939_v8 = vadd.f32 %v5938_v52, %v15878_v45  ;;  %v7979_v35 = vmul.f32 -1.442695, %v6249_v36  ;;  %v15967_v52 = vpack.c.bf16 %v6874_v41, %v6872_v26 }
 0xd33   : > { %v5941_v20 = vadd.f32 %v5940_v9, %v15882_v21  ;;  %v7980_v11 = vmul.f32 -1.442695, %v6250_v31 }
 0xd34   : > { %v6253_v9 = vadd.f32 %v7923_v0, %v5939_v8  ;;  %9373 = vmatpush1.bf16.msra.mxu1 %v15967_v52  ;;  %9836 = vpow2.f32 %v7979_v35 }
 0xd35   : > { %v5944_v3 = vpop.f32.mrb[200].mxu0  ;;  %9358 = vmatprep.subr.bf16.mxu1 %v15973_v24  ;;  %9838 = vpow2.f32 %v7980_v11 }
 0xd36   : > { %v5946_v54 = vpop.f32.mrb[201].mxu0  ;;  %v5945_v32 = vadd.f32 %v5944_v3, %v15878_v45  ;;  %v6876_v3 = vld [vmem:[%s16733_s16 + $0x60] sm:$0xff]  ;;  %v7981_v14 = vmul.f32 -1.442695, %v6253_v9  ;;  %v9829_v46 = vpop.eup %9828 }
 0xd37   : > { %v5947_v43 = vadd.f32 %v5946_v54, %v15882_v21  ;;  %v6254_v54 = vadd.f32 %v7924_v61, %v5941_v20  ;;  %v15994_v58 = vpack.c.bf16 %v6878_v56, %v6876_v3  ;;  %v6886_v20 = vld [vmem:[%s16733_s16 + $0xb0] sm:$0xff]  ;;  %v9831_v31 = vpop.eup %9830  ;;  %v6401_v61 = vadd.f32 1.0, %v9829_v46  ;;  %v7939_v9 = vld [vmem:[%s13306_s30 + $0x2e0] sm:$0xff] }
 0xd38   : > { %v6257_v42 = vadd.f32 %v7927_v16, %v5945_v32  ;;  %9840 = vpow2.f32 %v7981_v14 }
 0xd39   : > { %v5950_v15 = vpop.f32.mrb[202].mxu0  ;;  %v6258_v40 = vadd.f32 %v7928_v47, %v5947_v43  ;;  %v7982_v4 = vmul.f32 -1.442695, %v6254_v54  ;;  %9374 = vmatpush1.bf16.msra.mxu1 %v15994_v58  ;;  %v7940_v54 = vld [vmem:[%s13306_s30 + $0x2e8] sm:$0xff] }
 0xd3a   : > { %v15898_v13 = vpop.f32.mrb[203].mxu0  ;;  %v5951_v38 = vadd.f32 %v5950_v15, %v15878_v45  ;;  %v6881_v15 = vld [vmem:[%s16733_s16 + $0x88] sm:$0xff]  ;;  %v7983_v63 = vmul.f32 -1.442695, %v6257_v42  ;;  %v9833_v16 = vpop.eup %9832 }
 0xd3b   : > { %v5953_v59 = vadd.f32 %v15898_v13, %v15882_v21  ;;  %v16001_v48 = vpack.c.bf16 %v6883_v57, %v6881_v15  ;;  %v6882_v13 = vld [vmem:[%s16733_s16 + $0x90] sm:$0xff]  ;;  %v7984_v36 = vmul.f32 -1.442695, %v6258_v40  ;;  %9842 = vpow2.f32 %v7982_v4  ;;  %v9835_v3 = vpop.eup %9834  ;;  %v6893_v40 = vld [vmem:[%s16733_s16 + $0xe8] sm:$0xff] }
 0xd3c   : > { %v6261_v7 = vadd.f32 %v7931_v53, %v5951_v38  ;;  %v16023_v8 = vpack.c.bf16 %v6882_v13, %v6880_v50  ;;  %9844 = vpow2.f32 %v7983_v63  ;;  %v16055_v15 = vpack.c.bf16 %v6891_v30, %v6889_v12  ;;  %v6890_v57 = vld [vmem:[%s16733_s16 + $0xd0] sm:$0xff]  ;;  %v7943_v12 = vld [vmem:[%s13306_s30 + $0x300] sm:$0xff] }
 0xd3d   : > { %v15916_v49 = vpop.f32.mrb[204].mxu0  ;;  %9359 = vmatprep.subr.bf16.mxu1 %v16001_v48  ;;  %v6262_v44 = vadd.f32 %v7932_v27, %v5953_v59  ;;  %9846 = vpow2.f32 %v7984_v36  ;;  %v6895_v59 = vld [vmem:[%s16733_s16 + $0xf8] sm:$0xff]  ;;  %v6403_v27 = vadd.f32 1.0, %v9833_v16  ;;  %v6404_v13 = vadd.f32 1.0, %v9835_v3  ;;  %v6897_v36 = vld [vmem:[%s16733_s16 + $0x108] sm:$0xff] }
 0xd3e   : > { %v15926_v22 = vpop.f32.mrb[205].mxu0  ;;  %v5957_v62 = vadd.f32 %v15916_v49, %v15878_v45  ;;  %v6885_v49 = vld [vmem:[%s16733_s16 + $0xa8] sm:$0xff]  ;;  %v7985_v26 = vmul.f32 -1.442695, %v6261_v7  ;;  %9375 = vmatpush1.bf16.msra.mxu1 %v16023_v8  ;;  %17130 = vst [vmem:[#allocation10_spill] sm:$0xff] %v16055_v15  ;;  %v9837_v11 = vpop.eup %9836 }
 0xd3f   : > { %v5959_v5 = vadd.f32 %v15926_v22, %v15882_v21  ;;  %v16027_v0 = vpack.c.bf16 %v6887_v6, %v6885_v49  ;;  %v6884_v22 = vld [vmem:[%s16733_s16 + $0xa0] sm:$0xff]  ;;  %v7986_v43 = vmul.f32 -1.442695, %v6262_v44  ;;  %v6894_v6 = vld [vmem:[%s16733_s16 + $0xf0] sm:$0xff]  ;;  %v9839_v63 = vpop.eup %9838  ;;  %v6899_v44 = vld [vmem:[%s16733_s16 + $0x118] sm:$0xff] }
 0xd40   : > { %v6265_v41 = vadd.f32 %v7935_v2, %v5957_v62  ;;  %v16050_v38 = vpack.c.bf16 %v6886_v20, %v6884_v22  ;;  %9848 = vpow2.f32 %v7985_v26  ;;  %v16077_v2 = vpack.c.bf16 %v6895_v59, %v6893_v40  ;;  %v6892_v49 = vld [vmem:[%s16733_s16 + $0xe0] sm:$0xff] }
 0xd41   : > { %v15941_v55 = vpop.f32.mrb[206].mxu0  ;;  %v6266_v32 = vadd.f32 %v7936_v18, %v5959_v5  ;;  %9360 = vmatprep.subr.bf16.mxu1 %v16027_v0  ;;  %9850 = vrcp.f32 %v6401_v61  ;;  %v6405_v5 = vadd.f32 1.0, %v9837_v11 }
 0xd42   : > { %v15953_v60 = vpop.f32.mrb[207].mxu0  ;;  %v5963_v35 = vadd.f32 %v15941_v55, %v15878_v45  ;;  %v7987_v56 = vmul.f32 -1.442695, %v6265_v41  ;;  %v6888_v55 = vld [vmem:[%s16733_s16 + $0xc0] sm:$0xff]  ;;  %9376 = vmatpush1.bf16.msra.mxu1 %v16050_v38  ;;  %9852 = vpow2.f32 %v7986_v43  ;;  %17132 = vst [vmem:[#allocation11_spill] sm:$0xff] %v16077_v2  ;;  %v9841_v18 = vpop.eup %9840  ;;  %v16105_v43 = vpack.c.bf16 %v6899_v44, %v6897_v36  ;;  %v7948_v44 = vld [vmem:[%s13306_s30 + $0x328] sm:$0xff] }
 0xd43   : > { %v5965_v47 = vadd.f32 %v15953_v60, %v15882_v21  ;;  %v6402_v60 = vadd.f32 1.0, %v9831_v31  ;;  %v7988_v14 = vmul.f32 -1.442695, %v6266_v32  ;;  %9361 = vmatprep.subr.bf16.mxu1 %v16055_v15  ;;  %v16073_v50 = vpack.c.bf16 %v6890_v57, %v6888_v55  ;;  %v7934_v15 = vld [vmem:[%s13306_s30 + $0x2b8] sm:$0xff] }
 0xd44   : > { %v6269_v7 = vadd.f32 %v7939_v9, %v5963_v35  ;;  %9854 = vpow2.f32 %v7987_v56  ;;  %v16100_v31 = vpack.c.bf16 %v6894_v6, %v6892_v49  ;;  %v6406_v32 = vadd.f32 1.0, %v9839_v63  ;;  %v7944_v35 = vld [vmem:[%s13306_s30 + $0x308] sm:$0xff]  ;;  %17134 = vst [vmem:[#allocation13_spill] sm:$0xff] %v16105_v43  ;;  %v6898_v9 = vld [vmem:[%s16733_s16 + $0x110] sm:$0xff] }
 0xd45   : > { %v15971_v33 = vpop.f32.mrb[208].mxu0  ;;  %v6270_v62 = vadd.f32 %v7940_v54, %v5965_v47  ;;  %17131 = vst [vmem:[#allocation9_spill] sm:$0xff] %v16073_v50  ;;  %9856 = vrcp.f32 %v6402_v60  ;;  %v9843_v22 = vpop.eup %9842  ;;  %v6901_v56 = vld [vmem:[%s16733_s16 + $0x128] sm:$0xff]  ;;  %v6903_v54 = vld [vmem:[%s16733_s16 + $0x138] sm:$0xff]  ;;  %v6902_v63 = vld [vmem:[%s16733_s16 + $0x130] sm:$0xff] }
 0xd46   : > { %v15982_v19 = vpop.f32.mrb[209].mxu0  ;;  %9377 = vmatpush1.bf16.msra.mxu1 %v16073_v50  ;;  %9858 = vpow2.f32 %v7988_v14  ;;  %v7989_v26 = vmul.f32 -1.442695, %v6269_v7  ;;  %v5969_v41 = vadd.f32 %v15971_v33, %v15878_v45  ;;  %17133 = vst [vmem:[#allocation12_spill] sm:$0xff] %v16100_v31  ;;  %v9845_v61 = vpop.eup %9844  ;;  %v6896_v33 = vld [vmem:[%s16733_s16 + $0x100] sm:$0xff]  ;;  %v6408_v57 = vadd.f32 1.0, %v9843_v22 }
 0xd47   : > { %9362 = vmatprep.subr.bf16.mxu1 %v16077_v2  ;;  %9860 = vrcp.f32 %v6403_v27  ;;  %v7990_v20 = vmul.f32 -1.442695, %v6270_v62  ;;  %v5971_v30 = vadd.f32 %v15982_v19, %v15882_v21  ;;  %v9847_v47 = vpop.eup %9846  ;;  %v6407_v19 = vadd.f32 1.0, %v9841_v18  ;;  %v7947_v14 = vld [vmem:[%s13306_s30 + $0x320] sm:$0xff] }
 0xd48   : > { %9862 = vrcp.f32 %v6404_v13  ;;  %v6273_v11 = vadd.f32 %v7943_v12, %v5969_v41  ;;  %v6409_v40 = vadd.f32 1.0, %v9845_v61  ;;  %v16126_v7 = vpack.c.bf16 %v6898_v9, %v6896_v33  ;;  %v6907_v41 = vld [vmem:[%s16733_s16 + $0x158] sm:$0xff] }
 0xd49   : > { %v15999_v17 = vpop.f32.mrb[210].mxu0  ;;  %9864 = vrcp.f32 %v6405_v5  ;;  %v6274_v59 = vadd.f32 %v7944_v35, %v5971_v30  ;;  %v6410_v62 = vadd.f32 1.0, %v9847_v47  ;;  %v16134_v6 = vpack.c.bf16 %v6903_v54, %v6901_v56  ;;  %v7951_v30 = vld [vmem:[%s13306_s30 + $0x340] sm:$0xff]  ;;  %v7952_v35 = vld [vmem:[%s13306_s30 + $0x348] sm:$0xff] }
 0xd4a   : > { %v16010_v34 = vpop.f32.mrb[211].mxu0  ;;  %9378 = vmatpush1.bf16.msra.mxu1 %v16100_v31  ;;  %v9849_v55 = vpop.eup %9848  ;;  %9866 = vpow2.f32 %v7989_v26  ;;  %v5975_v60 = vadd.f32 %v15999_v17, %v15878_v45  ;;  %17135 = vst [vmem:[#allocation14_spill] sm:$0xff] %v16126_v7  ;;  %v6900_v17 = vld [vmem:[%s16733_s16 + $0x120] sm:$0xff]  ;;  %v6905_v26 = vld [vmem:[%s16733_s16 + $0x148] sm:$0xff] }
 0xd4b   : > { %9363 = vmatprep.subr.bf16.mxu1 %v16105_v43  ;;  %9868 = vpow2.f32 %v7990_v20  ;;  %v16128_v27 = vpop.eup %9850  ;;  %v5977_v13 = vadd.f32 %v16010_v34, %v15882_v21  ;;  %17136 = vst [vmem:[#allocation15_spill] sm:$0xff] %v16134_v6  ;;  %v6411_v36 = vadd.f32 1.0, %v9849_v55  ;;  %v7991_v20 = vmul.f32 -1.442695, %v6273_v11  ;;  %v6906_v55 = vld [vmem:[%s16733_s16 + $0x150] sm:$0xff] }
 0xd4c   : > { %9870 = vrcp.f32 %v6406_v32  ;;  %v9853_v5 = vpop.eup %9852  ;;  %v6277_v12 = vadd.f32 %v7947_v14, %v5975_v60  ;;  %v7992_v32 = vmul.f32 -1.442695, %v6274_v59  ;;  %v16161_v33 = vpack.c.bf16 %v6902_v63, %v6900_v17  ;;  %v17139_v59 = vld [vmem:[#allocation41_spill] sm:$0xff] }
 0xd4d   : > { %v16025_v10 = vpop.f32.mrb[212].mxu0  ;;  %9872 = vrcp.f32 %v6407_v19  ;;  %v6412_v47 = vadd.f32 1.0, %v9853_v5  ;;  %v6278_v19 = vadd.f32 %v7948_v44, %v5977_v13  ;;  %v16165_v54 = vpack.c.bf16 %v6907_v41, %v6905_v26  ;;  %v6911_v13 = vld [vmem:[%s16733_s16 + $0x178] sm:$0xff] }
 0xd4e   : > { %v16035_v25 = vpop.f32.mrb[213].mxu0  ;;  %v5981_v34 = vadd.f32 %v16025_v10, %v15878_v45  ;;  %9379 = vmatpush1.bf16.msra.mxu1 %v16126_v7  ;;  %v9855_v22 = vpop.eup %9854  ;;  %9874 = vrcp.f32 %v6408_v57  ;;  %17137 = vst [vmem:[#allocation16_spill] sm:$0xff] %v16161_v33  ;;  %v16179_v14 = vrot.slane %v15874_v1, %v17139_v59  ;;  %v7993_v63 = vmul.f32 -1.442695, %v6277_v12  ;;  %v7922_v7 = vld [vmem:[%s13306_s30 + $0x258] sm:$0xff] }
 0xd4f   : > { %v5983_v10 = vadd.f32 %v16035_v25, %v15882_v21  ;;  %9364 = vmatprep.subr.bf16.mxu1 %v16134_v6  ;;  %v16158_v61 = vpop.eup %9856  ;;  %9876 = vrcp.f32 %v6409_v40  ;;  %17138 = vst [vmem:[#allocation17_spill] sm:$0xff] %v16165_v54  ;;  %v6904_v25 = vld [vmem:[%s16733_s16 + $0x140] sm:$0xff]  ;;  %v6413_v11 = vadd.f32 1.0, %v9855_v22 }
 0xd50   : > { %v9859_v9 = vpop.eup %9858  ;;  %9878 = vrcp.f32 %v6410_v62  ;;  %v6281_v60 = vadd.f32 %v7951_v30, %v5981_v34  ;;  %v6909_v62 = vld [vmem:[%s16733_s16 + $0x168] sm:$0xff]  ;;  %v16197_v41 = vpack.c.bf16 %v6906_v55, %v6904_v25  ;;  %v7994_v30 = vmul.f32 -1.442695, %v6278_v19 }
 0xd51   : > { %v16053_v53 = vpop.f32.mrb[214].mxu0  ;;  %v16173_v57 = vpop.eup %9860  ;;  %9880 = vrcp.f32 %v6411_v36  ;;  %v6282_v5 = vadd.f32 %v7952_v35, %v5983_v10  ;;  %v17140_v36 = vld [vmem:[#allocation42_spill] sm:$0xff]  ;;  %v6414_v26 = vadd.f32 1.0, %v9859_v9  ;;  %v16201_v10 = vpack.c.bf16 %v6911_v13, %v6909_v62  ;;  %v6913_v55 = vld [vmem:[%s16733_s16 + $0x188] sm:$0xff]  ;;  %v7913_v13 = vld [vmem:[%s13306_s30 + $0x210] sm:$0xff] }
 0xd52   : > { %v16063_v42 = vpop.f32.mrb[215].mxu0  ;;  %9380 = vmatpush1.bf16.msra.mxu1 %v16161_v33  ;;  %v16188_v17 = vpop.eup %9862  ;;  %9882 = vpow2.f32 %v7991_v20  ;;  %v16192_v44 = vrot.slane %v15874_v1, %v17140_v36  ;;  %17141 = vst [vmem:[#allocation18_spill] sm:$0xff] %v16197_v41  ;;  %v5987_v20 = vadd.f32 %v16053_v53, %v15878_v45  ;;  %v6908_v1 = vld [vmem:[%s16733_s16 + $0x160] sm:$0xff]  ;;  %v7995_v9 = vmul.f32 -1.442695, %v6281_v60  ;;  %v6915_v62 = vld [vmem:[%s16733_s16 + $0x198] sm:$0xff] }
 0xd53   : > { %9365 = vmatprep.subr.bf16.mxu1 %v16165_v54  ;;  %v16195_v34 = vpop.eup %9864  ;;  %9884 = vpow2.f32 %v7992_v32  ;;  %17142 = vst [vmem:[#allocation19_spill] sm:$0xff] %v16201_v10  ;;  %v6910_v32 = vld [vmem:[%s16733_s16 + $0x170] sm:$0xff]  ;;  %v5989_v53 = vadd.f32 %v16063_v42, %v15882_v21  ;;  %v7996_v60 = vmul.f32 -1.442695, %v6282_v5  ;;  %v7956_v42 = vld [vmem:[%s13306_s30 + $0x368] sm:$0xff]  ;;  %v7914_v36 = vld [vmem:[%s13306_s30 + $0x218] sm:$0xff]  ;;  %v16234_v6 = vpack.c.bf16 %v6915_v62, %v6913_v55 }
 0xd54   : > { %v9867_v22 = vpop.eup %9866  ;;  %9886 = vrcp.f32 %v6412_v47  ;;  %v7955_v47 = vld [vmem:[%s13306_s30 + $0x360] sm:$0xff]  ;;  %v16229_v59 = vpack.c.bf16 %v6910_v32, %v6908_v1  ;;  %v7917_v5 = vld [vmem:[%s13306_s30 + $0x230] sm:$0xff]  ;;  %v7918_v62 = vld [vmem:[%s13306_s30 + $0x238] sm:$0xff] }
 0xd55   : > { %v16075_v4 = vpop.f32.mrb[216].mxu0  ;;  %v9869_v35 = vpop.eup %9868  ;;  %9888 = vrcp.f32 %v6413_v11  ;;  %v6415_v39 = vadd.f32 1.0, %v9867_v22  ;;  %17144 = vst [vmem:[#allocation21_spill] sm:$0xff] %v16234_v6  ;;  %v6286_v1 = vadd.f32 %v7956_v42, %v5989_v53 }
 0xd56   : > { %v16085_v46 = vpop.f32.mrb[217].mxu0  ;;  %9381 = vmatpush1.bf16.msra.mxu1 %v16197_v41  ;;  %v16220_v11 = vpop.eup %9870  ;;  %9890 = vpow2.f32 %v7993_v63  ;;  %17143 = vst [vmem:[#allocation20_spill] sm:$0xff] %v16229_v59  ;;  %v6416_v41 = vadd.f32 1.0, %v9869_v35  ;;  %v6285_v63 = vadd.f32 %v7955_v47, %v5987_v20  ;;  %v6917_v35 = vld [vmem:[%s16733_s16 + $0x1a8] sm:$0xff]  ;;  %v6919_v47 = vld [vmem:[%s16733_s16 + $0x1b8] sm:$0xff] }
 0xd57   : > { %9366 = vmatprep.subr.bf16.mxu1 %v16201_v10  ;;  %v16226_v37 = vpop.eup %9872  ;;  %9892 = vrcp.f32 %v6414_v26  ;;  %v6914_v26 = vld [vmem:[%s16733_s16 + $0x190] sm:$0xff]  ;;  %v5993_v10 = vadd.f32 %v16075_v4, %v15878_v45 }
 0xd58   : > { %v16231_v54 = vpop.eup %9874  ;;  %9894 = vpow2.f32 %v7994_v30 }
 0xd59   : > { %v16103_v16 = vpop.f32.mrb[218].mxu0  ;;  %v16242_v22 = vpop.eup %9876  ;;  %9896 = vpow2.f32 %v7995_v9 }
 0xd5a   : > { %v16113_v3 = vpop.f32.mrb[219].mxu0  ;;  %9382 = vmatpush1.bf16.msra.mxu1 %v16229_v59  ;;  %v16252_v55 = vpop.eup %9878  ;;  %9898 = vpow2.f32 %v7996_v60  ;;  %v7997_v59 = vmul.f32 -1.442695, %v6285_v63  ;;  %v6921_v63 = vld [vmem:[%s16733_s16 + $0x1c8] sm:$0xff] }
 0xd5b   : > { %9367 = vmatprep.subr.bf16.mxu1 %v16234_v6  ;;  %9900 = vrcp.f32 %v6415_v39  ;;  %v6918_v39 = vld [vmem:[%s16733_s16 + $0x1b0] sm:$0xff] }
 0xd5c   : > { %9902 = vrcp.f32 %v6416_v41 }
 0xd5d   : > { %v16132_v49 = vpop.f32.mrb[220].mxu0 }
 0xd5e   : > { %v16145_v18 = vpop.f32.mrb[221].mxu0 }
 0xd61   : > { %v16163_v56 = vpop.f32.mrb[222].mxu0 }
 0xd62   : > { %v16175_v40 = vpop.f32.mrb[223].mxu0 }
 0xd65   : > { %v6081_v12 = vpop.f32.mrb[224].mxu0 }
 0xd66   : > { %v6082_v19 = vadd.f32 %v6081_v12, %v16179_v14  ;;  %v6083_v25 = vpop.f32.mrb[225].mxu0 }
 0xd67   : > { %v6084_v12 = vadd.f32 %v6083_v25, %v16192_v44  ;;  %v6912_v25 = vld [vmem:[%s16733_s16 + $0x180] sm:$0xff] }
 0xd68   : > { %v6243_v32 = vadd.f32 %v7913_v13, %v6082_v19  ;;  %v16259_v42 = vpack.c.bf16 %v6914_v26, %v6912_v25  ;;  %v7998_v25 = vmul.f32 -1.442695, %v6286_v1  ;;  %v7959_v26 = vld [vmem:[%s13306_s30 + $0x380] sm:$0xff] }
 0xd69   : > { %v6087_v33 = vpop.f32.mrb[226].mxu0  ;;  %v6244_v9 = vadd.f32 %v7914_v36, %v6084_v12  ;;  %v7921_v36 = vld [vmem:[%s13306_s30 + $0x250] sm:$0xff]  ;;  %v16264_v12 = vpack.c.bf16 %v6919_v47, %v6917_v35 }
 0xd6a   : > { %v6088_v30 = vadd.f32 %v6087_v33, %v16179_v14  ;;  %v6089_v20 = vpop.f32.mrb[227].mxu0  ;;  %v16256_v33 = vpop.eup %9880  ;;  %17145 = vst [vmem:[#allocation22_spill] sm:$0xff] %v16259_v42  ;;  %9904 = vtanh.f32 %v6243_v32  ;;  %9383 = vmatpush1.bf16.msra.mxu1 %v16259_v42 }
 0xd6b   : > { %v6090_v53 = vadd.f32 %v6089_v20, %v16192_v44  ;;  %v9883_v13 = vpop.eup %9882  ;;  %17146 = vst [vmem:[#allocation23_spill] sm:$0xff] %v16264_v12  ;;  %v6916_v20 = vld [vmem:[%s16733_s16 + $0x1a0] sm:$0xff]  ;;  %9906 = vtanh.f32 %v6244_v9  ;;  %9368 = vmatprep.subr.bf16.mxu1 %v16264_v12  ;;  %v6289_v9 = vadd.f32 %v7959_v26, %v5993_v10 }
 0xd6c   : > { %v6247_v19 = vadd.f32 %v7917_v5, %v6088_v30  ;;  %v9885_v5 = vpop.eup %9884  ;;  %v6923_v30 = vld [vmem:[%s16733_s16 + $0x1d8] sm:$0xff]  ;;  %v16290_v43 = vpack.c.bf16 %v6918_v39, %v6916_v20  ;;  %v6417_v31 = vadd.f32 1.0, %v9883_v13 }
 0xd6d   : > { %v6093_v60 = vpop.f32.mrb[228].mxu0  ;;  %v16281_v35 = vpop.eup %9886  ;;  %v6248_v1 = vadd.f32 %v7918_v62, %v6090_v53  ;;  %v7960_v53 = vld [vmem:[%s13306_s30 + $0x388] sm:$0xff]  ;;  %v16294_v2 = vpack.c.bf16 %v6923_v30, %v6921_v63  ;;  %v6418_v50 = vadd.f32 1.0, %v9885_v5  ;;  %v7926_v13 = vld [vmem:[%s13306_s30 + $0x278] sm:$0xff]  ;;  %v7999_v26 = vmul.f32 -1.442695, %v6289_v9 }
 0xd6e   : > { %v6094_v41 = vadd.f32 %v6093_v60, %v16179_v14  ;;  %v6095_v4 = vpop.f32.mrb[229].mxu0  ;;  %v16285_v47 = vpop.eup %9888  ;;  %v5995_v60 = vadd.f32 %v16085_v46, %v15882_v21  ;;  %9908 = vtanh.f32 %v6247_v19  ;;  %17147 = vst [vmem:[#allocation24_spill] sm:$0xff] %v16290_v43  ;;  %9384 = vmatpush1.bf16.msra.mxu1 %v16290_v43  ;;  %v7929_v63 = vld [vmem:[%s13306_s30 + $0x290] sm:$0xff] }
 0xd6f   : > { %v6096_v32 = vadd.f32 %v6095_v4, %v16192_v44  ;;  %v9891_v42 = vpop.eup %9890  ;;  %9910 = vpow2.f32 %v7997_v59  ;;  %v7925_v4 = vld [vmem:[%s13306_s30 + $0x270] sm:$0xff]  ;;  %17148 = vst [vmem:[#allocation25_spill] sm:$0xff] %v16294_v2  ;;  %9369 = vmatprep.subr.bf16.mxu1 %v16294_v2 }
 0xd70   : > { %v6251_v6 = vadd.f32 %v7921_v36, %v6094_v41  ;;  %v16296_v12 = vpop.eup %9892  ;;  %9912 = vpow2.f32 %v7998_v25  ;;  %v6290_v39 = vadd.f32 %v7960_v53, %v5995_v60  ;;  %v5999_v41 = vadd.f32 %v16103_v16, %v15878_v45 }
 0xd71   : > { %v6099_v62 = vpop.f32.mrb[230].mxu0  ;;  %v16300_v36 = vpop.eup %9894  ;;  %9914 = vtanh.f32 %v6248_v1  ;;  %v6252_v59 = vadd.f32 %v7922_v7, %v6096_v32  ;;  %v7963_v1 = vld [vmem:[%s13306_s30 + $0x3a0] sm:$0xff] }
 0xd72   : > { %v6100_v46 = vadd.f32 %v6099_v62, %v16179_v14  ;;  %v6101_v19 = vpop.f32.mrb[231].mxu0  ;;  %v16305_v20 = vpop.eup %9896  ;;  %9916 = vtanh.f32 %v6251_v6  ;;  %v7930_v6 = vld [vmem:[%s13306_s30 + $0x298] sm:$0xff]  ;;  %v8000_v16 = vmul.f32 -1.442695, %v6290_v39 }
 0xd73   : > { %v6102_v10 = vadd.f32 %v6101_v19, %v16192_v44  ;;  %v16307_v25 = vpop.eup %9898  ;;  %9918 = vrcp.f32 %v6417_v31 }
 0xd74   : > { %v6255_v5 = vadd.f32 %v7925_v4, %v6100_v46  ;;  %v16312_v30 = vpop.eup %9900  ;;  %9920 = vrcp.f32 %v6418_v50  ;;  %v6293_v50 = vadd.f32 %v7963_v1, %v5999_v41 }
 0xd75   : > { %v6105_v7 = vpop.f32.mrb[232].mxu0  ;;  %v6256_v32 = vadd.f32 %v7926_v13, %v6102_v10  ;;  %v16317_v53 = vpop.eup %9902  ;;  %9922 = vtanh.f32 %v6252_v59  ;;  %v7933_v13 = vld [vmem:[%s13306_s30 + $0x2b0] sm:$0xff] }
 0xd76   : > { %v6106_v62 = vadd.f32 %v6105_v7, %v16179_v14  ;;  %v6107_v60 = vpop.f32.mrb[233].mxu0  ;;  %v9905_v9 = vpop.eup %9904  ;;  %9924 = vtanh.f32 %v6255_v5 }
 0xd77   : > { %v6108_v31 = vadd.f32 %v6107_v60, %v16192_v44  ;;  %v9907_v46 = vpop.eup %9906  ;;  %9926 = vpow2.f32 %v7999_v26  ;;  %v6529_v7 = vmul.f32 %v9905_v9, %v16128_v27  ;;  %v6419_v27 = vadd.f32 1.0, %v9891_v42  ;;  %v7937_v9 = vld [vmem:[%s13306_s30 + $0x2d0] sm:$0xff]  ;;  %v7938_v42 = vld [vmem:[%s13306_s30 + $0x2d8] sm:$0xff] }
 0xd78   : > { %v6259_v4 = vadd.f32 %v7929_v63, %v6106_v62  ;;  %v9909_v2 = vpop.eup %9908  ;;  %9928 = vtanh.f32 %v6256_v32  ;;  %v6530_v43 = vmul.f32 %v9907_v46, %v16158_v61  ;;  %v6001_v63 = vadd.f32 %v16113_v3, %v15882_v21  ;;  %v7964_v62 = vld [vmem:[%s13306_s30 + $0x3a8] sm:$0xff] }
 0xd79   : > { %v6260_v19 = vadd.f32 %v7930_v6, %v6108_v31  ;;  %v6111_v10 = vpop.f32.mrb[234].mxu0  ;;  %v16325_v39 = vpop.eup %9910  ;;  %v6531_v26 = vmul.f32 %v9909_v2, %v16173_v57  ;;  %v8001_v32 = vmul.f32 -1.442695, %v6293_v50  ;;  %v6420_v50 = vadd.f32 1.0, %v16300_v36 }
 0xd7a   : > { %v6112_v59 = vadd.f32 %v6111_v10, %v16179_v14  ;;  %v6113_v60 = vpop.f32.mrb[235].mxu0  ;;  %9930 = vtanh.f32 %v6259_v4  ;;  %v16329_v41 = vpop.eup %9912  ;;  %6703 = vmatprep.mubr.f32.mxu0 %v6530_v43 }
 0xd7b   : > { %v6114_v5 = vadd.f32 %v6113_v60, %v16192_v44  ;;  %9932 = vtanh.f32 %v6260_v19  ;;  %v9915_v1 = vpop.eup %9914  ;;  %6704 = vmatmul.mubr.f32.vlgmr.msra.gmra.mrb[128].mxu0 %v6529_v7  ;;  %v6294_v19 = vadd.f32 %v7964_v62, %v6001_v63  ;;  %v6007_v60 = vadd.f32 %v16145_v18, %v15882_v21  ;;  %v7942_v63 = vld [vmem:[%s13306_s30 + $0x2f8] sm:$0xff] }
 0xd7c   : > { %v6263_v61 = vadd.f32 %v7933_v13, %v6112_v59  ;;  %9934 = vpow2.f32 %v8000_v16  ;;  %v9917_v4 = vpop.eup %9916  ;;  %v6532_v2 = vmul.f32 %v9915_v1, %v16188_v17  ;;  %9262 = vmatpush1.bf16.msra.mxu0 %v15913_v28  ;;  %v6005_v16 = vadd.f32 %v16132_v49, %v15878_v45  ;;  %v7967_v28 = vld [vmem:[%s13306_s30 + $0x3c0] sm:$0xff]  ;;  %v7941_v59 = vld [vmem:[%s13306_s30 + $0x2f0] sm:$0xff] }
 0xd7d   : > { %v6264_v6 = vadd.f32 %v7934_v15, %v6114_v5  ;;  %v6117_v31 = vpop.f32.mrb[236].mxu0  ;;  %v16339_v43 = vpop.eup %9918  ;;  %v6533_v46 = vmul.f32 %v9917_v4, %v16195_v34  ;;  %9264 = vmatprep.subr.bf16.mxu0 %v15918_v51  ;;  %v6421_v49 = vadd.f32 1.0, %v16305_v20  ;;  %v8002_v62 = vmul.f32 -1.442695, %v6294_v19 }
 0xd7e   : > { %9936 = vtanh.f32 %v6263_v61  ;;  %v6118_v57 = vadd.f32 %v6117_v31, %v16179_v14  ;;  %v6119_v3 = vpop.f32.mrb[237].mxu0  ;;  %v16346_v17 = vpop.eup %9920  ;;  %6709 = vmatprep.mubr.f32.mxu0 %v6532_v2  ;;  %v6297_v61 = vadd.f32 %v7967_v28, %v6005_v16  ;;  %v6011_v31 = vadd.f32 %v16163_v56, %v15878_v45  ;;  %v7946_v16 = vld [vmem:[%s13306_s30 + $0x318] sm:$0xff] }
 0xd7f   : > { %9938 = vtanh.f32 %v6264_v6  ;;  %v6120_v15 = vadd.f32 %v6119_v3, %v16192_v44  ;;  %v9923_v13 = vpop.eup %9922  ;;  %6710 = vmatmul.mubr.f32.gmra.mrb[130].mxu0 %v6531_v26  ;;  %v7968_v26 = vld [vmem:[%s13306_s30 + $0x3c8] sm:$0xff]  ;;  %v7971_v3 = vld [vmem:[%s13306_s30 + $0x3e0] sm:$0xff]  ;;  %v6423_v19 = vadd.f32 1.0, %v16325_v39 }
 0xd80   : > { %9940 = vrcp.f32 %v6419_v27  ;;  %v6267_v10 = vadd.f32 %v7937_v9, %v6118_v57  ;;  %v9925_v51 = vpop.eup %9924  ;;  %v6534_v36 = vmul.f32 %v9923_v13, %v16220_v11  ;;  %9266 = vmatpush1.bf16.msra.mxu0 %v15938_v29  ;;  %v6422_v11 = vadd.f32 1.0, %v16307_v25  ;;  %v7972_v13 = vld [vmem:[%s13306_s30 + $0x3e8] sm:$0xff] }
 0xd81   : > { %9942 = vpow2.f32 %v8001_v32  ;;  %v6268_v7 = vadd.f32 %v7938_v42, %v6120_v15  ;;  %v6123_v34 = vpop.f32.mrb[238].mxu0  ;;  %v16358_v20 = vpop.eup %9926  ;;  %v6535_v32 = vmul.f32 %v9925_v51, %v16226_v37  ;;  %9268 = vmatprep.subr.bf16.mxu0 %v15943_v23  ;;  %v7945_v23 = vld [vmem:[%s13306_s30 + $0x310] sm:$0xff]  ;;  %v6298_v57 = vadd.f32 %v7968_v26, %v6007_v60 }
 0xd82   : > { %9944 = vtanh.f32 %v6267_v10  ;;  %v6124_v5 = vadd.f32 %v6123_v34, %v16179_v14  ;;  %v6125_v27 = vpop.f32.mrb[239].mxu0  ;;  %v9929_v18 = vpop.eup %9928  ;;  %6715 = vmatprep.mubr.f32.mxu0 %v6534_v36  ;;  %v8003_v56 = vmul.f32 -1.442695, %v6297_v61  ;;  %v6301_v10 = vadd.f32 %v7971_v3, %v6011_v31  ;;  %v7949_v34 = vld [vmem:[%s13306_s30 + $0x330] sm:$0xff] }
 0xd83   : > { %9946 = vtanh.f32 %v6268_v7  ;;  %v6126_v1 = vadd.f32 %v6125_v27, %v16192_v44  ;;  %6716 = vmatmul.mubr.f32.gmra.mrb[132].mxu0 %v6533_v46  ;;  %v6536_v37 = vmul.f32 %v9929_v18, %v16231_v54  ;;  %v8004_v36 = vmul.f32 -1.442695, %v6298_v57  ;;  %v7953_v26 = vld [vmem:[%s13306_s30 + $0x350] sm:$0xff] }
 0xd84   : > { %9948 = vrcp.f32 %v6420_v50  ;;  %v6271_v29 = vadd.f32 %v7941_v59, %v6124_v5  ;;  %v9931_v6 = vpop.eup %9930  ;;  %9270 = vmatpush1.bf16.msra.mxu0 %v15967_v52  ;;  %v6013_v52 = vadd.f32 %v16175_v40, %v15882_v21  ;;  %v7950_v21 = vld [vmem:[%s13306_s30 + $0x338] sm:$0xff]  ;;  %v8005_v61 = vmul.f32 -1.442695, %v6301_v10 }
 0xd85   : > { %9950 = vrcp.f32 %v6421_v49  ;;  %v6272_v9 = vadd.f32 %v7942_v63, %v6126_v1  ;;  %v6129_v4 = vpop.f32.mrb[240].mxu0  ;;  %v9933_v2 = vpop.eup %9932  ;;  %v6537_v15 = vmul.f32 %v9931_v6, %v16242_v22  ;;  %6721 = vmatprep.mubr.f32.mxu0 %v6536_v37  ;;  %9272 = vmatprep.subr.bf16.mxu0 %v15973_v24 }
 0xd86   : > { %9952 = vtanh.f32 %v6271_v29  ;;  %v6130_v25 = vadd.f32 %v6129_v4, %v16179_v14  ;;  %v6131_v42 = vpop.f32.mrb[241].mxu0  ;;  %v16374_v45 = vpop.eup %9934  ;;  %v6538_v46 = vmul.f32 %v9933_v2, %v16252_v55  ;;  %v6302_v5 = vadd.f32 %v7972_v13, %v6013_v52 }
 0xd87   : > { %9954 = vtanh.f32 %v6272_v9  ;;  %v6132_v54 = vadd.f32 %v6131_v42, %v16192_v44  ;;  %6722 = vmatmul.mubr.f32.gmra.mrb[134].mxu0 %v6535_v32  ;;  %v6424_v4 = vadd.f32 1.0, %v16329_v41 }
 0xd88   : > { %v9937_v50 = vpop.eup %9936  ;;  %9956 = vrcp.f32 %v6422_v11  ;;  %v6275_v22 = vadd.f32 %v7945_v23, %v6130_v25  ;;  %6727 = vmatprep.mubr.f32.mxu0 %v6538_v46  ;;  %9274 = vmatpush1.bf16.msra.mxu0 %v15994_v58  ;;  %v7954_v11 = vld [vmem:[%s13306_s30 + $0x358] sm:$0xff]  ;;  %v8006_v31 = vmul.f32 -1.442695, %v6302_v5 }
 0xd89   : > { %v9939_v28 = vpop.eup %9938  ;;  %9958 = vpow2.f32 %v8002_v62  ;;  %v6276_v49 = vadd.f32 %v7946_v16, %v6132_v54  ;;  %v6135_v7 = vpop.f32.mrb[242].mxu0  ;;  %v6539_v55 = vmul.f32 %v9937_v50, %v16256_v33  ;;  %9276 = vmatprep.subr.bf16.mxu0 %v16001_v48  ;;  %v7958_v25 = vld [vmem:[%s13306_s30 + $0x378] sm:$0xff]  ;;  %v6426_v50 = vadd.f32 1.0, %v16374_v45 }
 0xd8a   : > { %v16385_v24 = vpop.eup %9940  ;;  %9960 = vtanh.f32 %v6275_v22  ;;  %v6136_v39 = vadd.f32 %v6135_v7, %v16179_v14  ;;  %v6137_v59 = vpop.f32.mrb[243].mxu0  ;;  %v6540_v40 = vmul.f32 %v9939_v28, %v16281_v35 }
 0xd8b   : > { %v16391_v51 = vpop.eup %9942  ;;  %9962 = vtanh.f32 %v6276_v49  ;;  %v6138_v60 = vadd.f32 %v6137_v59, %v16192_v44  ;;  %6728 = vmatmul.mubr.f32.gmra.mrb[136].mxu0 %v6537_v15  ;;  %v17149_v15 = vld [vmem:[#allocation10_spill] sm:$0xff]  ;;  %v17150_v49 = vld [vmem:[#allocation9_spill] sm:$0xff] }
 0xd8c   : > { %v9945_v33 = vpop.eup %9944  ;;  %9964 = vpow2.f32 %v8003_v56  ;;  %v6279_v27 = vadd.f32 %v7949_v34, %v6136_v39  ;;  %6733 = vmatprep.mubr.f32.mxu0 %v6540_v40  ;;  %9278 = vmatpush1.bf16.msra.mxu0 %v16023_v8  ;;  %v7957_v8 = vld [vmem:[%s13306_s30 + $0x370] sm:$0xff]  ;;  %v6425_v56 = vadd.f32 1.0, %v16358_v20  ;;  %v7962_v20 = vld [vmem:[%s13306_s30 + $0x398] sm:$0xff]  ;;  %v17151_v34 = vld [vmem:[#allocation11_spill] sm:$0xff] }
 0xd8d   : > { %v9947_v63 = vpop.eup %9946  ;;  %9966 = vrcp.f32 %v6423_v19  ;;  %v6280_v35 = vadd.f32 %v7950_v21, %v6138_v60  ;;  %v6141_v58 = vpop.f32.mrb[244].mxu0  ;;  %v6541_v1 = vmul.f32 %v9945_v33, %v16285_v47  ;;  %9280 = vmatprep.subr.bf16.mxu0 %v16027_v0  ;;  %v7965_v60 = vld [vmem:[%s13306_s30 + $0x3b0] sm:$0xff] }
 0xd8e   : > { %v16397_v32 = vpop.eup %9948  ;;  %9968 = vtanh.f32 %v6279_v27  ;;  %v6142_v48 = vadd.f32 %v6141_v58, %v16179_v14  ;;  %v6143_v18 = vpop.f32.mrb[245].mxu0  ;;  %v6542_v62 = vmul.f32 %v9947_v63, %v16296_v12  ;;  %v7966_v63 = vld [vmem:[%s13306_s30 + $0x3b8] sm:$0xff] }
 0xd8f   : > { %v16403_v29 = vpop.eup %9950  ;;  %9970 = vtanh.f32 %v6280_v35  ;;  %v6144_v6 = vadd.f32 %v6143_v18, %v16192_v44  ;;  %6734 = vmatmul.mubr.f32.gmra.mrb[138].mxu0 %v6539_v55  ;;  %v6427_v55 = vadd.f32 1.0, %v16391_v51  ;;  %v17152_v51 = vld [vmem:[#allocation12_spill] sm:$0xff] }
 0xd90   : > { %v9953_v47 = vpop.eup %9952  ;;  %9972 = vpow2.f32 %v8004_v36  ;;  %v6283_v9 = vadd.f32 %v7953_v26, %v6142_v48  ;;  %6739 = vmatprep.mubr.f32.mxu0 %v6542_v62  ;;  %9282 = vmatpush1.bf16.msra.mxu0 %v16050_v38  ;;  %v7961_v38 = vld [vmem:[%s13306_s30 + $0x390] sm:$0xff] }
 0xd91   : > { %v9955_v37 = vpop.eup %9954  ;;  %9974 = vpow2.f32 %v8005_v61  ;;  %v6284_v12 = vadd.f32 %v7954_v11, %v6144_v6  ;;  %v6147_v23 = vpop.f32.mrb[246].mxu0  ;;  %v6543_v2 = vmul.f32 %v9953_v47, %v16312_v30  ;;  %9284 = vmatprep.subr.bf16.mxu0 %v17149_v15  ;;  %v17153_v26 = vld [vmem:[#allocation13_spill] sm:$0xff] }
 0xd92   : > { %v16410_v57 = vpop.eup %9956  ;;  %9976 = vtanh.f32 %v6283_v9  ;;  %v6148_v0 = vadd.f32 %v6147_v23, %v16179_v14  ;;  %v6149_v3 = vpop.f32.mrb[247].mxu0  ;;  %v6544_v42 = vmul.f32 %v9955_v37, %v16317_v53  ;;  %v7969_v6 = vld [vmem:[%s13306_s30 + $0x3d0] sm:$0xff]  ;;  %v17154_v23 = vld [vmem:[#allocation14_spill] sm:$0xff] }
 0xd93   : > { %v9959_v41 = vpop.eup %9958  ;;  %9978 = vtanh.f32 %v6284_v12  ;;  %v6150_v16 = vadd.f32 %v6149_v3, %v16192_v44  ;;  %6740 = vmatmul.mubr.f32.gmra.mrb[140].mxu0 %v6541_v1  ;;  %v7973_v15 = vld [vmem:[%s13306_s30 + $0x3f0] sm:$0xff] }
 0xd94   : > { %v9961_v30 = vpop.eup %9960  ;;  %9980 = vpow2.f32 %v8006_v31  ;;  %v6287_v54 = vadd.f32 %v7957_v8, %v6148_v0  ;;  %6745 = vmatprep.mubr.f32.mxu0 %v6544_v42  ;;  %9286 = vmatpush1.bf16.msra.mxu0 %v17150_v49  ;;  %v6428_v21 = vadd.f32 1.0, %v9959_v41  ;;  %v17155_v0 = vld [vmem:[#allocation15_spill] sm:$0xff] }
 0xd95   : > { %v9963_v46 = vpop.eup %9962  ;;  %9982 = vrcp.f32 %v6424_v4  ;;  %v6288_v53 = vadd.f32 %v7958_v25, %v6150_v16  ;;  %v6153_v19 = vpop.f32.mrb[248].mxu0  ;;  %v6545_v52 = vmul.f32 %v9961_v30, %v16339_v43  ;;  %9288 = vmatprep.subr.bf16.mxu0 %v17151_v34  ;;  %v7970_v4 = vld [vmem:[%s13306_s30 + $0x3d8] sm:$0xff] }
 0xd96   : > { %v9965_v22 = vpop.eup %9964  ;;  %9984 = vtanh.f32 %v6287_v54  ;;  %v6154_v28 = vadd.f32 %v6153_v19, %v16179_v14  ;;  %v6155_v10 = vpop.f32.mrb[249].mxu0  ;;  %v6546_v13 = vmul.f32 %v9963_v46, %v16346_v17  ;;  %v17156_v19 = vld [vmem:[#allocation16_spill] sm:$0xff] }
 0xd97   : > { %v16426_v7 = vpop.eup %9966  ;;  %9986 = vtanh.f32 %v6288_v53  ;;  %v6156_v45 = vadd.f32 %v6155_v10, %v16192_v44  ;;  %6746 = vmatmul.mubr.f32.gmra.mrb[142].mxu0 %v6543_v2 }
 0xd98   : > { %v9969_v43 = vpop.eup %9968  ;;  %9988 = vrcp.f32 %v6425_v56  ;;  %v6291_v39 = vadd.f32 %v7961_v38, %v6154_v28  ;;  %6751 = vmatprep.mubr.f32.mxu0 %v6546_v13  ;;  %9290 = vmatpush1.bf16.msra.mxu0 %v17152_v51 }
 0xd99   : > { %v9971_v59 = vpop.eup %9970  ;;  %9990 = vrcp.f32 %v6426_v50  ;;  %v6292_v17 = vadd.f32 %v7962_v20, %v6156_v45  ;;  %v6159_v40 = vpop.f32.mrb[250].mxu0  ;;  %v6547_v33 = vmul.f32 %v9969_v43, %v16385_v24  ;;  %9292 = vmatprep.subr.bf16.mxu0 %v17153_v26  ;;  %v6429_v24 = vadd.f32 1.0, %v9965_v22  ;;  %v7974_v50 = vld [vmem:[%s13306_s30 + $0x3f8] sm:$0xff]  ;;  %v17157_v22 = vld [vmem:[#allocation17_spill] sm:$0xff]  ;;  %v17159_v43 = vld [vmem:[#allocation19_spill] sm:$0xff]  ;;  %s17170_s30 = sshll.u32 %s17175_s21, 3 }
 0xd9a   : > { %v9973_v36 = vpop.eup %9972  ;;  %9992 = vtanh.f32 %v6291_v39  ;;  %v6160_v5 = vadd.f32 %v6159_v40, %v16179_v14  ;;  %v6161_v27 = vpop.f32.mrb[251].mxu0  ;;  %v6548_v61 = vmul.f32 %v9971_v59, %v16397_v32  ;;  %v17158_v45 = vld [vmem:[#allocation18_spill] sm:$0xff]  ;;  %s16673_s5 = scalar_lea.vmem %s16737_s20, %s17170_s30 }
 0xd9b   : > { %v9975_v35 = vpop.eup %9974  ;;  %9994 = vtanh.f32 %v6292_v17  ;;  %v6162_v58 = vadd.f32 %v6161_v27, %v16192_v44  ;;  %v6430_v11 = vadd.f32 1.0, %v9973_v36  ;;  %6752 = vmatmul.mubr.f32.gmra.mrb[144].mxu0 %v6545_v52  ;;  %v17160_v17 = vld [vmem:[#allocation20_spill] sm:$0xff] }
 0xd9c   : > { %v9977_v1 = vpop.eup %9976  ;;  %9996 = vrcp.f32 %v6427_v55  ;;  %v6295_v48 = vadd.f32 %v7965_v60, %v6160_v5  ;;  %6757 = vmatprep.mubr.f32.mxu0 %v6548_v61  ;;  %9294 = vmatpush1.bf16.msra.mxu0 %v17154_v23  ;;  %v17161_v60 = vld [vmem:[#allocation21_spill] sm:$0xff]  ;;  %v17162_v61 = vld [vmem:[#allocation22_spill] sm:$0xff]  ;;  %v7150_v23 = vld [vmem:[%s16735_s18 + $0x88] sm:$0xff] }
 0xd9d   : > { %v9979_v18 = vpop.eup %9978  ;;  %9998 = vrcp.f32 %v6428_v21  ;;  %v6296_v62 = vadd.f32 %v7966_v63, %v6162_v58  ;;  %v6165_v32 = vpop.f32.mrb[252].mxu0  ;;  %v6549_v47 = vmul.f32 %v9977_v1, %v16403_v29  ;;  %9296 = vmatprep.subr.bf16.mxu0 %v17155_v0  ;;  %v6431_v29 = vadd.f32 1.0, %v9975_v35  ;;  %v17163_v35 = vld [vmem:[#allocation23_spill] sm:$0xff] }
 0xd9e   : > { %v9981_v31 = vpop.eup %9980  ;;  %10000 = vtanh.f32 %v6295_v48  ;;  %v6166_v9 = vadd.f32 %v6165_v32, %v16179_v14  ;;  %v6167_v37 = vpop.f32.mrb[253].mxu0  ;;  %v6550_v12 = vmul.f32 %v9979_v18, %v16410_v57  ;;  %v17164_v48 = vld [vmem:[#allocation24_spill] sm:$0xff]  ;;  %v17165_v18 = vld [vmem:[#allocation25_spill] sm:$0xff]  ;;  %v10041_v0 = vld [vmem:[%s16732_s15] sm:$0xf] }
 0xd9f   : > { %v9983_v8 = vpop.eup %9982  ;;  %10002 = vtanh.f32 %v6296_v62  ;;  %v6168_v2 = vadd.f32 %v6167_v37, %v16192_v44  ;;  %v6432_v41 = vadd.f32 1.0, %v9981_v31  ;;  %6758 = vmatmul.mubr.f32.gmra.mrb[146].mxu0 %v6547_v33  ;;  %v6922_v62 = vld [vmem:[%s16733_s16 + $0x1d0] sm:$0xff] }
 0xda0   : > { %v9985_v3 = vpop.eup %9984  ;;  %10004 = vrcp.f32 %v6429_v24  ;;  %v6299_v25 = vadd.f32 %v7969_v6, %v6166_v9  ;;  %6763 = vmatprep.mubr.f32.mxu0 %v6550_v12  ;;  %9298 = vmatpush1.bf16.msra.mxu0 %v17156_v19  ;;  %v6925_v6 = vld [vmem:[%s16733_s16 + $0x1e8] sm:$0xff]  ;;  %v6924_v9 = vld [vmem:[%s16733_s16 + $0x1e0] sm:$0xff]  ;;  %v6926_v37 = vld [vmem:[%s16733_s16 + $0x1f0] sm:$0xff] }
 0xda1   : > { %v9987_v42 = vpop.eup %9986  ;;  %10006 = vrcp.f32 %v6430_v11  ;;  %v6300_v16 = vadd.f32 %v7970_v4, %v6168_v2  ;;  %v6171_v57 = vpop.f32.mrb[254].mxu0  ;;  %v6551_v30 = vmul.f32 %v9985_v3, %v16426_v7  ;;  %9300 = vmatprep.subr.bf16.mxu0 %v17157_v22  ;;  %v6920_v11 = vld [vmem:[%s16733_s16 + $0x1c0] sm:$0xff]  ;;  %v9321_v4 = vpack.c.bf16 %v6926_v37, %v6924_v9  ;;  %v17166_v3 = vld [vmem:[#allocation41_spill] sm:$0xff] }
 0xda2   : > { %v9989_v56 = vpop.eup %9988  ;;  %10008 = vtanh.f32 %v6299_v25  ;;  %v6172_v54 = vadd.f32 %v6171_v57, %v16179_v14  ;;  %v6173_v46 = vpop.f32.mrb[255].mxu0  ;;  %v6552_v53 = vmul.f32 %v9987_v42, %v9983_v8  ;;  %v9317_v32 = vpack.c.bf16 %v6922_v62, %v6920_v11  ;;  %v7149_v12 = vld [vmem:[%s16735_s18 + $0x80] sm:$0xff]  ;;  %v17167_v42 = vld [vmem:[#allocation42_spill] sm:$0xff]  ;;  %v7155_v11 = vld [vmem:[%s16735_s18 + $0xb0] sm:$0xff] }
 0xda3   : > { %v9991_v38 = vpop.eup %9990  ;;  %10010 = vtanh.f32 %v6300_v16  ;;  %v6174_v52 = vadd.f32 %v6173_v46, %v16192_v44  ;;  %6764 = vmatmul.mubr.f32.gmra.mrb[148].mxu0 %v6549_v47  ;;  %v6927_v47 = vld [vmem:[%s16733_s16 + $0x1f8] sm:$0xff]  ;;  %v9323_v8 = vpack.c.bf16 %v7150_v23, %v7149_v12  ;;  %v8071_v2 = vld [vmem:[%s16732_s15 + $0x4] sm:$0xf]  ;;  %v7139_v12 = vld [vmem:[%s16735_s18 + $0x30] sm:$0xff] }
 0xda4   : > { %v9993_v28 = vpop.eup %9992  ;;  %10012 = vrcp.f32 %v6431_v29  ;;  %v6303_v10 = vadd.f32 %v7973_v15, %v6172_v54  ;;  %6769 = vmatprep.mubr.f32.mxu0 %v6552_v53  ;;  %9302 = vmatpush1.bf16.msra.mxu0 %v17158_v45  ;;  %v9319_v31 = vpack.c.bf16 %v6927_v47, %v6925_v6  ;;  %v3830_v29 = vrot.slane %v10041_v0, %v17166_v3  ;;  %v7156_v62 = vld [vmem:[%s16735_s18 + $0xb8] sm:$0xff] }
 0xda5   : > { %v9995_v20 = vpop.eup %9994  ;;  %10014 = vrcp.f32 %v6432_v41  ;;  %v6304_v13 = vadd.f32 %v7974_v50, %v6174_v52  ;;  %v6553_v49 = vmul.f32 %v9993_v28, %v9989_v56  ;;  %9304 = vmatprep.subr.bf16.mxu0 %v17159_v43  ;;  %9385 = vmatpush1.bf16.msra.mxu1 %v9317_v32  ;;  %v6632_v25 = vrot.slane %v8071_v2, %v17166_v3  ;;  %v7152_v43 = vld [vmem:[%s16735_s18 + $0x98] sm:$0xff] }
 0xda6   : > { %v9997_v14 = vpop.eup %9996  ;;  %10016 = vtanh.f32 %v6303_v10  ;;  %v6554_v7 = vmul.f32 %v9995_v20, %v9991_v38  ;;  %9370 = vmatprep.subr.bf16.mxu1 %v9319_v31  ;;  %v3834_v41 = vrot.slane %v10041_v0, %v17167_v42  ;;  %v6636_v16 = vrot.slane %v8071_v2, %v17167_v42  ;;  %v7140_v23 = vld [vmem:[%s16735_s18 + $0x38] sm:$0xff]  ;;  %v7157_v2 = vld [vmem:[%s16735_s18 + $0xc0] sm:$0xff]  ;;  %v7158_v0 = vld [vmem:[%s16735_s18 + $0xc8] sm:$0xff] }
 0xda7   : > { %v9999_v34 = vpop.eup %9998  ;;  %10018 = vtanh.f32 %v6304_v13  ;;  %6770 = vmatmul.mubr.f32.gmra.mrb[150].mxu0 %v6551_v30  ;;  %v16496_v57 = vadd.f32 %v6632_v25, %v3830_v29  ;;  %v9337_v25 = vpack.c.bf16 %v7140_v23, %v7139_v12 }
 0xda8   : > { %v10001_v44 = vpop.eup %10000  ;;  %6775 = vmatprep.mubr.f32.mxu0 %v6554_v7  ;;  %9306 = vmatpush1.bf16.msra.mxu0 %v17160_v17  ;;  %v16498_v15 = vadd.f32 %v6636_v16, %v3834_v41  ;;  %v7134_v7 = vld [vmem:[%s16735_s18 + $0x8] sm:$0xff] }
 0xda9   : > { %v10003_v55 = vpop.eup %10002  ;;  %v6555_v39 = vmul.f32 %v10001_v44, %v9997_v14  ;;  %9308 = vmatprep.subr.bf16.mxu0 %v17161_v60  ;;  %9386 = vmatpush1.bf16.msra.mxu1 %v9321_v4  ;;  %v7133_v14 = vld [vmem:[%s16735_s18] sm:$0xff]  ;;  %v7135_v60 = vld [vmem:[%s16735_s18 + $0x10] sm:$0xff] }
 0xdaa   : > { %v10005_v59 = vpop.eup %10004  ;;  %v6556_v21 = vmul.f32 %v10003_v55, %v9999_v34  ;;  %9324 = vmatprep.subr.bf16.mxu1 %v9323_v8  ;;  %v7151_v34 = vld [vmem:[%s16735_s18 + $0x90] sm:$0xff] }
 0xdab   : > { %v10007_v40 = vpop.eup %10006  ;;  %6776 = vmatmul.mubr.f32.gmra.mrb[152].mxu0 %v6553_v49 }
 0xdac   : > { %v10009_v33 = vpop.eup %10008  ;;  %6781 = vmatprep.mubr.f32.mxu0 %v6556_v21  ;;  %9310 = vmatpush1.bf16.msra.mxu0 %v17162_v61 }
 0xdad   : > { %v10011_v36 = vpop.eup %10010  ;;  %v6557_v5 = vmul.f32 %v10009_v33, %v10005_v59  ;;  %9312 = vmatprep.subr.bf16.mxu0 %v17163_v35  ;;  %v7136_v33 = vld [vmem:[%s16735_s18 + $0x18] sm:$0xff] }
 0xdae   : > { %v10013_v27 = vpop.eup %10012  ;;  %v6558_v63 = vmul.f32 %v10011_v36, %v10007_v40  ;;  %v9327_v40 = vpack.c.bf16 %v7152_v43, %v7151_v34 }
 0xdaf   : > { %v10015_v51 = vpop.eup %10014  ;;  %6782 = vmatmul.mubr.f32.gmra.mrb[154].mxu0 %v6555_v39  ;;  %v9325_v39 = vpack.c.bf16 %v7134_v7, %v7133_v14  ;;  %v7161_v7 = vld [vmem:[%s16735_s18 + $0xe0] sm:$0xff] }
 0xdb0   : > { %v10017_v58 = vpop.eup %10016  ;;  %6787 = vmatprep.mubr.f32.mxu0 %v6558_v63  ;;  %9314 = vmatpush1.bf16.msra.mxu0 %v17164_v48  ;;  %v7138_v48 = vld [vmem:[%s16735_s18 + $0x28] sm:$0xff] }
 0xdb1   : > { %v10019_v26 = vpop.eup %10018  ;;  %v6559_v1 = vmul.f32 %v10017_v58, %v10013_v27  ;;  %9316 = vmatprep.subr.bf16.mxu0 %v17165_v18  ;;  %v7154_v27 = vld [vmem:[%s16735_s18 + $0xa8] sm:$0xff] }
 0xdb2   : > { %v6560_v24 = vmul.f32 %v10019_v26, %v10015_v51  ;;  %v9329_v51 = vpack.c.bf16 %v7136_v33, %v7135_v60 }
 0xdb3   : > { %6788 = vmatmul.mubr.f32.gmra.mrb[156].mxu0 %v6557_v5  ;;  %v7153_v5 = vld [vmem:[%s16735_s18 + $0xa0] sm:$0xff] }
 0xdb4   : > { %6793 = vmatprep.mubr.f32.mxu0 %v6560_v24  ;;  %9318 = vmatpush1.bf16.msra.mxu0 %v9317_v32  ;;  %v7137_v24 = vld [vmem:[%s16735_s18 + $0x20] sm:$0xff] }
 0xdb5   : > { %9320 = vmatprep.subr.bf16.mxu0 %v9319_v31  ;;  %v9333_v47 = vpack.c.bf16 %v7138_v48, %v7137_v24 }
 0xdb7   : > { %6794 = vmatmul.mubr.f32.gmra.mrb[158].mxu0 %v6559_v1  ;;  %v9331_v1 = vpack.c.bf16 %v7154_v27, %v7153_v5 }
 0xdb8   : > { %9322 = vmatpush1.bf16.msra.mxu0 %v9321_v4  ;;  %v9335_v4 = vpack.c.bf16 %v7156_v62, %v7155_v11 }
 0xe4e   : > { %v6705_v30 = vpop.f32.mrb[128].mxu0 }
 0xe4f   : > { %v9388_v56 = vadd.f32 %v16496_v57, %v6705_v30  ;;  %v6707_v54 = vpop.f32.mrb[129].mxu0  ;;  %v9339_v30 = vpack.c.bf16 %v7158_v0, %v7157_v2 }
 0xe50   : > { %v9390_v46 = vadd.f32 %v16498_v15, %v6707_v54  ;;  %v7142_v54 = vld [vmem:[%s16735_s18 + $0x48] sm:$0xff] }
 0xe51   : > { %v6832_v19 = vmul.f32 0.70710677, %v9388_v56  ;;  %v7141_v56 = vld [vmem:[%s16735_s18 + $0x40] sm:$0xff] }
 0xe52   : > { %v6833_v50 = vmul.f32 0.70710677, %v9390_v46  ;;  %v6711_v53 = vpop.f32.mrb[130].mxu0 }
 0xe53   : > { %v9392_v38 = vadd.f32 %v16496_v57, %v6711_v53  ;;  %v6713_v52 = vpop.f32.mrb[131].mxu0  ;;  %v7160_v53 = vld [vmem:[%s16735_s18 + $0xd8] sm:$0xff] }
 0xe54   : > { %v9394_v22 = vadd.f32 %v16498_v15, %v6713_v52  ;;  %7004 = vmatprep.mubr.f32.mxu0 %v6833_v50  ;;  %v7159_v50 = vld [vmem:[%s16735_s18 + $0xd0] sm:$0xff]  ;;  %v9341_v52 = vpack.c.bf16 %v7142_v54, %v7141_v56 }
 0xe55   : > { %7005 = vmatmul.mubr.f32.vlgmr.msra.gmra.mrb[0].mxu0 %v6832_v19  ;;  %v6834_v20 = vmul.f32 0.70710677, %v9392_v38 }
 0xe56   : > { %v6835_v28 = vmul.f32 0.70710677, %v9394_v22  ;;  %v6717_v10 = vpop.f32.mrb[132].mxu0 }
 0xe57   : > { %v9396_v13 = vadd.f32 %v16496_v57, %v6717_v10  ;;  %v6719_v49 = vpop.f32.mrb[133].mxu0 }
 0xe58   : > { %v9398_v45 = vadd.f32 %v16498_v15, %v6719_v49  ;;  %7010 = vmatprep.mubr.f32.mxu0 %v6835_v28  ;;  %v7144_v49 = vld [vmem:[%s16735_s18 + $0x58] sm:$0xff] }
 0xe59   : > { %7011 = vmatmul.mubr.f32.gmra.mrb[2].mxu0 %v6834_v20  ;;  %v6836_v59 = vmul.f32 0.70710677, %v9396_v13  ;;  %v9343_v20 = vpack.c.bf16 %v7160_v53, %v7159_v50  ;;  %v7143_v13 = vld [vmem:[%s16735_s18 + $0x50] sm:$0xff] }
 0xe5a   : > { %v6837_v44 = vmul.f32 0.70710677, %v9398_v45  ;;  %v6723_v55 = vpop.f32.mrb[134].mxu0  ;;  %v7162_v45 = vld [vmem:[%s16735_s18 + $0xe8] sm:$0xff] }
 0xe5b   : > { %v9400_v21 = vadd.f32 %v16496_v57, %v6723_v55  ;;  %v6725_v17 = vpop.f32.mrb[135].mxu0 }
 0xe5c   : > { %v9402_v36 = vadd.f32 %v16498_v15, %v6725_v17  ;;  %7016 = vmatprep.mubr.f32.mxu1 %v6837_v44  ;;  %v9345_v44 = vpack.c.bf16 %v7144_v49, %v7143_v13  ;;  %v7145_v17 = vld [vmem:[%s16735_s18 + $0x60] sm:$0xff] }
 0xe5d   : > { %7017 = vmatmul.mubr.f32.vlgmr.msra.gmra.mrb[224].mxu1 %v6836_v59  ;;  %v6838_v35 = vmul.f32 0.70710677, %v9400_v21  ;;  %v9347_v21 = vpack.c.bf16 %v7162_v45, %v7161_v7  ;;  %v17168_v7 = vld [vmem:[#allocation8_spill] sm:$0xff] }
 0xe5e   : > { %v6839_v63 = vmul.f32 0.70710677, %v9402_v36  ;;  %v6729_v61 = vpop.f32.mrb[136].mxu0  ;;  %9326 = vmatpush3.bf16.msra.mxu1 %v9325_v39 }
 0xe5f   : > { %v9404_v58 = vadd.f32 %v16496_v57, %v6729_v61  ;;  %v6731_v26 = vpop.f32.mrb[137].mxu0  ;;  %9328 = vmatprep.subr.bf16.mxu1 %v9327_v40  ;;  %v7146_v40 = vld [vmem:[%s16735_s18 + $0x68] sm:$0xff] }
 0xe60   : > { %v9406_v18 = vadd.f32 %v16498_v15, %v6731_v26  ;;  %7022 = vmatprep.mubr.f32.mxu1 %v6839_v63  ;;  %v9349_v5 = vpack.c.bf16 %v7146_v40, %v7145_v17 }
 0xe61   : > { %7023 = vmatmul.mubr.f32.gmra.mrb[226].mxu1 %v6838_v35  ;;  %v6840_v31 = vmul.f32 0.70710677, %v9404_v58 }
 0xe62   : > { %v6841_v32 = vmul.f32 0.70710677, %v9406_v18  ;;  %v6735_v6 = vpop.f32.mrb[138].mxu0  ;;  %9330 = vmatpush3.bf16.msra.mxu1 %v9329_v51 }
 0xe63   : > { %v9408_v9 = vadd.f32 %v16496_v57, %v6735_v6  ;;  %v6737_v37 = vpop.f32.mrb[139].mxu0  ;;  %9332 = vmatprep.subr.bf16.mxu1 %v9331_v1 }
 0xe64   : > { %v9410_v8 = vadd.f32 %v16498_v15, %v6737_v37  ;;  %7028 = vmatprep.mubr.f32.mxu1 %v6841_v32 }
 0xe65   : > { %7029 = vmatmul.mubr.f32.gmra.mrb[228].mxu1 %v6840_v31  ;;  %v6842_v42 = vmul.f32 0.70710677, %v9408_v9 }
 0xe66   : > { %v6843_v3 = vmul.f32 0.70710677, %v9410_v8  ;;  %v6741_v29 = vpop.f32.mrb[140].mxu0  ;;  %9334 = vmatpush3.bf16.msra.mxu1 %v9333_v47 }
 0xe67   : > { %v9412_v41 = vadd.f32 %v16496_v57, %v6741_v29  ;;  %v6743_v16 = vpop.f32.mrb[141].mxu0  ;;  %9336 = vmatprep.subr.bf16.mxu1 %v9335_v4 }
 0xe68   : > { %v9414_v46 = vadd.f32 %v16498_v15, %v6743_v16  ;;  %7034 = vmatprep.mubr.f32.mxu1 %v6843_v3 }
 0xe69   : > { %7035 = vmatmul.mubr.f32.gmra.mrb[230].mxu1 %v6842_v42  ;;  %v6844_v22 = vmul.f32 0.70710677, %v9412_v41 }
 0xe6a   : > { %v6845_v19 = vmul.f32 0.70710677, %v9414_v46  ;;  %v6747_v38 = vpop.f32.mrb[142].mxu0  ;;  %9338 = vmatpush3.bf16.msra.mxu1 %v9337_v25 }
 0xe6b   : > { %v9416_v28 = vadd.f32 %v16496_v57, %v6747_v38  ;;  %v6749_v10 = vpop.f32.mrb[143].mxu0  ;;  %9340 = vmatprep.subr.bf16.mxu1 %v9339_v30 }
 0xe6c   : > { %v9418_v14 = vadd.f32 %v16498_v15, %v6749_v10  ;;  %7040 = vmatprep.mubr.f32.mxu1 %v6845_v19  ;;  %v7163_v10 = vld [vmem:[%s16735_s18 + $0xf0] sm:$0xff] }
 0xe6d   : > { %7041 = vmatmul.mubr.f32.gmra.mrb[232].mxu1 %v6844_v22  ;;  %v6846_v55 = vmul.f32 0.70710677, %v9416_v28 }
 0xe6e   : > { %v6847_v34 = vmul.f32 0.70710677, %v9418_v14  ;;  %v6753_v43 = vpop.f32.mrb[144].mxu0  ;;  %9342 = vmatpush3.bf16.msra.mxu1 %v9341_v52  ;;  %v6928_v14 = vld [vmem:[%s16734_s17] sm:$0x3] }
 0xe6f   : > { %v9420_v39 = vadd.f32 %v16496_v57, %v6753_v43  ;;  %v6755_v59 = vpop.f32.mrb[145].mxu0  ;;  %9344 = vmatprep.subr.bf16.mxu1 %v9343_v20  ;;  %v7164_v20 = vld [vmem:[%s16735_s18 + $0xf8] sm:$0xff]  ;;  %v16626_v45 = vrot.slane %v6928_v14, %v17168_v7 }
 0xe70   : > { %v9422_v60 = vadd.f32 %v16498_v15, %v6755_v59  ;;  %7046 = vmatprep.mubr.f32.mxu1 %v6847_v34  ;;  %v9351_v13 = vpack.c.bf16 %v7164_v20, %v7163_v10  ;;  %v17169_v34 = vld [vmem:[#allocation7_spill] sm:$0xff] }
 0xe71   : > { %7047 = vmatmul.mubr.f32.gmra.mrb[234].mxu1 %v6846_v55  ;;  %v6848_v27 = vmul.f32 0.70710677, %v9420_v39  ;;  %v16629_v43 = vrot.slane %v6928_v14, %v17169_v34 }
 0xe72   : > { %v6849_v33 = vmul.f32 0.70710677, %v9422_v60  ;;  %v6759_v36 = vpop.f32.mrb[146].mxu0  ;;  %9346 = vmatpush3.bf16.msra.mxu1 %v9345_v44 }
 0xe73   : > { %v9424_v63 = vadd.f32 %v16496_v57, %v6759_v36  ;;  %v6761_v61 = vpop.f32.mrb[147].mxu0  ;;  %9348 = vmatprep.subr.bf16.mxu1 %v9347_v21 }
 0xe74   : > { %v9426_v51 = vadd.f32 %v16498_v15, %v6761_v61  ;;  %7052 = vmatprep.mubr.f32.mxu1 %v6849_v33 }
 0xe75   : > { %7053 = vmatmul.mubr.f32.gmra.mrb[236].mxu1 %v6848_v27  ;;  %v6850_v26 = vmul.f32 0.70710677, %v9424_v63 }
 0xe76   : > { %v6851_v35 = vmul.f32 0.70710677, %v9426_v51  ;;  %v6765_v58 = vpop.f32.mrb[148].mxu0  ;;  %9350 = vmatpush3.bf16.msra.mxu1 %v9349_v5 }
 0xe77   : > { %v9428_v1 = vadd.f32 %v16496_v57, %v6765_v58  ;;  %v6767_v24 = vpop.f32.mrb[149].mxu0  ;;  %9352 = vmatprep.subr.bf16.mxu1 %v9351_v13 }
 0xe78   : > { %v9430_v48 = vadd.f32 %v16498_v15, %v6767_v24  ;;  %7058 = vmatprep.mubr.f32.mxu1 %v6851_v35 }
 0xe79   : > { %7059 = vmatmul.mubr.f32.gmra.mrb[238].mxu1 %v6850_v26  ;;  %v6852_v62 = vmul.f32 0.70710677, %v9428_v1 }
 0xe7a   : > { %v6853_v18 = vmul.f32 0.70710677, %v9430_v48  ;;  %v6771_v11 = vpop.f32.mrb[150].mxu0 }
 0xe7b   : > { %v9432_v32 = vadd.f32 %v16496_v57, %v6771_v11  ;;  %v6773_v6 = vpop.f32.mrb[151].mxu0 }
 0xe7c   : > { %v9434_v47 = vadd.f32 %v16498_v15, %v6773_v6  ;;  %7064 = vmatprep.mubr.f32.mxu1 %v6853_v18 }
 0xe7d   : > { %7065 = vmatmul.mubr.f32.gmra.mrb[240].mxu1 %v6852_v62  ;;  %v6854_v37 = vmul.f32 0.70710677, %v9432_v32 }
 0xe7e   : > { %v6855_v31 = vmul.f32 0.70710677, %v9434_v47  ;;  %v6777_v9 = vpop.f32.mrb[152].mxu0 }
 0xe7f   : > { %v9436_v4 = vadd.f32 %v16496_v57, %v6777_v9  ;;  %v6779_v12 = vpop.f32.mrb[153].mxu0 }
 0xe80   : > { %v9438_v23 = vadd.f32 %v16498_v15, %v6779_v12  ;;  %7070 = vmatprep.mubr.f32.mxu1 %v6855_v31 }
 0xe81   : > { %7071 = vmatmul.mubr.f32.gmra.mrb[242].mxu1 %v6854_v37  ;;  %v6856_v0 = vmul.f32 0.70710677, %v9436_v4 }
 0xe82   : > { %v6857_v8 = vmul.f32 0.70710677, %v9438_v23  ;;  %v6783_v2 = vpop.f32.mrb[154].mxu0 }
 0xe83   : > { %v9440_v3 = vadd.f32 %v16496_v57, %v6783_v2  ;;  %v6785_v29 = vpop.f32.mrb[155].mxu0 }
 0xe84   : > { %v9442_v25 = vadd.f32 %v16498_v15, %v6785_v29  ;;  %7076 = vmatprep.mubr.f32.mxu1 %v6857_v8 }
 0xe85   : > { %7077 = vmatmul.mubr.f32.gmra.mrb[244].mxu1 %v6856_v0  ;;  %v6858_v16 = vmul.f32 0.70710677, %v9440_v3 }
 0xe86   : > { %v6859_v42 = vmul.f32 0.70710677, %v9442_v25  ;;  %v6789_v41 = vpop.f32.mrb[156].mxu0 }
 0xe87   : > { %v9444_v30 = vadd.f32 %v16496_v57, %v6789_v41  ;;  %v6791_v56 = vpop.f32.mrb[157].mxu0 }
 0xe88   : > { %v9446_v54 = vadd.f32 %v16498_v15, %v6791_v56  ;;  %7082 = vmatprep.mubr.f32.mxu1 %v6859_v42 }
 0xe89   : > { %7083 = vmatmul.mubr.f32.gmra.mrb[246].mxu1 %v6858_v16  ;;  %v6860_v53 = vmul.f32 0.70710677, %v9444_v30 }
 0xe8a   : > { %v6861_v46 = vmul.f32 0.70710677, %v9446_v54  ;;  %v6795_v50 = vpop.f32.mrb[158].mxu0 }
 0xe8b   : > { %v9448_v19 = vadd.f32 %v16496_v57, %v6795_v50  ;;  %v6797_v38 = vpop.f32.mrb[159].mxu0  ;;  %v7147_v57 = vld [vmem:[%s16735_s18 + $0x70] sm:$0xff] }
 0xe8c   : > { %v9450_v52 = vadd.f32 %v16498_v15, %v6797_v38  ;;  %7088 = vmatprep.mubr.f32.mxu1 %v6861_v46  ;;  %v7148_v15 = vld [vmem:[%s16735_s18 + $0x78] sm:$0xff] }
 0xe8d   : > { %7089 = vmatmul.mubr.f32.gmra.mrb[248].mxu1 %v6860_v53  ;;  %v6862_v28 = vmul.f32 0.70710677, %v9448_v19  ;;  %v9353_v49 = vpack.c.bf16 %v7148_v15, %v7147_v57 }
 0xe8e   : > { %v6863_v22 = vmul.f32 0.70710677, %v9450_v52 }
 0xe8f   : > { %9354 = vmatpush3.bf16.msra.mxu1 %v9353_v49 }
 0xe90   : > { %7094 = vmatprep.mubr.f32.mxu1 %v6863_v22 }
 0xe91   : > { %7095 = vmatmul.mubr.f32.gmra.mrb[250].mxu1 %v6862_v28 }
 0xf28   : > { %v7006_v44 = vpop.f32.mrb[0].mxu0 }
 0xf29   : > { %v7007_v55 = vadd.f32 %v7006_v44, %v16626_v45  ;;  %v7008_v39 = vpop.f32.mrb[1].mxu0 }
 0xf2a   : > { %v7009_v59 = vadd.f32 %v7008_v39, %v16629_v43 }
 0xf2b   : > { %v7101_v40 = vmax.f32 %v7007_v55, 0.0 }
 0xf2c   : > { %v7102_v21 = vmax.f32 %v7009_v59, 0.0  ;;  %v7012_v17 = vpop.f32.mrb[2].mxu0 }
 0xf2d   : > { %v7013_v60 = vadd.f32 %v7012_v17, %v16626_v45  ;;  %v7014_v33 = vpop.f32.mrb[3].mxu0 }
 0xf2e   : > { %v7015_v36 = vadd.f32 %v7014_v33, %v16629_v43  ;;  %7236 = vmatprep.mubr.f32.mxu1 %v7102_v21 }
 0xf2f   : > { %7237 = vmatmul.mubr.f32.vlgmr.msra.gmra.mrb[252].mxu1 %v7101_v40  ;;  %v7103_v63 = vmax.f32 %v7013_v60, 0.0 }
 0xf30   : > { %v7104_v5 = vmax.f32 %v7015_v36, 0.0  ;;  %v7018_v27 = vpop.f32.mrb[224].mxu1 }
 0xf31   : > { %v7019_v61 = vadd.f32 %v7018_v27, %v16626_v45  ;;  %v7020_v51 = vpop.f32.mrb[225].mxu1 }
 0xf32   : > { %v7021_v35 = vadd.f32 %v7020_v51, %v16629_v43  ;;  %7241 = vmatprep.mubr.f32.mxu1 %v7104_v5 }
 0xf33   : > { %7242 = vmatmul.mubr.f32.gmra.mrb[254].mxu1 %v7103_v63  ;;  %v7105_v1 = vmax.f32 %v7019_v61, 0.0 }
 0xf34   : > { %v7106_v58 = vmax.f32 %v7021_v35, 0.0  ;;  %v7024_v26 = vpop.f32.mrb[226].mxu1 }
 0xf35   : > { %v7025_v24 = vadd.f32 %v7024_v26, %v16626_v45  ;;  %v7026_v48 = vpop.f32.mrb[227].mxu1 }
 0xf36   : > { %v7027_v18 = vadd.f32 %v7026_v48, %v16629_v43  ;;  %7246 = vmatprep.mubr.f32.mxu1 %v7106_v58 }
 0xf37   : > { %7247 = vmatmul.mubr.f32.gmra.mrb[0].mxu1 %v7105_v1  ;;  %v7107_v32 = vmax.f32 %v7025_v24, 0.0 }
 0xf38   : > { %v7108_v11 = vmax.f32 %v7027_v18, 0.0  ;;  %v7030_v62 = vpop.f32.mrb[228].mxu1 }
 0xf39   : > { %v7031_v6 = vadd.f32 %v7030_v62, %v16626_v45  ;;  %v7032_v47 = vpop.f32.mrb[229].mxu1 }
 0xf3a   : > { %v7033_v31 = vadd.f32 %v7032_v47, %v16629_v43  ;;  %7251 = vmatprep.mubr.f32.mxu1 %v7108_v11 }
 0xf3b   : > { %7252 = vmatmul.mubr.f32.gmra.mrb[2].mxu1 %v7107_v32  ;;  %v7109_v4 = vmax.f32 %v7031_v6, 0.0 }
 0xf3c   : > { %v7110_v9 = vmax.f32 %v7033_v31, 0.0  ;;  %v7036_v37 = vpop.f32.mrb[230].mxu1 }
 0xf3d   : > { %v7037_v12 = vadd.f32 %v7036_v37, %v16626_v45  ;;  %v7038_v23 = vpop.f32.mrb[231].mxu1 }
 0xf3e   : > { %v7039_v8 = vadd.f32 %v7038_v23, %v16629_v43  ;;  %7256 = vmatprep.mubr.f32.mxu1 %v7110_v9 }
 0xf3f   : > { %7257 = vmatmul.mubr.f32.gmra.mrb[4].mxu1 %v7109_v4  ;;  %v7111_v3 = vmax.f32 %v7037_v12, 0.0 }
 0xf40   : > { %v7112_v2 = vmax.f32 %v7039_v8, 0.0  ;;  %v7042_v0 = vpop.f32.mrb[232].mxu1 }
 0xf41   : > { %v7043_v29 = vadd.f32 %v7042_v0, %v16626_v45  ;;  %v7044_v25 = vpop.f32.mrb[233].mxu1  ;;  %v16666_v0 = vld [vmem:[%s16736_s19] ss:$0 sm:$0xff] }
 0xf42   : > { %v7045_v42 = vadd.f32 %v7044_v25, %v16629_v43  ;;  %7261 = vmatprep.mubr.f32.mxu1 %v7112_v2 }
 0xf43   : > { %7262 = vmatmul.mubr.f32.gmra.mrb[6].mxu1 %v7111_v3  ;;  %v7113_v30 = vmax.f32 %v7043_v29, 0.0 }
 0xf44   : > { %v7114_v41 = vmax.f32 %v7045_v42, 0.0  ;;  %v7048_v16 = vpop.f32.mrb[234].mxu1 }
 0xf45   : > { %v7049_v56 = vadd.f32 %v7048_v16, %v16626_v45  ;;  %v7050_v54 = vpop.f32.mrb[235].mxu1 }
 0xf46   : > { %v7051_v46 = vadd.f32 %v7050_v54, %v16629_v43  ;;  %7266 = vmatprep.mubr.f32.mxu1 %v7114_v41 }
 0xf47   : > { %7267 = vmatmul.mubr.f32.gmra.mrb[8].mxu1 %v7113_v30  ;;  %v7115_v19 = vmax.f32 %v7049_v56, 0.0 }
 0xf48   : > { %v7116_v50 = vmax.f32 %v7051_v46, 0.0  ;;  %v7054_v53 = vpop.f32.mrb[236].mxu1 }
 0xf49   : > { %v7055_v38 = vadd.f32 %v7054_v53, %v16626_v45  ;;  %v7056_v52 = vpop.f32.mrb[237].mxu1 }
 0xf4a   : > { %v7057_v22 = vadd.f32 %v7056_v52, %v16629_v43  ;;  %7271 = vmatprep.mubr.f32.mxu1 %v7116_v50 }
 0xf4b   : > { %7272 = vmatmul.mubr.f32.gmra.mrb[10].mxu1 %v7115_v19  ;;  %v7117_v20 = vmax.f32 %v7055_v38, 0.0 }
 0xf4c   : > { %v7118_v28 = vmax.f32 %v7057_v22, 0.0  ;;  %v7060_v10 = vpop.f32.mrb[238].mxu1 }
 0xf4d   : > { %v7061_v13 = vadd.f32 %v7060_v10, %v16626_v45  ;;  %v7062_v57 = vpop.f32.mrb[239].mxu1 }
 0xf4e   : > { %v7063_v15 = vadd.f32 %v7062_v57, %v16629_v43  ;;  %7276 = vmatprep.mubr.f32.mxu1 %v7118_v28 }
 0xf4f   : > { %7277 = vmatmul.mubr.f32.gmra.mrb[12].mxu1 %v7117_v20  ;;  %v7119_v7 = vmax.f32 %v7061_v13, 0.0 }
 0xf50   : > { %v7120_v49 = vmax.f32 %v7063_v15, 0.0  ;;  %v7066_v14 = vpop.f32.mrb[240].mxu1 }
 0xf51   : > { %v7067_v34 = vadd.f32 %v7066_v14, %v16626_v45  ;;  %v7068_v44 = vpop.f32.mrb[241].mxu1 }
 0xf52   : > { %v7069_v55 = vadd.f32 %v7068_v44, %v16629_v43  ;;  %7281 = vmatprep.mubr.f32.mxu1 %v7120_v49 }
 0xf53   : > { %7282 = vmatmul.mubr.f32.gmra.mrb[14].mxu1 %v7119_v7  ;;  %v7121_v21 = vmax.f32 %v7067_v34, 0.0 }
 0xf54   : > { %v7122_v39 = vmax.f32 %v7069_v55, 0.0  ;;  %v7072_v59 = vpop.f32.mrb[242].mxu1 }
 0xf55   : > { %v7073_v17 = vadd.f32 %v7072_v59, %v16626_v45  ;;  %v7074_v40 = vpop.f32.mrb[243].mxu1 }
 0xf56   : > { %v7075_v60 = vadd.f32 %v7074_v40, %v16629_v43  ;;  %7286 = vmatprep.mubr.f32.mxu1 %v7122_v39 }
 0xf57   : > { %7287 = vmatmul.mubr.f32.gmra.mrb[16].mxu1 %v7121_v21  ;;  %v7123_v5 = vmax.f32 %v7073_v17, 0.0 }
 0xf58   : > { %v7124_v33 = vmax.f32 %v7075_v60, 0.0  ;;  %v7078_v36 = vpop.f32.mrb[244].mxu1 }
 0xf59   : > { %v7079_v27 = vadd.f32 %v7078_v36, %v16626_v45  ;;  %v7080_v63 = vpop.f32.mrb[245].mxu1 }
 0xf5a   : > { %v7081_v61 = vadd.f32 %v7080_v63, %v16629_v43  ;;  %7291 = vmatprep.mubr.f32.mxu1 %v7124_v33 }
 0xf5b   : > { %7292 = vmatmul.mubr.f32.gmra.mrb[18].mxu1 %v7123_v5  ;;  %v7125_v58 = vmax.f32 %v7079_v27, 0.0 }
 0xf5c   : > { %v7126_v51 = vmax.f32 %v7081_v61, 0.0  ;;  %v7084_v35 = vpop.f32.mrb[246].mxu1 }
 0xf5d   : > { %v7085_v26 = vadd.f32 %v7084_v35, %v16626_v45  ;;  %v7086_v1 = vpop.f32.mrb[247].mxu1 }
 0xf5e   : > { %v7087_v24 = vadd.f32 %v7086_v1, %v16629_v43  ;;  %7296 = vmatprep.mubr.f32.mxu1 %v7126_v51 }
 0xf5f   : > { %7297 = vmatmul.mubr.f32.gmra.mrb[20].mxu1 %v7125_v58  ;;  %v7127_v11 = vmax.f32 %v7085_v26, 0.0 }
 0xf60   : > { %v7128_v48 = vmax.f32 %v7087_v24, 0.0  ;;  %v7090_v18 = vpop.f32.mrb[248].mxu1 }
 0xf61   : > { %v7091_v62 = vadd.f32 %v7090_v18, %v16626_v45  ;;  %v7092_v32 = vpop.f32.mrb[249].mxu1 }
 0xf62   : > { %v7093_v6 = vadd.f32 %v7092_v32, %v16629_v43  ;;  %7301 = vmatprep.mubr.f32.mxu1 %v7128_v48 }
 0xf63   : > { %7302 = vmatmul.mubr.f32.gmra.mrb[22].mxu1 %v7127_v11  ;;  %v7129_v9 = vmax.f32 %v7091_v62, 0.0 }
 0xf64   : > { %v7130_v47 = vmax.f32 %v7093_v6, 0.0  ;;  %v7096_v31 = vpop.f32.mrb[250].mxu1 }
 0xf65   : > { %v7097_v37 = vadd.f32 %v7096_v31, %v16626_v45  ;;  %v7098_v4 = vpop.f32.mrb[251].mxu1 }
 0xf66   : > { %v7099_v12 = vadd.f32 %v7098_v4, %v16629_v43  ;;  %7306 = vmatprep.mubr.f32.mxu1 %v7130_v47 }
 0xf67   : > { %7307 = vmatmul.mubr.f32.gmra.mrb[24].mxu1 %v7129_v9  ;;  %v7131_v8 = vmax.f32 %v7097_v37, 0.0 }
 0xf68   : > { %v7132_v23 = vmax.f32 %v7099_v12, 0.0 }
 0xf6a   : > { %7311 = vmatprep.mubr.f32.mxu1 %v7132_v23 }
 0xf6b   : > { %7312 = vmatmul.mubr.f32.gmra.mrb[26].mxu1 %v7131_v8 }
0x1002   : > { %v8111_v2 = vpop.f32.mrb[252].mxu1 }
0x1003   : > { %v8112_v3 = vpop.f32.mrb[253].mxu1 }
0x1004   : > { %v8113_v29 = vadd.f32 %v8112_v3, %v8111_v2 }
0x1006   : > { %v7239_v45 = vadd.f32 %v8113_v29, %v16666_v0  ;;  %v8114_v43 = vpop.f32.mrb[254].mxu1 }
0x1007   : > { %v8115_v25 = vpop.f32.mrb[255].mxu1 }
0x1008   : > { %7317 = vst [vmem:[%s16673_s5] sm:$0xff] %v7239_v45  ;;  %v8116_v42 = vadd.f32 %v8115_v25, %v8114_v43 }
0x100a   : > { %v7244_v41 = vadd.f32 %v8116_v42, %v16666_v0  ;;  %v8117_v16 = vpop.f32.mrb[0].mxu1 }
0x100b   : > { %v8118_v30 = vpop.f32.mrb[1].mxu1 }
0x100c   : > { %7318 = vst [vmem:[%s16673_s5 + $0x8] sm:$0xff] %v7244_v41  ;;  %v8119_v56 = vadd.f32 %v8118_v30, %v8117_v16 }
0x100e   : > { %v7249_v54 = vadd.f32 %v8119_v56, %v16666_v0  ;;  %v8120_v46 = vpop.f32.mrb[2].mxu1 }
0x100f   : > { %v8121_v50 = vpop.f32.mrb[3].mxu1 }
0x1010   : > { %7319 = vst [vmem:[%s16673_s5 + $0x10] sm:$0xff] %v7249_v54  ;;  %v8122_v53 = vadd.f32 %v8121_v50, %v8120_v46 }
0x1012   : > { %v7254_v19 = vadd.f32 %v8122_v53, %v16666_v0  ;;  %v8123_v38 = vpop.f32.mrb[4].mxu1 }
0x1013   : > { %v8124_v52 = vpop.f32.mrb[5].mxu1 }
0x1014   : > { %7320 = vst [vmem:[%s16673_s5 + $0x18] sm:$0xff] %v7254_v19  ;;  %v8125_v22 = vadd.f32 %v8124_v52, %v8123_v38 }
0x1016   : > { %v7259_v28 = vadd.f32 %v8125_v22, %v16666_v0  ;;  %v8126_v10 = vpop.f32.mrb[6].mxu1 }
0x1017   : > { %v8127_v20 = vpop.f32.mrb[7].mxu1 }
0x1018   : > { %7321 = vst [vmem:[%s16673_s5 + $0x20] sm:$0xff] %v7259_v28  ;;  %v8128_v13 = vadd.f32 %v8127_v20, %v8126_v10 }
0x101a   : > { %v7264_v57 = vadd.f32 %v8128_v13, %v16666_v0  ;;  %v8129_v15 = vpop.f32.mrb[8].mxu1 }
0x101b   : > { %v8130_v49 = vpop.f32.mrb[9].mxu1 }
0x101c   : > { %7322 = vst [vmem:[%s16673_s5 + $0x28] sm:$0xff] %v7264_v57  ;;  %v8131_v14 = vadd.f32 %v8130_v49, %v8129_v15 }
0x101e   : > { %v7269_v7 = vadd.f32 %v8131_v14, %v16666_v0  ;;  %v8132_v34 = vpop.f32.mrb[10].mxu1 }
0x101f   : > { %v8133_v44 = vpop.f32.mrb[11].mxu1 }
0x1020   : > { %7323 = vst [vmem:[%s16673_s5 + $0x30] sm:$0xff] %v7269_v7  ;;  %v8134_v55 = vadd.f32 %v8133_v44, %v8132_v34 }
0x1022   : > { %v7274_v39 = vadd.f32 %v8134_v55, %v16666_v0  ;;  %v8135_v59 = vpop.f32.mrb[12].mxu1 }
0x1023   : > { %v8136_v21 = vpop.f32.mrb[13].mxu1 }
0x1024   : > { %7324 = vst [vmem:[%s16673_s5 + $0x38] sm:$0xff] %v7274_v39  ;;  %v8137_v17 = vadd.f32 %v8136_v21, %v8135_v59 }
0x1026   : > { %v7279_v40 = vadd.f32 %v8137_v17, %v16666_v0  ;;  %v8138_v60 = vpop.f32.mrb[14].mxu1 }
0x1027   : > { %v8139_v33 = vpop.f32.mrb[15].mxu1 }
0x1028   : > { %7325 = vst [vmem:[%s16673_s5 + $0x40] sm:$0xff] %v7279_v40  ;;  %v8140_v36 = vadd.f32 %v8139_v33, %v8138_v60 }
0x102a   : > { %v7284_v5 = vadd.f32 %v8140_v36, %v16666_v0  ;;  %v8141_v27 = vpop.f32.mrb[16].mxu1 }
0x102b   : > { %v8142_v63 = vpop.f32.mrb[17].mxu1 }
0x102c   : > { %7326 = vst [vmem:[%s16673_s5 + $0x48] sm:$0xff] %v7284_v5  ;;  %v8143_v61 = vadd.f32 %v8142_v63, %v8141_v27 }
0x102e   : > { %v7289_v51 = vadd.f32 %v8143_v61, %v16666_v0  ;;  %v8144_v35 = vpop.f32.mrb[18].mxu1 }
0x102f   : > { %v8145_v58 = vpop.f32.mrb[19].mxu1 }
0x1030   : > { %7327 = vst [vmem:[%s16673_s5 + $0x50] sm:$0xff] %v7289_v51  ;;  %v8146_v26 = vadd.f32 %v8145_v58, %v8144_v35 }
0x1032   : > { %v7294_v1 = vadd.f32 %v8146_v26, %v16666_v0  ;;  %v8147_v24 = vpop.f32.mrb[20].mxu1 }
0x1033   : > { %v8148_v48 = vpop.f32.mrb[21].mxu1 }
0x1034   : > { %7328 = vst [vmem:[%s16673_s5 + $0x58] sm:$0xff] %v7294_v1  ;;  %v8149_v18 = vadd.f32 %v8148_v48, %v8147_v24 }
0x1036   : > { %v7299_v11 = vadd.f32 %v8149_v18, %v16666_v0  ;;  %v8150_v62 = vpop.f32.mrb[22].mxu1 }
0x1037   : > { %v8151_v32 = vpop.f32.mrb[23].mxu1 }
0x1038   : > { %7329 = vst [vmem:[%s16673_s5 + $0x60] sm:$0xff] %v7299_v11  ;;  %v8152_v6 = vadd.f32 %v8151_v32, %v8150_v62 }
0x103a   : > { %v7304_v47 = vadd.f32 %v8152_v6, %v16666_v0  ;;  %v8153_v31 = vpop.f32.mrb[24].mxu1 }
0x103b   : > { %v8154_v9 = vpop.f32.mrb[25].mxu1 }
0x103c   : > { %7330 = vst [vmem:[%s16673_s5 + $0x68] sm:$0xff] %v7304_v47  ;;  %v8155_v37 = vadd.f32 %v8154_v9, %v8153_v31 }
0x103e   : > { %v7309_v4 = vadd.f32 %v8155_v37, %v16666_v0  ;;  %v8156_v12 = vpop.f32.mrb[26].mxu1 }
0x103f   : > { %v8157_v23 = vpop.f32.mrb[27].mxu1 }
0x1040   : > { %7331 = vst [vmem:[%s16673_s5 + $0x70] sm:$0xff] %v7309_v4  ;;  %v8158_v8 = vadd.f32 %v8157_v23, %v8156_v12 }
0x1042   : > { %v7314_v2 = vadd.f32 %v8158_v8, %v16666_v0 }
0x1044   : > { %7332 = vst [vmem:[%s16673_s5 + $0x78] sm:$0xff] %v7314_v2 }
0x1045 PF: > { %s17171_s23 = sld [smem:[#allocation5_spill]]  ;;  %s17172_s1 = sld [smem:[#allocation4_spill]] }
0x1046   : > { %s17173_s22 = sld [smem:[#allocation6_spill]] }
0x104b   : > { %p27_p9 = scmp.ge.s32.totalorder %s17171_s23, 4  }
0x104d   :  { %29 = sbr.rel (!%p27_p9) target bundleno = 9 (0x9), region = 204 }

</bundles_post_ra>
